<compile_context>
chip_gen: v7x
topology: tpu7x:2x2x1
jax: 0.10.0
libtpu: 0.0.40
codegen_flags: <defaults>
</compile_context>

<pallas_src>
import math

import jax
import jax.numpy as jnp
from jax.experimental import pallas as pl
from jax.experimental.pallas import tpu as pltpu

_LANE = 128
_VMEM_LIMIT_BYTES = 32 * 1024 * 1024  # fits scoped-VMEM defaults on v5e/v6e/v7x


def _round_up(x, m):
    return (x + m - 1) // m * m


def _largest_row_tile(n, d, budget_bytes=2 << 20):
    """Largest multiple-of-8 divisor of n whose (tile, d) f32 block fits budget."""
    cap = min(512, n, max(8, (budget_bytes // (4 * d)) // 8 * 8))
    for cand in range(cap, 7, -1):
        if cand % 8 == 0 and n % cand == 0:
            return cand
    return n  # full axis is always a legal block extent


def _gate_batch_tile(b):
    for cand in (128, 64, 32, 16, 8):
        if b % cand == 0:
            return cand
    return b


def _gate_freq_tile(length, tb, d, budget_bytes=4 << 20):
    """Largest multiple-of-8 divisor of `length` fitting VMEM budget; prefer >=2
    pipeline steps so the accumulator path overlaps DMA with compute."""
    divs = [c for c in (512, 256, 128, 64, 32, 16, 8) if length % c == 0]
    fits = [c for c in divs if 2 * tb * c * d * 4 <= budget_bytes]
    multi = [c for c in fits if length // c >= 2]
    if multi:
        return multi[0]
    if fits:
        return fits[0]
    return length  # full axis fallback (small / oddly-sized freq dim)


# ---------------------------------------------------------------------------
# Frequency gate kernel (Image2TextGate / Text2ImageGate)
# ---------------------------------------------------------------------------
def _freq_gate_kernel(x_ref, g_ref, w_ref, b_ref, o_ref, acc_ref):
    si = pl.program_id(1)                      # reduction (frequency) axis, last

    @pl.when(si == 0)
    def _init():
        acc_ref[...] = jnp.zeros_like(acc_ref)

    xr = x_ref[0]                              # (TB, TL, D) real part of spectrum
    xi = x_ref[1]                              # (TB, TL, D) imag part
    gr = g_ref[0]                              # (TL, D) gate real
    gi = g_ref[1]                              # (TL, D) gate imag
    # Only the real part of (x * gate) survives the AvgPool1d(.real).
    real = xr * gr[None, :, :] - xi * gi[None, :, :]
    acc_ref[...] += jnp.sum(real, axis=1)      # accumulate SUM; 1/len folded into W

    @pl.when(si == pl.num_programs(1) - 1)
    def _finalize():
        # 1x1 Conv1d over channels == dense layer (MXU); weight pre-scaled by 1/len
        out = jnp.dot(acc_ref[...], w_ref[...], preferred_element_type=jnp.float32)
        o_ref[...] = (out + b_ref[...]).astype(o_ref.dtype)


def prepare_gate_params(select_para, conv_w, conv_b, length):
    """One-time parameter preprocessing (hoisted out of the per-call path)."""
    D = conv_b.shape[0]
    Dp = _round_up(D, _LANE)                                   # lane-dense output
    gate = jnp.stack([select_para[..., 0], select_para[..., 1]], axis=0)  # (2, L, D)
    w_t = jnp.transpose(conv_w[:, :, 0]).astype(jnp.float32) / float(length)
    w_pad = jnp.zeros((D, Dp), jnp.float32).at[:, :D].set(w_t)
    b_pad = jnp.zeros((1, Dp), jnp.float32).at[0, :D].set(conv_b.astype(jnp.float32))
    return {"gate": gate, "w": w_pad, "b": b_pad}


def frequency_gate(x_re, x_im, prep):
    """Gate module: complex gating, mean over freq bins of the real part, 1x1 conv.
    x_re/x_im: (B, L, D) float32.  Returns real gate of shape (B, 1, D)."""
    B, L, D = x_re.shape
    Dp = prep["w"].shape[1]

    TB = _gate_batch_tile(B)
    TL = _gate_freq_tile(L, TB, D)

    x = jnp.stack([x_re, x_im], axis=0)        # (2, B, L, D): one DMA per grid step

    out = pl.pallas_call(
        _freq_gate_kernel,
        out_shape=jax.ShapeDtypeStruct((B, Dp), jnp.float32),
        grid=(B // TB, L // TL),               # reduction axis last
        in_specs=[
            pl.BlockSpec((2, TB, TL, D), lambda bi, si: (0, bi, si, 0)),
            pl.BlockSpec((2, TL, D), lambda bi, si: (0, si, 0)),  # no batch dependence
            pl.BlockSpec((D, Dp), lambda bi, si: (0, 0)),
            pl.BlockSpec((1, Dp), lambda bi, si: (0, 0)),
        ],
        out_specs=pl.BlockSpec((TB, Dp), lambda bi, si: (bi, 0)),
        scratch_shapes=[pltpu.VMEM((TB, D), jnp.float32)],
        compiler_params=pltpu.CompilerParams(
            dimension_semantics=("parallel", "arbitrary"),
            vmem_limit_bytes=_VMEM_LIMIT_BYTES,
        ),
    )(x, prep["gate"], prep["w"], prep["b"])

    return out[:, :D].reshape(B, 1, D)


# ---------------------------------------------------------------------------
# AddNorm kernel: (+residual) -> LayerNorm -> Linear -> GELU -> Linear
#                 -> +normed-res -> LayerNorm
# ---------------------------------------------------------------------------
_SQRT_2_OVER_PI = 0.7978845608028654
_LN_EPS = 1e-5


def _gelu_tanh(x):
    # TODO(synk): PyTorch nn.GELU default is the exact erf form; tanh approximation
    # is used here (and in the reference) for a guaranteed TPU elementwise lowering.
    return 0.5 * x * (1.0 + jnp.tanh(_SQRT_2_OVER_PI * (x + 0.044715 * x * x * x)))


def _add_norm_kernel(t_ref, r_ref, g1_ref, b1_ref, w1_ref, c1_ref, w2_ref, c2_ref,
                     g2_ref, b2_ref, o_ref):
    x = t_ref[...] + r_ref[...]                 # fused outer residual add
    mu = jnp.mean(x, axis=-1, keepdims=True)
    var = jnp.mean(jnp.square(x - mu), axis=-1, keepdims=True)
    xn = (x - mu) * jax.lax.rsqrt(var + _LN_EPS)
    xn = xn * g1_ref[...] + b1_ref[...]

    # FeedForward (dropout p=0 -> identity)
    h = jnp.dot(xn, w1_ref[...], preferred_element_type=jnp.float32) + c1_ref[...]
    h = _gelu_tanh(h)
    y = jnp.dot(h, w2_ref[...], preferred_element_type=jnp.float32) + c2_ref[...]
    y = y + xn                                  # residual with normed input

    mu2 = jnp.mean(y, axis=-1, keepdims=True)
    var2 = jnp.mean(jnp.square(y - mu2), axis=-1, keepdims=True)
    yn = (y - mu2) * jax.lax.rsqrt(var2 + _LN_EPS)
    o_ref[...] = (yn * g2_ref[...] + b2_ref[...]).astype(o_ref.dtype)


def add_norm(x_t, residual, p):
    B, S, D = x_t.shape
    R = B * S
    x2 = x_t.reshape(R, D)
    r2 = residual.reshape(R, D)
    TR = _largest_row_tile(R, D)

    out = pl.pallas_call(
        _add_norm_kernel,
        out_shape=jax.ShapeDtypeStruct((R, D), jnp.float32),
        grid=(R // TR,),
        in_specs=[
            pl.BlockSpec((TR, D), lambda i: (i, 0)),  # irfft result
            pl.BlockSpec((TR, D), lambda i: (i, 0)),  # residual
            pl.BlockSpec((1, D), lambda i: (0, 0)),   # ln1 gamma
            pl.BlockSpec((1, D), lambda i: (0, 0)),   # ln1 beta
            pl.BlockSpec((D, D), lambda i: (0, 0)),   # W1
            pl.BlockSpec((1, D), lambda i: (0, 0)),   # b1
            pl.BlockSpec((D, D), lambda i: (0, 0)),   # W2
            pl.BlockSpec((1, D), lambda i: (0, 0)),   # b2
            pl.BlockSpec((1, D), lambda i: (0, 0)),   # ln2 gamma
            pl.BlockSpec((1, D), lambda i: (0, 0)),   # ln2 beta
        ],
        out_specs=pl.BlockSpec((TR, D), lambda i: (i, 0)),
        compiler_params=pltpu.CompilerParams(
            dimension_semantics=("parallel",),
            vmem_limit_bytes=_VMEM_LIMIT_BYTES,
        ),
    )(x2, r2, p["ln1_g"], p["ln1_b"], p["w1"], p["b1"], p["w2"], p["b2"],
      p["ln2_g"], p["ln2_b"])
    return out.reshape(B, S, D)


# ---------------------------------------------------------------------------
# FtLayer forward (Pallas path)
# ---------------------------------------------------------------------------
def ft_layer_forward(params, text, image):
    B, S, D = text.shape
    N = image.shape[1]

    # TODO(synk): FFT has no Pallas TPU equivalent; rfft/irfft stay in XLA.
    tf = jnp.fft.rfft(text, axis=1, norm="ortho")     # (B, s, D) complex64
    imf = jnp.fft.rfft(image, axis=1, norm="ortho")   # (B, n, D) complex64

    # Filter bank collapses to one precomputed complex coefficient per (bin, chan):
    #   sum_k bank[k]*cos_k / length  (hoisted to init time).
    tf = tf * tf * params["text_coeff"][None]
    imf = imf * imf * params["image_coeff"][None]

    # TextFrequencySelection: gate the text spectrum with Image2TextGate(image)
    img_gate = frequency_gate(jnp.real(imf), jnp.imag(imf), params["i2t_prep"])
    tf = tf * img_gate

    # ImageFrequencySelection: gate the image spectrum with Text2ImageGate(updated text)
    txt_gate = frequency_gate(jnp.real(tf), jnp.imag(tf), params["t2i_prep"])
    imf = imf * txt_gate

    text_t = jnp.fft.irfft(tf, n=S, axis=1, norm="ortho")
    image_t = jnp.fft.irfft(imf, n=N, axis=1, norm="ortho")

    # Residual add is fused into the AddNorm kernel (saves one HBM round trip).
    text_out = add_norm(text_t, text, params["text_addnorm"])
    image_out = add_norm(image_t, image, params["image_addnorm"])
    return text_out, image_out


# ---------------------------------------------------------------------------
# Parameter construction (deterministic, synthetic init)
# ---------------------------------------------------------------------------
def init_ft_layer_params(key, d_model, s, n, num_filter=2):
    keys = jax.random.split(key, 10)

    def randn(k, shape, scale=1.0):
        return scale * jax.random.normal(k, shape, dtype=jnp.float32)

    text_bank = randn(keys[0], (num_filter, s, d_model, 2))
    image_bank = randn(keys[1], (num_filter, n, d_model, 2))

    cos = jnp.asarray(
        [math.cos((2 * (k + 1) - 1) * math.pi / 2 * num_filter)
         for k in range(num_filter)], dtype=jnp.float32)

    def collapse(bank, length):
        cplx = bank[..., 0] + 1j * bank[..., 1]           # (num_filter, L, D)
        return jnp.sum(cplx * cos[:, None, None], axis=0) / length

    i2t_select = randn(keys[2], (n, d_model, 2))
    i2t_conv_w = randn(keys[3], (d_model, d_model, 1), 0.1)
    i2t_conv_b = randn(keys[4], (d_model,), 0.1)
    t2i_select = randn(keys[5], (s, d_model, 2))
    t2i_conv_w = randn(keys[6], (d_model, d_model, 1), 0.1)
    t2i_conv_b = randn(keys[7], (d_model,), 0.1)

    def addnorm_params(k):
        k1, k2, k3, k4 = jax.random.split(k, 4)
        return {
            "ln1_g": jnp.ones((1, d_model), jnp.float32),
            "ln1_b": jnp.zeros((1, d_model), jnp.float32),
            "w1": randn(k1, (d_model, d_model), 0.1),
            "b1": randn(k2, (1, d_model), 0.1),
            "w2": randn(k3, (d_model, d_model), 0.1),
            "b2": randn(k4, (1, d_model), 0.1),
            "ln2_g": jnp.ones((1, d_model), jnp.float32),
            "ln2_b": jnp.zeros((1, d_model), jnp.float32),
        }

    return {
        "s": s, "n": n, "num_filter": num_filter,
        "text_bank": text_bank, "image_bank": image_bank,
        "text_coeff": collapse(text_bank, s),
        "image_coeff": collapse(image_bank, n),
        "i2t_select": i2t_select, "i2t_conv_w": i2t_conv_w, "i2t_conv_b": i2t_conv_b,
        "t2i_select": t2i_select, "t2i_conv_w": t2i_conv_w, "t2i_conv_b": t2i_conv_b,
        "i2t_prep": prepare_gate_params(i2t_select, i2t_conv_w, i2t_conv_b, n),
        "t2i_prep": prepare_gate_params(t2i_select, t2i_conv_w, t2i_conv_b, s),
        "text_addnorm": addnorm_params(keys[8]),
        "image_addnorm": addnorm_params(keys[9]),
    }


# ---------------------------------------------------------------------------
# Pure-JAX reference mirroring the PyTorch forward
# ---------------------------------------------------------------------------
def _filter_reference(x, length, bank, num_filter):
    power = x * x / length
    terms = []
    for k in range(num_filter):
        c = math.cos((2 * (k + 1) - 1) * math.pi / 2 * num_filter)
        terms.append(power * (bank[k, ..., 0] + 1j * bank[k, ..., 1]) * c)
    return jnp.sum(jnp.stack(terms), axis=0)


def _gate_reference(x_cplx, select_para, conv_w, conv_b):
    gate = select_para[..., 0] + 1j * select_para[..., 1]
    pooled = jnp.mean((x_cplx * gate[None]).real, axis=1)          # AvgPool1d(L)
    out = pooled @ conv_w[:, :, 0].T + conv_b[None, :]             # 1x1 Conv1d
    return out[:, None, :]                                          # (B, 1, D)


def _add_norm_reference(x, p):
    def ln(v, g, b):
        mu = jnp.mean(v, axis=-1, keepdims=True)
        var = jnp.mean(jnp.square(v - mu), axis=-1, keepdims=True)
        return (v - mu) / jnp.sqrt(var + _LN_EPS) * g + b

    xn = ln(x, p["ln1_g"], p["ln1_b"])
    h = _gelu_tanh(xn @ p["w1"] + p["b1"])
    y = h @ p["w2"] + p["b2"] + xn
    return ln(y, p["ln2_g"], p["ln2_b"])


def ft_layer_reference(params, text, image):
    B, S, D = text.shape
    N = image.shape[1]
    tf = jnp.fft.rfft(text, axis=1, norm="ortho")
    imf = jnp.fft.rfft(image, axis=1, norm="ortho")
    tf = _filter_reference(tf, params["s"], params["text_bank"], params["num_filter"])
    imf = _filter_reference(imf, params["n"], params["image_bank"], params["num_filter"])
    img_gate = _gate_reference(imf, params["i2t_select"], params["i2t_conv_w"],
                               params["i2t_conv_b"])
    tf = tf * img_gate
    txt_gate = _gate_reference(tf, params["t2i_select"], params["t2i_conv_w"],
                               params["t2i_conv_b"])
    imf = imf * txt_gate
    text_t = jnp.fft.irfft(tf, n=S, axis=1, norm="ortho")
    image_t = jnp.fft.irfft(imf, n=N, axis=1, norm="ortho")
    return (_add_norm_reference(text_t + text, params["text_addnorm"]),
            _add_norm_reference(image_t + image, params["image_addnorm"]))


# ---------------------------------------------------------------------------
if __name__ == "__main__":
    # Small demo shapes: seq length 30 -> s = n = 16 frequency bins, d_model = 32.
    # B = 16 exercises the gate kernel's multi-step frequency reduction
    # (freq axis tiled into >= 2 steps by _gate_freq_tile).
    B, S_time, N_time, d_model = 16, 30, 30, 32
    s = S_time // 2 + 1
    n = N_time // 2 + 1

    key = jax.random.PRNGKey(0)
    kp, kt, ki = jax.random.split(key, 3)
    params = init_ft_layer_params(kp, d_model, s, n, num_filter=2)

    text = jax.random.normal(kt, (B, S_time, d_model), dtype=jnp.float32)
    image = jax.random.normal(ki, (B, N_time, d_model), dtype=jnp.float32)

    forward = jax.jit(ft_layer_forward)
    text_out, image_out = jax.block_until_ready(forward(params, text, image))

    ref_text, ref_image = ft_layer_reference(params, text, image)
    assert text_out.shape == (B, S_time, d_model), text_out.shape
    assert image_out.shape == (B, N_time, d_model), image_out.shape
    assert jnp.allclose(text_out, ref_text, atol=2e-3, rtol=2e-3), (
        "text mismatch, max abs err = %e" % float(jnp.max(jnp.abs(text_out - ref_text))))
    assert jnp.allclose(image_out, ref_image, atol=2e-3, rtol=2e-3), (
        "image mismatch, max abs err = %e" % float(jnp.max(jnp.abs(image_out - ref_image))))

    print("KERNEL_OK")
</pallas_src>

<mosaic_0001>
module attributes {stable_mosaic.version = 11 : i64} {
  func.func @_freq_gate_kernel(%arg0: i32, %arg1: i32, %arg2: memref<2x16x8x32xf32, #tpu.memory_space<vmem>>, %arg3: memref<2x8x32xf32, #tpu.memory_space<vmem>>, %arg4: memref<32x128xf32, #tpu.memory_space<vmem>>, %arg5: memref<1x128xf32, #tpu.memory_space<vmem>>, %arg6: memref<16x128xf32, #tpu.memory_space<vmem>>, %arg7: memref<16x32xf32, #tpu.memory_space<vmem>>) attributes {dimension_semantics = [#tpu.dimension_semantics<parallel>, #tpu.dimension_semantics<arbitrary>], iteration_bounds = array<i64: 1, 2>, scalar_prefetch = 0 : i64, scratch_operands = 1 : i64, tpu.core_type = #tpu.core_type<tc>, window_params = [{transform_indices = @transform_0, window_bounds = array<i64: 2, 16, 8, 32>}, {transform_indices = @transform_1, window_bounds = array<i64: 2, 8, 32>}, {pipeline_mode = #tpu.pipeline_mode<synchronous>, transform_indices = @transform_2, window_bounds = array<i64: 32, 128>}, {pipeline_mode = #tpu.pipeline_mode<synchronous>, transform_indices = @transform_3, window_bounds = array<i64: 1, 128>}, {transform_indices = @transform_4, window_bounds = array<i64: 16, 128>}]} {
    %c0_i32 = arith.constant 0 : i32
    %0 = arith.cmpi eq, %arg1, %c0_i32 : i32
    %1 = arith.extui %0 : i1 to i32
    %c0_i32_0 = arith.constant 0 : i32
    %2 = arith.cmpi ne, %1, %c0_i32_0 : i32
    scf.if %2 {
      %cst_18 = arith.constant 0.000000e+00 : f32
      %25 = vector.broadcast %cst_18 : f32 to vector<16x32xf32>
      %c0_19 = arith.constant 0 : index
      %c0_20 = arith.constant 0 : index
      %26 = vector.load %arg7[%c0_19, %c0_20] : memref<16x32xf32, #tpu.memory_space<vmem>>, vector<16x32xf32>
      tpu.vector_store %arg7[%c0_19, %c0_20], %25 {strides = array<i32>} : memref<16x32xf32, #tpu.memory_space<vmem>>, vector<16x32xf32>,
    } else {
    }
    %c0 = arith.constant 0 : index
    %c0_1 = arith.constant 0 : index
    %c0_2 = arith.constant 0 : index
    %c0_3 = arith.constant 0 : index
    %3 = vector.load %arg2[%c0, %c0_1, %c0_2, %c0_3] : memref<2x16x8x32xf32, #tpu.memory_space<vmem>>, vector<1x16x8x32xf32>
    %4 = vector.shape_cast %3 : vector<1x16x8x32xf32> to vector<16x8x32xf32>
    %c1 = arith.constant 1 : index
    %c0_4 = arith.constant 0 : index
    %c0_5 = arith.constant 0 : index
    %c0_6 = arith.constant 0 : index
    %5 = vector.load %arg2[%c1, %c0_4, %c0_5, %c0_6] : memref<2x16x8x32xf32, #tpu.memory_space<vmem>>, vector<1x16x8x32xf32>
    %6 = vector.shape_cast %5 : vector<1x16x8x32xf32> to vector<16x8x32xf32>
    %c0_7 = arith.constant 0 : index
    %c0_8 = arith.constant 0 : index
    %c0_9 = arith.constant 0 : index
    %7 = vector.load %arg3[%c0_7, %c0_8, %c0_9] : memref<2x8x32xf32, #tpu.memory_space<vmem>>, vector<1x8x32xf32>
    %8 = vector.shape_cast %7 : vector<1x8x32xf32> to vector<8x32xf32>
    %c1_10 = arith.constant 1 : index
    %c0_11 = arith.constant 0 : index
    %c0_12 = arith.constant 0 : index
    %9 = vector.load %arg3[%c1_10, %c0_11, %c0_12] : memref<2x8x32xf32, #tpu.memory_space<vmem>>, vector<1x8x32xf32>
    %10 = vector.shape_cast %9 : vector<1x8x32xf32> to vector<8x32xf32>
    %11 = vector.shape_cast %8 : vector<8x32xf32> to vector<1x8x32xf32>
    %12 = vector.broadcast %11 : vector<1x8x32xf32> to vector<16x8x32xf32>
    %13 = arith.mulf %4, %12 : vector<16x8x32xf32>
    %14 = vector.shape_cast %10 : vector<8x32xf32> to vector<1x8x32xf32>
    %15 = vector.broadcast %14 : vector<1x8x32xf32> to vector<16x8x32xf32>
    %16 = arith.mulf %6, %15 : vector<16x8x32xf32>
    %17 = arith.subf %13, %16 : vector<16x8x32xf32>
    %c0_13 = arith.constant 0 : index
    %c0_14 = arith.constant 0 : index
    %18 = vector.load %arg7[%c0_13, %c0_14] : memref<16x32xf32, #tpu.memory_space<vmem>>, vector<16x32xf32>
    %cst = arith.constant dense<0.000000e+00> : vector<16x32xf32>
    %19 = vector.multi_reduction <add>, %17, %cst [1] : vector<16x8x32xf32> to vector<16x32xf32>
    %20 = arith.addf %18, %19 : vector<16x32xf32>
    %c0_15 = arith.constant 0 : index
    %c0_16 = arith.constant 0 : index
    %21 = vector.load %arg7[%c0_15, %c0_16] : memref<16x32xf32, #tpu.memory_space<vmem>>, vector<16x32xf32>
    tpu.vector_store %arg7[%c0_15, %c0_16], %20 {strides = array<i32>} : memref<16x32xf32, #tpu.memory_space<vmem>>, vector<16x32xf32>,
    %c1_i32 = arith.constant 1 : i32
    %22 = arith.cmpi eq, %arg1, %c1_i32 : i32
    %23 = arith.extui %22 : i1 to i32
    %c0_i32_17 = arith.constant 0 : i32
    %24 = arith.cmpi ne, %23, %c0_i32_17 : i32
    scf.if %24 {
      %c0_18 = arith.constant 0 : index
      %c0_19 = arith.constant 0 : index
      %25 = vector.load %arg7[%c0_18, %c0_19] : memref<16x32xf32, #tpu.memory_space<vmem>>, vector<16x32xf32>
      %c0_20 = arith.constant 0 : index
      %c0_21 = arith.constant 0 : index
      %26 = vector.load %arg4[%c0_20, %c0_21] : memref<32x128xf32, #tpu.memory_space<vmem>>, vector<32x128xf32>
      %cst_22 = arith.constant dense<0.000000e+00> : vector<16x128xf32>
      %27 = tpu.matmul %25, %26, %cst_22 {dimension_numbers = #tpu.dot_dimension_numbers<[1], [0], [0], [1], [0, 0, 1, 1], [], []>} : vector<16x32xf32>, vector<32x128xf32>, vector<16x128xf32> -> vector<16x128xf32>
      %c0_23 = arith.constant 0 : index
      %c0_24 = arith.constant 0 : index
      %28 = vector.load %arg5[%c0_23, %c0_24] : memref<1x128xf32, #tpu.memory_space<vmem>>, vector<1x128xf32>
      %29 = vector.broadcast %28 : vector<1x128xf32> to vector<16x128xf32>
      %30 = arith.addf %27, %29 : vector<16x128xf32>
      %c0_25 = arith.constant 0 : index
      %c0_26 = arith.constant 0 : index
      %31 = vector.load %arg6[%c0_25, %c0_26] : memref<16x128xf32, #tpu.memory_space<vmem>>, vector<16x128xf32>
      tpu.vector_store %arg6[%c0_25, %c0_26], %30 {strides = array<i32>} : memref<16x128xf32, #tpu.memory_space<vmem>>, vector<16x128xf32>,
    } else {
    }
    return
  }
  func.func @transform_0(%arg0: i32, %arg1: i32) -> (i32, i32, i32, i32) {
    %c0_i32 = arith.constant 0 : i32
    %c0_i32_0 = arith.constant 0 : i32
    %c0_i32_1 = arith.constant 0 : i32
    return %c0_i32, %arg0, %arg1, %c0_i32_0 : i32, i32, i32, i32
  }
  func.func @transform_1(%arg0: i32, %arg1: i32) -> (i32, i32, i32) {
    %c0_i32 = arith.constant 0 : i32
    %c0_i32_0 = arith.constant 0 : i32
    %c0_i32_1 = arith.constant 0 : i32
    return %c0_i32, %arg1, %c0_i32_0 : i32, i32, i32
  }
  func.func @transform_2(%arg0: i32, %arg1: i32) -> (i32, i32) {
    %c0_i32 = arith.constant 0 : i32
    %c0_i32_0 = arith.constant 0 : i32
    %c0_i32_1 = arith.constant 0 : i32
    return %c0_i32, %c0_i32_0 : i32, i32
  }
  func.func @transform_3(%arg0: i32, %arg1: i32) -> (i32, i32) {
    %c0_i32 = arith.constant 0 : i32
    %c0_i32_0 = arith.constant 0 : i32
    %c0_i32_1 = arith.constant 0 : i32
    return %c0_i32, %c0_i32_0 : i32, i32
  }
  func.func @transform_4(%arg0: i32, %arg1: i32) -> (i32, i32) {
    %c0_i32 = arith.constant 0 : i32
    %c0_i32_0 = arith.constant 0 : i32
    return %arg0, %c0_i32 : i32, i32
  }
}

module attributes {stable_mosaic.version = 11 : i64} {
  func.func @_add_norm_kernel(%arg0: i32, %arg1: memref<480x32xf32, #tpu.memory_space<vmem>>, %arg2: memref<480x32xf32, #tpu.memory_space<vmem>>, %arg3: memref<1x32xf32, #tpu.memory_space<vmem>>, %arg4: memref<1x32xf32, #tpu.memory_space<vmem>>, %arg5: memref<32x32xf32, #tpu.memory_space<vmem>>, %arg6: memref<1x32xf32, #tpu.memory_space<vmem>>, %arg7: memref<32x32xf32, #tpu.memory_space<vmem>>, %arg8: memref<1x32xf32, #tpu.memory_space<vmem>>, %arg9: memref<1x32xf32, #tpu.memory_space<vmem>>, %arg10: memref<1x32xf32, #tpu.memory_space<vmem>>, %arg11: memref<480x32xf32, #tpu.memory_space<vmem>>) attributes {dimension_semantics = [#tpu.dimension_semantics<parallel>], iteration_bounds = array<i64: 1>, scalar_prefetch = 0 : i64, scratch_operands = 0 : i64, tpu.core_type = #tpu.core_type<tc>, window_params = [{transform_indices = @transform_0, window_bounds = array<i64: 480, 32>}, {transform_indices = @transform_1, window_bounds = array<i64: 480, 32>}, {pipeline_mode = #tpu.pipeline_mode<synchronous>, transform_indices = @transform_2, window_bounds = array<i64: 1, 32>}, {pipeline_mode = #tpu.pipeline_mode<synchronous>, transform_indices = @transform_3, window_bounds = array<i64: 1, 32>}, {pipeline_mode = #tpu.pipeline_mode<synchronous>, transform_indices = @transform_4, window_bounds = array<i64: 32, 32>}, {pipeline_mode = #tpu.pipeline_mode<synchronous>, transform_indices = @transform_5, window_bounds = array<i64: 1, 32>}, {pipeline_mode = #tpu.pipeline_mode<synchronous>, transform_indices = @transform_6, window_bounds = array<i64: 32, 32>}, {pipeline_mode = #tpu.pipeline_mode<synchronous>, transform_indices = @transform_7, window_bounds = array<i64: 1, 32>}, {pipeline_mode = #tpu.pipeline_mode<synchronous>, transform_indices = @transform_8, window_bounds = array<i64: 1, 32>}, {pipeline_mode = #tpu.pipeline_mode<synchronous>, transform_indices = @transform_9, window_bounds = array<i64: 1, 32>}, {transform_indices = @transform_10, window_bounds = array<i64: 480, 32>}]} {
    %c0 = arith.constant 0 : index
    %c0_0 = arith.constant 0 : index
    %0 = vector.load %arg1[%c0, %c0_0] : memref<480x32xf32, #tpu.memory_space<vmem>>, vector<480x32xf32>
    %c0_1 = arith.constant 0 : index
    %c0_2 = arith.constant 0 : index
    %1 = vector.load %arg2[%c0_1, %c0_2] : memref<480x32xf32, #tpu.memory_space<vmem>>, vector<480x32xf32>
    %2 = arith.addf %0, %1 : vector<480x32xf32>
    %cst = arith.constant dense<0.000000e+00> : vector<480xf32>
    %3 = vector.multi_reduction <add>, %2, %cst [1] : vector<480x32xf32> to vector<480xf32>
    %4 = vector.shape_cast %3 : vector<480xf32> to vector<480x1xf32>
    %cst_3 = arith.constant 3.200000e+01 : f32
    %5 = vector.broadcast %cst_3 : f32 to vector<480x1xf32>
    %6 = arith.divf %4, %5 : vector<480x1xf32>
    %7 = vector.broadcast %6 : vector<480x1xf32> to vector<480x32xf32>
    %8 = arith.subf %2, %7 : vector<480x32xf32>
    %9 = arith.mulf %8, %8 : vector<480x32xf32>
    %cst_4 = arith.constant dense<0.000000e+00> : vector<480xf32>
    %10 = vector.multi_reduction <add>, %9, %cst_4 [1] : vector<480x32xf32> to vector<480xf32>
    %11 = vector.shape_cast %10 : vector<480xf32> to vector<480x1xf32>
    %cst_5 = arith.constant 3.200000e+01 : f32
    %12 = vector.broadcast %cst_5 : f32 to vector<480x1xf32>
    %13 = arith.divf %11, %12 : vector<480x1xf32>
    %14 = vector.broadcast %6 : vector<480x1xf32> to vector<480x32xf32>
    %15 = arith.subf %2, %14 : vector<480x32xf32>
    %cst_6 = arith.constant 9.99999974E-6 : f32
    %16 = vector.broadcast %cst_6 : f32 to vector<480x1xf32>
    %17 = arith.addf %13, %16 : vector<480x1xf32>
    %18 = math.rsqrt %17 : vector<480x1xf32>
    %19 = vector.broadcast %18 : vector<480x1xf32> to vector<480x32xf32>
    %20 = arith.mulf %15, %19 : vector<480x32xf32>
    %c0_7 = arith.constant 0 : index
    %c0_8 = arith.constant 0 : index
    %21 = vector.load %arg3[%c0_7, %c0_8] : memref<1x32xf32, #tpu.memory_space<vmem>>, vector<1x32xf32>
    %22 = vector.broadcast %21 : vector<1x32xf32> to vector<480x32xf32>
    %23 = arith.mulf %20, %22 : vector<480x32xf32>
    %c0_9 = arith.constant 0 : index
    %c0_10 = arith.constant 0 : index
    %24 = vector.load %arg4[%c0_9, %c0_10] : memref<1x32xf32, #tpu.memory_space<vmem>>, vector<1x32xf32>
    %25 = vector.broadcast %24 : vector<1x32xf32> to vector<480x32xf32>
    %26 = arith.addf %23, %25 : vector<480x32xf32>
    %c0_11 = arith.constant 0 : index
    %c0_12 = arith.constant 0 : index
    %27 = vector.load %arg5[%c0_11, %c0_12] : memref<32x32xf32, #tpu.memory_space<vmem>>, vector<32x32xf32>
    %cst_13 = arith.constant dense<0.000000e+00> : vector<480x32xf32>
    %28 = tpu.matmul %26, %27, %cst_13 {dimension_numbers = #tpu.dot_dimension_numbers<[1], [0], [0], [1], [0, 0, 1, 1], [], []>} : vector<480x32xf32>, vector<32x32xf32>, vector<480x32xf32> -> vector<480x32xf32>
    %c0_14 = arith.constant 0 : index
    %c0_15 = arith.constant 0 : index
    %29 = vector.load %arg6[%c0_14, %c0_15] : memref<1x32xf32, #tpu.memory_space<vmem>>, vector<1x32xf32>
    %30 = vector.broadcast %29 : vector<1x32xf32> to vector<480x32xf32>
    %31 = arith.addf %28, %30 : vector<480x32xf32>
    %cst_16 = arith.constant 5.000000e-01 : f32
    %32 = vector.broadcast %cst_16 : f32 to vector<480x32xf32>
    %33 = arith.mulf %32, %31 : vector<480x32xf32>
    %cst_17 = arith.constant 4.471500e-02 : f32
    %34 = vector.broadcast %cst_17 : f32 to vector<480x32xf32>
    %35 = arith.mulf %34, %31 : vector<480x32xf32>
    %36 = arith.mulf %35, %31 : vector<480x32xf32>
    %37 = arith.mulf %36, %31 : vector<480x32xf32>
    %38 = arith.addf %31, %37 : vector<480x32xf32>
    %cst_18 = arith.constant 0.797884583 : f32
    %39 = vector.broadcast %cst_18 : f32 to vector<480x32xf32>
    %40 = arith.mulf %39, %38 : vector<480x32xf32>
    %41 = math.tanh %40 : vector<480x32xf32>
    %cst_19 = arith.constant 1.000000e+00 : f32
    %42 = vector.broadcast %cst_19 : f32 to vector<480x32xf32>
    %43 = arith.addf %42, %41 : vector<480x32xf32>
    %44 = arith.mulf %33, %43 : vector<480x32xf32>
    %c0_20 = arith.constant 0 : index
    %c0_21 = arith.constant 0 : index
    %45 = vector.load %arg7[%c0_20, %c0_21] : memref<32x32xf32, #tpu.memory_space<vmem>>, vector<32x32xf32>
    %cst_22 = arith.constant dense<0.000000e+00> : vector<480x32xf32>
    %46 = tpu.matmul %44, %45, %cst_22 {dimension_numbers = #tpu.dot_dimension_numbers<[1], [0], [0], [1], [0, 0, 1, 1], [], []>} : vector<480x32xf32>, vector<32x32xf32>, vector<480x32xf32> -> vector<480x32xf32>
    %c0_23 = arith.constant 0 : index
    %c0_24 = arith.constant 0 : index
    %47 = vector.load %arg8[%c0_23, %c0_24] : memref<1x32xf32, #tpu.memory_space<vmem>>, vector<1x32xf32>
    %48 = vector.broadcast %47 : vector<1x32xf32> to vector<480x32xf32>
    %49 = arith.addf %46, %48 : vector<480x32xf32>
    %50 = arith.addf %49, %26 : vector<480x32xf32>
    %cst_25 = arith.constant dense<0.000000e+00> : vector<480xf32>
    %51 = vector.multi_reduction <add>, %50, %cst_25 [1] : vector<480x32xf32> to vector<480xf32>
    %52 = vector.shape_cast %51 : vector<480xf32> to vector<480x1xf32>
    %cst_26 = arith.constant 3.200000e+01 : f32
    %53 = vector.broadcast %cst_26 : f32 to vector<480x1xf32>
    %54 = arith.divf %52, %53 : vector<480x1xf32>
    %55 = vector.broadcast %54 : vector<480x1xf32> to vector<480x32xf32>
    %56 = arith.subf %50, %55 : vector<480x32xf32>
    %57 = arith.mulf %56, %56 : vector<480x32xf32>
    %cst_27 = arith.constant dense<0.000000e+00> : vector<480xf32>
    %58 = vector.multi_reduction <add>, %57, %cst_27 [1] : vector<480x32xf32> to vector<480xf32>
    %59 = vector.shape_cast %58 : vector<480xf32> to vector<480x1xf32>
    %cst_28 = arith.constant 3.200000e+01 : f32
    %60 = vector.broadcast %cst_28 : f32 to vector<480x1xf32>
    %61 = arith.divf %59, %60 : vector<480x1xf32>
    %62 = vector.broadcast %54 : vector<480x1xf32> to vector<480x32xf32>
    %63 = arith.subf %50, %62 : vector<480x32xf32>
    %cst_29 = arith.constant 9.99999974E-6 : f32
    %64 = vector.broadcast %cst_29 : f32 to vector<480x1xf32>
    %65 = arith.addf %61, %64 : vector<480x1xf32>
    %66 = math.rsqrt %65 : vector<480x1xf32>
    %67 = vector.broadcast %66 : vector<480x1xf32> to vector<480x32xf32>
    %68 = arith.mulf %63, %67 : vector<480x32xf32>
    %c0_30 = arith.constant 0 : index
    %c0_31 = arith.constant 0 : index
    %69 = vector.load %arg9[%c0_30, %c0_31] : memref<1x32xf32, #tpu.memory_space<vmem>>, vector<1x32xf32>
    %70 = vector.broadcast %69 : vector<1x32xf32> to vector<480x32xf32>
    %71 = arith.mulf %68, %70 : vector<480x32xf32>
    %c0_32 = arith.constant 0 : index
    %c0_33 = arith.constant 0 : index
    %72 = vector.load %arg10[%c0_32, %c0_33] : memref<1x32xf32, #tpu.memory_space<vmem>>, vector<1x32xf32>
    %73 = vector.broadcast %72 : vector<1x32xf32> to vector<480x32xf32>
    %74 = arith.addf %71, %73 : vector<480x32xf32>
    %c0_34 = arith.constant 0 : index
    %c0_35 = arith.constant 0 : index
    %75 = vector.load %arg11[%c0_34, %c0_35] : memref<480x32xf32, #tpu.memory_space<vmem>>, vector<480x32xf32>
    tpu.vector_store %arg11[%c0_34, %c0_35], %74 {strides = array<i32>} : memref<480x32xf32, #tpu.memory_space<vmem>>, vector<480x32xf32>,
    return
  }
  func.func @transform_0(%arg0: i32) -> (i32, i32) {
    %c0_i32 = arith.constant 0 : i32
    %c0_i32_0 = arith.constant 0 : i32
    return %arg0, %c0_i32 : i32, i32
  }
  func.func @transform_1(%arg0: i32) -> (i32, i32) {
    %c0_i32 = arith.constant 0 : i32
    %c0_i32_0 = arith.constant 0 : i32
    return %arg0, %c0_i32 : i32, i32
  }
  func.func @transform_2(%arg0: i32) -> (i32, i32) {
    %c0_i32 = arith.constant 0 : i32
    %c0_i32_0 = arith.constant 0 : i32
    %c0_i32_1 = arith.constant 0 : i32
    return %c0_i32, %c0_i32_0 : i32, i32
  }
  func.func @transform_3(%arg0: i32) -> (i32, i32) {
    %c0_i32 = arith.constant 0 : i32
    %c0_i32_0 = arith.constant 0 : i32
    %c0_i32_1 = arith.constant 0 : i32
    return %c0_i32, %c0_i32_0 : i32, i32
  }
  func.func @transform_4(%arg0: i32) -> (i32, i32) {
    %c0_i32 = arith.constant 0 : i32
    %c0_i32_0 = arith.constant 0 : i32
    %c0_i32_1 = arith.constant 0 : i32
    return %c0_i32, %c0_i32_0 : i32, i32
  }
  func.func @transform_5(%arg0: i32) -> (i32, i32) {
    %c0_i32 = arith.constant 0 : i32
    %c0_i32_0 = arith.constant 0 : i32
    %c0_i32_1 = arith.constant 0 : i32
    return %c0_i32, %c0_i32_0 : i32, i32
  }
  func.func @transform_6(%arg0: i32) -> (i32, i32) {
    %c0_i32 = arith.constant 0 : i32
    %c0_i32_0 = arith.constant 0 : i32
    %c0_i32_1 = arith.constant 0 : i32
    return %c0_i32, %c0_i32_0 : i32, i32
  }
  func.func @transform_7(%arg0: i32) -> (i32, i32) {
    %c0_i32 = arith.constant 0 : i32
    %c0_i32_0 = arith.constant 0 : i32
    %c0_i32_1 = arith.constant 0 : i32
    return %c0_i32, %c0_i32_0 : i32, i32
  }
  func.func @transform_8(%arg0: i32) -> (i32, i32) {
    %c0_i32 = arith.constant 0 : i32
    %c0_i32_0 = arith.constant 0 : i32
    %c0_i32_1 = arith.constant 0 : i32
    return %c0_i32, %c0_i32_0 : i32, i32
  }
  func.func @transform_9(%arg0: i32) -> (i32, i32) {
    %c0_i32 = arith.constant 0 : i32
    %c0_i32_0 = arith.constant 0 : i32
    %c0_i32_1 = arith.constant 0 : i32
    return %c0_i32, %c0_i32_0 : i32, i32
  }
  func.func @transform_10(%arg0: i32) -> (i32, i32) {
    %c0_i32 = arith.constant 0 : i32
    %c0_i32_0 = arith.constant 0 : i32
    return %arg0, %c0_i32 : i32, i32
  }
}

</mosaic_0001>

<bundles_post_ra>
// kernel: custom-call.3
= control target key start
LH: loop header
LB: loop body
LE: loop exit
PB: predicated region body
PF: predicated region fallthrough
CT: control target
= control target key end

     0   :  { %s59_s0 = inlined_call_operand.hbm [shape: c64[16,32], index: 0, kind: input, shape index: {}]   ;;  %s60_s1 = inlined_call_operand.vmem [shape: f32[16,32], index: 1, kind: output, shape index: {}]  }
   0x1   :  { %s2_s8 = scalar_lea.hbm %s59_s0, 256 }
   0x2   :  { %3 = vsyncpa [#allocation0], 0  ;;  %s4_s11 = sshll.u32 %s60_s1, 4  ;;  %s34_s14 = scalar_lea.hbm %s59_s0, 512  ;;  %s5_s11 = int_to_ptr.vmem [resolvable:$true] %s4_s11 }
   0x3   :  { %p11_p0 = scmp.ne.s32.totalorder %s2_s8, %s34_s14  ;;  %p13_p1 = scmp.lt.u32.totalorder %s2_s8, %s59_s0 }
   0x4   :  { %p14_p2 = scmp.lt.u32.totalorder %s34_s14, %s34_s14  ;;  %p16_p4 = scmp.lt.u32.totalorder %s34_s14, %s2_s8 }
   0x6   :  { %p15_p3 = por %p14_p2, %p13_p1 }
   0x8   :  { %p17_p5 = por %p16_p4, %p15_p3 }
   0xa   :  { %p18_p6 = pnand %p17_p5, %p11_p0 }
   0xc   :  { %21 = shalt.err (!%p18_p6)  }
   0xd   :  { %s22_s17 = scalar_lea.vmem %s5_s11, 256  ;;  %p27_p8 = scmp.lt.s32.totalorder %s5_s11, %s5_s11 }
   0xe   :  { %p23_p7 = scmp.ne.s32.totalorder %s5_s11, %s22_s17  ;;  %p28_p9 = scmp.lt.s32.totalorder %s22_s17, %s22_s17 }
  0x10   :  { %p29_p10 = por %p28_p9, %p27_p8 }
  0x12   :  { %p30_p11 = pnand %p29_p10, %p23_p7 }
  0x14   :  { %33 = shalt.err (!%p30_p11)  }
  0x15   :  { %7 = dma.hbm_to_vmem [thread:$0]  %s2_s8, 256, %s5_s11, [#allocation0] }
  0x16   :  { %35 = dma.done.wait [#allocation0], 256  }
  0x17   :  { %36 = vsyncadd [#allocation0], 4294967040 }
  0x18   :  { %9 = vsyncpa [#allocation0], 1 }

// kernel: custom-call.2
= control target key start
LH: loop header
LB: loop body
LE: loop exit
PB: predicated region body
PF: predicated region fallthrough
CT: control target
= control target key end

     0   :  { %2 = vsyncpa [#allocation0], 0  ;;  %s61_s0 = inlined_call_operand.hbm [shape: c64[16,32], index: 0, kind: input, shape index: {}]   ;;  %s62_s1 = inlined_call_operand.vmem [shape: f32[16,32], index: 1, kind: output, shape index: {}]  }
   0x1   :  { %s3_s8 = sshll.u32 %s62_s1, 4  ;;  %s9_s11 = scalar_lea.hbm %s61_s0, 256  ;;  %s4_s8 = int_to_ptr.vmem [resolvable:$true] %s3_s8 }
   0x2   :  { %p10_p0 = scmp.ne.s32.totalorder %s61_s0, %s9_s11  ;;  %s11_s16 = scalar_lea.hbm %s61_s0, 512 }
   0x3   :  { %p12_p1 = scmp.lt.u32.totalorder %s11_s16, %s9_s11  ;;  %p13_p2 = scmp.lt.u32.totalorder %s9_s11, %s61_s0 }
   0x5   :  { %p14_p3 = por %p13_p2, %p12_p1 }
   0x7   :  { %p15_p4 = pnand %p14_p3, %p10_p0 }
   0x9   :  { %18 = shalt.err (!%p15_p4)  }
   0xa   :  { %s19_s1 = scalar_lea.vmem %s4_s8, 256  ;;  %p24_p6 = scmp.lt.s32.totalorder %s4_s8, %s4_s8 }
   0xb   :  { %p20_p5 = scmp.ne.s32.totalorder %s4_s8, %s19_s1  ;;  %p25_p7 = scmp.lt.s32.totalorder %s19_s1, %s19_s1 }
   0xd   :  { %p26_p8 = por %p25_p7, %p24_p6 }
   0xf   :  { %p27_p9 = pnand %p26_p8, %p20_p5 }
  0x11   :  { %30 = shalt.err (!%p27_p9)  }
  0x12   :  { %6 = dma.hbm_to_vmem [thread:$0]  %s61_s0, 256, %s4_s8, [#allocation0] }
  0x13   :  { %31 = dma.done.wait [#allocation0], 256  }
  0x14   :  { %32 = vsyncadd [#allocation0], 4294967040 }
  0x15   :  { %8 = vsyncpa [#allocation0], 1 }

// kernel: ft_layer_forward.4
= control target key start
LH: loop header
LB: loop body
LE: loop exit
PB: predicated region body
PF: predicated region fallthrough
CT: control target
= control target key end

     0   :  { %s1038_s15 = smov 0   ;;  %s1040_s16 = smov 0   ;;  %s1350_s0 = inlined_call_operand.vmem [shape: f32[2,16,16,32], index: 0, kind: input, shape index: {}]   ;;  %s1351_s1 = inlined_call_operand.vmem [shape: f32[2,16,32], index: 1, kind: input, shape index: {}]   ;;  %s1352_s2 = inlined_call_operand.vmem [shape: f32[32,128], index: 2, kind: input, shape index: {}]   ;;  %s1353_s3 = inlined_call_operand.vmem [shape: f32[1,128], index: 3, kind: input, shape index: {}]   ;;  %s1354_s4 = inlined_call_operand.vmem [shape: f32[16,128], index: 4, kind: output, shape index: {}]  }
   0x1   :  { %s1042_s17 = smov 0   ;;  %s1044_s18 = smov 0  }
   0x2   :  { %s1046_s19 = smov 0  }
   0x3 LB: > { %s23_s20 = sadd.s32 1, %s1006_s18  ;;  %p42_p1 = scmp.ne.s32.totalorder %s998_s16, %s994_s15  ;;  %s1010_s19 = sphi %s1046_s19, %s14_s19   ;;  %s1006_s18 = sphi %s1044_s18, %s1359_s18   ;;  %s1002_s17 = sphi %s1042_s17, %s1358_s17   ;;  %s998_s16 = sphi %s1040_s16, %s1357_s16   ;;  %s994_s15 = sphi %s1038_s15, %s1356_s15  }
   0x4   : > { %p24_p0 = scmp.ge.s32.totalorder %s23_s20, 2  ;;  %p43_p2 = scmp.eq.s32.totalorder %s1010_s19, 0 }
   0x5   : > { %s35_s23 = sadd.s32 1, %s998_s16  ;;  %p872_p5 = scmp.ge.s32.totalorder %s1010_s19, 2 }
   0x6   : > { %s1361_s20 = smov (%p24_p0, %s23_s20), 0  ;;  %p1069_p3 = por %p43_p2, %p42_p1 }
   0x7   : > { %s31_s22 = ssub.s32 %s1006_s18, %s1361_s20  ;;  %168 = sbr.rel (%p872_p5) target bundleno = 41 (0x29), region = 24 }
   0x8   : > { %p33_p4 = scmp.eq.s32.totalorder %s31_s22, 0 }
   0xa   : > { %s1077_s24 = scalar_select %p33_p4, %s998_s16, %s35_s23  }
   0xe   : > { %171 = sbr.rel (!%p1069_p3) target bundleno = 34 (0x22), region = 28  ;;  %s173_s25 = sand.u32 (%p1069_p3), 1, %s998_s16  }
   0xf   : > { %s874_s26 = sshll.u32 (%p1069_p3), %s1006_s18, 3  ;;  %s873_s27 = sshll.u32 (%p1069_p3), %s173_s25, 8 }
  0x10   : > { %s1087_s30 = scalar_lea.vmem (%p1069_p3), %s1350_s0, %s874_s26  ;;  %s1092_s5 = scalar_lea.vmem (%p1069_p3), [#allocation3], %s873_s27 }
  0x11   : > { %v270_v0 = vld [vmem:[%s1087_s30] sm:$0xff] (%p1069_p3)  ;;  %v272_v1 = vld [vmem:[%s1087_s30 + $0x10] sm:$0xff] (%p1069_p3) }
  0x12   : > { %v274_v2 = vld [vmem:[%s1087_s30 + $0x20] sm:$0xff] (%p1069_p3)  ;;  %271 = vst [vmem:[%s1092_s5] sm:$0xff] (%p1069_p3), %v270_v0  ;;  %273 = vst [vmem:[%s1092_s5 + $0x8] sm:$0xff] (%p1069_p3), %v272_v1  ;;  %v276_v3 = vld [vmem:[%s1087_s30 + $0x30] sm:$0xff] (%p1069_p3) }
  0x13   : > { %275 = vst [vmem:[%s1092_s5 + $0x10] sm:$0xff] (%p1069_p3), %v274_v2  ;;  %v278_v4 = vld [vmem:[%s1087_s30 + $0x40] sm:$0xff] (%p1069_p3)  ;;  %v280_v5 = vld [vmem:[%s1087_s30 + $0x50] sm:$0xff] (%p1069_p3)  ;;  %277 = vst [vmem:[%s1092_s5 + $0x18] sm:$0xff] (%p1069_p3), %v276_v3 }
  0x14   : > { %279 = vst [vmem:[%s1092_s5 + $0x20] sm:$0xff] (%p1069_p3), %v278_v4  ;;  %281 = vst [vmem:[%s1092_s5 + $0x28] sm:$0xff] (%p1069_p3), %v280_v5  ;;  %v282_v6 = vld [vmem:[%s1087_s30 + $0x60] sm:$0xff] (%p1069_p3)  ;;  %v284_v7 = vld [vmem:[%s1087_s30 + $0x70] sm:$0xff] (%p1069_p3) }
  0x15   : > { %v286_v8 = vld [vmem:[%s1087_s30 + $0x80] sm:$0xff]  ;;  %283 = vst [vmem:[%s1092_s5 + $0x30] sm:$0xff] %v282_v6  ;;  %285 = vst [vmem:[%s1092_s5 + $0x38] sm:$0xff] %v284_v7  ;;  %v288_v9 = vld [vmem:[%s1087_s30 + $0x90] sm:$0xff] }
  0x16   : > { %287 = vst [vmem:[%s1092_s5 + $0x40] sm:$0xff] %v286_v8  ;;  %v290_v10 = vld [vmem:[%s1087_s30 + $0xa0] sm:$0xff]  ;;  %v292_v11 = vld [vmem:[%s1087_s30 + $0xb0] sm:$0xff]  ;;  %289 = vst [vmem:[%s1092_s5 + $0x48] sm:$0xff] %v288_v9 }
  0x17   : > { %291 = vst [vmem:[%s1092_s5 + $0x50] sm:$0xff] %v290_v10  ;;  %293 = vst [vmem:[%s1092_s5 + $0x58] sm:$0xff] %v292_v11  ;;  %v294_v12 = vld [vmem:[%s1087_s30 + $0xc0] sm:$0xff]  ;;  %v296_v13 = vld [vmem:[%s1087_s30 + $0xd0] sm:$0xff] }
  0x18   : > { %v298_v14 = vld [vmem:[%s1087_s30 + $0xe0] sm:$0xff]  ;;  %295 = vst [vmem:[%s1092_s5 + $0x60] sm:$0xff] %v294_v12  ;;  %297 = vst [vmem:[%s1092_s5 + $0x68] sm:$0xff] %v296_v13  ;;  %v300_v15 = vld [vmem:[%s1087_s30 + $0xf0] sm:$0xff] }
  0x19   : > { %299 = vst [vmem:[%s1092_s5 + $0x70] sm:$0xff] %v298_v14  ;;  %v302_v16 = vld [vmem:[%s1087_s30 + $0x100] sm:$0xff]  ;;  %v304_v17 = vld [vmem:[%s1087_s30 + $0x110] sm:$0xff]  ;;  %301 = vst [vmem:[%s1092_s5 + $0x78] sm:$0xff] %v300_v15 }
  0x1a   : > { %303 = vst [vmem:[%s1092_s5 + $0x80] sm:$0xff] %v302_v16  ;;  %305 = vst [vmem:[%s1092_s5 + $0x88] sm:$0xff] %v304_v17  ;;  %v306_v18 = vld [vmem:[%s1087_s30 + $0x120] sm:$0xff]  ;;  %v308_v19 = vld [vmem:[%s1087_s30 + $0x130] sm:$0xff] }
  0x1b   : > { %v310_v20 = vld [vmem:[%s1087_s30 + $0x140] sm:$0xff]  ;;  %307 = vst [vmem:[%s1092_s5 + $0x90] sm:$0xff] %v306_v18  ;;  %309 = vst [vmem:[%s1092_s5 + $0x98] sm:$0xff] %v308_v19  ;;  %v312_v21 = vld [vmem:[%s1087_s30 + $0x150] sm:$0xff] }
  0x1c   : > { %311 = vst [vmem:[%s1092_s5 + $0xa0] sm:$0xff] %v310_v20  ;;  %v314_v22 = vld [vmem:[%s1087_s30 + $0x160] sm:$0xff]  ;;  %v316_v23 = vld [vmem:[%s1087_s30 + $0x170] sm:$0xff]  ;;  %313 = vst [vmem:[%s1092_s5 + $0xa8] sm:$0xff] %v312_v21 }
  0x1d   : > { %315 = vst [vmem:[%s1092_s5 + $0xb0] sm:$0xff] %v314_v22  ;;  %317 = vst [vmem:[%s1092_s5 + $0xb8] sm:$0xff] %v316_v23  ;;  %v318_v24 = vld [vmem:[%s1087_s30 + $0x180] sm:$0xff]  ;;  %v320_v25 = vld [vmem:[%s1087_s30 + $0x190] sm:$0xff] }
  0x1e   : > { %v322_v26 = vld [vmem:[%s1087_s30 + $0x1a0] sm:$0xff]  ;;  %319 = vst [vmem:[%s1092_s5 + $0xc0] sm:$0xff] %v318_v24  ;;  %321 = vst [vmem:[%s1092_s5 + $0xc8] sm:$0xff] %v320_v25  ;;  %v324_v27 = vld [vmem:[%s1087_s30 + $0x1b0] sm:$0xff] }
  0x1f   : > { %323 = vst [vmem:[%s1092_s5 + $0xd0] sm:$0xff] %v322_v26  ;;  %v326_v28 = vld [vmem:[%s1087_s30 + $0x1c0] sm:$0xff]  ;;  %v328_v29 = vld [vmem:[%s1087_s30 + $0x1d0] sm:$0xff]  ;;  %325 = vst [vmem:[%s1092_s5 + $0xd8] sm:$0xff] %v324_v27 }
  0x20   : > { %327 = vst [vmem:[%s1092_s5 + $0xe0] sm:$0xff] %v326_v28  ;;  %329 = vst [vmem:[%s1092_s5 + $0xe8] sm:$0xff] %v328_v29  ;;  %v330_v30 = vld [vmem:[%s1087_s30 + $0x1e0] sm:$0xff]  ;;  %v332_v31 = vld [vmem:[%s1087_s30 + $0x1f0] sm:$0xff] }
  0x21   : > { %331 = vst [vmem:[%s1092_s5 + $0xf0] sm:$0xff] %v330_v30  ;;  %333 = vst [vmem:[%s1092_s5 + $0xf8] sm:$0xff] %v332_v31 }
  0x22 PF: > { %339 = sbr.rel (!%p1069_p3) target bundleno = 41 (0x29), region = 66  ;;  %s341_s6 = sand.u32 (%p1069_p3), 1, %s998_s16  }
  0x23   : > { %s876_s7 = sshll.u32 (%p1069_p3), %s1006_s18, 3  ;;  %s875_s8 = sshll.u32 (%p1069_p3), %s341_s6, 4 }
  0x24   : > { %s345_s11 = scalar_lea.vmem (%p1069_p3), %s1351_s1, %s876_s7  ;;  %s343_s12 = scalar_lea.vmem (%p1069_p3), [#allocation4], %s875_s8 }
  0x25   : > { %v375_v32 = vld [vmem:[%s345_s11] sm:$0xff] (%p1069_p3)  ;;  %v377_v33 = vld [vmem:[%s345_s11 + $0x10] sm:$0xff] (%p1069_p3) }
  0x26   : > { %376 = vst [vmem:[%s343_s12] sm:$0xff] (%p1069_p3), %v375_v32  ;;  %378 = vst [vmem:[%s343_s12 + $0x8] sm:$0xff] (%p1069_p3), %v377_v33 }
  0x29 PF: > { %p877_p6 = scmp.ge.s32.totalorder %s1010_s19, 1  ;;  %p383_p7 = scmp.lt.s32.totalorder %s1010_s19, 3 }
  0x2b   : > { %p384_p8 = pnand %p877_p6, %p383_p7 }
  0x2c   : > { %s390_s13 = sand.u32 (!%p384_p8), 1, %s994_s15   ;;  %p880_p9 = scmp.ne.s32.totalorder (!%p384_p8), %s1002_s17, 0 }
  0x2d   : > { %387 = sbr.rel (%p384_p8) target bundleno = 337 (0x151), region = 104  ;;  %s878_s14 = sshll.u32 (!%p384_p8), %s390_s13, 8 }
  0x2e   : > { %s1165_s21 = sshll.u32 (!%p384_p8), %s390_s13, 4  ;;  %s1167_s22 = scalar_lea.vmem (!%p384_p8), [#allocation3], %s878_s14 }
  0x2f   : > { %s399_s23 = scalar_lea.vmem (!%p384_p8), [#allocation4], %s1165_s21 }
  0x34   : > { %436 = sbr.rel (%p880_p9) target bundleno = 59 (0x3b), region = 116  ;;  %vm437_vm0 = vcmask (!%p880_p9), 261120   ;;  %v1012_v34 = vmov (!%p880_p9), 0.0  }
  0x35   : > { %438 = vst.msk [vmem:[#allocation2] sm:$0xff] (!%p880_p9), %vm437_vm0, %v1012_v34  ;;  %439 = vst.msk [vmem:[#allocation2 + $0x8] sm:$0xff] (!%p880_p9), %vm437_vm0, %v1012_v34 }
  0x3b PF: > { %v440_v35 = vld [vmem:[%s1167_s22] sm:$0xff]  ;;  %v441_v36 = vld [vmem:[%s1167_s22 + $0x8] sm:$0xff]  ;;  %v442_v37 = vld [vmem:[%s1167_s22 + $0x10] sm:$0xff]  ;;  %vm526_vm1 = vcmask 261120   ;;  %vm655_vm2 = vcmask 1041409   ;;  %vm657_vm3 = vcmask 1042434  }
  0x3c   : > { %v443_v38 = vld [vmem:[%s1167_s22 + $0x18] sm:$0xff]  ;;  %v444_v39 = vld [vmem:[%s1167_s22 + $0x20] sm:$0xff]  ;;  %v445_v40 = vld [vmem:[%s1167_s22 + $0x28] sm:$0xff]  ;;  %vm659_vm4 = vcmask 1043459   ;;  %vm661_vm5 = vcmask 1044484   ;;  %vm663_vm6 = vcmask 1045509  }
  0x3d   : > { %v446_v41 = vld [vmem:[%s1167_s22 + $0x30] sm:$0xff]  ;;  %v447_v42 = vld [vmem:[%s1167_s22 + $0x38] sm:$0xff]  ;;  %v448_v43 = vld [vmem:[%s1167_s22 + $0x40] sm:$0xff]  ;;  %vm665_vm7 = vcmask 1046534   ;;  %vm667_vm8 = vcmask 1047559   ;;  %p898_p10 = scmp.ne.s32.totalorder %s1002_s17, 1 }
  0x3e   : > { %v449_v44 = vld [vmem:[%s1167_s22 + $0x48] sm:$0xff]  ;;  %v450_v45 = vld [vmem:[%s1167_s22 + $0x50] sm:$0xff]  ;;  %v451_v46 = vld [vmem:[%s1167_s22 + $0x58] sm:$0xff] }
  0x3f   : > { %v473_v47 = vld [vmem:[%s399_s23] sm:$0xff]  ;;  %v453_v49 = vld [vmem:[%s1167_s22 + $0x68] sm:$0xff]  ;;  %v884_v54 = vld [vmem:[%s1167_s22 + $0x98] sm:$0xff] }
  0x40   : > { %v452_v48 = vld [vmem:[%s1167_s22 + $0x60] sm:$0xff]  ;;  %v454_v50 = vld [vmem:[%s1167_s22 + $0x70] sm:$0xff]  ;;  %v882_v52 = vld [vmem:[%s1167_s22 + $0x88] sm:$0xff]  ;;  %v476_v56 = vmul.f32 %v473_v47, %v440_v35  ;;  %v477_v57 = vmul.f32 %v473_v47, %v441_v36  ;;  %v478_v58 = vmul.f32 %v473_v47, %v442_v37  ;;  %v479_v59 = vmul.f32 %v473_v47, %v443_v38 }
  0x41   : > { %v881_v51 = vld [vmem:[%s1167_s22 + $0x80] sm:$0xff]  ;;  %v883_v53 = vld [vmem:[%s1167_s22 + $0x90] sm:$0xff]  ;;  %v897_v55 = vld [vmem:[%s399_s23 + $0x8] sm:$0xff]  ;;  %v480_v63 = vmul.f32 %v473_v47, %v444_v39  ;;  %v481_v0 = vmul.f32 %v473_v47, %v445_v40  ;;  %v482_v1 = vmul.f32 %v473_v47, %v446_v41  ;;  %v483_v2 = vmul.f32 %v473_v47, %v447_v42 }
  0x42   : > { %v455_v60 = vld [vmem:[%s1167_s22 + $0x78] sm:$0xff]  ;;  %v885_v61 = vld [vmem:[%s1167_s22 + $0xa0] sm:$0xff]  ;;  %v886_v62 = vld [vmem:[%s1167_s22 + $0xa8] sm:$0xff]  ;;  %v1196_v6 = vmul.f32 %v473_v47, %v448_v43  ;;  %v1198_v7 = vmul.f32 %v473_v47, %v449_v44  ;;  %v1200_v8 = vmul.f32 %v473_v47, %v450_v45  ;;  %v1202_v9 = vmul.f32 %v473_v47, %v451_v46 }
  0x43   : > { %v887_v3 = vld [vmem:[%s1167_s22 + $0xb0] sm:$0xff]  ;;  %v888_v4 = vld [vmem:[%s1167_s22 + $0xb8] sm:$0xff]  ;;  %v889_v5 = vld [vmem:[%s1167_s22 + $0xc0] sm:$0xff]  ;;  %v492_v13 = vmul.f32 %v897_v55, %v881_v51  ;;  %v493_v14 = vmul.f32 %v897_v55, %v882_v52  ;;  %v494_v15 = vmul.f32 %v897_v55, %v883_v53  ;;  %v495_v16 = vmul.f32 %v897_v55, %v884_v54 }
  0x44   : > { %v890_v10 = vld [vmem:[%s1167_s22 + $0xc8] sm:$0xff]  ;;  %v891_v11 = vld [vmem:[%s1167_s22 + $0xd0] sm:$0xff]  ;;  %v892_v12 = vld [vmem:[%s1167_s22 + $0xd8] sm:$0xff]  ;;  %v1208_v18 = vmul.f32 %v473_v47, %v452_v48  ;;  %v1210_v19 = vmul.f32 %v473_v47, %v453_v49  ;;  %v1212_v20 = vmul.f32 %v473_v47, %v454_v50  ;;  %v1214_v21 = vmul.f32 %v473_v47, %v455_v60 }
  0x45   : > { %v893_v17 = vld [vmem:[%s1167_s22 + $0xe0] sm:$0xff]  ;;  %v894_v22 = vld [vmem:[%s1167_s22 + $0xe8] sm:$0xff]  ;;  %v895_v23 = vld [vmem:[%s1167_s22 + $0xf0] sm:$0xff]  ;;  %v496_v25 = vmul.f32 %v897_v55, %v885_v61  ;;  %v497_v26 = vmul.f32 %v897_v55, %v886_v62  ;;  %v498_v27 = vmul.f32 %v897_v55, %v887_v3  ;;  %v499_v28 = vmul.f32 %v897_v55, %v888_v4 }
  0x46   : > { %v896_v24 = vld [vmem:[%s1167_s22 + $0xf8] sm:$0xff]  ;;  %v1219_v29 = vmul.f32 %v897_v55, %v889_v5  ;;  %v1221_v30 = vmul.f32 %v897_v55, %v890_v10  ;;  %v1223_v31 = vmul.f32 %v897_v55, %v891_v11  ;;  %v1225_v32 = vmul.f32 %v897_v55, %v892_v12 }
  0x47   : > { %v508_v33 = vsub.f32 %v476_v56, %v492_v13  ;;  %v509_v34 = vsub.f32 %v477_v57, %v493_v14  ;;  %v510_v35 = vsub.f32 %v478_v58, %v494_v15  ;;  %v511_v36 = vsub.f32 %v479_v59, %v495_v16 }
  0x48   : > { %v1227_v37 = vmul.f32 %v897_v55, %v893_v17  ;;  %v1229_v38 = vmul.f32 %v897_v55, %v894_v22  ;;  %v1231_v39 = vmul.f32 %v897_v55, %v895_v23  ;;  %v1233_v40 = vmul.f32 %v897_v55, %v896_v24 }
  0x49   : > { %v512_v41 = vsub.f32 %v480_v63, %v496_v25  ;;  %v513_v42 = vsub.f32 %v481_v0, %v497_v26  ;;  %v514_v43 = vsub.f32 %v482_v1, %v498_v27  ;;  %v515_v44 = vsub.f32 %v483_v2, %v499_v28 }
  0x4a   : > { %v516_v45 = vsub.f32 %v1196_v6, %v1219_v29  ;;  %v517_v46 = vsub.f32 %v1198_v7, %v1221_v30  ;;  %v518_v47 = vsub.f32 %v1200_v8, %v1223_v31  ;;  %v519_v48 = vsub.f32 %v1202_v9, %v1225_v32 }
  0x4b   : > { %v527_v49 = vsel %vm526_vm1, %v508_v33, 0.0  ;;  %v534_v50 = vsel %vm526_vm1, %v509_v34, 0.0  ;;  %v541_v51 = vsel %vm526_vm1, %v510_v35, 0.0  ;;  %v548_v52 = vsel %vm526_vm1, %v511_v36, 0.0 }
  0x4c   : > { %v528_v53 = vrot.slane %v527_v49, 4  ;;  %v535_v54 = vrot.slane %v534_v50, 4  ;;  %v542_v55 = vrot.slane %v541_v51, 4  ;;  %v549_v56 = vrot.slane %v548_v52, 4 }
  0x4d   : > { %v555_v57 = vsel %vm526_vm1, %v512_v41, 0.0  ;;  %v562_v58 = vsel %vm526_vm1, %v513_v42, 0.0  ;;  %v569_v59 = vsel %vm526_vm1, %v514_v43, 0.0  ;;  %v576_v60 = vsel %vm526_vm1, %v515_v44, 0.0 }
  0x4e   : > { %v529_v61 = vadd.f32 %v528_v53, %v527_v49  ;;  %v536_v62 = vadd.f32 %v535_v54, %v534_v50  ;;  %v543_v63 = vadd.f32 %v542_v55, %v541_v51  ;;  %v550_v0 = vadd.f32 %v549_v56, %v548_v52 }
  0x4f   : > { %v556_v1 = vrot.slane %v555_v57, 4  ;;  %v563_v2 = vrot.slane %v562_v58, 4  ;;  %v570_v3 = vrot.slane %v569_v59, 4  ;;  %v577_v4 = vrot.slane %v576_v60, 4 }
  0x50   : > { %v530_v5 = vrot.slane %v529_v61, 2  ;;  %v537_v6 = vrot.slane %v536_v62, 2  ;;  %v544_v7 = vrot.slane %v543_v63, 2  ;;  %v551_v8 = vrot.slane %v550_v0, 2 }
  0x51   : > { %v557_v9 = vadd.f32 %v556_v1, %v555_v57  ;;  %v564_v10 = vadd.f32 %v563_v2, %v562_v58  ;;  %v571_v11 = vadd.f32 %v570_v3, %v569_v59  ;;  %v578_v12 = vadd.f32 %v577_v4, %v576_v60 }
  0x52   : > { %v531_v13 = vadd.f32 %v530_v5, %v529_v61  ;;  %v538_v14 = vadd.f32 %v537_v6, %v536_v62  ;;  %v545_v15 = vadd.f32 %v544_v7, %v543_v63  ;;  %v552_v16 = vadd.f32 %v551_v8, %v550_v0 }
  0x53   : > { %v558_v17 = vrot.slane %v557_v9, 2  ;;  %v565_v22 = vrot.slane %v564_v10, 2  ;;  %v572_v23 = vrot.slane %v571_v11, 2  ;;  %v579_v24 = vrot.slane %v578_v12, 2 }
  0x54   : > { %v532_v25 = vrot.slane %v531_v13, 1  ;;  %v539_v26 = vrot.slane %v538_v14, 1  ;;  %v546_v27 = vrot.slane %v545_v15, 1  ;;  %v553_v28 = vrot.slane %v552_v16, 1 }
  0x55   : > { %v1251_v29 = vadd.f32 %v558_v17, %v557_v9  ;;  %v1253_v30 = vadd.f32 %v565_v22, %v564_v10  ;;  %v1255_v31 = vadd.f32 %v572_v23, %v571_v11  ;;  %v1257_v32 = vadd.f32 %v579_v24, %v578_v12 }
  0x56   : > { %v520_v33 = vsub.f32 %v1208_v18, %v1227_v37  ;;  %v521_v34 = vsub.f32 %v1210_v19, %v1229_v38  ;;  %v522_v35 = vsub.f32 %v1212_v20, %v1231_v39  ;;  %v523_v36 = vsub.f32 %v1214_v21, %v1233_v40 }
  0x57   : > { %v1267_v41 = vadd.f32 %v532_v25, %v531_v13  ;;  %v1269_v42 = vadd.f32 %v539_v26, %v538_v14  ;;  %v1271_v43 = vadd.f32 %v546_v27, %v545_v15  ;;  %v1273_v44 = vadd.f32 %v553_v28, %v552_v16 }
  0x58   : > { %v583_v49 = vsel %vm526_vm1, %v516_v45, 0.0  ;;  %v590_v18 = vsel %vm526_vm1, %v517_v46, 0.0  ;;  %v597_v19 = vsel %vm526_vm1, %v518_v47, 0.0  ;;  %v604_v37 = vsel %vm526_vm1, %v519_v48, 0.0 }
  0x59   : > { %v560_v20 = vrot.slane %v1251_v29, 1  ;;  %v567_v21 = vrot.slane %v1253_v30, 1  ;;  %v574_v38 = vrot.slane %v1255_v31, 1  ;;  %v581_v39 = vrot.slane %v1257_v32, 1 }
  0x5a   : > { %v584_v40 = vrot.slane %v583_v49, 4  ;;  %v591_v50 = vrot.slane %v590_v18, 4  ;;  %v598_v51 = vrot.slane %v597_v19, 4  ;;  %v605_v52 = vrot.slane %v604_v37, 4 }
  0x5b   : > { %v611_v45 = vsel %vm526_vm1, %v520_v33, 0.0  ;;  %v618_v46 = vsel %vm526_vm1, %v521_v34, 0.0  ;;  %v625_v47 = vsel %vm526_vm1, %v522_v35, 0.0  ;;  %v632_v48 = vsel %vm526_vm1, %v523_v36, 0.0 }
  0x5c   : > { %v585_v53 = vadd.f32 %v584_v40, %v583_v49  ;;  %v592_v54 = vadd.f32 %v591_v50, %v590_v18  ;;  %v599_v55 = vadd.f32 %v598_v51, %v597_v19  ;;  %v606_v56 = vadd.f32 %v605_v52, %v604_v37 }
  0x5d   : > { %v612_v57 = vrot.slane %v611_v45, 4  ;;  %v619_v58 = vrot.slane %v618_v46, 4  ;;  %v626_v59 = vrot.slane %v625_v47, 4  ;;  %v633_v60 = vrot.slane %v632_v48, 4 }
  0x5e   : > { %v586_v61 = vrot.slane %v585_v53, 2  ;;  %v593_v62 = vrot.slane %v592_v54, 2  ;;  %v600_v63 = vrot.slane %v599_v55, 2  ;;  %v607_v0 = vrot.slane %v606_v56, 2 }
  0x5f   : > { %v613_v1 = vadd.f32 %v612_v57, %v611_v45  ;;  %v620_v2 = vadd.f32 %v619_v58, %v618_v46  ;;  %v627_v3 = vadd.f32 %v626_v59, %v625_v47  ;;  %v634_v4 = vadd.f32 %v633_v60, %v632_v48  ;;  %v525_v46 = vld [vmem:[#allocation2 + $0x8] sm:$0xff]  ;;  %v690_v57 = vld [vmem:[%s1352_s2 + $0x10] sm:$0xff] (!%p898_p10)  ;;  %v691_v59 = vld [vmem:[%s1352_s2 + $0x18] sm:$0xff] (!%p898_p10) }
  0x60   : > { %v587_v5 = vadd.f32 %v586_v61, %v585_v53  ;;  %v594_v6 = vadd.f32 %v593_v62, %v592_v54  ;;  %v601_v7 = vadd.f32 %v600_v63, %v599_v55  ;;  %v608_v8 = vadd.f32 %v607_v0, %v606_v56  ;;  %v688_v55 = vld [vmem:[%s1352_s2] sm:$0xff] (!%p898_p10)  ;;  %v689_v56 = vld [vmem:[%s1352_s2 + $0x8] sm:$0xff] (!%p898_p10) }
  0x61   : > { %v614_v9 = vrot.slane %v613_v1, 2  ;;  %v621_v10 = vrot.slane %v620_v2, 2  ;;  %v628_v11 = vrot.slane %v627_v3, 2  ;;  %v635_v12 = vrot.slane %v634_v4, 2  ;;  %v899_v63 = vld [vmem:[%s1353_s3] ss:$0 sm:$0xff] (!%p898_p10) }
  0x62   : > { %v588_v13 = vrot.slane %v587_v5, 1  ;;  %v595_v14 = vrot.slane %v594_v6, 1  ;;  %v602_v15 = vrot.slane %v601_v7, 1  ;;  %v609_v16 = vrot.slane %v608_v8, 1 }
  0x63   : > { %v615_v17 = vadd.f32 %v614_v9, %v613_v1  ;;  %v622_v22 = vadd.f32 %v621_v10, %v620_v2  ;;  %v629_v23 = vadd.f32 %v628_v11, %v627_v3  ;;  %v636_v24 = vadd.f32 %v635_v12, %v634_v4 }
  0x64   : > { %v589_v25 = vadd.f32 %v588_v13, %v587_v5  ;;  %v596_v26 = vadd.f32 %v595_v14, %v594_v6  ;;  %v603_v27 = vadd.f32 %v602_v15, %v601_v7  ;;  %v610_v28 = vadd.f32 %v609_v16, %v608_v8 }
  0x65   : > { %v616_v33 = vrot.slane %v615_v17, 1  ;;  %v623_v34 = vrot.slane %v622_v22, 1  ;;  %v630_v35 = vrot.slane %v629_v23, 1  ;;  %v637_v36 = vrot.slane %v636_v24, 1 }
  0x66   : > { %v561_v49 = vadd.f32 %v560_v20, %v1251_v29  ;;  %v656_v18 = vsel %vm655_vm2, %v1269_v42, %v1267_v41  ;;  %v669_v19 = vsel %vm655_vm2, %v596_v26, %v589_v25  ;;  %v568_v37 = vadd.f32 %v567_v21, %v1253_v30 }
  0x67   : > { %v617_v40 = vadd.f32 %v616_v33, %v615_v17  ;;  %v624_v50 = vadd.f32 %v623_v34, %v622_v22  ;;  %v575_v51 = vadd.f32 %v574_v38, %v1255_v31  ;;  %v631_v52 = vadd.f32 %v630_v35, %v629_v23  ;;  %v524_v38 = vld [vmem:[#allocation2] sm:$0xff] }
  0x68   : > { %v658_v45 = vsel %vm657_vm3, %v1271_v43, %v656_v18  ;;  %v670_v29 = vsel %vm657_vm3, %v603_v27, %v669_v19  ;;  %v582_v41 = vadd.f32 %v581_v39, %v1257_v32  ;;  %v638_v42 = vadd.f32 %v637_v36, %v636_v24 }
  0x69   : > { %v660_v20 = vsel %vm659_vm4, %v1273_v44, %v658_v45  ;;  %v671_v30 = vsel %vm659_vm4, %v610_v28, %v670_v29  ;;  %v923_v58 = vpack.c.bf16 (!%p898_p10), %v689_v56, %v688_v55  ;;  %v927_v61 = vpack.c.bf16 (!%p898_p10), %v691_v59, %v690_v57 }
  0x6a   : > { %v662_v21 = vsel %vm661_vm5, %v561_v49, %v660_v20  ;;  %v672_v31 = vsel %vm661_vm5, %v617_v40, %v671_v30  ;;  %685 = sbr.rel (%p898_p10) target bundleno = 337 (0x151), region = 120 }
  0x6b   : > { %v664_v43 = vsel %vm663_vm6, %v568_v37, %v662_v21  ;;  %v673_v47 = vsel %vm663_vm6, %v624_v50, %v672_v31  ;;  %924 = vmatprep.subr.bf16.mxu0 (!%p898_p10), %v923_v58 }
  0x6c   : > { %v666_v48 = vsel %vm665_vm7, %v575_v51, %v664_v43  ;;  %v674_v32 = vsel %vm665_vm7, %v631_v52, %v673_v47  ;;  %926 = vmatpush3.bf16.msra.mxu0 (!%p898_p10), %v923_v58 }
  0x6d   : > { %v668_v39 = vsel %vm667_vm8, %v582_v41, %v666_v48  ;;  %v675_v53 = vsel %vm667_vm8, %v638_v42, %v674_v32  ;;  %928 = vmatprep.subr.bf16.mxu0 (!%p898_p10), %v927_v61 }
  0x6e   : > { %v678_v44 = vadd.f32 %v668_v39, %v524_v38  ;;  %v679_v54 = vadd.f32 %v675_v53, %v525_v46 }
  0x70   : > { %680 = vst.msk [vmem:[#allocation2] sm:$0xff] %vm526_vm1, %v678_v44  ;;  %681 = vst.msk [vmem:[#allocation2 + $0x8] sm:$0xff] %vm526_vm1, %v679_v54  ;;  %930 = vmatpush3.bf16.msra.mxu0 (!%p898_p10), %v927_v61 }
  0x77   : > { %v686_v60 = vld [vmem:[#allocation2] sm:$0xff]  ;;  %v687_v62 = vld [vmem:[#allocation2 + $0x8] sm:$0xff] }
  0x78   : > { %920 = vmatprep.mubr.msk.f32.mxu0 %vm526_vm1, %v686_v60 }
  0x79   : > { %921 = vmatmul.mubr.msk.f32.vlgmr.msra.gmra.mrb[0].mxu0 %vm526_vm1, %v687_v62 }
 0x14c   : > { %v922_v0 = vpop.f32.mrb[0].mxu0 }
 0x14d   : > { %v777_v1 = vadd.f32 %v922_v0, %v899_v63  ;;  %v771_v2 = vpop.f32.mrb[1].mxu0 }
 0x14e   : > { %v772_v3 = vadd.f32 %v899_v63, %v771_v2 }
 0x14f   : > { %781 = vst [vmem:[%s1354_s4 + $0x8] sm:$0xff] %v777_v1 }
 0x150   : > { %780 = vst [vmem:[%s1354_s4] sm:$0xff] %v772_v3 }
 0x151 PF: > { %s14_s19 = sadd.s32 1, %s1010_s19   ;;  %s1356_s15 = smov %s998_s16 }
 0x152   : > { %p11_p11 = scmp.ge.s32.totalorder %s14_s19, 4   ;;  %s1357_s16 = smov %s1077_s24 }
 0x153   : > { %s1358_s17 = smov %s1006_s18  ;;  %s1359_s18 = smov %s1361_s20 }
 0x154   :  { %13 = sbr.rel (!%p11_p11) target bundleno = 3 (0x3), region = 165 }

// kernel: reverse.7
= control target key start
LH: loop header
LB: loop body
LE: loop exit
PB: predicated region body
PF: predicated region fallthrough
CT: control target
= control target key end

     0   :  { %v168_v12 = vlaneseq  ;;  %v174_v37 = vld [vmem:[#allocation0 + $0x7] ss:$-1 sm:$0xff]  ;;  %v202_v45 = vld [vmem:[#allocation0 + $0x1f] ss:$-1 sm:$0xff]  ;;  %v230_v53 = vld [vmem:[#allocation0 + $0x37] ss:$-1 sm:$0xff]  ;;  %s1161_s0 = inlined_call_operand.vmem [shape: f32[16,32,14], index: 0, kind: input, shape index: {}]   ;;  %s1162_s1 = inlined_call_operand.vmem [shape: f32[16,32,14], index: 1, kind: output, shape index: {}]  }
   0x1   :  { %v92_v0 = vld [vmem:[%s1161_s0] sm:$0xff]  ;;  %v94_v1 = vld [vmem:[%s1161_s0 + $0x8] sm:$0xff]  ;;  %v96_v2 = vld [vmem:[%s1161_s0 + $0x10] sm:$0xff]  ;;  %v175_v39 = vrot.slane %v174_v37, 2  ;;  %v203_v47 = vrot.slane %v202_v45, 2  ;;  %v231_v55 = vrot.slane %v230_v53, 2 }
   0x2   :  { %93 = vst [vmem:[#allocation0 + $0x8] sm:$0xff] %v92_v0  ;;  %95 = vst [vmem:[#allocation0 + $0x10] sm:$0xff] %v94_v1  ;;  %v98_v3 = vld [vmem:[%s1161_s0 + $0x18] sm:$0xff]  ;;  %v100_v4 = vld [vmem:[%s1161_s0 + $0x20] sm:$0xff]  ;;  %v974_v25 = vshrl.u32 %v168_v12, 7 }
   0x3   :  { %97 = vst [vmem:[#allocation0 + $0x20] sm:$0xff] %v96_v2  ;;  %v102_v5 = vld [vmem:[%s1161_s0 + $0x28] sm:$0xff]  ;;  %99 = vst [vmem:[#allocation0 + $0x28] sm:$0xff] %v98_v3  ;;  %v104_v6 = vld [vmem:[%s1161_s0 + $0x30] sm:$0xff] }
   0x4   :  { %101 = vst [vmem:[#allocation0 + $0x38] sm:$0xff] %v100_v4  ;;  %103 = vst [vmem:[#allocation0 + $0x40] sm:$0xff] %v102_v5  ;;  %v106_v7 = vld [vmem:[%s1161_s0 + $0x38] sm:$0xff]  ;;  %v108_v8 = vld [vmem:[%s1161_s0 + $0x40] sm:$0xff]  ;;  %vm170_vm0 = vcmp.lt.s32.totalorder %v974_v25, 6 }
   0x5   :  { %105 = vst [vmem:[#allocation0 + $0x50] sm:$0xff] %v104_v6  ;;  %107 = vst [vmem:[#allocation0 + $0x58] sm:$0xff] %v106_v7  ;;  %v110_v9 = vld [vmem:[%s1161_s0 + $0x48] sm:$0xff]  ;;  %v112_v10 = vld [vmem:[%s1161_s0 + $0x50] sm:$0xff] }
   0x6   :  { %109 = vst [vmem:[#allocation0 + $0x68] sm:$0xff] %v108_v8  ;;  %v114_v11 = vld [vmem:[%s1161_s0 + $0x58] sm:$0xff]  ;;  %111 = vst [vmem:[#allocation0 + $0x70] sm:$0xff] %v110_v9  ;;  %v116_v13 = vld [vmem:[%s1161_s0 + $0x60] sm:$0xff] }
   0x7   :  { %113 = vst [vmem:[#allocation0 + $0x80] sm:$0xff] %v112_v10  ;;  %115 = vst [vmem:[#allocation0 + $0x88] sm:$0xff] %v114_v11  ;;  %v118_v14 = vld [vmem:[%s1161_s0 + $0x68] sm:$0xff]  ;;  %v120_v15 = vld [vmem:[%s1161_s0 + $0x70] sm:$0xff] }
   0x8   :  { %117 = vst [vmem:[#allocation0 + $0x98] sm:$0xff] %v116_v13  ;;  %119 = vst [vmem:[#allocation0 + $0xa0] sm:$0xff] %v118_v14  ;;  %v122_v16 = vld [vmem:[%s1161_s0 + $0x78] sm:$0xff]  ;;  %v124_v17 = vld [vmem:[%s1161_s0 + $0x80] sm:$0xff] }
   0x9   :  { %121 = vst [vmem:[#allocation0 + $0xb0] sm:$0xff] %v120_v15  ;;  %v126_v18 = vld [vmem:[%s1161_s0 + $0x88] sm:$0xff]  ;;  %123 = vst [vmem:[#allocation0 + $0xb8] sm:$0xff] %v122_v16  ;;  %v128_v19 = vld [vmem:[%s1161_s0 + $0x90] sm:$0xff] }
   0xa   :  { %125 = vst [vmem:[#allocation0 + $0xc8] sm:$0xff] %v124_v17  ;;  %127 = vst [vmem:[#allocation0 + $0xd0] sm:$0xff] %v126_v18  ;;  %v130_v20 = vld [vmem:[%s1161_s0 + $0x98] sm:$0xff]  ;;  %v132_v21 = vld [vmem:[%s1161_s0 + $0xa0] sm:$0xff] }
   0xb   :  { %129 = vst [vmem:[#allocation0 + $0xe0] sm:$0xff] %v128_v19  ;;  %131 = vst [vmem:[#allocation0 + $0xe8] sm:$0xff] %v130_v20  ;;  %v134_v22 = vld [vmem:[%s1161_s0 + $0xa8] sm:$0xff]  ;;  %v136_v23 = vld [vmem:[%s1161_s0 + $0xb0] sm:$0xff] }
   0xc   :  { %133 = vst [vmem:[#allocation0 + $0xf8] sm:$0xff] %v132_v21  ;;  %v138_v24 = vld [vmem:[%s1161_s0 + $0xb8] sm:$0xff]  ;;  %135 = vst [vmem:[#allocation0 + $0x100] sm:$0xff] %v134_v22  ;;  %v140_v26 = vld [vmem:[%s1161_s0 + $0xc0] sm:$0xff] }
   0xd   :  { %137 = vst [vmem:[#allocation0 + $0x110] sm:$0xff] %v136_v23  ;;  %139 = vst [vmem:[#allocation0 + $0x118] sm:$0xff] %v138_v24  ;;  %v142_v27 = vld [vmem:[%s1161_s0 + $0xc8] sm:$0xff]  ;;  %v144_v28 = vld [vmem:[%s1161_s0 + $0xd0] sm:$0xff] }
   0xe   :  { %141 = vst [vmem:[#allocation0 + $0x128] sm:$0xff] %v140_v26  ;;  %143 = vst [vmem:[#allocation0 + $0x130] sm:$0xff] %v142_v27  ;;  %v146_v29 = vld [vmem:[%s1161_s0 + $0xd8] sm:$0xff]  ;;  %v148_v30 = vld [vmem:[%s1161_s0 + $0xe0] sm:$0xff] }
   0xf   :  { %145 = vst [vmem:[#allocation0 + $0x140] sm:$0xff] %v144_v28  ;;  %v150_v31 = vld [vmem:[%s1161_s0 + $0xe8] sm:$0xff]  ;;  %147 = vst [vmem:[#allocation0 + $0x148] sm:$0xff] %v146_v29  ;;  %v152_v32 = vld [vmem:[%s1161_s0 + $0xf0] sm:$0xff] }
  0x10   :  { %149 = vst [vmem:[#allocation0 + $0x158] sm:$0xff] %v148_v30  ;;  %151 = vst [vmem:[#allocation0 + $0x160] sm:$0xff] %v150_v31  ;;  %v154_v33 = vld [vmem:[%s1161_s0 + $0xf8] sm:$0xff]  ;;  %v161_v34 = vld [vmem:[#allocation0 + $0xf] ss:$-1 sm:$0xff] }
  0x11   :  { %153 = vst [vmem:[#allocation0 + $0x170] sm:$0xff] %v152_v32  ;;  %155 = vst [vmem:[#allocation0 + $0x178] sm:$0xff] %v154_v33  ;;  %v162_v35 = vrot.slane %v161_v34, 2  ;;  %v166_v36 = vld [vmem:[#allocation0 + $0x17] ss:$-1 sm:$0xff] }
  0x12   :  { %v167_v38 = vrot.slane %v166_v36, 2  ;;  %v179_v40 = vld [vmem:[#allocation0 + $0xf] ss:$-1 sm:$0xff]  ;;  %v189_v41 = vld [vmem:[#allocation0 + $0x27] ss:$-1 sm:$0xff]  ;;  %176 = vst [vmem:[#allocation1 + $0x8] sm:$0xff] %v175_v39 }
  0x13   :  { %163 = vst [vmem:[#allocation1] sm:$0xff] %v162_v35  ;;  %v180_v42 = vrot.slane %v179_v40, 2  ;;  %v190_v43 = vrot.slane %v189_v41, 2  ;;  %v194_v44 = vld [vmem:[#allocation0 + $0x2f] ss:$-1 sm:$0xff]  ;;  %204 = vst [vmem:[#allocation1 + $0x18] sm:$0xff] %v203_v47 }
  0x14   :  { %171 = vst.msk [vmem:[#allocation1] sm:$0xff] %vm170_vm0, %v167_v38  ;;  %v195_v46 = vrot.slane %v194_v44, 2  ;;  %v207_v48 = vld [vmem:[#allocation0 + $0x27] ss:$-1 sm:$0xff]  ;;  %v217_v49 = vld [vmem:[#allocation0 + $0x3f] ss:$-1 sm:$0xff] }
  0x15   :  { %184 = vst.msk [vmem:[#allocation1 + $0x8] sm:$0xff] %vm170_vm0, %v180_v42  ;;  %191 = vst [vmem:[#allocation1 + $0x10] sm:$0xff] %v190_v43  ;;  %v208_v50 = vrot.slane %v207_v48, 2  ;;  %v218_v51 = vrot.slane %v217_v49, 2  ;;  %v222_v52 = vld [vmem:[#allocation0 + $0x47] ss:$-1 sm:$0xff] }
  0x16   :  { %199 = vst.msk [vmem:[#allocation1 + $0x10] sm:$0xff] %vm170_vm0, %v195_v46  ;;  %v223_v54 = vrot.slane %v222_v52, 2  ;;  %v235_v56 = vld [vmem:[#allocation0 + $0x3f] ss:$-1 sm:$0xff]  ;;  %v245_v57 = vld [vmem:[#allocation0 + $0x57] ss:$-1 sm:$0xff] }
  0x17   :  { %212 = vst.msk [vmem:[#allocation1 + $0x18] sm:$0xff] %vm170_vm0, %v208_v50  ;;  %219 = vst [vmem:[#allocation1 + $0x20] sm:$0xff] %v218_v51  ;;  %v236_v58 = vrot.slane %v235_v56, 2  ;;  %v246_v59 = vrot.slane %v245_v57, 2  ;;  %v250_v60 = vld [vmem:[#allocation0 + $0x5f] ss:$-1 sm:$0xff] }
  0x18   :  { %v258_v61 = vld [vmem:[#allocation0 + $0x4f] ss:$-1 sm:$0xff]  ;;  %227 = vst.msk [vmem:[#allocation1 + $0x20] sm:$0xff] %vm170_vm0, %v223_v54  ;;  %232 = vst [vmem:[#allocation1 + $0x28] sm:$0xff] %v231_v55  ;;  %v251_v62 = vrot.slane %v250_v60, 2 }
  0x19   :  { %v259_v63 = vrot.slane %v258_v61, 2  ;;  %v263_v0 = vld [vmem:[#allocation0 + $0x57] ss:$-1 sm:$0xff]  ;;  %v273_v1 = vld [vmem:[#allocation0 + $0x6f] ss:$-1 sm:$0xff]  ;;  %240 = vst.msk [vmem:[#allocation1 + $0x28] sm:$0xff] %vm170_vm0, %v236_v58 }
  0x1a   :  { %247 = vst [vmem:[#allocation1 + $0x30] sm:$0xff] %v246_v59  ;;  %v264_v2 = vrot.slane %v263_v0, 2  ;;  %v274_v3 = vrot.slane %v273_v1, 2  ;;  %v278_v4 = vld [vmem:[#allocation0 + $0x77] ss:$-1 sm:$0xff] }
  0x1b   :  { %v286_v5 = vld [vmem:[#allocation0 + $0x67] ss:$-1 sm:$0xff]  ;;  %255 = vst.msk [vmem:[#allocation1 + $0x30] sm:$0xff] %vm170_vm0, %v251_v62  ;;  %260 = vst [vmem:[#allocation1 + $0x38] sm:$0xff] %v259_v63  ;;  %v279_v6 = vrot.slane %v278_v4, 2 }
  0x1c   :  { %v287_v7 = vrot.slane %v286_v5, 2  ;;  %v291_v8 = vld [vmem:[#allocation0 + $0x6f] ss:$-1 sm:$0xff]  ;;  %v301_v9 = vld [vmem:[#allocation0 + $0x87] ss:$-1 sm:$0xff]  ;;  %268 = vst.msk [vmem:[#allocation1 + $0x38] sm:$0xff] %vm170_vm0, %v264_v2 }
  0x1d   :  { %275 = vst [vmem:[#allocation1 + $0x40] sm:$0xff] %v274_v3  ;;  %v292_v10 = vrot.slane %v291_v8, 2  ;;  %v302_v11 = vrot.slane %v301_v9, 2  ;;  %v306_v12 = vld [vmem:[#allocation0 + $0x8f] ss:$-1 sm:$0xff] }
  0x1e   :  { %v314_v13 = vld [vmem:[#allocation0 + $0x7f] ss:$-1 sm:$0xff]  ;;  %283 = vst.msk [vmem:[#allocation1 + $0x40] sm:$0xff] %vm170_vm0, %v279_v6  ;;  %288 = vst [vmem:[#allocation1 + $0x48] sm:$0xff] %v287_v7  ;;  %v307_v14 = vrot.slane %v306_v12, 2 }
  0x1f   :  { %v315_v15 = vrot.slane %v314_v13, 2  ;;  %v319_v16 = vld [vmem:[#allocation0 + $0x87] ss:$-1 sm:$0xff]  ;;  %v329_v17 = vld [vmem:[#allocation0 + $0x9f] ss:$-1 sm:$0xff]  ;;  %296 = vst.msk [vmem:[#allocation1 + $0x48] sm:$0xff] %vm170_vm0, %v292_v10 }
  0x20   :  { %303 = vst [vmem:[#allocation1 + $0x50] sm:$0xff] %v302_v11  ;;  %v320_v18 = vrot.slane %v319_v16, 2  ;;  %v330_v19 = vrot.slane %v329_v17, 2  ;;  %v334_v20 = vld [vmem:[#allocation0 + $0xa7] ss:$-1 sm:$0xff] }
  0x21   :  { %v342_v21 = vld [vmem:[#allocation0 + $0x97] ss:$-1 sm:$0xff]  ;;  %311 = vst.msk [vmem:[#allocation1 + $0x50] sm:$0xff] %vm170_vm0, %v307_v14  ;;  %316 = vst [vmem:[#allocation1 + $0x58] sm:$0xff] %v315_v15  ;;  %v335_v22 = vrot.slane %v334_v20, 2 }
  0x22   :  { %v343_v23 = vrot.slane %v342_v21, 2  ;;  %v347_v24 = vld [vmem:[#allocation0 + $0x9f] ss:$-1 sm:$0xff]  ;;  %v357_v26 = vld [vmem:[#allocation0 + $0xb7] ss:$-1 sm:$0xff]  ;;  %324 = vst.msk [vmem:[#allocation1 + $0x58] sm:$0xff] %vm170_vm0, %v320_v18 }
  0x23   :  { %331 = vst [vmem:[#allocation1 + $0x60] sm:$0xff] %v330_v19  ;;  %v348_v27 = vrot.slane %v347_v24, 2  ;;  %v358_v28 = vrot.slane %v357_v26, 2  ;;  %v362_v29 = vld [vmem:[#allocation0 + $0xbf] ss:$-1 sm:$0xff] }
  0x24   :  { %v370_v30 = vld [vmem:[#allocation0 + $0xaf] ss:$-1 sm:$0xff]  ;;  %339 = vst.msk [vmem:[#allocation1 + $0x60] sm:$0xff] %vm170_vm0, %v335_v22  ;;  %344 = vst [vmem:[#allocation1 + $0x68] sm:$0xff] %v343_v23  ;;  %v363_v31 = vrot.slane %v362_v29, 2 }
  0x25   :  { %v371_v32 = vrot.slane %v370_v30, 2  ;;  %v375_v33 = vld [vmem:[#allocation0 + $0xb7] ss:$-1 sm:$0xff]  ;;  %v385_v34 = vld [vmem:[#allocation0 + $0xcf] ss:$-1 sm:$0xff]  ;;  %352 = vst.msk [vmem:[#allocation1 + $0x68] sm:$0xff] %vm170_vm0, %v348_v27 }
  0x26   :  { %359 = vst [vmem:[#allocation1 + $0x70] sm:$0xff] %v358_v28  ;;  %v376_v35 = vrot.slane %v375_v33, 2  ;;  %v386_v36 = vrot.slane %v385_v34, 2  ;;  %v390_v37 = vld [vmem:[#allocation0 + $0xd7] ss:$-1 sm:$0xff]  ;;  %v710_v25 = vld [vmem:[#allocation1 + $0x40] sm:$0xff] }
  0x27   :  { %v398_v38 = vld [vmem:[#allocation0 + $0xc7] ss:$-1 sm:$0xff]  ;;  %367 = vst.msk [vmem:[#allocation1 + $0x70] sm:$0xff] %vm170_vm0, %v363_v31  ;;  %372 = vst [vmem:[#allocation1 + $0x78] sm:$0xff] %v371_v32  ;;  %v391_v39 = vrot.slane %v390_v37, 2 }
  0x28   :  { %v399_v40 = vrot.slane %v398_v38, 2  ;;  %v403_v41 = vld [vmem:[#allocation0 + $0xcf] ss:$-1 sm:$0xff]  ;;  %v413_v42 = vld [vmem:[#allocation0 + $0xe7] ss:$-1 sm:$0xff]  ;;  %380 = vst.msk [vmem:[#allocation1 + $0x78] sm:$0xff] %vm170_vm0, %v376_v35 }
  0x29   :  { %387 = vst [vmem:[#allocation1 + $0x80] sm:$0xff] %v386_v36  ;;  %v404_v43 = vrot.slane %v403_v41, 2  ;;  %v414_v44 = vrot.slane %v413_v42, 2  ;;  %v418_v45 = vld [vmem:[#allocation0 + $0xef] ss:$-1 sm:$0xff]  ;;  %v694_v35 = vld [vmem:[#allocation1] sm:$0xff] }
  0x2a   :  { %v426_v46 = vld [vmem:[#allocation0 + $0xdf] ss:$-1 sm:$0xff]  ;;  %395 = vst.msk [vmem:[#allocation1 + $0x80] sm:$0xff] %vm170_vm0, %v391_v39  ;;  %400 = vst [vmem:[#allocation1 + $0x88] sm:$0xff] %v399_v40  ;;  %v419_v47 = vrot.slane %v418_v45, 2  ;;  %v696_v36 = vld [vmem:[#allocation1 + $0x8] sm:$0xff] }
  0x2b   :  { %v427_v48 = vrot.slane %v426_v46, 2  ;;  %v431_v49 = vld [vmem:[#allocation0 + $0xe7] ss:$-1 sm:$0xff]  ;;  %v441_v50 = vld [vmem:[#allocation0 + $0xff] ss:$-1 sm:$0xff]  ;;  %408 = vst.msk [vmem:[#allocation1 + $0x88] sm:$0xff] %vm170_vm0, %v404_v43  ;;  %695 = vst [vmem:[%s1162_s1] sm:$0xff] %v694_v35 }
  0x2c   :  { %415 = vst [vmem:[#allocation1 + $0x90] sm:$0xff] %v414_v44  ;;  %v432_v51 = vrot.slane %v431_v49, 2  ;;  %v442_v52 = vrot.slane %v441_v50, 2  ;;  %v446_v53 = vld [vmem:[#allocation0 + $0x107] ss:$-1 sm:$0xff]  ;;  %697 = vst [vmem:[%s1162_s1 + $0x8] sm:$0xff] %v696_v36 }
  0x2d   :  { %v454_v54 = vld [vmem:[#allocation0 + $0xf7] ss:$-1 sm:$0xff]  ;;  %423 = vst.msk [vmem:[#allocation1 + $0x90] sm:$0xff] %vm170_vm0, %v419_v47  ;;  %428 = vst [vmem:[#allocation1 + $0x98] sm:$0xff] %v427_v48  ;;  %v447_v55 = vrot.slane %v446_v53, 2  ;;  %v700_v39 = vld [vmem:[#allocation1 + $0x18] sm:$0xff] }
  0x2e   :  { %v455_v56 = vrot.slane %v454_v54, 2  ;;  %v459_v57 = vld [vmem:[#allocation0 + $0xff] ss:$-1 sm:$0xff]  ;;  %v469_v58 = vld [vmem:[#allocation0 + $0x117] ss:$-1 sm:$0xff]  ;;  %436 = vst.msk [vmem:[#allocation1 + $0x98] sm:$0xff] %vm170_vm0, %v432_v51 }
  0x2f   :  { %443 = vst [vmem:[#allocation1 + $0xa0] sm:$0xff] %v442_v52  ;;  %v460_v59 = vrot.slane %v459_v57, 2  ;;  %v470_v60 = vrot.slane %v469_v58, 2  ;;  %v474_v61 = vld [vmem:[#allocation0 + $0x11f] ss:$-1 sm:$0xff]  ;;  %v698_v38 = vld [vmem:[#allocation1 + $0x10] sm:$0xff] }
  0x30   :  { %v482_v62 = vld [vmem:[#allocation0 + $0x10f] ss:$-1 sm:$0xff]  ;;  %451 = vst.msk [vmem:[#allocation1 + $0xa0] sm:$0xff] %vm170_vm0, %v447_v55  ;;  %456 = vst [vmem:[#allocation1 + $0xa8] sm:$0xff] %v455_v56  ;;  %v475_v63 = vrot.slane %v474_v61, 2  ;;  %v702_v40 = vld [vmem:[#allocation1 + $0x20] sm:$0xff] }
  0x31   :  { %v483_v0 = vrot.slane %v482_v62, 2  ;;  %v487_v1 = vld [vmem:[#allocation0 + $0x117] ss:$-1 sm:$0xff]  ;;  %v497_v2 = vld [vmem:[#allocation0 + $0x12f] ss:$-1 sm:$0xff]  ;;  %464 = vst.msk [vmem:[#allocation1 + $0xa8] sm:$0xff] %vm170_vm0, %v460_v59 }
  0x32   :  { %471 = vst [vmem:[#allocation1 + $0xb0] sm:$0xff] %v470_v60  ;;  %v488_v3 = vrot.slane %v487_v1, 2  ;;  %v498_v4 = vrot.slane %v497_v2, 2  ;;  %v502_v5 = vld [vmem:[#allocation0 + $0x137] ss:$-1 sm:$0xff]  ;;  %699 = vst [vmem:[%s1162_s1 + $0x10] sm:$0xff] %v698_v38 }
  0x33   :  { %v510_v6 = vld [vmem:[#allocation0 + $0x127] ss:$-1 sm:$0xff]  ;;  %479 = vst.msk [vmem:[#allocation1 + $0xb0] sm:$0xff] %vm170_vm0, %v475_v63  ;;  %484 = vst [vmem:[#allocation1 + $0xb8] sm:$0xff] %v483_v0  ;;  %v503_v7 = vrot.slane %v502_v5, 2  ;;  %v704_v41 = vld [vmem:[#allocation1 + $0x28] sm:$0xff] }
  0x34   :  { %v511_v8 = vrot.slane %v510_v6, 2  ;;  %v515_v9 = vld [vmem:[#allocation0 + $0x12f] ss:$-1 sm:$0xff]  ;;  %v525_v10 = vld [vmem:[#allocation0 + $0x147] ss:$-1 sm:$0xff]  ;;  %492 = vst.msk [vmem:[#allocation1 + $0xb8] sm:$0xff] %vm170_vm0, %v488_v3 }
  0x35   :  { %499 = vst [vmem:[#allocation1 + $0xc0] sm:$0xff] %v498_v4  ;;  %v516_v11 = vrot.slane %v515_v9, 2  ;;  %v526_v12 = vrot.slane %v525_v10, 2  ;;  %v530_v13 = vld [vmem:[#allocation0 + $0x14f] ss:$-1 sm:$0xff]  ;;  %701 = vst [vmem:[%s1162_s1 + $0x18] sm:$0xff] %v700_v39 }
  0x36   :  { %v538_v14 = vld [vmem:[#allocation0 + $0x13f] ss:$-1 sm:$0xff]  ;;  %507 = vst.msk [vmem:[#allocation1 + $0xc0] sm:$0xff] %vm170_vm0, %v503_v7  ;;  %512 = vst [vmem:[#allocation1 + $0xc8] sm:$0xff] %v511_v8  ;;  %v531_v15 = vrot.slane %v530_v13, 2  ;;  %v706_v42 = vld [vmem:[#allocation1 + $0x30] sm:$0xff] }
  0x37   :  { %v539_v16 = vrot.slane %v538_v14, 2  ;;  %v543_v17 = vld [vmem:[#allocation0 + $0x147] ss:$-1 sm:$0xff]  ;;  %v553_v18 = vld [vmem:[#allocation0 + $0x15f] ss:$-1 sm:$0xff]  ;;  %520 = vst.msk [vmem:[#allocation1 + $0xc8] sm:$0xff] %vm170_vm0, %v516_v11 }
  0x38   :  { %527 = vst [vmem:[#allocation1 + $0xd0] sm:$0xff] %v526_v12  ;;  %v544_v19 = vrot.slane %v543_v17, 2  ;;  %v554_v20 = vrot.slane %v553_v18, 2  ;;  %v558_v21 = vld [vmem:[#allocation0 + $0x167] ss:$-1 sm:$0xff]  ;;  %703 = vst [vmem:[%s1162_s1 + $0x20] sm:$0xff] %v702_v40 }
  0x39   :  { %v566_v22 = vld [vmem:[#allocation0 + $0x157] ss:$-1 sm:$0xff]  ;;  %535 = vst.msk [vmem:[#allocation1 + $0xd0] sm:$0xff] %vm170_vm0, %v531_v15  ;;  %540 = vst [vmem:[#allocation1 + $0xd8] sm:$0xff] %v539_v16  ;;  %v559_v23 = vrot.slane %v558_v21, 2  ;;  %v708_v43 = vld [vmem:[#allocation1 + $0x38] sm:$0xff] }
  0x3a   :  { %v567_v24 = vrot.slane %v566_v22, 2  ;;  %v571_v26 = vld [vmem:[#allocation0 + $0x15f] ss:$-1 sm:$0xff]  ;;  %v581_v27 = vld [vmem:[#allocation0 + $0x177] ss:$-1 sm:$0xff]  ;;  %548 = vst.msk [vmem:[#allocation1 + $0xd8] sm:$0xff] %vm170_vm0, %v544_v19 }
  0x3b   :  { %555 = vst [vmem:[#allocation1 + $0xe0] sm:$0xff] %v554_v20  ;;  %v572_v28 = vrot.slane %v571_v26, 2  ;;  %v582_v29 = vrot.slane %v581_v27, 2  ;;  %v586_v30 = vld [vmem:[#allocation0 + $0x17f] ss:$-1 sm:$0xff]  ;;  %705 = vst [vmem:[%s1162_s1 + $0x28] sm:$0xff] %v704_v41 }
  0x3c   :  { %v594_v31 = vld [vmem:[#allocation0 + $0x16f] ss:$-1 sm:$0xff]  ;;  %563 = vst.msk [vmem:[#allocation1 + $0xe0] sm:$0xff] %vm170_vm0, %v559_v23  ;;  %568 = vst [vmem:[#allocation1 + $0xe8] sm:$0xff] %v567_v24  ;;  %v587_v32 = vrot.slane %v586_v30, 2  ;;  %v714_v45 = vld [vmem:[#allocation1 + $0x50] sm:$0xff] }
  0x3d   :  { %v595_v33 = vrot.slane %v594_v31, 2  ;;  %v599_v34 = vld [vmem:[#allocation0 + $0x177] ss:$-1 sm:$0xff]  ;;  %576 = vst.msk [vmem:[#allocation1 + $0xe8] sm:$0xff] %vm170_vm0, %v572_v28  ;;  %583 = vst [vmem:[#allocation1 + $0xf0] sm:$0xff] %v582_v29  ;;  %v712_v44 = vld [vmem:[#allocation1 + $0x48] sm:$0xff] }
  0x3e   :  { %v600_v37 = vrot.slane %v599_v34, 2  ;;  %591 = vst.msk [vmem:[#allocation1 + $0xf0] sm:$0xff] %vm170_vm0, %v587_v32  ;;  %707 = vst [vmem:[%s1162_s1 + $0x30] sm:$0xff] %v706_v42  ;;  %v716_v46 = vld [vmem:[#allocation1 + $0x58] sm:$0xff]  ;;  %v718_v47 = vld [vmem:[#allocation1 + $0x60] sm:$0xff] }
  0x3f   :  { %596 = vst [vmem:[#allocation1 + $0xf8] sm:$0xff] %v595_v33  ;;  %709 = vst [vmem:[%s1162_s1 + $0x38] sm:$0xff] %v708_v43  ;;  %v720_v48 = vld [vmem:[#allocation1 + $0x68] sm:$0xff]  ;;  %v722_v49 = vld [vmem:[#allocation1 + $0x70] sm:$0xff] }
  0x40   :  { %604 = vst.msk [vmem:[#allocation1 + $0xf8] sm:$0xff] %vm170_vm0, %v600_v37  ;;  %711 = vst [vmem:[%s1162_s1 + $0x40] sm:$0xff] %v710_v25  ;;  %v724_v50 = vld [vmem:[#allocation1 + $0x78] sm:$0xff]  ;;  %v726_v51 = vld [vmem:[#allocation1 + $0x80] sm:$0xff] }
  0x41   :  { %713 = vst [vmem:[%s1162_s1 + $0x48] sm:$0xff] %v712_v44  ;;  %715 = vst [vmem:[%s1162_s1 + $0x50] sm:$0xff] %v714_v45  ;;  %v728_v52 = vld [vmem:[#allocation1 + $0x88] sm:$0xff]  ;;  %v730_v53 = vld [vmem:[#allocation1 + $0x90] sm:$0xff] }
  0x42   :  { %717 = vst [vmem:[%s1162_s1 + $0x58] sm:$0xff] %v716_v46  ;;  %719 = vst [vmem:[%s1162_s1 + $0x60] sm:$0xff] %v718_v47  ;;  %v732_v54 = vld [vmem:[#allocation1 + $0x98] sm:$0xff]  ;;  %v734_v55 = vld [vmem:[#allocation1 + $0xa0] sm:$0xff] }
  0x43   :  { %721 = vst [vmem:[%s1162_s1 + $0x68] sm:$0xff] %v720_v48  ;;  %723 = vst [vmem:[%s1162_s1 + $0x70] sm:$0xff] %v722_v49  ;;  %v736_v56 = vld [vmem:[#allocation1 + $0xa8] sm:$0xff]  ;;  %v738_v57 = vld [vmem:[#allocation1 + $0xb0] sm:$0xff] }
  0x44   :  { %725 = vst [vmem:[%s1162_s1 + $0x78] sm:$0xff] %v724_v50  ;;  %727 = vst [vmem:[%s1162_s1 + $0x80] sm:$0xff] %v726_v51  ;;  %v740_v58 = vld [vmem:[#allocation1 + $0xb8] sm:$0xff]  ;;  %v742_v59 = vld [vmem:[#allocation1 + $0xc0] sm:$0xff] }
  0x45   :  { %729 = vst [vmem:[%s1162_s1 + $0x88] sm:$0xff] %v728_v52  ;;  %731 = vst [vmem:[%s1162_s1 + $0x90] sm:$0xff] %v730_v53  ;;  %v744_v60 = vld [vmem:[#allocation1 + $0xc8] sm:$0xff]  ;;  %v746_v61 = vld [vmem:[#allocation1 + $0xd0] sm:$0xff] }
  0x46   :  { %733 = vst [vmem:[%s1162_s1 + $0x98] sm:$0xff] %v732_v54  ;;  %735 = vst [vmem:[%s1162_s1 + $0xa0] sm:$0xff] %v734_v55  ;;  %v748_v62 = vld [vmem:[#allocation1 + $0xd8] sm:$0xff]  ;;  %v750_v63 = vld [vmem:[#allocation1 + $0xe0] sm:$0xff] }
  0x47   :  { %737 = vst [vmem:[%s1162_s1 + $0xa8] sm:$0xff] %v736_v56  ;;  %739 = vst [vmem:[%s1162_s1 + $0xb0] sm:$0xff] %v738_v57  ;;  %v752_v0 = vld [vmem:[#allocation1 + $0xe8] sm:$0xff]  ;;  %v754_v1 = vld [vmem:[#allocation1 + $0xf0] sm:$0xff] }
  0x48   :  { %741 = vst [vmem:[%s1162_s1 + $0xb8] sm:$0xff] %v740_v58  ;;  %743 = vst [vmem:[%s1162_s1 + $0xc0] sm:$0xff] %v742_v59  ;;  %v756_v2 = vld [vmem:[#allocation1 + $0xf8] sm:$0xff] }
  0x49   :  { %745 = vst [vmem:[%s1162_s1 + $0xc8] sm:$0xff] %v744_v60  ;;  %747 = vst [vmem:[%s1162_s1 + $0xd0] sm:$0xff] %v746_v61 }
  0x4a   :  { %749 = vst [vmem:[%s1162_s1 + $0xd8] sm:$0xff] %v748_v62  ;;  %751 = vst [vmem:[%s1162_s1 + $0xe0] sm:$0xff] %v750_v63 }
  0x4b   :  { %753 = vst [vmem:[%s1162_s1 + $0xe8] sm:$0xff] %v752_v0  ;;  %755 = vst [vmem:[%s1162_s1 + $0xf0] sm:$0xff] %v754_v1 }
  0x4c   :  { %757 = vst [vmem:[%s1162_s1 + $0xf8] sm:$0xff] %v756_v2 }

// kernel: ft_layer_forward.7
= control target key start
LH: loop header
LB: loop body
LE: loop exit
PB: predicated region body
PF: predicated region fallthrough
CT: control target
= control target key end

     0   :  { %vm215_vm0 = vcmask 261120   ;;  %s7856_s0 = inlined_call_operand.vmem [shape: f32[480,32], index: 0, kind: input, shape index: {}]   ;;  %s7857_s1 = inlined_call_operand.vmem [shape: f32[480,32], index: 1, kind: input, shape index: {}]   ;;  %s7858_s4 = inlined_call_operand.vmem [shape: f32[32,32], index: 4, kind: input, shape index: {}]   ;;  %s7859_s2 = inlined_call_operand.vmem [shape: f32[1,32], index: 2, kind: input, shape index: {}]   ;;  %s7860_s3 = inlined_call_operand.vmem [shape: f32[1,32], index: 3, kind: input, shape index: {}]   ;;  %s7861_s6 = inlined_call_operand.vmem [shape: f32[32,32], index: 6, kind: input, shape index: {}]   ;;  %s7862_s5 = inlined_call_operand.vmem [shape: f32[1,32], index: 5, kind: input, shape index: {}]   ;;  %s7863_s7 = inlined_call_operand.vmem [shape: f32[1,32], index: 7, kind: input, shape index: {}]   ;;  %s7864_s8 = inlined_call_operand.vmem [shape: f32[1,32], index: 8, kind: input, shape index: {}]   ;;  %s7865_s9 = inlined_call_operand.vmem [shape: f32[1,32], index: 9, kind: input, shape index: {}]   ;;  %s7866_s10 = inlined_call_operand.vmem [shape: f32[480,32], index: 10, kind: output, shape index: {}]  }
   0x1   :  { %v37_v0 = vld [vmem:[%s7856_s0 + $0x10] sm:$0xff]  ;;  %v35_v2 = vld [vmem:[%s7856_s0] sm:$0xff]  ;;  %v38_v5 = vld [vmem:[%s7856_s0 + $0x18] sm:$0xff] }
   0x2   :  { %v97_v1 = vld [vmem:[%s7857_s1 + $0x10] sm:$0xff]  ;;  %v95_v4 = vld [vmem:[%s7857_s1] sm:$0xff]  ;;  %v98_v6 = vld [vmem:[%s7857_s1 + $0x18] sm:$0xff] }
   0x3   :  { %v4714_v3 = vadd.f32 %v97_v1, %v37_v0  ;;  %v4725_v7 = vadd.f32 %v95_v4, %v35_v2  ;;  %v4727_v8 = vadd.f32 %v98_v6, %v38_v5  ;;  %v36_v9 = vld [vmem:[%s7856_s0 + $0x8] sm:$0xff]  ;;  %v39_v16 = vld [vmem:[%s7856_s0 + $0x20] sm:$0xff]  ;;  %v42_v21 = vld [vmem:[%s7856_s0 + $0x38] sm:$0xff] }
   0x4   :  { %v96_v10 = vld [vmem:[%s7857_s1 + $0x8] sm:$0xff]  ;;  %v99_v19 = vld [vmem:[%s7857_s1 + $0x20] sm:$0xff]  ;;  %v102_v22 = vld [vmem:[%s7857_s1 + $0x38] sm:$0xff] }
   0x5   :  { %v40_v11 = vld [vmem:[%s7856_s0 + $0x28] sm:$0xff]  ;;  %v222_v12 = vsel %vm215_vm0, %v4714_v3, 0.0  ;;  %v4740_v13 = vadd.f32 %v96_v10, %v36_v9  ;;  %v216_v15 = vsel %vm215_vm0, %v4725_v7, 0.0  ;;  %v225_v17 = vsel %vm215_vm0, %v4727_v8, 0.0  ;;  %v41_v24 = vld [vmem:[%s7856_s0 + $0x30] sm:$0xff]  ;;  %v43_v32 = vld [vmem:[%s7856_s0 + $0x40] sm:$0xff] }
   0x6   :  { %v100_v14 = vld [vmem:[%s7857_s1 + $0x28] sm:$0xff]  ;;  %223 = vadd.xlane.f32.xlu1 %v222_v12  ;;  %217 = vadd.xlane.f32.xlu0 %v216_v15  ;;  %v4765_v23 = vadd.f32 %v99_v19, %v39_v16  ;;  %v101_v25 = vld [vmem:[%s7857_s1 + $0x30] sm:$0xff]  ;;  %v4775_v27 = vadd.f32 %v102_v22, %v42_v21  ;;  %v103_v33 = vld [vmem:[%s7857_s1 + $0x40] sm:$0xff] }
   0x7   :  { %v4752_v18 = vadd.f32 %v100_v14, %v40_v11  ;;  %v219_v20 = vsel %vm215_vm0, %v4740_v13, 0.0  ;;  %v44_v28 = vld [vmem:[%s7856_s0 + $0x48] sm:$0xff]  ;;  %v4785_v31 = vadd.f32 %v101_v25, %v41_v24  ;;  %v46_v36 = vld [vmem:[%s7856_s0 + $0x58] sm:$0xff]  ;;  %v4805_v39 = vadd.f32 %v103_v33, %v43_v32  ;;  %v45_v40 = vld [vmem:[%s7856_s0 + $0x50] sm:$0xff] }
   0x8   :  { %v104_v29 = vld [vmem:[%s7857_s1 + $0x48] sm:$0xff]  ;;  %v228_v30 = vsel %vm215_vm0, %v4765_v23, 0.0  ;;  %v237_v34 = vsel %vm215_vm0, %v4775_v27, 0.0  ;;  %v106_v37 = vld [vmem:[%s7857_s1 + $0x58] sm:$0xff]  ;;  %v105_v41 = vld [vmem:[%s7857_s1 + $0x50] sm:$0xff] }
   0x9   :  { %v231_v26 = vsel %vm215_vm0, %v4752_v18, 0.0  ;;  %v4795_v35 = vadd.f32 %v104_v29, %v44_v28  ;;  %v234_v38 = vsel %vm215_vm0, %v4785_v31, 0.0  ;;  %v48_v42 = vld [vmem:[%s7856_s0 + $0x68] sm:$0xff]  ;;  %v4824_v46 = vadd.f32 %v106_v37, %v46_v36  ;;  %v70_v49 = vld [vmem:[%s7856_s0 + $0x118] sm:$0xff]  ;;  %v47_v53 = vld [vmem:[%s7856_s0 + $0x60] sm:$0xff] }
   0xa   :  { %226 = vadd.xlane.f32.xlu1 %v225_v17  ;;  %220 = vadd.xlane.f32.xlu0 %v219_v20  ;;  %v68_v43 = vld [vmem:[%s7856_s0 + $0x108] sm:$0xff]  ;;  %v130_v50 = vld [vmem:[%s7857_s1 + $0x118] sm:$0xff]  ;;  %v240_v51 = vsel %vm215_vm0, %v4805_v39, 0.0  ;;  %v4839_v52 = vadd.f32 %v105_v41, %v45_v40  ;;  %v107_v57 = vld [vmem:[%s7857_s1 + $0x60] sm:$0xff] }
   0xb   :  { %v128_v44 = vld [vmem:[%s7857_s1 + $0x108] sm:$0xff]  ;;  %v243_v45 = vsel %vm215_vm0, %v4795_v35, 0.0  ;;  %v4844_v54 = vadd.f32 %v130_v50, %v70_v49  ;;  %v74_v59 = vld [vmem:[%s7856_s0 + $0x138] sm:$0xff]  ;;  %v75_v62 = vld [vmem:[%s7856_s0 + $0x140] sm:$0xff]  ;;  %v249_v0 = vsel %vm215_vm0, %v4824_v46, 0.0  ;;  %v4891_v11 = vadd.f32 %v107_v57, %v47_v53 }
   0xc   :  { %v108_v47 = vld [vmem:[%s7857_s1 + $0x68] sm:$0xff]  ;;  %v4829_v48 = vadd.f32 %v128_v44, %v68_v43  ;;  %v134_v60 = vld [vmem:[%s7857_s1 + $0x138] sm:$0xff]  ;;  %v135_v63 = vld [vmem:[%s7857_s1 + $0x140] sm:$0xff]  ;;  %v246_v10 = vsel %vm215_vm0, %v4839_v52, 0.0 }
   0xd   :  { %v72_v55 = vld [vmem:[%s7856_s0 + $0x128] sm:$0xff]  ;;  %v4863_v61 = vadd.f32 %v134_v60, %v74_v59  ;;  %v4873_v1 = vadd.f32 %v108_v47, %v48_v42  ;;  %v4875_v2 = vadd.f32 %v135_v63, %v75_v62  ;;  %v50_v6 = vld [vmem:[%s7856_s0 + $0x78] sm:$0xff]  ;;  %v77_v14 = vld [vmem:[%s7856_s0 + $0x150] sm:$0xff]  ;;  %v252_v32 = vsel %vm215_vm0, %v4891_v11, 0.0 }
   0xe   :  { %232 = vadd.xlane.f32.xlu1 %v231_v26  ;;  %229 = vadd.xlane.f32.xlu0 %v228_v30  ;;  %v132_v56 = vld [vmem:[%s7857_s1 + $0x128] sm:$0xff]  ;;  %v110_v9 = vld [vmem:[%s7857_s1 + $0x78] sm:$0xff]  ;;  %v49_v15 = vld [vmem:[%s7856_s0 + $0x70] sm:$0xff] }
   0xf   :  { %v4855_v58 = vadd.f32 %v132_v56, %v72_v55  ;;  %v76_v4 = vld [vmem:[%s7856_s0 + $0x148] sm:$0xff]  ;;  %v109_v16 = vld [vmem:[%s7857_s1 + $0x70] sm:$0xff]  ;;  %v78_v20 = vld [vmem:[%s7856_s0 + $0x158] sm:$0xff]  ;;  %v255_v22 = vsel %vm215_vm0, %v4873_v1, 0.0  ;;  %v4917_v24 = vadd.f32 %v110_v9, %v50_v6 }
  0x10   :  { %v136_v5 = vld [vmem:[%s7857_s1 + $0x148] sm:$0xff]  ;;  %v137_v17 = vld [vmem:[%s7857_s1 + $0x150] sm:$0xff]  ;;  %v138_v21 = vld [vmem:[%s7857_s1 + $0x158] sm:$0xff]  ;;  %v4935_v33 = vadd.f32 %v109_v16, %v49_v15 }
  0x11   :  { %v4893_v12 = vadd.f32 %v136_v5, %v76_v4  ;;  %v4907_v19 = vadd.f32 %v137_v17, %v77_v14  ;;  %v4919_v25 = vadd.f32 %v138_v21, %v78_v20  ;;  %v79_v26 = vld [vmem:[%s7856_s0 + $0x160] sm:$0xff]  ;;  %v52_v29 = vld [vmem:[%s7856_s0 + $0x88] sm:$0xff]  ;;  %v54_v41 = vld [vmem:[%s7856_s0 + $0x98] sm:$0xff]  ;;  %v261_v49 = vsel %vm215_vm0, %v4917_v24, 0.0 }
  0x12   :  { %238 = vadd.xlane.f32.xlu1 %v237_v34  ;;  %235 = vadd.xlane.f32.xlu0 %v234_v38  ;;  %v139_v28 = vld [vmem:[%s7857_s1 + $0x160] sm:$0xff]  ;;  %v112_v30 = vld [vmem:[%s7857_s1 + $0x88] sm:$0xff]  ;;  %v114_v42 = vld [vmem:[%s7857_s1 + $0x98] sm:$0xff]  ;;  %v258_v60 = vsel %vm215_vm0, %v4935_v33, 0.0 }
  0x13   :  { %v4937_v34 = vadd.f32 %v139_v28, %v79_v26  ;;  %v80_v36 = vld [vmem:[%s7856_s0 + $0x168] sm:$0xff]  ;;  %v51_v37 = vld [vmem:[%s7856_s0 + $0x80] sm:$0xff]  ;;  %v81_v44 = vld [vmem:[%s7856_s0 + $0x170] sm:$0xff]  ;;  %v4970_v50 = vadd.f32 %v112_v30, %v52_v29  ;;  %v5038_v30 = vadd.f32 %v114_v42, %v54_v41 }
  0x14   :  { %v111_v38 = vld [vmem:[%s7857_s1 + $0x80] sm:$0xff]  ;;  %v140_v40 = vld [vmem:[%s7857_s1 + $0x168] sm:$0xff]  ;;  %v113_v53 = vld [vmem:[%s7857_s1 + $0x90] sm:$0xff] }
  0x15   :  { %v4957_v43 = vadd.f32 %v140_v40, %v80_v36  ;;  %v67_v47 = vld [vmem:[%s7856_s0 + $0x100] sm:$0xff]  ;;  %v82_v57 = vld [vmem:[%s7856_s0 + $0x178] sm:$0xff]  ;;  %v4991_v62 = vadd.f32 %v111_v38, %v51_v37  ;;  %v69_v4 = vld [vmem:[%s7856_s0 + $0x110] sm:$0xff]  ;;  %v267_v29 = vsel %vm215_vm0, %v4970_v50, 0.0  ;;  %7963 = vst [vmem:[#allocation2_spill] sm:$0xff] %v5038_v30 }
  0x16   :  { %244 = vadd.xlane.f32.xlu1 %v243_v45  ;;  %241 = vadd.xlane.f32.xlu0 %v240_v51  ;;  %v141_v45 = vld [vmem:[%s7857_s1 + $0x170] sm:$0xff]  ;;  %v127_v56 = vld [vmem:[%s7857_s1 + $0x100] sm:$0xff]  ;;  %v142_v59 = vld [vmem:[%s7857_s1 + $0x178] sm:$0xff] }
  0x17   :  { %v53_v51 = vld [vmem:[%s7856_s0 + $0x90] sm:$0xff]  ;;  %v4978_v55 = vadd.f32 %v141_v45, %v81_v44  ;;  %v4993_v63 = vadd.f32 %v127_v56, %v67_v47  ;;  %v83_v6 = vld [vmem:[%s7856_s0 + $0x180] sm:$0xff]  ;;  %v56_v16 = vld [vmem:[%s7856_s0 + $0xa8] sm:$0xff]  ;;  %v264_v42 = vsel %vm215_vm0, %v4991_v62, 0.0 }
  0x18   :  { %v129_v5 = vld [vmem:[%s7857_s1 + $0x110] sm:$0xff]  ;;  %v71_v14 = vld [vmem:[%s7856_s0 + $0x120] sm:$0xff]  ;;  %v116_v17 = vld [vmem:[%s7857_s1 + $0xa8] sm:$0xff]  ;;  %v5059_v44 = vadd.f32 %v113_v53, %v53_v51 }
  0x19   :  { %v5006_v9 = vadd.f32 %v129_v5, %v69_v4  ;;  %v131_v15 = vld [vmem:[%s7857_s1 + $0x120] sm:$0xff]  ;;  %v144_v26 = vld [vmem:[%s7857_s1 + $0x188] sm:$0xff]  ;;  %v73_v28 = vld [vmem:[%s7856_s0 + $0x130] sm:$0xff] }
  0x1a   :  { %250 = vadd.xlane.f32.xlu1 %v249_v0  ;;  %247 = vadd.xlane.f32.xlu0 %v246_v10  ;;  %v4995_v0 = vadd.f32 %v142_v59, %v82_v57  ;;  %v143_v10 = vld [vmem:[%s7857_s1 + $0x180] sm:$0xff]  ;;  %v5025_v21 = vadd.f32 %v131_v15, %v71_v14  ;;  %v133_v38 = vld [vmem:[%s7857_s1 + $0x130] sm:$0xff]  ;;  %7964 = vst [vmem:[#allocation3_spill] sm:$0xff] %v5059_v44  ;;  %v146_v56 = vld [vmem:[%s7857_s1 + $0x198] sm:$0xff] }
  0x1b   :  { %v5023_v20 = vadd.f32 %v143_v10, %v83_v6  ;;  %v115_v36 = vld [vmem:[%s7857_s1 + $0xa0] sm:$0xff]  ;;  %v85_v40 = vld [vmem:[%s7856_s0 + $0x190] sm:$0xff]  ;;  %v5061_v45 = vadd.f32 %v133_v38, %v73_v28  ;;  %v88_v53 = vld [vmem:[%s7856_s0 + $0x1a8] sm:$0xff]  ;;  %v5106_v28 = vadd.f32 %v116_v17, %v56_v16 }
  0x1c   :  { %v145_v41 = vld [vmem:[%s7857_s1 + $0x190] sm:$0xff]  ;;  %v87_v57 = vld [vmem:[%s7856_s0 + $0x1a0] sm:$0xff]  ;;  %v58_v4 = vld [vmem:[%s7856_s0 + $0xb8] sm:$0xff] }
  0x1d   :  { %v5063_v47 = vadd.f32 %v145_v41, %v85_v40  ;;  %v147_v51 = vld [vmem:[%s7857_s1 + $0x1a0] sm:$0xff]  ;;  %v118_v5 = vld [vmem:[%s7857_s1 + $0xb8] sm:$0xff]  ;;  %v89_v14 = vld [vmem:[%s7856_s0 + $0x1b0] sm:$0xff] }
  0x1e   :  { %256 = vadd.xlane.f32.xlu1 %v255_v22  ;;  %253 = vadd.xlane.f32.xlu0 %v252_v32  ;;  %v84_v22 = vld [vmem:[%s7856_s0 + $0x188] sm:$0xff]  ;;  %v55_v32 = vld [vmem:[%s7856_s0 + $0xa0] sm:$0xff]  ;;  %v5091_v6 = vadd.f32 %v147_v51, %v87_v57  ;;  %v149_v15 = vld [vmem:[%s7857_s1 + $0x1b0] sm:$0xff] }
  0x1f   :  { %v5046_v37 = vadd.f32 %v144_v26, %v84_v22  ;;  %v90_v22 = vld [vmem:[%s7856_s0 + $0x1b8] sm:$0xff]  ;;  %v273_v26 = vsel %vm215_vm0, %v5038_v30, 0.0  ;;  %v117_v38 = vld [vmem:[%s7857_s1 + $0xb0] sm:$0xff]  ;;  %v5114_v40 = vadd.f32 %v149_v15, %v89_v14  ;;  %v91_v16 = vld [vmem:[%s7856_s0 + $0x1c0] sm:$0xff] }
  0x20   :  { %v150_v41 = vld [vmem:[%s7857_s1 + $0x1b8] sm:$0xff]  ;;  %v151_v17 = vld [vmem:[%s7857_s1 + $0x1c0] sm:$0xff]  ;;  %v92_v51 = vld [vmem:[%s7856_s0 + $0x1c8] sm:$0xff] }
  0x21   :  { %7965 = vst [vmem:[#allocation4_spill] sm:$0xff] %v5114_v40  ;;  %v5131_v57 = vadd.f32 %v151_v17, %v91_v16  ;;  %v154_v15 = vld [vmem:[%s7857_s1 + $0x1d8] sm:$0xff]  ;;  %v279_v16 = vsel %vm215_vm0, %v5106_v28, 0.0  ;;  %v5159_v17 = vadd.f32 %v118_v5, %v58_v4  ;;  %v119_v4 = vld [vmem:[%s7857_s1 + $0xc0] sm:$0xff] }
  0x22   :  { %262 = vadd.xlane.f32.xlu1 %v261_v49  ;;  %259 = vadd.xlane.f32.xlu0 %v258_v60  ;;  %v86_v49 = vld [vmem:[%s7856_s0 + $0x198] sm:$0xff]  ;;  %v148_v60 = vld [vmem:[%s7857_s1 + $0x1a8] sm:$0xff] }
  0x23   :  { %v5074_v59 = vadd.f32 %v146_v56, %v86_v49  ;;  %v5093_v10 = vadd.f32 %v148_v60, %v88_v53  ;;  %v5127_v49 = vadd.f32 %v115_v36, %v55_v32  ;;  %v5129_v56 = vadd.f32 %v150_v41, %v90_v22  ;;  %7967 = vst [vmem:[#allocation6_spill] sm:$0xff] %v5131_v57  ;;  %v152_v53 = vld [vmem:[%s7857_s1 + $0x1c8] sm:$0xff]  ;;  %v93_v60 = vld [vmem:[%s7856_s0 + $0x1d0] sm:$0xff]  ;;  %v94_v36 = vld [vmem:[%s7856_s0 + $0x1d8] sm:$0xff] }
  0x24   :  { %v5142_v14 = vadd.f32 %v152_v53, %v92_v51  ;;  %v153_v32 = vld [vmem:[%s7857_s1 + $0x1d0] sm:$0xff]  ;;  %v5155_v41 = vadd.f32 %v154_v15, %v94_v36  ;;  %v60_v51 = vld [vmem:[%s7856_s0 + $0xc8] sm:$0xff]  ;;  %v285_v5 = vsel %vm215_vm0, %v5159_v17, 0.0 }
  0x25   :  { %7966 = vst [vmem:[#allocation5_spill] sm:$0xff] %v5127_v49  ;;  %v5153_v22 = vadd.f32 %v153_v32, %v93_v60  ;;  %v120_v53 = vld [vmem:[%s7857_s1 + $0xc8] sm:$0xff]  ;;  %v59_v32 = vld [vmem:[%s7856_s0 + $0xc0] sm:$0xff] }
  0x26   :  { %268 = vadd.xlane.f32.xlu1 %v267_v29  ;;  %265 = vadd.xlane.f32.xlu0 %v264_v42  ;;  %v57_v29 = vld [vmem:[%s7856_s0 + $0xb0] sm:$0xff]  ;;  %v270_v42 = vsel %vm215_vm0, %v5059_v44, 0.0  ;;  %7968 = vst [vmem:[#allocation7_spill] sm:$0xff] %v5142_v14  ;;  %v5189_v15 = vadd.f32 %v119_v4, %v59_v32  ;;  %v64_v32 = vld [vmem:[%s7856_s0 + $0xe8] sm:$0xff] }
  0x27   :  { %7969 = vst [vmem:[#allocation8_spill] sm:$0xff] %v5153_v22  ;;  %v5169_v60 = vadd.f32 %v117_v38, %v57_v29  ;;  %v62_v29 = vld [vmem:[%s7856_s0 + $0xd8] sm:$0xff]  ;;  %v124_v4 = vld [vmem:[%s7857_s1 + $0xe8] sm:$0xff] }
  0x28   :  { %v122_v38 = vld [vmem:[%s7857_s1 + $0xd8] sm:$0xff]  ;;  %7971 = vst [vmem:[#allocation10_spill] sm:$0xff] %v5189_v15 }
  0x29   :  { %7970 = vst [vmem:[#allocation9_spill] sm:$0xff] %v5169_v60  ;;  %v282_v36 = vsel %vm215_vm0, %v5169_v60, 0.0  ;;  %v288_v60 = vsel %vm215_vm0, %v5189_v15, 0.0 }
  0x2a   :  { %274 = vadd.xlane.f32.xlu1 %v273_v26  ;;  %271 = vadd.xlane.f32.xlu0 %v270_v42  ;;  %v276_v26 = vsel %vm215_vm0, %v5127_v49, 0.0  ;;  %v5179_v42 = vadd.f32 %v120_v53, %v60_v51  ;;  %v121_v51 = vld [vmem:[%s7857_s1 + $0xd0] sm:$0xff] }
  0x2c   :  { %v291_v53 = vsel %vm215_vm0, %v5179_v42, 0.0 }
  0x2e   :  { %280 = vadd.xlane.f32.xlu1 %v279_v16  ;;  %277 = vadd.xlane.f32.xlu0 %v276_v26  ;;  %v61_v16 = vld [vmem:[%s7856_s0 + $0xd0] sm:$0xff]  ;;  %v5199_v26 = vadd.f32 %v122_v38, %v62_v29  ;;  %v123_v29 = vld [vmem:[%s7857_s1 + $0xe0] sm:$0xff] }
  0x2f   :  { %v5209_v49 = vadd.f32 %v121_v51, %v61_v16  ;;  %v66_v16 = vld [vmem:[%s7856_s0 + $0xf8] sm:$0xff] }
  0x30   :  { %v297_v38 = vsel %vm215_vm0, %v5199_v26, 0.0  ;;  %v126_v51 = vld [vmem:[%s7857_s1 + $0xf8] sm:$0xff] }
  0x31   :  { %7972 = vst [vmem:[#allocation11_spill] sm:$0xff] %v5209_v49  ;;  %v294_v15 = vsel %vm215_vm0, %v5209_v49, 0.0 }
  0x32   :  { %286 = vadd.xlane.f32.xlu1 %v285_v5  ;;  %283 = vadd.xlane.f32.xlu0 %v282_v36  ;;  %v63_v5 = vld [vmem:[%s7856_s0 + $0xe0] sm:$0xff]  ;;  %v5219_v36 = vadd.f32 %v124_v4, %v64_v32  ;;  %v5239_v4 = vadd.f32 %v126_v51, %v66_v16  ;;  %v321_v16 = vsel %vm215_vm0, %v4844_v54, 0.0  ;;  %v318_v51 = vsel %vm215_vm0, %v5006_v9, 0.0 }
  0x33   :  { %v5229_v30 = vadd.f32 %v123_v29, %v63_v5 }
  0x34   :  { %v303_v32 = vsel %vm215_vm0, %v5219_v36, 0.0  ;;  %v309_v29 = vsel %vm215_vm0, %v5239_v4, 0.0 }
  0x35   :  { %v300_v49 = vsel %vm215_vm0, %v5229_v30, 0.0 }
  0x36   :  { %292 = vadd.xlane.f32.xlu1 %v291_v53  ;;  %289 = vadd.xlane.f32.xlu0 %v288_v60  ;;  %v65_v53 = vld [vmem:[%s7856_s0 + $0xf0] sm:$0xff] }
  0x37   :  { %v125_v60 = vld [vmem:[%s7857_s1 + $0xf0] sm:$0xff] }
  0x38   :  { %v5243_v5 = vadd.f32 %v125_v60, %v65_v53  ;;  %v324_v53 = vsel %vm215_vm0, %v5025_v21, 0.0  ;;  %v330_v60 = vsel %vm215_vm0, %v5061_v45, 0.0 }
  0x3a   :  { %298 = vadd.xlane.f32.xlu1 %v297_v38  ;;  %295 = vadd.xlane.f32.xlu0 %v294_v15  ;;  %v306_v44 = vsel %vm215_vm0, %v5243_v5, 0.0  ;;  %v315_v38 = vsel %vm215_vm0, %v4829_v48, 0.0  ;;  %v312_v15 = vsel %vm215_vm0, %v4993_v63, 0.0 }
  0x3e   :  { %304 = vadd.xlane.f32.xlu1 %v303_v32  ;;  %301 = vadd.xlane.f32.xlu0 %v300_v49  ;;  %v327_v49 = vsel %vm215_vm0, %v4855_v58, 0.0  ;;  %v336_v32 = vsel %vm215_vm0, %v4875_v2, 0.0 }
  0x42   :  { %310 = vadd.xlane.f32.xlu1 %v309_v29  ;;  %307 = vadd.xlane.f32.xlu0 %v306_v44  ;;  %v333_v44 = vsel %vm215_vm0, %v4863_v61, 0.0  ;;  %v339_v29 = vsel %vm215_vm0, %v4893_v12, 0.0 }
  0x46   :  { %316 = vadd.xlane.f32.xlu1 %v315_v38  ;;  %313 = vadd.xlane.f32.xlu0 %v312_v15  ;;  %v342_v38 = vsel %vm215_vm0, %v4907_v19, 0.0  ;;  %v345_v15 = vsel %vm215_vm0, %v4919_v25, 0.0 }
  0x4a   :  { %322 = vadd.xlane.f32.xlu1 %v321_v16  ;;  %319 = vadd.xlane.f32.xlu0 %v318_v51  ;;  %v348_v16 = vsel %vm215_vm0, %v4937_v34, 0.0  ;;  %v351_v51 = vsel %vm215_vm0, %v4957_v43, 0.0 }
  0x4e   :  { %328 = vadd.xlane.f32.xlu1 %v327_v49  ;;  %325 = vadd.xlane.f32.xlu0 %v324_v53  ;;  %v354_v49 = vsel %vm215_vm0, %v4978_v55, 0.0  ;;  %v357_v53 = vsel %vm215_vm0, %v4995_v0, 0.0 }
  0x52   :  { %334 = vadd.xlane.f32.xlu1 %v333_v44  ;;  %331 = vadd.xlane.f32.xlu0 %v330_v60  ;;  %v360_v44 = vsel %vm215_vm0, %v5023_v20, 0.0  ;;  %v363_v60 = vsel %vm215_vm0, %v5046_v37, 0.0 }
  0x56   :  { %337 = vadd.xlane.f32.xlu1 %v336_v32  ;;  %v366_v32 = vsel %vm215_vm0, %v5063_v47, 0.0 }
  0x5a   :  { %340 = vadd.xlane.f32.xlu1 %v339_v29  ;;  %v369_v29 = vsel %vm215_vm0, %v5074_v59, 0.0 }
  0x5e   :  { %343 = vadd.xlane.f32.xlu1 %v342_v38  ;;  %v372_v38 = vsel %vm215_vm0, %v5091_v6, 0.0 }
  0x62   :  { %346 = vadd.xlane.f32.xlu1 %v345_v15  ;;  %v375_v15 = vsel %vm215_vm0, %v5093_v10, 0.0 }
  0x66   :  { %349 = vadd.xlane.f32.xlu1 %v348_v16  ;;  %v378_v16 = vsel %vm215_vm0, %v5114_v40, 0.0 }
  0x6a   :  { %352 = vadd.xlane.f32.xlu1 %v351_v51  ;;  %v381_v51 = vsel %vm215_vm0, %v5129_v56, 0.0 }
  0x6e   :  { %355 = vadd.xlane.f32.xlu1 %v354_v49 }
  0x72   :  { %358 = vadd.xlane.f32.xlu1 %v357_v53  ;;  %v384_v53 = vsel %vm215_vm0, %v5131_v57, 0.0  ;;  %v390_v57 = vsel %vm215_vm0, %v5153_v22, 0.0 }
  0x76   :  { %361 = vadd.xlane.f32.xlu1 %v360_v44 }
  0x7a   :  { %364 = vadd.xlane.f32.xlu1 %v363_v60 }
  0x7e   :  { %367 = vadd.xlane.f32.xlu1 %v366_v32 }
  0x82   :  { %370 = vadd.xlane.f32.xlu1 %v369_v29 }
  0x86   :  { %373 = vadd.xlane.f32.xlu1 %v372_v38 }
  0x8a   :  { %376 = vadd.xlane.f32.xlu1 %v375_v15  ;;  %v387_v15 = vsel %vm215_vm0, %v5142_v14, 0.0 }
  0x8e   :  { %379 = vadd.xlane.f32.xlu1 %v378_v16 }
  0x92   :  { %382 = vadd.xlane.f32.xlu1 %v381_v51 }
  0x93   :  { %v224_v49 = vpop.xlane.xlu1 %223  ;;  %v218_v44 = vpop.xlane.xlu0 %217 }
  0x94   :  { %v397_v60 = vmul.f32 0.03125, %v218_v44  ;;  %v399_v32 = vmul.f32 0.03125, %v224_v49 }
  0x96   :  { %385 = vadd.xlane.f32.xlu1 %v384_v53  ;;  %v5300_v29 = vsub.f32 %v4725_v7, %v397_v60  ;;  %v5309_v44 = vsub.f32 %v4714_v3, %v399_v32 }
  0x97   :  { %v227_v38 = vpop.xlane.xlu1 %226  ;;  %v221_v16 = vpop.xlane.xlu0 %220 }
  0x98   :  { %7973 = vst [vmem:[#allocation12_spill] sm:$0xff] %v5300_v29  ;;  %v398_v40 = vmul.f32 0.03125, %v221_v16  ;;  %v517_v51 = vmul.f32 %v5300_v29, %v5300_v29  ;;  %v400_v49 = vmul.f32 0.03125, %v227_v38 }
  0x9a   :  { %388 = vadd.xlane.f32.xlu1 %v387_v15  ;;  %v5312_v7 = vsub.f32 %v4740_v13, %v398_v40  ;;  %v577_v60 = vsel %vm215_vm0, %v517_v51, 0.0  ;;  %v5318_v15 = vsub.f32 %v4727_v8, %v400_v49  ;;  %v393_v13 = vsel %vm215_vm0, %v5155_v41, 0.0 }
  0x9b   :  { %v233_v53 = vpop.xlane.xlu1 %232  ;;  %578 = vadd.xlane.f32.xlu0 %v577_v60  ;;  %v230_v14 = vpop.xlane.xlu0 %229  ;;  %v519_v40 = vmul.f32 %v5309_v44, %v5309_v44 }
  0x9c   :  { %v518_v16 = vmul.f32 %v5312_v7, %v5312_v7  ;;  %v401_v29 = vmul.f32 0.03125, %v230_v14  ;;  %7974 = vst [vmem:[#allocation13_spill] sm:$0xff] %v5318_v15  ;;  %v402_v14 = vmul.f32 0.03125, %v233_v53  ;;  %v520_v51 = vmul.f32 %v5318_v15, %v5318_v15 }
  0x9d   :  { %v583_v8 = vsel %vm215_vm0, %v519_v40, 0.0 }
  0x9e   :  { %391 = vadd.xlane.f32.xlu1 %v390_v57  ;;  %v580_v3 = vsel %vm215_vm0, %v518_v16, 0.0  ;;  %v5326_v32 = vsub.f32 %v4765_v23, %v401_v29  ;;  %v5334_v16 = vsub.f32 %v4752_v18, %v402_v14  ;;  %v586_v23 = vsel %vm215_vm0, %v520_v51, 0.0 }
  0x9f   :  { %v239_v22 = vpop.xlane.xlu1 %238  ;;  %581 = vadd.xlane.f32.xlu0 %v580_v3  ;;  %v236_v38 = vpop.xlane.xlu0 %235 }
  0xa0   :  { %v521_v49 = vmul.f32 %v5326_v32, %v5326_v32  ;;  %v403_v60 = vmul.f32 0.03125, %v236_v38  ;;  %7975 = vst [vmem:[#allocation14_spill] sm:$0xff] %v5334_v16  ;;  %v404_v40 = vmul.f32 0.03125, %v239_v22 }
  0xa2   :  { %394 = vadd.xlane.f32.xlu1 %v393_v13  ;;  %v589_v29 = vsel %vm215_vm0, %v521_v49, 0.0  ;;  %v5339_v53 = vsub.f32 %v4785_v31, %v403_v60  ;;  %v5346_v14 = vsub.f32 %v4775_v27, %v404_v40 }
  0xa3   :  { %v245_v57 = vpop.xlane.xlu1 %244  ;;  %584 = vadd.xlane.f32.xlu0 %v583_v8  ;;  %v242_v13 = vpop.xlane.xlu0 %241  ;;  %v522_v8 = vmul.f32 %v5334_v16, %v5334_v16 }
  0xa4   :  { %7976 = vst [vmem:[#allocation15_spill] sm:$0xff] %v5339_v53  ;;  %v523_v18 = vmul.f32 %v5339_v53, %v5339_v53  ;;  %v405_v38 = vmul.f32 0.03125, %v242_v13  ;;  %7977 = vst [vmem:[#allocation16_spill] sm:$0xff] %v5346_v14  ;;  %v524_v13 = vmul.f32 %v5346_v14, %v5346_v14  ;;  %v1133_v53 = vld [vmem:[%s7858_s4 + $0x10] sm:$0xff] }
  0xa5   :  { %v592_v49 = vsel %vm215_vm0, %v522_v8, 0.0 }
  0xa6   :  { %v595_v31 = vsel %vm215_vm0, %v523_v18, 0.0  ;;  %v5353_v22 = vsub.f32 %v4805_v39, %v405_v38  ;;  %v598_v39 = vsel %vm215_vm0, %v524_v13, 0.0  ;;  %v1132_v38 = vld [vmem:[%s7858_s4 + $0x8] sm:$0xff] }
  0xa7   :  { %v251_v3 = vpop.xlane.xlu1 %250  ;;  %587 = vadd.xlane.f32.xlu0 %v586_v23  ;;  %v248_v60 = vpop.xlane.xlu0 %247  ;;  %v406_v23 = vmul.f32 0.03125, %v245_v57  ;;  %v1131_v57 = vld [vmem:[%s7858_s4] sm:$0xff] }
  0xa8   :  { %7978 = vst [vmem:[#allocation17_spill] sm:$0xff] %v5353_v22  ;;  %v525_v27 = vmul.f32 %v5353_v22, %v5353_v22  ;;  %v407_v40 = vmul.f32 0.03125, %v248_v60 }
  0xa9   :  { %v5362_v8 = vsub.f32 %v4795_v35, %v406_v23  ;;  %v4271_v35 = vpack.c.bf16 %v1132_v38, %v1131_v57  ;;  %v408_v23 = vmul.f32 0.03125, %v251_v3 }
  0xaa   :  { %v5375_v60 = vsub.f32 %v4839_v52, %v407_v40  ;;  %v1134_v52 = vld [vmem:[%s7858_s4 + $0x18] sm:$0xff] }
  0xab   :  { %v257_v15 = vpop.xlane.xlu1 %256  ;;  %590 = vadd.xlane.f32.xlu0 %v589_v29  ;;  %7979 = vst [vmem:[#allocation18_spill] sm:$0xff] %v5362_v8  ;;  %v254_v18 = vpop.xlane.xlu0 %253  ;;  %v526_v13 = vmul.f32 %v5362_v8, %v5362_v8  ;;  %4272 = vmatprep.subr.bf16.mxu0 %v4271_v35  ;;  %v4275_v40 = vpack.c.bf16 %v1134_v52, %v1133_v53 }
  0xac   :  { %4274 = vmatpush3.bf16.msra.mxu0 %v4271_v35  ;;  %v527_v3 = vmul.f32 %v5375_v60, %v5375_v60 }
  0xad   :  { %4276 = vmatprep.subr.bf16.mxu0 %v4275_v40 }
  0xaf   :  { %v5348_v51 = vpop.xlane.xlu1 %262  ;;  %593 = vadd.xlane.f32.xlu0 %v592_v49  ;;  %v260_v14 = vpop.xlane.xlu0 %259 }
  0xb0   :  { %4278 = vmatpush3.bf16.msra.mxu0 %v4275_v40 }
  0xb3   :  { %v5355_v29 = vpop.xlane.xlu1 %268  ;;  %596 = vadd.xlane.f32.xlu0 %v595_v31  ;;  %v601_v31 = vsel %vm215_vm0, %v525_v27, 0.0  ;;  %v409_v27 = vmul.f32 0.03125, %v254_v18  ;;  %v266_v16 = vpop.xlane.xlu0 %265  ;;  %v607_v18 = vsel %vm215_vm0, %v527_v3, 0.0 }
  0xb5   :  { %v5398_v53 = vsub.f32 %v4891_v11, %v409_v27  ;;  %v411_v27 = vmul.f32 0.03125, %v260_v14 }
  0xb7   :  { %v5364_v49 = vpop.xlane.xlu1 %274  ;;  %599 = vadd.xlane.f32.xlu0 %v598_v39  ;;  %v272_v3 = vpop.xlane.xlu0 %271  ;;  %v529_v11 = vmul.f32 %v5398_v53, %v5398_v53 }
  0xb9   :  { %v613_v14 = vsel %vm215_vm0, %v529_v11, 0.0 }
  0xbb   :  { %v281_v22 = vpop.xlane.xlu1 %280  ;;  %602 = vadd.xlane.f32.xlu0 %v601_v31  ;;  %v604_v31 = vsel %vm215_vm0, %v526_v13, 0.0 }
  0xbc   :  { %v418_v39 = vmul.f32 0.03125, %v281_v22  ;;  %v5391_v22 = vsub.f32 %v4824_v46, %v408_v23  ;;  %v410_v23 = vmul.f32 0.03125, %v257_v15 }
  0xbe   :  { %v5388_v57 = vsub.f32 %v5106_v28, %v418_v39  ;;  %v528_v39 = vmul.f32 %v5391_v22, %v5391_v22 }
  0xbf   :  { %v287_v38 = vpop.xlane.xlu1 %286  ;;  %605 = vadd.xlane.f32.xlu0 %v604_v31 }
  0xc0   :  { %v420_v35 = vmul.f32 0.03125, %v287_v38  ;;  %v538_v8 = vmul.f32 %v5388_v57, %v5388_v57  ;;  %v610_v31 = vsel %vm215_vm0, %v528_v39, 0.0 }
  0xc2   :  { %v5401_v28 = vsub.f32 %v5159_v17, %v420_v35  ;;  %v640_v46 = vsel %vm215_vm0, %v538_v8, 0.0  ;;  %v5415_v8 = vsub.f32 %v4873_v1, %v410_v23  ;;  %v412_v23 = vmul.f32 0.03125, %v5348_v51 }
  0xc3   :  { %641 = vadd.xlane.f32.xlu1 %v640_v46  ;;  %v293_v13 = vpop.xlane.xlu1 %292  ;;  %608 = vadd.xlane.f32.xlu0 %v607_v18  ;;  %v278_v46 = vpop.xlane.xlu0 %277 }
  0xc4   :  { %v422_v52 = vmul.f32 0.03125, %v293_v13  ;;  %v540_v40 = vmul.f32 %v5401_v28, %v5401_v28 }
  0xc6   :  { %v5411_v17 = vsub.f32 %v5179_v42, %v422_v52  ;;  %v646_v15 = vsel %vm215_vm0, %v540_v40, 0.0  ;;  %v5422_v42 = vsub.f32 %v4935_v33, %v411_v27  ;;  %v530_v52 = vmul.f32 %v5415_v8, %v5415_v8 }
  0xc7   :  { %647 = vadd.xlane.f32.xlu1 %v646_v15  ;;  %v299_v38 = vpop.xlane.xlu1 %298  ;;  %611 = vadd.xlane.f32.xlu0 %v610_v31  ;;  %v413_v27 = vmul.f32 0.03125, %v266_v16  ;;  %v284_v51 = vpop.xlane.xlu0 %283 }
  0xc8   :  { %v424_v35 = vmul.f32 0.03125, %v299_v38  ;;  %v542_v18 = vmul.f32 %v5411_v17, %v5411_v17  ;;  %v531_v33 = vmul.f32 %v5422_v42, %v5422_v42  ;;  %v5440_v38 = vsub.f32 %v4917_v24, %v412_v23 }
  0xc9   :  { %v414_v23 = vmul.f32 0.03125, %v5355_v29 }
  0xca   :  { %v5425_v13 = vsub.f32 %v5199_v26, %v424_v35  ;;  %v652_v1 = vsel %vm215_vm0, %v542_v18, 0.0  ;;  %v616_v35 = vsel %vm215_vm0, %v530_v52, 0.0  ;;  %v619_v16 = vsel %vm215_vm0, %v531_v33, 0.0 }
  0xcb   :  { %653 = vadd.xlane.f32.xlu1 %v652_v1  ;;  %v305_v39 = vpop.xlane.xlu1 %304  ;;  %614 = vadd.xlane.f32.xlu0 %v613_v14  ;;  %v532_v52 = vmul.f32 %v5440_v38, %v5440_v38  ;;  %v290_v33 = vpop.xlane.xlu0 %289 }
  0xcc   :  { %v426_v40 = vmul.f32 0.03125, %v305_v39  ;;  %v544_v11 = vmul.f32 %v5425_v13, %v5425_v13 }
  0xce   :  { %v5436_v26 = vsub.f32 %v5219_v36, %v426_v40  ;;  %v658_v15 = vsel %vm215_vm0, %v544_v11, 0.0  ;;  %v5447_v36 = vsub.f32 %v4991_v62, %v413_v27 }
  0xcf   :  { %659 = vadd.xlane.f32.xlu1 %v658_v15  ;;  %v311_v31 = vpop.xlane.xlu1 %310  ;;  %617 = vadd.xlane.f32.xlu0 %v616_v35  ;;  %v5465_v15 = vsub.f32 %v4970_v50, %v414_v23  ;;  %v622_v35 = vsel %vm215_vm0, %v532_v52, 0.0  ;;  %v296_v23 = vpop.xlane.xlu0 %295 }
  0xd0   :  { %v428_v18 = vmul.f32 0.03125, %v311_v31  ;;  %v546_v14 = vmul.f32 %v5436_v26, %v5436_v26  ;;  %v533_v62 = vmul.f32 %v5447_v36, %v5447_v36 }
  0xd2   :  { %v5450_v1 = vsub.f32 %v5239_v4, %v428_v18  ;;  %v664_v24 = vsel %vm215_vm0, %v546_v14, 0.0  ;;  %v415_v4 = vmul.f32 0.03125, %v272_v3  ;;  %v7980_v3 = vld [vmem:[#allocation3_spill] sm:$0xff] }
  0xd3   :  { %665 = vadd.xlane.f32.xlu1 %v664_v24  ;;  %v317_v39 = vpop.xlane.xlu1 %316  ;;  %620 = vadd.xlane.f32.xlu0 %v619_v16  ;;  %v625_v16 = vsel %vm215_vm0, %v533_v62, 0.0 }
  0xd4   :  { %v430_v40 = vmul.f32 0.03125, %v317_v39  ;;  %v548_v11 = vmul.f32 %v5450_v1, %v5450_v1  ;;  %v5472_v24 = vsub.f32 %v7980_v3, %v415_v4  ;;  %v416_v39 = vmul.f32 0.03125, %v5364_v49  ;;  %v7982_v49 = vld [vmem:[#allocation2_spill] sm:$0xff] }
  0xd6   :  { %v5461_v27 = vsub.f32 %v4829_v48, %v430_v40  ;;  %v670_v29 = vsel %vm215_vm0, %v548_v11, 0.0  ;;  %v534_v40 = vmul.f32 %v5465_v15, %v5465_v15  ;;  %v535_v4 = vmul.f32 %v5472_v24, %v5472_v24 }
  0xd7   :  { %671 = vadd.xlane.f32.xlu1 %v670_v29  ;;  %v323_v31 = vpop.xlane.xlu1 %322  ;;  %623 = vadd.xlane.f32.xlu0 %v622_v35  ;;  %v5490_v35 = vsub.f32 %v7982_v49, %v416_v39 }
  0xd8   :  { %v432_v18 = vmul.f32 0.03125, %v323_v31  ;;  %v550_v14 = vmul.f32 %v5461_v27, %v5461_v27 }
  0xda   :  { %v5475_v48 = vsub.f32 %v4844_v54, %v432_v18  ;;  %v676_v50 = vsel %vm215_vm0, %v550_v14, 0.0  ;;  %v417_v54 = vmul.f32 0.03125, %v278_v46  ;;  %v628_v14 = vsel %vm215_vm0, %v534_v40, 0.0 }
  0xdb   :  { %677 = vadd.xlane.f32.xlu1 %v676_v50  ;;  %v329_v52 = vpop.xlane.xlu1 %328  ;;  %626 = vadd.xlane.f32.xlu0 %v625_v16  ;;  %v302_v50 = vpop.xlane.xlu0 %301  ;;  %v631_v46 = vsel %vm215_vm0, %v535_v4, 0.0  ;;  %v536_v40 = vmul.f32 %v5490_v35, %v5490_v35  ;;  %v7985_v4 = vld [vmem:[#allocation9_spill] sm:$0xff] }
  0xdc   :  { %v434_v11 = vmul.f32 0.03125, %v329_v52  ;;  %v552_v62 = vmul.f32 %v5475_v48, %v5475_v48  ;;  %v7983_v52 = vld [vmem:[#allocation5_spill] sm:$0xff] }
  0xde   :  { %v5486_v29 = vsub.f32 %v4855_v58, %v434_v11  ;;  %v682_v31 = vsel %vm215_vm0, %v552_v62, 0.0  ;;  %v5497_v58 = vsub.f32 %v7983_v52, %v417_v54  ;;  %v419_v11 = vmul.f32 0.03125, %v284_v51 }
  0xdf   :  { %683 = vadd.xlane.f32.xlu1 %v682_v31  ;;  %v335_v18 = vpop.xlane.xlu1 %334  ;;  %629 = vadd.xlane.f32.xlu0 %v628_v14  ;;  %v308_v14 = vpop.xlane.xlu0 %307 }
  0xe0   :  { %7981 = vst [vmem:[#allocation3_spill] sm:$0xff] %v5486_v29  ;;  %v436_v16 = vmul.f32 0.03125, %v335_v18  ;;  %v554_v3 = vmul.f32 %v5486_v29, %v5486_v29  ;;  %v5510_v18 = vsub.f32 %v7985_v4, %v419_v11  ;;  %v537_v51 = vmul.f32 %v5497_v58, %v5497_v58 }
  0xe1   :  { %v423_v4 = vmul.f32 0.03125, %v296_v23 }
  0xe2   :  { %v5500_v62 = vsub.f32 %v4863_v61, %v436_v16  ;;  %v688_v39 = vsel %vm215_vm0, %v554_v3, 0.0  ;;  %v421_v61 = vmul.f32 0.03125, %v290_v33  ;;  %v634_v3 = vsel %vm215_vm0, %v536_v40, 0.0 }
  0xe3   :  { %689 = vadd.xlane.f32.xlu1 %v688_v39  ;;  %v5503_v31 = vpop.xlane.xlu1 %337  ;;  %632 = vadd.xlane.f32.xlu0 %v631_v46  ;;  %v637_v46 = vsel %vm215_vm0, %v537_v51, 0.0  ;;  %v7986_v39 = vld [vmem:[#allocation10_spill] sm:$0xff]  ;;  %v539_v11 = vmul.f32 %v5510_v18, %v5510_v18  ;;  %v7988_v51 = vld [vmem:[#allocation11_spill] sm:$0xff] }
  0xe4   :  { %7984 = vst [vmem:[#allocation2_spill] sm:$0xff] %v5500_v62  ;;  %v556_v49 = vmul.f32 %v5500_v62, %v5500_v62  ;;  %v5518_v62 = vsub.f32 %v7986_v39, %v421_v61  ;;  %v425_v39 = vmul.f32 0.03125, %v302_v50 }
  0xe6   :  { %v694_v54 = vsel %vm215_vm0, %v556_v49, 0.0  ;;  %v541_v61 = vmul.f32 %v5518_v62, %v5518_v62 }
  0xe7   :  { %695 = vadd.xlane.f32.xlu1 %v694_v54  ;;  %v341_v16 = vpop.xlane.xlu1 %340  ;;  %635 = vadd.xlane.f32.xlu0 %v634_v3  ;;  %v314_v54 = vpop.xlane.xlu0 %313  ;;  %v5531_v3 = vsub.f32 %v7988_v51, %v423_v4  ;;  %v427_v4 = vmul.f32 0.03125, %v308_v14 }
  0xe8   :  { %v438_v52 = vmul.f32 0.03125, %v341_v16  ;;  %v643_v16 = vsel %vm215_vm0, %v539_v11, 0.0 }
  0xe9   :  { %v543_v11 = vmul.f32 %v5531_v3, %v5531_v3 }
  0xea   :  { %v5523_v33 = vsub.f32 %v4893_v12, %v438_v52 }
  0xeb   :  { %v5525_v49 = vpop.xlane.xlu1 %343  ;;  %638 = vadd.xlane.f32.xlu0 %v637_v46  ;;  %v649_v46 = vsel %vm215_vm0, %v541_v61, 0.0  ;;  %v320_v29 = vpop.xlane.xlu0 %319  ;;  %v5549_v61 = vsub.f32 %v5243_v5, %v427_v4 }
  0xec   :  { %7987 = vst [vmem:[#allocation5_spill] sm:$0xff] %v5523_v33  ;;  %v558_v40 = vmul.f32 %v5523_v33, %v5523_v33  ;;  %v5538_v33 = vsub.f32 %v5229_v30, %v425_v39  ;;  %v429_v39 = vmul.f32 0.03125, %v314_v54 }
  0xed   :  { %v547_v5 = vmul.f32 %v5549_v61, %v5549_v61 }
  0xee   :  { %v700_v23 = vsel %vm215_vm0, %v558_v40, 0.0  ;;  %v545_v30 = vmul.f32 %v5538_v33, %v5538_v33 }
  0xef   :  { %701 = vadd.xlane.f32.xlu1 %v700_v23  ;;  %v347_v12 = vpop.xlane.xlu1 %346  ;;  %644 = vadd.xlane.f32.xlu0 %v643_v16  ;;  %v655_v16 = vsel %vm215_vm0, %v543_v11, 0.0  ;;  %v431_v11 = vmul.f32 0.03125, %v320_v29 }
  0xf0   :  { %v440_v52 = vmul.f32 0.03125, %v347_v12  ;;  %v326_v12 = vpop.xlane.xlu0 %325 }
  0xf2   :  { %v5543_v51 = vsub.f32 %v4919_v25, %v440_v52  ;;  %v661_v52 = vsel %vm215_vm0, %v545_v30, 0.0  ;;  %v433_v30 = vmul.f32 0.03125, %v326_v12 }
  0xf3   :  { %v350_v50 = vpop.xlane.xlu1 %349  ;;  %650 = vadd.xlane.f32.xlu0 %v649_v46  ;;  %v5556_v46 = vsub.f32 %v4993_v63, %v429_v39 }
  0xf4   :  { %v560_v40 = vmul.f32 %v5543_v51, %v5543_v51  ;;  %v332_v29 = vpop.xlane.xlu0 %331 }
  0xf5   :  { %v549_v63 = vmul.f32 %v5556_v46, %v5556_v46 }
  0xf6   :  { %v706_v14 = vsel %vm215_vm0, %v560_v40, 0.0 }
  0xf7   :  { %707 = vadd.xlane.f32.xlu1 %v706_v14  ;;  %v353_v25 = vpop.xlane.xlu1 %352  ;;  %656 = vadd.xlane.f32.xlu0 %v655_v16  ;;  %v667_v16 = vsel %vm215_vm0, %v547_v5, 0.0  ;;  %v5567_v14 = vsub.f32 %v5006_v9, %v431_v11  ;;  %v435_v5 = vmul.f32 0.03125, %v332_v29 }
  0xf8   :  { %v442_v23 = vmul.f32 0.03125, %v353_v25 }
  0xf9   :  { %v551_v9 = vmul.f32 %v5567_v14, %v5567_v14 }
  0xfa   :  { %v5561_v4 = vsub.f32 %v4957_v43, %v442_v23  ;;  %v673_v23 = vsel %vm215_vm0, %v549_v63, 0.0 }
  0xfb   :  { %v356_v54 = vpop.xlane.xlu1 %355  ;;  %662 = vadd.xlane.f32.xlu0 %v661_v52  ;;  %v5574_v52 = vsub.f32 %v5025_v21, %v433_v30  ;;  %v437_v30 = vmul.f32 0.03125, %v5503_v31 }
  0xfc   :  { %v562_v40 = vmul.f32 %v5561_v4, %v5561_v4 }
  0xfd   :  { %v553_v21 = vmul.f32 %v5574_v52, %v5574_v52 }
  0xfe   :  { %v712_v39 = vsel %vm215_vm0, %v562_v40, 0.0 }
  0xff   :  { %713 = vadd.xlane.f32.xlu1 %v712_v39  ;;  %v359_v43 = vpop.xlane.xlu1 %358  ;;  %668 = vadd.xlane.f32.xlu0 %v667_v16  ;;  %v679_v39 = vsel %vm215_vm0, %v551_v9, 0.0  ;;  %v5585_v16 = vsub.f32 %v5061_v45, %v435_v5  ;;  %v5598_v45 = vsub.f32 %v4875_v2, %v437_v30  ;;  %v439_v9 = vmul.f32 0.03125, %v5525_v49 }
 0x100   :  { %v444_v25 = vmul.f32 0.03125, %v359_v43  ;;  %v685_v43 = vsel %vm215_vm0, %v553_v21, 0.0 }
 0x101   :  { %v5606_v21 = vsub.f32 %v4907_v19, %v439_v9  ;;  %v557_v2 = vmul.f32 %v5598_v45, %v5598_v45 }
 0x102   :  { %v5579_v11 = vsub.f32 %v4995_v0, %v444_v25  ;;  %v555_v25 = vmul.f32 %v5585_v16, %v5585_v16 }
 0x103   :  { %v362_v12 = vpop.xlane.xlu1 %361  ;;  %674 = vadd.xlane.f32.xlu0 %v673_v23  ;;  %v559_v19 = vmul.f32 %v5606_v21, %v5606_v21 }
 0x104   :  { %v564_v40 = vmul.f32 %v5579_v11, %v5579_v11 }
 0x106   :  { %v718_v63 = vsel %vm215_vm0, %v564_v40, 0.0  ;;  %v691_v40 = vsel %vm215_vm0, %v555_v25, 0.0  ;;  %v697_v25 = vsel %vm215_vm0, %v557_v2, 0.0 }
 0x107   :  { %719 = vadd.xlane.f32.xlu1 %v718_v63  ;;  %v365_v0 = vpop.xlane.xlu1 %364  ;;  %680 = vadd.xlane.f32.xlu0 %v679_v39  ;;  %v441_v63 = vmul.f32 0.03125, %v350_v50 }
 0x108   :  { %v446_v29 = vmul.f32 0.03125, %v365_v0 }
 0x109   :  { %v5614_v0 = vsub.f32 %v4937_v34, %v441_v63 }
 0x10a   :  { %v5595_v23 = vsub.f32 %v5046_v37, %v446_v29  ;;  %v443_v29 = vmul.f32 0.03125, %v356_v54  ;;  %v703_v54 = vsel %vm215_vm0, %v559_v19, 0.0 }
 0x10b   :  { %v368_v5 = vpop.xlane.xlu1 %367  ;;  %686 = vadd.xlane.f32.xlu0 %v685_v43 }
 0x10c   :  { %v566_v31 = vmul.f32 %v5595_v23, %v5595_v23  ;;  %v447_v2 = vmul.f32 0.03125, %v368_v5 }
 0x10e   :  { %v724_v39 = vsel %vm215_vm0, %v566_v31, 0.0  ;;  %v5623_v31 = vsub.f32 %v4978_v55, %v443_v29  ;;  %v5641_v19 = vsub.f32 %v5063_v47, %v447_v2 }
 0x10f   :  { %725 = vadd.xlane.f32.xlu1 %v724_v39  ;;  %v371_v37 = vpop.xlane.xlu1 %370  ;;  %692 = vadd.xlane.f32.xlu0 %v691_v40  ;;  %v561_v40 = vmul.f32 %v5614_v0, %v5614_v0 }
 0x110   :  { %v448_v30 = vmul.f32 0.03125, %v371_v37 }
 0x111   :  { %v709_v55 = vsel %vm215_vm0, %v561_v40, 0.0 }
 0x112   :  { %v5611_v49 = vsub.f32 %v5074_v59, %v448_v30  ;;  %v445_v59 = vmul.f32 0.03125, %v362_v12  ;;  %v563_v12 = vmul.f32 %v5623_v31, %v5623_v31 }
 0x113   :  { %v374_v43 = vpop.xlane.xlu1 %373  ;;  %698 = vadd.xlane.f32.xlu0 %v697_v25 }
 0x114   :  { %v568_v50 = vmul.f32 %v5611_v49, %v5611_v49  ;;  %v5632_v37 = vsub.f32 %v5023_v20, %v445_v59  ;;  %v715_v5 = vsel %vm215_vm0, %v563_v12, 0.0 }
 0x116   :  { %v730_v9 = vsel %vm215_vm0, %v568_v50, 0.0  ;;  %v565_v50 = vmul.f32 %v5632_v37, %v5632_v37 }
 0x117   :  { %731 = vadd.xlane.f32.xlu1 %v730_v9  ;;  %v377_v34 = vpop.xlane.xlu1 %376  ;;  %704 = vadd.xlane.f32.xlu0 %v703_v54 }
 0x118   :  { %v450_v39 = vmul.f32 0.03125, %v377_v34  ;;  %v721_v47 = vsel %vm215_vm0, %v565_v50, 0.0 }
 0x11a   :  { %v5629_v63 = vsub.f32 %v5093_v10, %v450_v39  ;;  %v449_v10 = vmul.f32 0.03125, %v374_v43  ;;  %v567_v43 = vmul.f32 %v5641_v19, %v5641_v19 }
 0x11b   :  { %v380_v30 = vpop.xlane.xlu1 %379  ;;  %710 = vadd.xlane.f32.xlu0 %v709_v55  ;;  %v7989_v55 = vld [vmem:[#allocation4_spill] sm:$0xff] }
 0x11c   :  { %v570_v29 = vmul.f32 %v5629_v63, %v5629_v63  ;;  %v5650_v34 = vsub.f32 %v5091_v6, %v449_v10  ;;  %v451_v54 = vmul.f32 0.03125, %v380_v30  ;;  %v727_v30 = vsel %vm215_vm0, %v567_v43, 0.0 }
 0x11e   :  { %v736_v25 = vsel %vm215_vm0, %v570_v29, 0.0  ;;  %v5659_v12 = vsub.f32 %v7989_v55, %v451_v54  ;;  %v569_v29 = vmul.f32 %v5650_v34, %v5650_v34 }
 0x11f   :  { %737 = vadd.xlane.f32.xlu1 %v736_v25  ;;  %v383_v20 = vpop.xlane.xlu1 %382  ;;  %716 = vadd.xlane.f32.xlu0 %v715_v5 }
 0x120   :  { %v452_v9 = vmul.f32 0.03125, %v383_v20  ;;  %v7990_v20 = vld [vmem:[#allocation7_spill] sm:$0xff] }
 0x122   :  { %v5647_v59 = vsub.f32 %v5129_v56, %v452_v9  ;;  %v7991_v9 = vld [vmem:[#allocation6_spill] sm:$0xff] }
 0x123   :  { %v386_v40 = vpop.xlane.xlu1 %385  ;;  %722 = vadd.xlane.f32.xlu0 %v721_v47 }
 0x124   :  { %v572_v39 = vmul.f32 %v5647_v59, %v5647_v59  ;;  %v453_v56 = vmul.f32 0.03125, %v386_v40  ;;  %v733_v40 = vsel %vm215_vm0, %v569_v29, 0.0 }
 0x126   :  { %v742_v2 = vsel %vm215_vm0, %v572_v39, 0.0  ;;  %v5668_v47 = vsub.f32 %v7991_v9, %v453_v56  ;;  %v571_v39 = vmul.f32 %v5659_v12, %v5659_v12 }
 0x127   :  { %743 = vadd.xlane.f32.xlu1 %v742_v2  ;;  %v389_v6 = vpop.xlane.xlu1 %388  ;;  %728 = vadd.xlane.f32.xlu0 %v727_v30 }
 0x128   :  { %v454_v25 = vmul.f32 0.03125, %v389_v6  ;;  %v579_v10 = vpop.xlane.xlu0 %578  ;;  %v739_v29 = vsel %vm215_vm0, %v571_v39, 0.0 }
 0x129   :  { %v757_v50 = vmul.f32 0.03125, %v579_v10  ;;  %v7992_v10 = vld [vmem:[#allocation8_spill] sm:$0xff] }
 0x12a   :  { %v5665_v5 = vsub.f32 %v7990_v20, %v454_v25 }
 0x12b   :  { %v392_v54 = vpop.xlane.xlu1 %391  ;;  %v817_v43 = vadd.f32 1e-05, %v757_v50  ;;  %734 = vadd.xlane.f32.xlu0 %v733_v40  ;;  %v573_v50 = vmul.f32 %v5668_v47, %v5668_v47 }
 0x12c   :  { %v455_v2 = vmul.f32 0.03125, %v392_v54  ;;  %v574_v55 = vmul.f32 %v5665_v5, %v5665_v5  ;;  %v582_v6 = vpop.xlane.xlu0 %581 }
 0x12d   :  { %4287 = vrsqrt.f32 %v817_v43  ;;  %v758_v30 = vmul.f32 0.03125, %v582_v6 }
 0x12e   :  { %v748_v25 = vsel %vm215_vm0, %v574_v55, 0.0  ;;  %v5677_v56 = vsub.f32 %v7992_v10, %v455_v2  ;;  %v745_v55 = vsel %vm215_vm0, %v573_v50, 0.0  ;;  %v5695_v50 = vld [vmem:[%s7859_s2] ss:$0 sm:$0xff] }
 0x12f   :  { %749 = vadd.xlane.f32.xlu1 %v748_v25  ;;  %v395_v20 = vpop.xlane.xlu1 %394  ;;  %v818_v9 = vadd.f32 1e-05, %v758_v30  ;;  %740 = vadd.xlane.f32.xlu0 %v739_v29 }
 0x130   :  { %7993 = vst [vmem:[#allocation9_spill] sm:$0xff] %v5677_v56  ;;  %v456_v54 = vmul.f32 0.03125, %v395_v20  ;;  %v585_v40 = vpop.xlane.xlu0 %584  ;;  %v575_v2 = vmul.f32 %v5677_v56, %v5677_v56 }
 0x131   :  { %4289 = vrsqrt.f32 %v818_v9  ;;  %v759_v6 = vmul.f32 0.03125, %v585_v40  ;;  %v7994_v40 = vld [vmem:[#allocation12_spill] sm:$0xff] }
 0x132   :  { %v5683_v43 = vsub.f32 %v5155_v41, %v456_v54  ;;  %v751_v41 = vsel %vm215_vm0, %v575_v2, 0.0 }
 0x133   :  { %v819_v25 = vadd.f32 1e-05, %v759_v6  ;;  %746 = vadd.xlane.f32.xlu0 %v745_v55 }
 0x134   :  { %v576_v39 = vmul.f32 %v5683_v43, %v5683_v43  ;;  %v588_v10 = vpop.xlane.xlu0 %587 }
 0x135   :  { %4291 = vrsqrt.f32 %v819_v25  ;;  %v760_v30 = vmul.f32 0.03125, %v588_v10  ;;  %v5701_v25 = vld [vmem:[%s7860_s3] ss:$0 sm:$0xff] }
 0x136   :  { %v754_v20 = vsel %vm215_vm0, %v576_v39, 0.0 }
 0x137   :  { %755 = vadd.xlane.f32.xlu1 %v754_v20  ;;  %v4288_v29 = vpop.eup %4287  ;;  %v820_v9 = vadd.f32 1e-05, %v760_v30  ;;  %752 = vadd.xlane.f32.xlu0 %v751_v41 }
 0x138   :  { %v591_v54 = vpop.xlane.xlu0 %590  ;;  %v937_v6 = vmul.f32 %v4288_v29, %v7994_v40 }
 0x139   :  { %4293 = vrsqrt.f32 %v820_v9  ;;  %v761_v55 = vmul.f32 0.03125, %v591_v54 }
 0x13a   :  { %v1004_v2 = vmul.f32 %v5695_v50, %v937_v6 }
 0x13b   :  { %v4290_v39 = vpop.eup %4289  ;;  %v821_v10 = vadd.f32 1e-05, %v761_v55 }
 0x13c   :  { %v594_v30 = vpop.xlane.xlu0 %593  ;;  %v5705_v20 = vadd.f32 %v5701_v25, %v1004_v2  ;;  %v938_v41 = vmul.f32 %v4290_v39, %v5312_v7 }
 0x13d   :  { %4295 = vrsqrt.f32 %v821_v10  ;;  %v762_v56 = vmul.f32 0.03125, %v594_v30 }
 0x13e   :  { %7995 = vst [vmem:[#allocation10_spill] sm:$0xff] %v5705_v20  ;;  %4083 = vmatprep.mubr.msk.f32.mxu0 %vm215_vm0, %v5705_v20  ;;  %v1005_v29 = vmul.f32 %v5695_v50, %v938_v41 }
 0x13f   :  { %v4292_v9 = vpop.eup %4291  ;;  %v822_v54 = vadd.f32 1e-05, %v762_v56  ;;  %v7998_v56 = vld [vmem:[#allocation13_spill] sm:$0xff] }
 0x140   :  { %v597_v40 = vpop.xlane.xlu0 %596  ;;  %v5712_v6 = vadd.f32 %v5701_v25, %v1005_v29  ;;  %v939_v55 = vmul.f32 %v4292_v9, %v5309_v44 }
 0x141   :  { %4297 = vrsqrt.f32 %v822_v54  ;;  %v763_v2 = vmul.f32 0.03125, %v597_v40 }
 0x142   :  { %7996 = vst [vmem:[#allocation11_spill] sm:$0xff] %v5712_v6  ;;  %4084 = vmatmul.mubr.msk.f32.vlgmr.msra.gmra.mrb[0].mxu0 %vm215_vm0, %v5712_v6  ;;  %v1006_v7 = vmul.f32 %v5695_v50, %v939_v55 }
 0x143   :  { %v4294_v39 = vpop.eup %4293  ;;  %v823_v10 = vadd.f32 1e-05, %v763_v2 }
 0x144   :  { %v600_v30 = vpop.xlane.xlu0 %599  ;;  %v5719_v41 = vadd.f32 %v5701_v25, %v1006_v7  ;;  %v940_v20 = vmul.f32 %v4294_v39, %v7998_v56 }
 0x145   :  { %4299 = vrsqrt.f32 %v823_v10  ;;  %v764_v29 = vmul.f32 0.03125, %v600_v30 }
 0x146   :  { %7997 = vst [vmem:[#allocation4_spill] sm:$0xff] %v5719_v41  ;;  %4086 = vmatprep.mubr.msk.f32.mxu0 %vm215_vm0, %v5719_v41  ;;  %v1007_v44 = vmul.f32 %v5695_v50, %v940_v20 }
 0x147   :  { %v4296_v9 = vpop.eup %4295  ;;  %v824_v54 = vadd.f32 1e-05, %v764_v29  ;;  %v8001_v29 = vld [vmem:[#allocation14_spill] sm:$0xff] }
 0x148   :  { %v603_v40 = vpop.xlane.xlu0 %602  ;;  %v5726_v55 = vadd.f32 %v5701_v25, %v1007_v44  ;;  %v941_v2 = vmul.f32 %v4296_v9, %v5326_v32 }
 0x149   :  { %4301 = vrsqrt.f32 %v824_v54  ;;  %v765_v7 = vmul.f32 0.03125, %v603_v40 }
 0x14a   :  { %7999 = vst [vmem:[#allocation7_spill] sm:$0xff] %v5726_v55  ;;  %4087 = vmatmul.mubr.msk.f32.gmra.mrb[2].mxu0 %vm215_vm0, %v5726_v55  ;;  %v1008_v39 = vmul.f32 %v5695_v50, %v941_v2 }
 0x14b   :  { %v4298_v10 = vpop.eup %4297  ;;  %v825_v30 = vadd.f32 1e-05, %v765_v7  ;;  %v8003_v7 = vld [vmem:[#allocation15_spill] sm:$0xff] }
 0x14c   :  { %v606_v56 = vpop.xlane.xlu0 %605  ;;  %v5733_v20 = vadd.f32 %v5701_v25, %v1008_v39  ;;  %v942_v41 = vmul.f32 %v4298_v10, %v8001_v29 }
 0x14d   :  { %4303 = vrsqrt.f32 %v825_v30  ;;  %v766_v44 = vmul.f32 0.03125, %v606_v56 }
 0x14e   :  { %8000 = vst [vmem:[#allocation6_spill] sm:$0xff] %v5733_v20  ;;  %4089 = vmatprep.mubr.msk.f32.mxu0 %vm215_vm0, %v5733_v20  ;;  %v1009_v32 = vmul.f32 %v5695_v50, %v942_v41 }
 0x14f   :  { %v4300_v9 = vpop.eup %4299  ;;  %v826_v54 = vadd.f32 1e-05, %v766_v44  ;;  %v8005_v44 = vld [vmem:[#allocation16_spill] sm:$0xff] }
 0x150   :  { %v609_v40 = vpop.xlane.xlu0 %608  ;;  %v5740_v2 = vadd.f32 %v5701_v25, %v1009_v32  ;;  %v943_v55 = vmul.f32 %v4300_v9, %v8003_v7  ;;  %v642_v6 = vpop.xlane.xlu1 %641 }
 0x151   :  { %4305 = vrsqrt.f32 %v826_v54  ;;  %v767_v39 = vmul.f32 0.03125, %v609_v40 }
 0x152   :  { %8002 = vst [vmem:[#allocation8_spill] sm:$0xff] %v5740_v2  ;;  %4090 = vmatmul.mubr.msk.f32.gmra.mrb[4].mxu0 %vm215_vm0, %v5740_v2  ;;  %v1010_v10 = vmul.f32 %v5695_v50, %v943_v55 }
 0x153   :  { %v4302_v30 = vpop.eup %4301  ;;  %v827_v56 = vadd.f32 1e-05, %v767_v39  ;;  %v8007_v39 = vld [vmem:[#allocation17_spill] sm:$0xff] }
 0x154   :  { %v612_v29 = vpop.xlane.xlu0 %611  ;;  %v5747_v41 = vadd.f32 %v5701_v25, %v1010_v10  ;;  %v944_v20 = vmul.f32 %v4302_v30, %v8005_v44 }
 0x155   :  { %4307 = vrsqrt.f32 %v827_v56  ;;  %v768_v32 = vmul.f32 0.03125, %v612_v29 }
 0x156   :  { %8004 = vst [vmem:[#allocation12_spill] sm:$0xff] %v5747_v41  ;;  %4092 = vmatprep.mubr.msk.f32.mxu0 %vm215_vm0, %v5747_v41  ;;  %v1011_v9 = vmul.f32 %v5695_v50, %v944_v20 }
 0x157   :  { %v4304_v54 = vpop.eup %4303  ;;  %v828_v40 = vadd.f32 1e-05, %v768_v32  ;;  %v8009_v32 = vld [vmem:[#allocation18_spill] sm:$0xff] }
 0x158   :  { %v615_v7 = vpop.xlane.xlu0 %614  ;;  %v5754_v55 = vadd.f32 %v5701_v25, %v1011_v9  ;;  %v945_v2 = vmul.f32 %v4304_v54, %v8007_v39 }
 0x159   :  { %4309 = vrsqrt.f32 %v828_v40  ;;  %v769_v10 = vmul.f32 0.03125, %v615_v7  ;;  %v648_v7 = vpop.xlane.xlu1 %647 }
 0x15a   :  { %8006 = vst [vmem:[#allocation13_spill] sm:$0xff] %v5754_v55  ;;  %4093 = vmatmul.mubr.msk.f32.gmra.mrb[6].mxu0 %vm215_vm0, %v5754_v55  ;;  %v1012_v30 = vmul.f32 %v5695_v50, %v945_v2 }
 0x15b   :  { %v4306_v56 = vpop.eup %4305  ;;  %v829_v29 = vadd.f32 1e-05, %v769_v10 }
 0x15c   :  { %v618_v44 = vpop.xlane.xlu0 %617  ;;  %v5761_v20 = vadd.f32 %v5701_v25, %v1012_v30  ;;  %v946_v41 = vmul.f32 %v4306_v56, %v8009_v32 }
 0x15d   :  { %4311 = vrsqrt.f32 %v829_v29  ;;  %v770_v9 = vmul.f32 0.03125, %v618_v44 }
 0x15e   :  { %8008 = vst [vmem:[#allocation14_spill] sm:$0xff] %v5761_v20  ;;  %4095 = vmatprep.mubr.msk.f32.mxu0 %vm215_vm0, %v5761_v20  ;;  %v1013_v54 = vmul.f32 %v5695_v50, %v946_v41  ;;  %v654_v20 = vpop.xlane.xlu1 %653 }
 0x15f   :  { %v4308_v40 = vpop.eup %4307  ;;  %v830_v39 = vadd.f32 1e-05, %v770_v9 }
 0x160   :  { %v621_v55 = vpop.xlane.xlu0 %620  ;;  %v5768_v2 = vadd.f32 %v5701_v25, %v1013_v54  ;;  %v947_v10 = vmul.f32 %v4308_v40, %v5375_v60 }
 0x161   :  { %4313 = vrsqrt.f32 %v830_v39  ;;  %v771_v30 = vmul.f32 0.03125, %v621_v55 }
 0x162   :  { %8010 = vst [vmem:[#allocation15_spill] sm:$0xff] %v5768_v2  ;;  %4096 = vmatmul.mubr.msk.f32.gmra.mrb[8].mxu0 %vm215_vm0, %v5768_v2  ;;  %v1014_v56 = vmul.f32 %v5695_v50, %v947_v10 }
 0x163   :  { %v4310_v29 = vpop.eup %4309  ;;  %v831_v44 = vadd.f32 1e-05, %v771_v30 }
 0x164   :  { %v624_v32 = vpop.xlane.xlu0 %623  ;;  %v5775_v41 = vadd.f32 %v5701_v25, %v1014_v56  ;;  %v948_v9 = vmul.f32 %v4310_v29, %v5391_v22 }
 0x165   :  { %4315 = vrsqrt.f32 %v831_v44  ;;  %v772_v54 = vmul.f32 0.03125, %v624_v32  ;;  %v660_v44 = vpop.xlane.xlu1 %659 }
 0x166   :  { %8011 = vst [vmem:[#allocation16_spill] sm:$0xff] %v5775_v41  ;;  %4098 = vmatprep.mubr.msk.f32.mxu0 %vm215_vm0, %v5775_v41  ;;  %v1015_v60 = vmul.f32 %v5695_v50, %v948_v9 }
 0x167   :  { %v4312_v55 = vpop.eup %4311  ;;  %v832_v40 = vadd.f32 1e-05, %v772_v54 }
 0x168   :  { %v627_v39 = vpop.xlane.xlu0 %626  ;;  %v5782_v10 = vadd.f32 %v5701_v25, %v1015_v60  ;;  %v949_v30 = vmul.f32 %v4312_v55, %v5398_v53 }
 0x169   :  { %4317 = vrsqrt.f32 %v832_v40  ;;  %v773_v56 = vmul.f32 0.03125, %v627_v39  ;;  %v778_v39 = vmul.f32 0.03125, %v642_v6 }
 0x16a   :  { %8012 = vst [vmem:[#allocation17_spill] sm:$0xff] %v5782_v10  ;;  %4099 = vmatmul.mubr.msk.f32.gmra.mrb[10].mxu0 %vm215_vm0, %v5782_v10  ;;  %v1016_v22 = vmul.f32 %v5695_v50, %v949_v30 }
 0x16b   :  { %v4314_v29 = vpop.eup %4313  ;;  %v833_v32 = vadd.f32 1e-05, %v773_v56 }
 0x16c   :  { %v630_v41 = vpop.xlane.xlu0 %629  ;;  %v5789_v9 = vadd.f32 %v5701_v25, %v1016_v22  ;;  %v950_v54 = vmul.f32 %v4314_v29, %v5415_v8  ;;  %v666_v22 = vpop.xlane.xlu1 %665 }
 0x16d   :  { %4319 = vrsqrt.f32 %v833_v32  ;;  %v774_v60 = vmul.f32 0.03125, %v630_v41  ;;  %v838_v32 = vadd.f32 1e-05, %v778_v39 }
 0x16e   :  { %8013 = vst [vmem:[#allocation18_spill] sm:$0xff] %v5789_v9  ;;  %4101 = vmatprep.mubr.msk.f32.mxu0 %vm215_vm0, %v5789_v9  ;;  %v1017_v53 = vmul.f32 %v5695_v50, %v950_v54  ;;  %v780_v54 = vmul.f32 0.03125, %v648_v7 }
 0x16f   :  { %v4316_v55 = vpop.eup %4315  ;;  %v834_v40 = vadd.f32 1e-05, %v774_v60 }
 0x170   :  { %v633_v30 = vpop.xlane.xlu0 %632  ;;  %v5796_v10 = vadd.f32 %v5701_v25, %v1017_v53  ;;  %v951_v56 = vmul.f32 %v4316_v55, %v5422_v42  ;;  %v782_v55 = vmul.f32 0.03125, %v654_v20 }
 0x171   :  { %4321 = vrsqrt.f32 %v834_v40  ;;  %v775_v2 = vmul.f32 0.03125, %v633_v30 }
 0x172   :  { %4102 = vmatmul.mubr.msk.f32.gmra.mrb[12].mxu0 %vm215_vm0, %v5796_v10  ;;  %v1018_v8 = vmul.f32 %v5695_v50, %v951_v56  ;;  %v672_v56 = vpop.xlane.xlu1 %671 }
 0x173   :  { %v4318_v41 = vpop.eup %4317  ;;  %v835_v29 = vadd.f32 1e-05, %v775_v2  ;;  %v840_v2 = vadd.f32 1e-05, %v780_v54 }
 0x174   :  { %v636_v60 = vpop.xlane.xlu0 %635  ;;  %v5803_v6 = vadd.f32 %v5701_v25, %v1018_v8  ;;  %v952_v53 = vmul.f32 %v4318_v41, %v5440_v38  ;;  %v842_v41 = vadd.f32 1e-05, %v782_v55 }
 0x175   :  { %4323 = vrsqrt.f32 %v835_v29  ;;  %v776_v42 = vmul.f32 0.03125, %v636_v60 }
 0x176   :  { %4104 = vmatprep.mubr.msk.f32.mxu0 %vm215_vm0, %v5803_v6  ;;  %v1019_v40 = vmul.f32 %v5695_v50, %v952_v53  ;;  %4325 = vrsqrt.f32 %v838_v32  ;;  %v784_v53 = vmul.f32 0.03125, %v660_v44 }
 0x177   :  { %v4320_v30 = vpop.eup %4319  ;;  %v836_v9 = vadd.f32 1e-05, %v776_v42 }
 0x178   :  { %v639_v7 = vpop.xlane.xlu0 %638  ;;  %v5810_v39 = vadd.f32 %v5701_v25, %v1019_v40  ;;  %v953_v8 = vmul.f32 %v4320_v30, %v5447_v36  ;;  %v678_v40 = vpop.xlane.xlu1 %677 }
 0x179   :  { %4327 = vrsqrt.f32 %v836_v9  ;;  %v777_v38 = vmul.f32 0.03125, %v639_v7  ;;  %v844_v7 = vadd.f32 1e-05, %v784_v53 }
 0x17a   :  { %4105 = vmatmul.mubr.msk.f32.gmra.mrb[14].mxu0 %vm215_vm0, %v5810_v39  ;;  %v1020_v20 = vmul.f32 %v5695_v50, %v953_v8  ;;  %4329 = vrsqrt.f32 %v840_v2  ;;  %v786_v2 = vmul.f32 0.03125, %v666_v22 }
 0x17b   :  { %v4322_v29 = vpop.eup %4321  ;;  %v837_v60 = vadd.f32 1e-05, %v777_v38 }
 0x17c   :  { %v645_v32 = vpop.xlane.xlu0 %644  ;;  %v5817_v54 = vadd.f32 %v5701_v25, %v1020_v20  ;;  %v954_v42 = vmul.f32 %v4322_v29, %v5465_v15  ;;  %v788_v29 = vmul.f32 0.03125, %v672_v56  ;;  %v846_v22 = vadd.f32 1e-05, %v786_v2 }
 0x17d   :  { %4331 = vrsqrt.f32 %v837_v60  ;;  %v779_v36 = vmul.f32 0.03125, %v645_v32  ;;  %v684_v32 = vpop.xlane.xlu1 %683 }
 0x17e   :  { %8014 = vst [vmem:[#allocation19_spill] sm:$0xff] %v5817_v54  ;;  %4333 = vrsqrt.f32 %v842_v41  ;;  %4107 = vmatprep.mubr.msk.f32.mxu0 %vm215_vm0, %v5817_v54  ;;  %v1021_v9 = vmul.f32 %v5695_v50, %v954_v42 }
 0x17f   :  { %v4324_v55 = vpop.eup %4323  ;;  %v839_v30 = vadd.f32 1e-05, %v779_v36 }
 0x180   :  { %v651_v44 = vpop.xlane.xlu0 %650  ;;  %v5824_v8 = vadd.f32 %v5701_v25, %v1021_v9  ;;  %v955_v38 = vmul.f32 %v4324_v55, %v5472_v24  ;;  %v4326_v20 = vpop.eup %4325 }
 0x181   :  { %4335 = vrsqrt.f32 %v839_v30  ;;  %v781_v15 = vmul.f32 0.03125, %v651_v44  ;;  %v958_v56 = vmul.f32 %v4326_v20, %v5388_v57  ;;  %v848_v30 = vadd.f32 1e-05, %v788_v29 }
 0x182   :  { %4108 = vmatmul.mubr.msk.f32.gmra.mrb[16].mxu0 %vm215_vm0, %v5824_v8  ;;  %v1022_v41 = vmul.f32 %v5695_v50, %v955_v38  ;;  %4337 = vrsqrt.f32 %v844_v7 }
 0x183   :  { %v4328_v60 = vpop.eup %4327  ;;  %v841_v42 = vadd.f32 1e-05, %v781_v15  ;;  %v790_v15 = vmul.f32 0.03125, %v678_v40  ;;  %v1025_v20 = vmul.f32 %v5695_v50, %v958_v56 }
 0x184   :  { %v657_v53 = vpop.xlane.xlu0 %656  ;;  %v5831_v36 = vadd.f32 %v5701_v25, %v1022_v41  ;;  %v956_v24 = vmul.f32 %v4328_v60, %v5490_v35  ;;  %v4330_v55 = vpop.eup %4329 }
 0x185   :  { %4339 = vrsqrt.f32 %v841_v42  ;;  %v783_v9 = vmul.f32 0.03125, %v657_v53  ;;  %v690_v60 = vpop.xlane.xlu1 %689  ;;  %v960_v29 = vmul.f32 %v4330_v55, %v5401_v28  ;;  %v5853_v55 = vadd.f32 %v5701_v25, %v1025_v20 }
 0x186   :  { %4110 = vmatprep.mubr.msk.f32.mxu0 %vm215_vm0, %v5831_v36  ;;  %v1023_v44 = vmul.f32 %v5695_v50, %v956_v24  ;;  %4341 = vrsqrt.f32 %v846_v22  ;;  %v850_v24 = vadd.f32 1e-05, %v790_v15 }
 0x187   :  { %v4332_v38 = vpop.eup %4331  ;;  %v843_v7 = vadd.f32 1e-05, %v783_v9  ;;  %v792_v9 = vmul.f32 0.03125, %v684_v32 }
 0x188   :  { %v4334_v2 = vpop.eup %4333  ;;  %v663_v41 = vpop.xlane.xlu0 %662  ;;  %v5839_v54 = vadd.f32 %v5701_v25, %v1023_v44  ;;  %v957_v35 = vmul.f32 %v4332_v38, %v5497_v58 }
 0x189   :  { %4343 = vrsqrt.f32 %v843_v7  ;;  %v785_v57 = vmul.f32 0.03125, %v663_v41  ;;  %v962_v53 = vmul.f32 %v4334_v2, %v5411_v17  ;;  %v794_v7 = vmul.f32 0.03125, %v690_v60  ;;  %v696_v2 = vpop.xlane.xlu1 %695 }
 0x18a   :  { %4345 = vrsqrt.f32 %v848_v30  ;;  %4111 = vmatmul.mubr.msk.f32.gmra.mrb[18].mxu0 %vm215_vm0, %v5839_v54  ;;  %v1024_v42 = vmul.f32 %v5695_v50, %v957_v35  ;;  %v1027_v30 = vmul.f32 %v5695_v50, %v960_v29  ;;  %v852_v41 = vadd.f32 1e-05, %v792_v9 }
 0x18b   :  { %v4336_v40 = vpop.eup %4335  ;;  %v845_v22 = vadd.f32 1e-05, %v785_v57 }
 0x18c   :  { %v669_v58 = vpop.xlane.xlu0 %668  ;;  %v5849_v44 = vadd.f32 %v5701_v25, %v1024_v42  ;;  %v959_v56 = vmul.f32 %v4336_v40, %v5510_v18  ;;  %v4338_v38 = vpop.eup %4337  ;;  %v1029_v18 = vmul.f32 %v5695_v50, %v962_v53  ;;  %v5867_v29 = vadd.f32 %v5701_v25, %v1027_v30 }
 0x18d   :  { %4347 = vrsqrt.f32 %v845_v22  ;;  %v787_v28 = vmul.f32 0.03125, %v669_v58  ;;  %v964_v42 = vmul.f32 %v4338_v38, %v5425_v13  ;;  %v854_v22 = vadd.f32 1e-05, %v794_v7  ;;  %v702_v9 = vpop.xlane.xlu1 %701 }
 0x18e   :  { %4113 = vmatprep.mubr.msk.f32.mxu0 %vm215_vm0, %v5849_v44  ;;  %v1026_v17 = vmul.f32 %v5695_v50, %v959_v56  ;;  %4349 = vrsqrt.f32 %v850_v24  ;;  %v796_v58 = vmul.f32 0.03125, %v696_v2  ;;  %v5879_v13 = vadd.f32 %v5701_v25, %v1029_v18 }
 0x18f   :  { %v4340_v32 = vpop.eup %4339  ;;  %v847_v15 = vadd.f32 1e-05, %v787_v28  ;;  %4114 = vmatmul.mubr.msk.f32.gmra.mrb[20].mxu0 %vm215_vm0, %v5853_v55  ;;  %v798_v18 = vmul.f32 0.03125, %v702_v9 }
 0x190   :  { %v675_v35 = vpop.xlane.xlu0 %674  ;;  %v5863_v57 = vadd.f32 %v5701_v25, %v1026_v17  ;;  %v961_v60 = vmul.f32 %v4340_v32, %v5518_v62  ;;  %v4342_v40 = vpop.eup %4341  ;;  %v1031_v17 = vmul.f32 %v5695_v50, %v964_v42  ;;  %v856_v2 = vadd.f32 1e-05, %v796_v58 }
 0x191   :  { %4351 = vrsqrt.f32 %v847_v15  ;;  %v789_v20 = vmul.f32 0.03125, %v675_v35  ;;  %v966_v32 = vmul.f32 %v4342_v40, %v5436_v26  ;;  %v708_v35 = vpop.xlane.xlu1 %707 }
 0x192   :  { %4116 = vmatprep.mubr.msk.f32.mxu0 %vm215_vm0, %v5863_v57  ;;  %v1028_v53 = vmul.f32 %v5695_v50, %v961_v60  ;;  %4353 = vrsqrt.f32 %v852_v41 }
 0x193   :  { %v4344_v24 = vpop.eup %4343  ;;  %v849_v56 = vadd.f32 1e-05, %v789_v20  ;;  %4117 = vmatmul.mubr.msk.f32.gmra.mrb[22].mxu0 %vm215_vm0, %v5867_v29  ;;  %v1033_v58 = vmul.f32 %v5695_v50, %v966_v32 }
 0x194   :  { %v4346_v62 = vpop.eup %4345  ;;  %v681_v28 = vpop.xlane.xlu0 %680  ;;  %v5876_v30 = vadd.f32 %v5701_v25, %v1028_v53  ;;  %v963_v38 = vmul.f32 %v4344_v24, %v5531_v3  ;;  %v800_v24 = vmul.f32 0.03125, %v708_v35 }
 0x195   :  { %4355 = vrsqrt.f32 %v849_v56  ;;  %v791_v7 = vmul.f32 0.03125, %v681_v28  ;;  %v968_v3 = vmul.f32 %v4346_v62, %v5450_v1  ;;  %v714_v56 = vpop.xlane.xlu1 %713  ;;  %v858_v28 = vadd.f32 1e-05, %v798_v18 }
 0x196   :  { %4357 = vrsqrt.f32 %v854_v22  ;;  %4119 = vmatprep.mubr.msk.f32.mxu0 %vm215_vm0, %v5876_v30  ;;  %v1030_v15 = vmul.f32 %v5695_v50, %v963_v38  ;;  %v5895_v22 = vadd.f32 %v5701_v25, %v1031_v17  ;;  %v860_v35 = vadd.f32 1e-05, %v800_v24 }
 0x197   :  { %v4348_v41 = vpop.eup %4347  ;;  %v851_v60 = vadd.f32 1e-05, %v791_v7  ;;  %4120 = vmatmul.mubr.msk.f32.gmra.mrb[24].mxu0 %vm215_vm0, %v5879_v13 }
 0x198   :  { %v687_v20 = vpop.xlane.xlu0 %686  ;;  %v5891_v42 = vadd.f32 %v5701_v25, %v1030_v15  ;;  %v965_v26 = vmul.f32 %v4348_v41, %v5538_v33  ;;  %v4350_v53 = vpop.eup %4349  ;;  %v1035_v33 = vmul.f32 %v5695_v50, %v968_v3 }
 0x199   :  { %4359 = vrsqrt.f32 %v851_v60  ;;  %v793_v40 = vmul.f32 0.03125, %v687_v20  ;;  %v970_v15 = vmul.f32 %v4350_v53, %v5461_v27  ;;  %v720_v18 = vpop.xlane.xlu1 %719 }
 0x19a   :  { %4361 = vrsqrt.f32 %v856_v2  ;;  %4122 = vmatprep.mubr.msk.f32.mxu0 %vm215_vm0, %v5891_v42  ;;  %v1032_v1 = vmul.f32 %v5695_v50, %v965_v26  ;;  %v5909_v2 = vadd.f32 %v5701_v25, %v1033_v58 }
 0x19b   :  { %v4352_v9 = vpop.eup %4351  ;;  %v853_v62 = vadd.f32 1e-05, %v793_v40  ;;  %4123 = vmatmul.mubr.msk.f32.gmra.mrb[26].mxu0 %vm215_vm0, %v5895_v22  ;;  %v802_v40 = vmul.f32 0.03125, %v714_v56 }
 0x19c   :  { %v693_v38 = vpop.xlane.xlu0 %692  ;;  %v5905_v7 = vadd.f32 %v5701_v25, %v1032_v1  ;;  %v967_v17 = vmul.f32 %v4352_v9, %v5549_v61  ;;  %8016 = vst [vmem:[#allocation21_spill] sm:$0xff] %v5909_v2  ;;  %v4354_v41 = vpop.eup %4353  ;;  %v5918_v61 = vadd.f32 %v5701_v25, %v1035_v33  ;;  %v1037_v1 = vmul.f32 %v5695_v50, %v970_v15 }
 0x19d   :  { %4363 = vrsqrt.f32 %v853_v62  ;;  %v795_v32 = vmul.f32 0.03125, %v693_v38  ;;  %v972_v9 = vmul.f32 %v4354_v41, %v5475_v48  ;;  %v726_v56 = vpop.xlane.xlu1 %725  ;;  %v8019_v38 = vld [vmem:[#allocation3_spill] sm:$0xff] }
 0x19e   :  { %8015 = vst [vmem:[#allocation20_spill] sm:$0xff] %v5905_v7  ;;  %4125 = vmatprep.mubr.msk.f32.mxu0 %vm215_vm0, %v5905_v7  ;;  %v1034_v60 = vmul.f32 %v5695_v50, %v967_v17  ;;  %8017 = vst [vmem:[#allocation22_spill] sm:$0xff] %v5918_v61  ;;  %4365 = vrsqrt.f32 %v858_v28 }
 0x19f   :  { %v4356_v3 = vpop.eup %4355  ;;  %v855_v20 = vadd.f32 1e-05, %v795_v32  ;;  %4126 = vmatmul.mubr.msk.f32.gmra.mrb[28].mxu0 %vm215_vm0, %v5909_v2  ;;  %v862_v32 = vadd.f32 1e-05, %v802_v40 }
 0x1a0   :  { %v4358_v26 = vpop.eup %4357  ;;  %v699_v27 = vpop.xlane.xlu0 %698  ;;  %v5921_v58 = vadd.f32 %v5701_v25, %v1034_v60  ;;  %v969_v53 = vmul.f32 %v4356_v3, %v5556_v46  ;;  %v804_v60 = vmul.f32 0.03125, %v720_v18  ;;  %v5937_v3 = vadd.f32 %v5701_v25, %v1037_v1 }
 0x1a1   :  { %4367 = vrsqrt.f32 %v855_v20  ;;  %v797_v24 = vmul.f32 0.03125, %v699_v27  ;;  %v974_v46 = vmul.f32 %v4358_v26, %v8019_v38  ;;  %v1039_v20 = vmul.f32 %v5695_v50, %v972_v9  ;;  %v2228_v38 = vld [vmem:[%s7861_s6 + $0x8] sm:$0xff] }
 0x1a2   :  { %8018 = vst [vmem:[#allocation23_spill] sm:$0xff] %v5921_v58  ;;  %4369 = vrsqrt.f32 %v860_v35  ;;  %4128 = vmatprep.mubr.msk.f32.mxu0 %vm215_vm0, %v5921_v58  ;;  %v1036_v62 = vmul.f32 %v5695_v50, %v969_v53  ;;  %8021 = vst [vmem:[#allocation24_spill] sm:$0xff] %v5937_v3  ;;  %v806_v27 = vmul.f32 0.03125, %v726_v56  ;;  %v8022_v53 = vld [vmem:[#allocation2_spill] sm:$0xff]  ;;  %v864_v1 = vadd.f32 1e-05, %v804_v60 }
 0x1a3   :  { %v4360_v33 = vpop.eup %4359  ;;  %v857_v28 = vadd.f32 1e-05, %v797_v24  ;;  %4129 = vmatmul.mubr.msk.f32.gmra.mrb[30].mxu0 %vm215_vm0, %v5918_v61 }
 0x1a4   :  { %v4362_v17 = vpop.eup %4361  ;;  %v705_v15 = vpop.xlane.xlu0 %704  ;;  %v5933_v48 = vadd.f32 %v5701_v25, %v1036_v62  ;;  %v971_v41 = vmul.f32 %v4360_v33, %v5567_v14  ;;  %v1041_v14 = vmul.f32 %v5695_v50, %v974_v46 }
 0x1a5   :  { %4371 = vrsqrt.f32 %v857_v28  ;;  %v799_v35 = vmul.f32 0.03125, %v705_v15  ;;  %v976_v24 = vmul.f32 %v4362_v17, %v8022_v53  ;;  %v732_v62 = vpop.xlane.xlu1 %731  ;;  %v2227_v28 = vld [vmem:[%s7861_s6] sm:$0xff]  ;;  %v5958_v17 = vadd.f32 %v5701_v25, %v1039_v20 }
 0x1a6   :  { %8020 = vst [vmem:[#allocation3_spill] sm:$0xff] %v5933_v48  ;;  %4131 = vmatprep.mubr.msk.f32.mxu0 %vm215_vm0, %v5933_v48  ;;  %v1038_v26 = vmul.f32 %v5695_v50, %v971_v41  ;;  %4373 = vrsqrt.f32 %v862_v32  ;;  %v4279_v32 = vpack.c.bf16 %v2228_v38, %v2227_v28  ;;  %v866_v15 = vadd.f32 1e-05, %v806_v27  ;;  %v8027_v28 = vld [vmem:[#allocation5_spill] sm:$0xff] }
 0x1a7   :  { %v4364_v18 = vpop.eup %4363  ;;  %v859_v40 = vadd.f32 1e-05, %v799_v35  ;;  %4132 = vmatmul.mubr.msk.f32.gmra.mrb[32].mxu0 %vm215_vm0, %v5937_v3  ;;  %8024 = vst [vmem:[#allocation25_spill] sm:$0xff] %v5958_v17  ;;  %v808_v35 = vmul.f32 0.03125, %v732_v62  ;;  %v2229_v62 = vld [vmem:[%s7861_s6 + $0x10] sm:$0xff] }
 0x1a8   :  { %v711_v33 = vpop.xlane.xlu0 %710  ;;  %v5948_v9 = vadd.f32 %v5701_v25, %v1038_v26  ;;  %v973_v56 = vmul.f32 %v4364_v18, %v5574_v52  ;;  %v4366_v60 = vpop.eup %4365  ;;  %v5966_v18 = vadd.f32 %v5701_v25, %v1041_v14  ;;  %4280 = vmatprep.subr.bf16.mxu1 %v4279_v32  ;;  %v2230_v14 = vld [vmem:[%s7861_s6 + $0x18] sm:$0xff] }
 0x1a9   :  { %4375 = vrsqrt.f32 %v859_v40  ;;  %v801_v46 = vmul.f32 0.03125, %v711_v33  ;;  %v1043_v33 = vmul.f32 %v5695_v50, %v976_v24  ;;  %4282 = vmatpush3.bf16.msra.mxu1 %v4279_v32  ;;  %v978_v38 = vmul.f32 %v4366_v60, %v8027_v28 }
 0x1aa   :  { %8023 = vst [vmem:[#allocation2_spill] sm:$0xff] %v5948_v9  ;;  %4134 = vmatprep.mubr.msk.f32.mxu0 %vm215_vm0, %v5948_v9  ;;  %v1040_v52 = vmul.f32 %v5695_v50, %v973_v56  ;;  %8025 = vst [vmem:[#allocation26_spill] sm:$0xff] %v5966_v18  ;;  %4377 = vrsqrt.f32 %v864_v1  ;;  %v868_v32 = vadd.f32 1e-05, %v808_v35 }
 0x1ab   :  { %v4368_v41 = vpop.eup %4367  ;;  %v861_v26 = vadd.f32 1e-05, %v801_v46  ;;  %4135 = vmatmul.mubr.msk.f32.gmra.mrb[34].mxu0 %vm215_vm0, %v5958_v17  ;;  %v4283_v46 = vpack.c.bf16 %v2230_v14, %v2229_v62  ;;  %v1045_v35 = vmul.f32 %v5695_v50, %v978_v38 }
 0x1ac   :  { %v4370_v20 = vpop.eup %4369  ;;  %v717_v40 = vpop.xlane.xlu0 %716  ;;  %v5969_v27 = vadd.f32 %v5701_v25, %v1040_v52  ;;  %v975_v53 = vmul.f32 %v4368_v41, %v5585_v16 }
 0x1ad   :  { %4379 = vrsqrt.f32 %v861_v26  ;;  %v738_v56 = vpop.xlane.xlu1 %737  ;;  %v803_v1 = vmul.f32 0.03125, %v717_v40  ;;  %v980_v41 = vmul.f32 %v4370_v20, %v5543_v51  ;;  %4284 = vmatprep.subr.bf16.mxu1 %v4283_v46 }
 0x1ae   :  { %8026 = vst [vmem:[#allocation27_spill] sm:$0xff] %v5969_v27  ;;  %4381 = vrsqrt.f32 %v866_v15  ;;  %4137 = vmatprep.mubr.msk.f32.mxu0 %vm215_vm0, %v5969_v27  ;;  %v1042_v16 = vmul.f32 %v5695_v50, %v975_v53  ;;  %v810_v26 = vmul.f32 0.03125, %v738_v56  ;;  %4286 = vmatpush3.bf16.msra.mxu1 %v4283_v46  ;;  %v5991_v53 = vadd.f32 %v5701_v25, %v1043_v33 }
 0x1af   :  { %v4372_v24 = vpop.eup %4371  ;;  %v863_v52 = vadd.f32 1e-05, %v803_v1  ;;  %4138 = vmatmul.mubr.msk.f32.gmra.mrb[36].mxu0 %vm215_vm0, %v5966_v18  ;;  %v1047_v1 = vmul.f32 %v5695_v50, %v980_v41 }
 0x1b0   :  { %v723_v40 = vpop.xlane.xlu0 %722  ;;  %v5987_v60 = vadd.f32 %v5701_v25, %v1042_v16  ;;  %v977_v15 = vmul.f32 %v4372_v24, %v5598_v45  ;;  %8029 = vst [vmem:[#allocation28_spill] sm:$0xff] %v5991_v53  ;;  %v4374_v14 = vpop.eup %4373  ;;  %v870_v28 = vadd.f32 1e-05, %v810_v26 }
 0x1b1   :  { %4383 = vrsqrt.f32 %v863_v52  ;;  %v805_v62 = vmul.f32 0.03125, %v723_v40  ;;  %v6005_v52 = vadd.f32 %v5701_v25, %v1045_v35 }
 0x1b2   :  { %8028 = vst [vmem:[#allocation5_spill] sm:$0xff] %v5987_v60  ;;  %4140 = vmatprep.mubr.msk.f32.mxu0 %vm215_vm0, %v5987_v60  ;;  %v1044_v51 = vmul.f32 %v5695_v50, %v977_v15  ;;  %4385 = vrsqrt.f32 %v868_v32  ;;  %v982_v32 = vmul.f32 %v4374_v14, %v5561_v4 }
 0x1b3   :  { %v4376_v20 = vpop.eup %4375  ;;  %v865_v56 = vadd.f32 1e-05, %v805_v62  ;;  %4141 = vmatmul.mubr.msk.f32.gmra.mrb[38].mxu0 %vm215_vm0, %v5991_v53  ;;  %8031 = vst [vmem:[#allocation30_spill] sm:$0xff] %v6005_v52 }
 0x1b4   :  { %v744_v45 = vpop.xlane.xlu1 %743  ;;  %v729_v46 = vpop.xlane.xlu0 %728  ;;  %v6001_v38 = vadd.f32 %v5701_v25, %v1044_v51  ;;  %v979_v16 = vmul.f32 %v4376_v20, %v5606_v21  ;;  %v6014_v21 = vadd.f32 %v5701_v25, %v1047_v1 }
 0x1b5   :  { %v812_v33 = vmul.f32 0.03125, %v744_v45  ;;  %4387 = vrsqrt.f32 %v865_v56  ;;  %v807_v24 = vmul.f32 0.03125, %v729_v46  ;;  %v4378_v40 = vpop.eup %4377  ;;  %v1049_v56 = vmul.f32 %v5695_v50, %v982_v32 }
 0x1b6   :  { %8030 = vst [vmem:[#allocation29_spill] sm:$0xff] %v6001_v38  ;;  %4143 = vmatprep.mubr.msk.f32.mxu0 %vm215_vm0, %v6001_v38  ;;  %v1046_v41 = vmul.f32 %v5695_v50, %v979_v16  ;;  %8032 = vst [vmem:[#allocation31_spill] sm:$0xff] %v6014_v21  ;;  %4389 = vrsqrt.f32 %v870_v28  ;;  %v984_v45 = vmul.f32 %v4378_v40, %v5579_v11 }
 0x1b7   :  { %v4380_v26 = vpop.eup %4379  ;;  %v867_v15 = vadd.f32 1e-05, %v807_v24  ;;  %4144 = vmatmul.mubr.msk.f32.gmra.mrb[40].mxu0 %vm215_vm0, %v6005_v52  ;;  %v872_v35 = vadd.f32 1e-05, %v812_v33 }
 0x1b8   :  { %v4382_v62 = vpop.eup %4381  ;;  %v735_v51 = vpop.xlane.xlu0 %734  ;;  %v6017_v4 = vadd.f32 %v5701_v25, %v1046_v41  ;;  %v981_v14 = vmul.f32 %v4380_v26, %v5614_v0  ;;  %v6033_v26 = vadd.f32 %v5701_v25, %v1049_v56 }
 0x1b9   :  { %4391 = vrsqrt.f32 %v867_v15  ;;  %v809_v20 = vmul.f32 0.03125, %v735_v51  ;;  %v986_v16 = vmul.f32 %v4382_v62, %v5595_v23  ;;  %v1051_v15 = vmul.f32 %v5695_v50, %v984_v45 }
 0x1ba   :  { %8033 = vst [vmem:[#allocation32_spill] sm:$0xff] %v6017_v4  ;;  %4146 = vmatprep.mubr.msk.f32.mxu0 %vm215_vm0, %v6017_v4  ;;  %v1048_v1 = vmul.f32 %v5695_v50, %v981_v14  ;;  %4393 = vrsqrt.f32 %v872_v35  ;;  %8035 = vst [vmem:[#allocation34_spill] sm:$0xff] %v6033_v26 }
 0x1bb   :  { %v4384_v46 = vpop.eup %4383  ;;  %v869_v28 = vadd.f32 1e-05, %v809_v20  ;;  %4147 = vmatmul.mubr.msk.f32.gmra.mrb[42].mxu0 %vm215_vm0, %v6014_v21  ;;  %v1053_v56 = vmul.f32 %v5695_v50, %v986_v16 }
 0x1bc   :  { %v750_v33 = vpop.xlane.xlu1 %749  ;;  %v741_v24 = vpop.xlane.xlu0 %740  ;;  %v6029_v32 = vadd.f32 %v5701_v25, %v1048_v1  ;;  %v983_v11 = vmul.f32 %v4384_v46, %v5623_v31  ;;  %v6047_v1 = vadd.f32 %v5701_v25, %v1051_v15 }
 0x1bd   :  { %v814_v0 = vmul.f32 0.03125, %v750_v33  ;;  %v4386_v40 = vpop.eup %4385  ;;  %4395 = vrsqrt.f32 %v869_v28  ;;  %v811_v41 = vmul.f32 0.03125, %v741_v24  ;;  %v6059_v15 = vadd.f32 %v5701_v25, %v1053_v56 }
 0x1be   :  { %8034 = vst [vmem:[#allocation33_spill] sm:$0xff] %v6029_v32  ;;  %4149 = vmatprep.mubr.msk.f32.mxu0 %vm215_vm0, %v6029_v32  ;;  %v1050_v23 = vmul.f32 %v5695_v50, %v983_v11  ;;  %8037 = vst [vmem:[#allocation36_spill] sm:$0xff] %v6047_v1  ;;  %v988_v46 = vmul.f32 %v4386_v40, %v5611_v49 }
 0x1bf   :  { %v874_v51 = vadd.f32 1e-05, %v814_v0  ;;  %v4388_v62 = vpop.eup %4387  ;;  %v871_v35 = vadd.f32 1e-05, %v811_v41  ;;  %4150 = vmatmul.mubr.msk.f32.gmra.mrb[44].mxu0 %vm215_vm0, %v6033_v26  ;;  %8039 = vst [vmem:[#allocation38_spill] sm:$0xff] %v6059_v15 }
 0x1c0   :  { %v747_v31 = vpop.xlane.xlu0 %746  ;;  %v6042_v14 = vadd.f32 %v5701_v25, %v1050_v23  ;;  %v985_v20 = vmul.f32 %v4388_v62, %v5632_v37  ;;  %v4390_v28 = vpop.eup %4389 }
 0x1c1   :  { %4397 = vrsqrt.f32 %v874_v51  ;;  %v813_v45 = vmul.f32 0.03125, %v747_v31  ;;  %v1055_v51 = vmul.f32 %v5695_v50, %v988_v46  ;;  %v990_v23 = vmul.f32 %v4390_v28, %v5629_v63 }
 0x1c2   :  { %8036 = vst [vmem:[#allocation35_spill] sm:$0xff] %v6042_v14  ;;  %4399 = vrsqrt.f32 %v871_v35  ;;  %4152 = vmatprep.mubr.msk.f32.mxu0 %vm215_vm0, %v6042_v14  ;;  %v1052_v33 = vmul.f32 %v5695_v50, %v985_v20 }
 0x1c3   :  { %v4392_v0 = vpop.eup %4391  ;;  %v873_v24 = vadd.f32 1e-05, %v813_v45  ;;  %4153 = vmatmul.mubr.msk.f32.gmra.mrb[46].mxu0 %vm215_vm0, %v6047_v1  ;;  %v6074_v63 = vadd.f32 %v5701_v25, %v1055_v51  ;;  %v1057_v46 = vmul.f32 %v5695_v50, %v990_v23 }
 0x1c4   :  { %v756_v37 = vpop.xlane.xlu1 %755  ;;  %v753_v11 = vpop.xlane.xlu0 %752  ;;  %v6056_v41 = vadd.f32 %v5701_v25, %v1052_v33  ;;  %v987_v49 = vmul.f32 %v4392_v0, %v5641_v19 }
 0x1c5   :  { %v816_v16 = vmul.f32 0.03125, %v756_v37  ;;  %4401 = vrsqrt.f32 %v873_v24  ;;  %v815_v40 = vmul.f32 0.03125, %v753_v11  ;;  %v4394_v62 = vpop.eup %4393  ;;  %8041 = vst [vmem:[#allocation40_spill] sm:$0xff] %v6074_v63 }
 0x1c6   :  { %8038 = vst [vmem:[#allocation37_spill] sm:$0xff] %v6056_v41  ;;  %4155 = vmatprep.mubr.msk.f32.mxu0 %vm215_vm0, %v6056_v41  ;;  %v1054_v31 = vmul.f32 %v5695_v50, %v987_v49  ;;  %v992_v28 = vmul.f32 %v4394_v62, %v5647_v59  ;;  %v4647_v49 = vld [vmem:[%s7859_s2] ss:$0 sm:$0xff] }
 0x1c7   :  { %v876_v35 = vadd.f32 1e-05, %v816_v16  ;;  %v4396_v20 = vpop.eup %4395  ;;  %v875_v45 = vadd.f32 1e-05, %v815_v40  ;;  %4156 = vmatmul.mubr.msk.f32.gmra.mrb[48].mxu0 %vm215_vm0, %v6059_v15  ;;  %v6088_v16 = vadd.f32 %v5701_v25, %v1057_v46 }
 0x1c8   :  { %v6070_v19 = vadd.f32 %v5701_v25, %v1054_v31  ;;  %v989_v56 = vmul.f32 %v4396_v20, %v5650_v34  ;;  %v1059_v59 = vmul.f32 %v5695_v50, %v992_v28 }
 0x1c9   :  { %4403 = vrsqrt.f32 %v876_v35  ;;  %8043 = vst [vmem:[#allocation42_spill] sm:$0xff] %v6088_v16 }
 0x1ca   :  { %8040 = vst [vmem:[#allocation39_spill] sm:$0xff] %v6070_v19  ;;  %4405 = vrsqrt.f32 %v875_v45  ;;  %4158 = vmatprep.mubr.msk.f32.mxu0 %vm215_vm0, %v6070_v19  ;;  %v1056_v0 = vmul.f32 %v5695_v50, %v989_v56 }
 0x1cb   :  { %v4398_v33 = vpop.eup %4397  ;;  %4159 = vmatmul.mubr.msk.f32.gmra.mrb[50].mxu0 %vm215_vm0, %v6074_v63 }
 0x1cc   :  { %v4400_v24 = vpop.eup %4399  ;;  %v6084_v34 = vadd.f32 %v5701_v25, %v1056_v0  ;;  %v994_v11 = vmul.f32 %v4398_v33, %v5665_v5  ;;  %v4648_v5 = vld [vmem:[%s7860_s3] ss:$0 sm:$0xff] }
 0x1cd   :  { %v991_v37 = vmul.f32 %v4400_v24, %v5659_v12  ;;  %v6106_v50 = vadd.f32 %v4648_v5, %v1059_v59 }
 0x1ce   :  { %8042 = vst [vmem:[#allocation41_spill] sm:$0xff] %v6084_v34  ;;  %4161 = vmatprep.mubr.msk.f32.mxu0 %vm215_vm0, %v6084_v34  ;;  %v1061_v62 = vmul.f32 %v4647_v49, %v994_v11 }
 0x1cf   :  { %v1058_v40 = vmul.f32 %v4647_v49, %v991_v37  ;;  %v4402_v51 = vpop.eup %4401  ;;  %4162 = vmatmul.mubr.msk.f32.gmra.mrb[52].mxu0 %vm215_vm0, %v6088_v16  ;;  %8045 = vst [vmem:[#allocation44_spill] sm:$0xff] %v6106_v50 }
 0x1d0   :  { %v993_v23 = vmul.f32 %v4402_v51, %v5668_v47  ;;  %v8047_v47 = vld [vmem:[#allocation9_spill] sm:$0xff]  ;;  %v6116_v46 = vadd.f32 %v4648_v5, %v1061_v62 }
 0x1d1   :  { %v6100_v12 = vadd.f32 %v5701_v25, %v1058_v40 }
 0x1d2   :  { %v1060_v31 = vmul.f32 %v4647_v49, %v993_v23  ;;  %8048 = vst [vmem:[#allocation9_spill] sm:$0xff] %v6116_v46 }
 0x1d3   :  { %8044 = vst [vmem:[#allocation43_spill] sm:$0xff] %v6100_v12  ;;  %v4404_v35 = vpop.eup %4403  ;;  %4164 = vmatprep.mubr.msk.f32.mxu0 %vm215_vm0, %v6100_v12 }
 0x1d4   :  { %v4406_v20 = vpop.eup %4405  ;;  %4165 = vmatmul.mubr.msk.f32.gmra.mrb[54].mxu0 %vm215_vm0, %v6106_v50  ;;  %v996_v25 = vmul.f32 %v4404_v35, %v5683_v43  ;;  %v6113_v45 = vadd.f32 %v4648_v5, %v1060_v31  ;;  %v6133_v43 = vld [vmem:[%s7862_s5] ss:$0 sm:$0xff] }
 0x1d5   :  { %v995_v56 = vmul.f32 %v4406_v20, %v8047_v47 }
 0x1d6   :  { %8046 = vst [vmem:[#allocation45_spill] sm:$0xff] %v6113_v45  ;;  %v1063_v28 = vmul.f32 %v4647_v49, %v996_v25  ;;  %4167 = vmatprep.mubr.msk.f32.mxu0 %vm215_vm0, %v6113_v45 }
 0x1d7   :  { %v1062_v33 = vmul.f32 %v4647_v49, %v995_v56 }
 0x1d8   :  { %4168 = vmatmul.mubr.msk.f32.gmra.mrb[56].mxu0 %vm215_vm0, %v6116_v46  ;;  %v6122_v0 = vadd.f32 %v4648_v5, %v1063_v28 }
 0x1d9   :  { %v6124_v24 = vadd.f32 %v4648_v5, %v1062_v33 }
 0x1da   :  { %8049 = vst [vmem:[#allocation46_spill] sm:$0xff] %v6122_v0 }
 0x1db   :  { %8050 = vst [vmem:[#allocation47_spill] sm:$0xff] %v6124_v24  ;;  %4170 = vmatprep.mubr.msk.f32.mxu0 %vm215_vm0, %v6124_v24 }
 0x1dc   :  { %4171 = vmatmul.mubr.msk.f32.gmra.mrb[58].mxu0 %vm215_vm0, %v6122_v0 }
 0x215   :  { %v4085_v37 = vpop.f32.mrb[0].mxu0 }
 0x216   :  { %v1394_v59 = vadd.f32 %v4085_v37, %v6133_v43  ;;  %v1388_v11 = vpop.f32.mrb[1].mxu0 }
 0x217   :  { %v1389_v49 = vadd.f32 %v6133_v43, %v1388_v11 }
 0x218   :  { %v1748_v40 = vmul.f32 0.044715, %v1394_v59 }
 0x219   :  { %v1747_v51 = vmul.f32 0.044715, %v1389_v49  ;;  %v1687_v12 = vmul.f32 0.5, %v1389_v49 }
 0x21a   :  { %v1808_v23 = vmul.f32 %v1748_v40, %v1394_v59 }
 0x21b   :  { %v1807_v5 = vmul.f32 %v1747_v51, %v1389_v49 }
 0x21c   :  { %v1868_v62 = vmul.f32 %v1808_v23, %v1394_v59 }
 0x21d   :  { %v4088_v35 = vpop.f32.mrb[2].mxu0  ;;  %v1867_v31 = vmul.f32 %v1807_v5, %v1389_v49 }
 0x21e   :  { %v1928_v20 = vadd.f32 %v1868_v62, %v1394_v59  ;;  %v6138_v25 = vadd.f32 %v4088_v35, %v6133_v43  ;;  %v1398_v47 = vpop.f32.mrb[3].mxu0 }
 0x21f   :  { %v1399_v56 = vadd.f32 %v6133_v43, %v1398_v47  ;;  %v1927_v28 = vadd.f32 %v1867_v31, %v1389_v49 }
 0x220   :  { %v1750_v33 = vmul.f32 0.044715, %v6138_v25  ;;  %v1988_v37 = vmul.f32 0.7978846, %v1928_v20 }
 0x221   :  { %v1749_v24 = vmul.f32 0.044715, %v1399_v56  ;;  %v1987_v11 = vmul.f32 0.7978846, %v1927_v28 }
 0x222   :  { %v1810_v0 = vmul.f32 %v1750_v33, %v6138_v25  ;;  %4407 = vtanh.f32 %v1988_v37 }
 0x223   :  { %v1809_v40 = vmul.f32 %v1749_v24, %v1399_v56  ;;  %4409 = vtanh.f32 %v1987_v11 }
 0x224   :  { %v1870_v51 = vmul.f32 %v1810_v0, %v6138_v25 }
 0x225   :  { %v1869_v23 = vmul.f32 %v1809_v40, %v1399_v56  ;;  %v4091_v5 = vpop.f32.mrb[4].mxu0 }
 0x226   :  { %v1930_v62 = vadd.f32 %v1870_v51, %v6138_v25  ;;  %v6146_v35 = vadd.f32 %v4091_v5, %v6133_v43  ;;  %v1408_v31 = vpop.f32.mrb[5].mxu0 }
 0x227   :  { %v1929_v47 = vadd.f32 %v1869_v23, %v1399_v56  ;;  %v6149_v20 = vadd.f32 %v6133_v43, %v1408_v31 }
 0x228   :  { %v1752_v28 = vmul.f32 0.044715, %v6146_v35  ;;  %v1990_v33 = vmul.f32 0.7978846, %v1930_v62 }
 0x229   :  { %v1751_v24 = vmul.f32 0.044715, %v6149_v20  ;;  %v1989_v37 = vmul.f32 0.7978846, %v1929_v47 }
 0x22a   :  { %v1812_v0 = vmul.f32 %v1752_v28, %v6146_v35  ;;  %4411 = vtanh.f32 %v1990_v33 }
 0x22b   :  { %v1811_v11 = vmul.f32 %v1751_v24, %v6149_v20  ;;  %4413 = vtanh.f32 %v1989_v37  ;;  %v1688_v37 = vmul.f32 0.5, %v1394_v59 }
 0x22c   :  { %v4408_v40 = vpop.eup %4407  ;;  %v1872_v51 = vmul.f32 %v1812_v0, %v6146_v35 }
 0x22d   :  { %v4410_v5 = vpop.eup %4409  ;;  %v1871_v23 = vmul.f32 %v1811_v11, %v6149_v20  ;;  %v4094_v31 = vpop.f32.mrb[6].mxu0  ;;  %v2108_v45 = vadd.f32 1.0, %v4408_v40 }
 0x22e   :  { %v1932_v46 = vadd.f32 %v1872_v51, %v6146_v35  ;;  %v6159_v62 = vadd.f32 %v4094_v31, %v6133_v43  ;;  %v1418_v47 = vpop.f32.mrb[7].mxu0  ;;  %v2107_v28 = vadd.f32 1.0, %v4410_v5 }
 0x22f   :  { %v1931_v33 = vadd.f32 %v1871_v23, %v6149_v20  ;;  %v6163_v24 = vadd.f32 %v6133_v43, %v1418_v47  ;;  %v2168_v34 = vmul.f32 %v2108_v45, %v1688_v37 }
 0x230   :  { %v1754_v0 = vmul.f32 0.044715, %v6159_v62  ;;  %v2167_v50 = vmul.f32 %v2107_v28, %v1687_v12  ;;  %v1992_v11 = vmul.f32 0.7978846, %v1932_v46 }
 0x231   :  { %v1753_v40 = vmul.f32 0.044715, %v6163_v24  ;;  %v1991_v51 = vmul.f32 0.7978846, %v1931_v33  ;;  %v1689_v33 = vmul.f32 0.5, %v1399_v56 }
 0x232   :  { %v1814_v31 = vmul.f32 %v1754_v0, %v6159_v62  ;;  %4181 = vmatprep.mubr.msk.f32.mxu1 %vm215_vm0, %v2167_v50  ;;  %4415 = vtanh.f32 %v1992_v11  ;;  %v1690_v11 = vmul.f32 0.5, %v6138_v25 }
 0x233   :  { %v1813_v49 = vmul.f32 %v1753_v40, %v6163_v24  ;;  %4182 = vmatmul.mubr.msk.f32.vlgmr.msra.gmra.mrb[0].mxu1 %vm215_vm0, %v2168_v34  ;;  %4417 = vtanh.f32 %v1991_v51 }
 0x234   :  { %v4412_v5 = vpop.eup %4411  ;;  %v1874_v59 = vmul.f32 %v1814_v31, %v6159_v62 }
 0x235   :  { %v4414_v23 = vpop.eup %4413  ;;  %v1873_v12 = vmul.f32 %v1813_v49, %v6163_v24  ;;  %v4097_v46 = vpop.f32.mrb[8].mxu0  ;;  %v2110_v47 = vadd.f32 1.0, %v4412_v5 }
 0x236   :  { %v1934_v45 = vadd.f32 %v1874_v59, %v6159_v62  ;;  %v6175_v28 = vadd.f32 %v4097_v46, %v6133_v43  ;;  %v1428_v50 = vpop.f32.mrb[9].mxu0  ;;  %v2109_v37 = vadd.f32 1.0, %v4414_v23 }
 0x237   :  { %v1933_v0 = vadd.f32 %v1873_v12, %v6163_v24  ;;  %v6179_v34 = vadd.f32 %v6133_v43, %v1428_v50  ;;  %v2170_v5 = vmul.f32 %v2110_v47, %v1690_v11  ;;  %v1691_v11 = vmul.f32 0.5, %v6149_v20 }
 0x238   :  { %v1756_v40 = vmul.f32 0.044715, %v6175_v28  ;;  %v2169_v51 = vmul.f32 %v2109_v37, %v1689_v33  ;;  %v1994_v31 = vmul.f32 0.7978846, %v1934_v45 }
 0x239   :  { %v1755_v49 = vmul.f32 0.044715, %v6179_v34  ;;  %v1993_v59 = vmul.f32 0.7978846, %v1933_v0 }
 0x23a   :  { %v1816_v46 = vmul.f32 %v1756_v40, %v6175_v28  ;;  %4184 = vmatprep.mubr.msk.f32.mxu1 %vm215_vm0, %v2169_v51  ;;  %4419 = vtanh.f32 %v1994_v31 }
 0x23b   :  { %v1815_v56 = vmul.f32 %v1755_v49, %v6179_v34  ;;  %4185 = vmatmul.mubr.msk.f32.gmra.mrb[2].mxu1 %vm215_vm0, %v2170_v5  ;;  %4421 = vtanh.f32 %v1993_v59  ;;  %v1692_v49 = vmul.f32 0.5, %v6146_v35 }
 0x23c   :  { %v4416_v23 = vpop.eup %4415  ;;  %v1876_v25 = vmul.f32 %v1816_v46, %v6175_v28 }
 0x23d   :  { %v4418_v12 = vpop.eup %4417  ;;  %v1875_v45 = vmul.f32 %v1815_v56, %v6179_v34  ;;  %v4100_v50 = vpop.f32.mrb[10].mxu0  ;;  %v2112_v33 = vadd.f32 1.0, %v4416_v23 }
 0x23e   :  { %v1936_v47 = vadd.f32 %v1876_v25, %v6175_v28  ;;  %v6192_v37 = vadd.f32 %v4100_v50, %v6133_v43  ;;  %v1438_v0 = vpop.f32.mrb[11].mxu0  ;;  %v2111_v40 = vadd.f32 1.0, %v4418_v12 }
 0x23f   :  { %v1935_v51 = vadd.f32 %v1875_v45, %v6179_v34  ;;  %v6197_v31 = vadd.f32 %v6133_v43, %v1438_v0  ;;  %v2172_v23 = vmul.f32 %v2112_v33, %v1692_v49  ;;  %v1693_v49 = vmul.f32 0.5, %v6163_v24 }
 0x240   :  { %v1758_v5 = vmul.f32 0.044715, %v6192_v37  ;;  %v2171_v59 = vmul.f32 %v2111_v40, %v1691_v11  ;;  %v1996_v46 = vmul.f32 0.7978846, %v1936_v47 }
 0x241   :  { %v1757_v56 = vmul.f32 0.044715, %v6197_v31  ;;  %v1995_v25 = vmul.f32 0.7978846, %v1935_v51 }
 0x242   :  { %v1818_v50 = vmul.f32 %v1758_v5, %v6192_v37  ;;  %4187 = vmatprep.mubr.msk.f32.mxu1 %vm215_vm0, %v2171_v59  ;;  %4423 = vtanh.f32 %v1996_v46 }
 0x243   :  { %v1817_v20 = vmul.f32 %v1757_v56, %v6197_v31  ;;  %4188 = vmatmul.mubr.msk.f32.gmra.mrb[4].mxu1 %vm215_vm0, %v2172_v23  ;;  %4425 = vtanh.f32 %v1995_v25  ;;  %v1694_v56 = vmul.f32 0.5, %v6159_v62 }
 0x244   :  { %v4420_v12 = vpop.eup %4419  ;;  %v1878_v35 = vmul.f32 %v1818_v50, %v6192_v37 }
 0x245   :  { %v4422_v45 = vpop.eup %4421  ;;  %v1877_v47 = vmul.f32 %v1817_v20, %v6197_v31  ;;  %v4103_v0 = vpop.f32.mrb[12].mxu0  ;;  %v2114_v11 = vadd.f32 1.0, %v4420_v12 }
 0x246   :  { %v1938_v33 = vadd.f32 %v1878_v35, %v6192_v37  ;;  %v6210_v40 = vadd.f32 %v4103_v0, %v6133_v43  ;;  %v1448_v51 = vpop.f32.mrb[13].mxu0  ;;  %v2113_v5 = vadd.f32 1.0, %v4422_v45 }
 0x247   :  { %v1937_v59 = vadd.f32 %v1877_v47, %v6197_v31  ;;  %v6215_v46 = vadd.f32 %v6133_v43, %v1448_v51  ;;  %v2174_v12 = vmul.f32 %v2114_v11, %v1694_v56  ;;  %v1695_v56 = vmul.f32 0.5, %v6179_v34 }
 0x248   :  { %v1760_v23 = vmul.f32 0.044715, %v6210_v40  ;;  %v2173_v25 = vmul.f32 %v2113_v5, %v1693_v49  ;;  %v1998_v50 = vmul.f32 0.7978846, %v1938_v33 }
 0x249   :  { %v1759_v20 = vmul.f32 0.044715, %v6215_v46  ;;  %v1997_v35 = vmul.f32 0.7978846, %v1937_v59 }
 0x24a   :  { %v1820_v0 = vmul.f32 %v1760_v23, %v6210_v40  ;;  %4190 = vmatprep.mubr.msk.f32.mxu1 %vm215_vm0, %v2173_v25  ;;  %4427 = vtanh.f32 %v1998_v50 }
 0x24b   :  { %v1819_v24 = vmul.f32 %v1759_v20, %v6215_v46  ;;  %4191 = vmatmul.mubr.msk.f32.gmra.mrb[6].mxu1 %vm215_vm0, %v2174_v12  ;;  %4429 = vtanh.f32 %v1997_v35  ;;  %v1696_v20 = vmul.f32 0.5, %v6175_v28 }
 0x24c   :  { %v4424_v45 = vpop.eup %4423  ;;  %v1880_v62 = vmul.f32 %v1820_v0, %v6210_v40 }
 0x24d   :  { %v4426_v47 = vpop.eup %4425  ;;  %v1879_v33 = vmul.f32 %v1819_v24, %v6215_v46  ;;  %v4106_v51 = vpop.f32.mrb[14].mxu0  ;;  %v2116_v49 = vadd.f32 1.0, %v4424_v45 }
 0x24e   :  { %v1940_v11 = vadd.f32 %v1880_v62, %v6210_v40  ;;  %v6228_v5 = vadd.f32 %v4106_v51, %v6133_v43  ;;  %v1458_v59 = vpop.f32.mrb[15].mxu0  ;;  %v2115_v23 = vadd.f32 1.0, %v4426_v47 }
 0x24f   :  { %v1939_v25 = vadd.f32 %v1879_v33, %v6215_v46  ;;  %v6233_v50 = vadd.f32 %v6133_v43, %v1458_v59  ;;  %v2176_v45 = vmul.f32 %v2116_v49, %v1696_v20  ;;  %v1697_v20 = vmul.f32 0.5, %v6197_v31 }
 0x250   :  { %v1762_v12 = vmul.f32 0.044715, %v6228_v5  ;;  %v2175_v35 = vmul.f32 %v2115_v23, %v1695_v56  ;;  %v2000_v0 = vmul.f32 0.7978846, %v1940_v11 }
 0x251   :  { %v1761_v24 = vmul.f32 0.044715, %v6233_v50  ;;  %v1999_v62 = vmul.f32 0.7978846, %v1939_v25 }
 0x252   :  { %v1822_v51 = vmul.f32 %v1762_v12, %v6228_v5  ;;  %4193 = vmatprep.mubr.msk.f32.mxu1 %vm215_vm0, %v2175_v35  ;;  %4431 = vtanh.f32 %v2000_v0 }
 0x253   :  { %v1821_v34 = vmul.f32 %v1761_v24, %v6233_v50  ;;  %4194 = vmatmul.mubr.msk.f32.gmra.mrb[8].mxu1 %vm215_vm0, %v2176_v45  ;;  %4433 = vtanh.f32 %v1999_v62  ;;  %v1698_v24 = vmul.f32 0.5, %v6192_v37 }
 0x254   :  { %v4428_v47 = vpop.eup %4427  ;;  %v1882_v28 = vmul.f32 %v1822_v51, %v6228_v5 }
 0x255   :  { %v4430_v33 = vpop.eup %4429  ;;  %v1881_v11 = vmul.f32 %v1821_v34, %v6233_v50  ;;  %v4109_v59 = vpop.f32.mrb[16].mxu0  ;;  %v2118_v56 = vadd.f32 1.0, %v4428_v47 }
 0x256   :  { %v1942_v49 = vadd.f32 %v1882_v28, %v6228_v5  ;;  %v6246_v23 = vadd.f32 %v4109_v59, %v6133_v43  ;;  %v1468_v25 = vpop.f32.mrb[17].mxu0  ;;  %v2117_v12 = vadd.f32 1.0, %v4430_v33 }
 0x257   :  { %v1941_v35 = vadd.f32 %v1881_v11, %v6233_v50  ;;  %v6251_v0 = vadd.f32 %v6133_v43, %v1468_v25  ;;  %v2178_v47 = vmul.f32 %v2118_v56, %v1698_v24  ;;  %v1699_v24 = vmul.f32 0.5, %v6215_v46 }
 0x258   :  { %v1764_v45 = vmul.f32 0.044715, %v6246_v23  ;;  %v2177_v62 = vmul.f32 %v2117_v12, %v1697_v20  ;;  %v2002_v51 = vmul.f32 0.7978846, %v1942_v49 }
 0x259   :  { %v1763_v34 = vmul.f32 0.044715, %v6251_v0  ;;  %v2001_v28 = vmul.f32 0.7978846, %v1941_v35 }
 0x25a   :  { %v1824_v59 = vmul.f32 %v1764_v45, %v6246_v23  ;;  %4196 = vmatprep.mubr.msk.f32.mxu1 %vm215_vm0, %v2177_v62  ;;  %4435 = vtanh.f32 %v2002_v51 }
 0x25b   :  { %v1823_v31 = vmul.f32 %v1763_v34, %v6251_v0  ;;  %4197 = vmatmul.mubr.msk.f32.gmra.mrb[10].mxu1 %vm215_vm0, %v2178_v47  ;;  %4437 = vtanh.f32 %v2001_v28  ;;  %v1700_v34 = vmul.f32 0.5, %v6210_v40 }
 0x25c   :  { %v4432_v33 = vpop.eup %4431  ;;  %v1884_v37 = vmul.f32 %v1824_v59, %v6246_v23 }
 0x25d   :  { %v4434_v11 = vpop.eup %4433  ;;  %v1883_v49 = vmul.f32 %v1823_v31, %v6251_v0  ;;  %v4112_v25 = vpop.f32.mrb[18].mxu0  ;;  %v2120_v20 = vadd.f32 1.0, %v4432_v33 }
 0x25e   :  { %v1944_v56 = vadd.f32 %v1884_v37, %v6246_v23  ;;  %v6264_v12 = vadd.f32 %v4112_v25, %v6133_v43  ;;  %v1478_v35 = vpop.f32.mrb[19].mxu0  ;;  %v2119_v45 = vadd.f32 1.0, %v4434_v11 }
 0x25f   :  { %v1943_v62 = vadd.f32 %v1883_v49, %v6251_v0  ;;  %v6269_v51 = vadd.f32 %v6133_v43, %v1478_v35  ;;  %v2180_v33 = vmul.f32 %v2120_v20, %v1700_v34 }
 0x260   :  { %v1766_v47 = vmul.f32 0.044715, %v6264_v12  ;;  %v2179_v28 = vmul.f32 %v2119_v45, %v1699_v24  ;;  %v2004_v59 = vmul.f32 0.7978846, %v1944_v56 }
 0x261   :  { %v1765_v31 = vmul.f32 0.044715, %v6269_v51  ;;  %v2003_v37 = vmul.f32 0.7978846, %v1943_v62 }
 0x262   :  { %v1826_v25 = vmul.f32 %v1766_v47, %v6264_v12  ;;  %v4115_v16 = vpop.f32.mrb[20].mxu0  ;;  %4199 = vmatprep.mubr.msk.f32.mxu1 %vm215_vm0, %v2179_v28  ;;  %4439 = vtanh.f32 %v2004_v59  ;;  %v1701_v28 = vmul.f32 0.5, %v6233_v50 }
 0x263   :  { %v1825_v46 = vmul.f32 %v1765_v31, %v6269_v51  ;;  %v6278_v11 = vadd.f32 %v4115_v16, %v6133_v43  ;;  %v1488_v40 = vpop.f32.mrb[21].mxu0  ;;  %4200 = vmatmul.mubr.msk.f32.gmra.mrb[12].mxu1 %vm215_vm0, %v2180_v33  ;;  %4441 = vtanh.f32 %v2003_v37 }
 0x264   :  { %v4436_v49 = vpop.eup %4435  ;;  %v1886_v56 = vmul.f32 %v1826_v25, %v6264_v12  ;;  %v6283_v20 = vadd.f32 %v6133_v43, %v1488_v40 }
 0x265   :  { %v4438_v35 = vpop.eup %4437  ;;  %v1885_v24 = vmul.f32 %v1825_v46, %v6269_v51  ;;  %v1768_v45 = vmul.f32 0.044715, %v6278_v11  ;;  %v2122_v62 = vadd.f32 1.0, %v4436_v49  ;;  %v1702_v46 = vmul.f32 0.5, %v6228_v5 }
 0x266   :  { %v1946_v34 = vadd.f32 %v1886_v56, %v6264_v12  ;;  %v1767_v16 = vmul.f32 0.044715, %v6283_v20  ;;  %v4118_v47 = vpop.f32.mrb[22].mxu0  ;;  %v2121_v59 = vadd.f32 1.0, %v4438_v35  ;;  %v1704_v5 = vmul.f32 0.5, %v6246_v23 }
 0x267   :  { %v1945_v31 = vadd.f32 %v1885_v24, %v6269_v51  ;;  %v1828_v33 = vmul.f32 %v1768_v45, %v6278_v11  ;;  %v6293_v37 = vadd.f32 %v4118_v47, %v6133_v43  ;;  %v1498_v25 = vpop.f32.mrb[23].mxu0  ;;  %v2182_v24 = vmul.f32 %v2122_v62, %v1702_v46 }
 0x268   :  { %v1827_v40 = vmul.f32 %v1767_v16, %v6283_v20  ;;  %v6298_v49 = vadd.f32 %v6133_v43, %v1498_v25  ;;  %v2181_v56 = vmul.f32 %v2121_v59, %v1701_v28  ;;  %v2006_v19 = vmul.f32 0.7978846, %v1946_v34 }
 0x269   :  { %v1888_v50 = vmul.f32 %v1828_v33, %v6278_v11  ;;  %v1770_v35 = vmul.f32 0.044715, %v6293_v37  ;;  %v2005_v63 = vmul.f32 0.7978846, %v1945_v31 }
 0x26a   :  { %v1887_v45 = vmul.f32 %v1827_v40, %v6283_v20  ;;  %v1769_v47 = vmul.f32 0.044715, %v6298_v49  ;;  %v4121_v41 = vpop.f32.mrb[24].mxu0  ;;  %4202 = vmatprep.mubr.msk.f32.mxu1 %vm215_vm0, %v2181_v56  ;;  %4443 = vtanh.f32 %v2006_v19  ;;  %v1703_v19 = vmul.f32 0.5, %v6251_v0 }
 0x26b   :  { %v1948_v16 = vadd.f32 %v1888_v50, %v6278_v11  ;;  %v1830_v34 = vmul.f32 %v1770_v35, %v6293_v37  ;;  %v6309_v28 = vadd.f32 %v4121_v41, %v6133_v43  ;;  %v1508_v59 = vpop.f32.mrb[25].mxu0  ;;  %4203 = vmatmul.mubr.msk.f32.gmra.mrb[14].mxu1 %vm215_vm0, %v2182_v24  ;;  %4445 = vtanh.f32 %v2005_v63 }
 0x26c   :  { %v4440_v62 = vpop.eup %4439  ;;  %v1947_v31 = vadd.f32 %v1887_v45, %v6283_v20  ;;  %v1829_v33 = vmul.f32 %v1769_v47, %v6298_v49  ;;  %v6315_v25 = vadd.f32 %v6133_v43, %v1508_v59 }
 0x26d   :  { %v4442_v23 = vpop.eup %4441  ;;  %v1890_v46 = vmul.f32 %v1830_v34, %v6293_v37  ;;  %v1772_v41 = vmul.f32 0.044715, %v6309_v28  ;;  %v2124_v40 = vadd.f32 1.0, %v4440_v62  ;;  %v2008_v56 = vmul.f32 0.7978846, %v1948_v16 }
 0x26e   :  { %v1889_v50 = vmul.f32 %v1829_v33, %v6298_v49  ;;  %v1771_v63 = vmul.f32 0.044715, %v6315_v25  ;;  %v4124_v35 = vpop.f32.mrb[26].mxu0  ;;  %v2123_v24 = vadd.f32 1.0, %v4442_v23  ;;  %v2007_v45 = vmul.f32 0.7978846, %v1947_v31 }
 0x26f   :  { %v1950_v47 = vadd.f32 %v1890_v46, %v6293_v37  ;;  %v1832_v59 = vmul.f32 %v1772_v41, %v6309_v28  ;;  %v6325_v0 = vadd.f32 %v4124_v35, %v6133_v43  ;;  %v1518_v15 = vpop.f32.mrb[27].mxu0  ;;  %v2184_v34 = vmul.f32 %v2124_v40, %v1704_v5 }
 0x270   :  { %v1949_v14 = vadd.f32 %v1889_v50, %v6298_v49  ;;  %v1831_v16 = vmul.f32 %v1771_v63, %v6315_v25  ;;  %v6330_v62 = vadd.f32 %v6133_v43, %v1518_v15  ;;  %v2183_v33 = vmul.f32 %v2123_v24, %v1703_v19 }
 0x271   :  { %v1892_v23 = vmul.f32 %v1832_v59, %v6309_v28  ;;  %v1774_v31 = vmul.f32 0.044715, %v6325_v0  ;;  %4447 = vtanh.f32 %v2007_v45  ;;  %v2010_v46 = vmul.f32 0.7978846, %v1950_v47 }
 0x272   :  { %v1891_v41 = vmul.f32 %v1831_v16, %v6315_v25  ;;  %v1773_v35 = vmul.f32 0.044715, %v6330_v62  ;;  %v4127_v1 = vpop.f32.mrb[28].mxu0  ;;  %4205 = vmatprep.mubr.msk.f32.mxu1 %vm215_vm0, %v2183_v33  ;;  %4449 = vtanh.f32 %v2008_v56  ;;  %v2009_v5 = vmul.f32 0.7978846, %v1949_v14 }
 0x273   :  { %v1834_v40 = vmul.f32 %v1774_v31, %v6325_v0  ;;  %v6339_v15 = vadd.f32 %v4127_v1, %v6133_v43  ;;  %v1528_v19 = vpop.f32.mrb[29].mxu0  ;;  %4206 = vmatmul.mubr.msk.f32.gmra.mrb[16].mxu1 %vm215_vm0, %v2184_v34  ;;  %4451 = vtanh.f32 %v2010_v46  ;;  %v1952_v14 = vadd.f32 %v1892_v23, %v6309_v28 }
 0x274   :  { %v4444_v50 = vpop.eup %4443  ;;  %v1951_v63 = vadd.f32 %v1891_v41, %v6315_v25  ;;  %v1833_v24 = vmul.f32 %v1773_v35, %v6330_v62  ;;  %v6345_v45 = vadd.f32 %v6133_v43, %v1528_v19  ;;  %4453 = vtanh.f32 %v2009_v5 }
 0x275   :  { %v4446_v56 = vpop.eup %4445  ;;  %v1705_v47 = vmul.f32 0.5, %v6269_v51  ;;  %v2126_v1 = vadd.f32 1.0, %v4444_v50  ;;  %v1706_v41 = vmul.f32 0.5, %v6264_v12  ;;  %v1894_v35 = vmul.f32 %v1834_v40, %v6325_v0 }
 0x276   :  { %v1893_v59 = vmul.f32 %v1833_v24, %v6330_v62  ;;  %v1775_v34 = vmul.f32 0.044715, %v6345_v45  ;;  %v4130_v16 = vpop.f32.mrb[30].mxu0  ;;  %v2125_v33 = vadd.f32 1.0, %v4446_v56  ;;  %v2011_v31 = vmul.f32 0.7978846, %v1951_v63 }
 0x277   :  { %v1538_v46 = vpop.f32.mrb[31].mxu0  ;;  %v1776_v5 = vmul.f32 0.044715, %v6339_v15  ;;  %v2186_v50 = vmul.f32 %v2126_v1, %v1706_v41  ;;  %v6360_v56 = vadd.f32 %v4130_v16, %v6133_v43  ;;  %v2012_v40 = vmul.f32 0.7978846, %v1952_v14 }
 0x278   :  { %v6355_v19 = vadd.f32 %v6133_v43, %v1538_v46  ;;  %v2185_v23 = vmul.f32 %v2125_v33, %v1705_v47  ;;  %v1953_v51 = vadd.f32 %v1893_v59, %v6330_v62  ;;  %4455 = vtanh.f32 %v2011_v31 }
 0x279   :  { %v1835_v24 = vmul.f32 %v1775_v34, %v6345_v45  ;;  %v1708_v1 = vmul.f32 0.5, %v6278_v11  ;;  %v1954_v34 = vadd.f32 %v1894_v35, %v6325_v0  ;;  %v1836_v16 = vmul.f32 %v1776_v5, %v6339_v15 }
 0x27a   :  { %v1777_v63 = vmul.f32 0.044715, %v6355_v19  ;;  %v4133_v12 = vpop.f32.mrb[32].mxu0  ;;  %4208 = vmatprep.mubr.msk.f32.mxu1 %vm215_vm0, %v2185_v23  ;;  %v1707_v33 = vmul.f32 0.5, %v6283_v20  ;;  %4457 = vtanh.f32 %v2012_v40  ;;  %v1778_v11 = vmul.f32 0.044715, %v6360_v56 }
 0x27b   :  { %v4448_v32 = vpop.eup %4447  ;;  %v6365_v46 = vadd.f32 %v4133_v12, %v6133_v43  ;;  %v1548_v47 = vpop.f32.mrb[33].mxu0  ;;  %4209 = vmatmul.mubr.msk.f32.gmra.mrb[18].mxu1 %vm215_vm0, %v2186_v50  ;;  %v2013_v12 = vmul.f32 0.7978846, %v1953_v51  ;;  %v1895_v50 = vmul.f32 %v1835_v24, %v6345_v45  ;;  %v1709_v51 = vmul.f32 0.5, %v6298_v49 }
 0x27c   :  { %v4450_v59 = vpop.eup %4449  ;;  %v2127_v31 = vadd.f32 1.0, %v4448_v32  ;;  %v6373_v14 = vadd.f32 %v6133_v43, %v1548_v47  ;;  %v1837_v4 = vmul.f32 %v1777_v63, %v6355_v19  ;;  %v1710_v24 = vmul.f32 0.5, %v6293_v37 }
 0x27d   :  { %v4452_v41 = vpop.eup %4451  ;;  %v2128_v23 = vadd.f32 1.0, %v4450_v59  ;;  %v1780_v5 = vmul.f32 0.044715, %v6365_v46  ;;  %v1896_v59 = vmul.f32 %v1836_v16, %v6339_v15  ;;  %4459 = vtanh.f32 %v2013_v12 }
 0x27e   :  { %v4454_v26 = vpop.eup %4453  ;;  %v4136_v35 = vpop.f32.mrb[34].mxu0  ;;  %v2187_v21 = vmul.f32 %v2127_v31, %v1707_v33  ;;  %v2130_v38 = vadd.f32 1.0, %v4452_v41  ;;  %v1779_v63 = vmul.f32 0.044715, %v6373_v14  ;;  %v1838_v31 = vmul.f32 %v1778_v11, %v6360_v56 }
 0x27f   :  { %v6380_v32 = vadd.f32 %v4136_v35, %v6133_v43  ;;  %v1558_v20 = vpop.f32.mrb[35].mxu0  ;;  %v2188_v47 = vmul.f32 %v2128_v23, %v1708_v1  ;;  %v2129_v40 = vadd.f32 1.0, %v4454_v26  ;;  %v1955_v1 = vadd.f32 %v1895_v50, %v6345_v45 }
 0x280   :  { %4211 = vmatprep.mubr.msk.f32.mxu1 %vm215_vm0, %v2187_v21  ;;  %v6388_v33 = vadd.f32 %v6133_v43, %v1558_v20  ;;  %v1897_v21 = vmul.f32 %v1837_v4, %v6355_v19  ;;  %v1840_v37 = vmul.f32 %v1780_v5, %v6365_v46  ;;  %v2190_v35 = vmul.f32 %v2130_v38, %v1710_v24 }
 0x281   :  { %4212 = vmatmul.mubr.msk.f32.gmra.mrb[20].mxu1 %vm215_vm0, %v2188_v47  ;;  %v2189_v26 = vmul.f32 %v2129_v40, %v1709_v51  ;;  %v1782_v16 = vmul.f32 0.044715, %v6380_v32  ;;  %v2014_v20 = vmul.f32 0.7978846, %v1954_v34  ;;  %v1711_v12 = vmul.f32 0.5, %v6315_v25 }
 0x282   :  { %v4139_v49 = vpop.f32.mrb[36].mxu0  ;;  %v4456_v41 = vpop.eup %4455  ;;  %v1956_v4 = vadd.f32 %v1896_v59, %v6339_v15  ;;  %v1839_v11 = vmul.f32 %v1779_v63, %v6373_v14  ;;  %v1781_v47 = vmul.f32 0.044715, %v6388_v33  ;;  %v1898_v38 = vmul.f32 %v1838_v31, %v6360_v56 }
 0x283   :  { %v1568_v23 = vpop.f32.mrb[37].mxu0  ;;  %v6397_v52 = vadd.f32 %v4139_v49, %v6133_v43  ;;  %4214 = vmatprep.mubr.msk.f32.mxu1 %vm215_vm0, %v2189_v26  ;;  %v2131_v50 = vadd.f32 1.0, %v4456_v41  ;;  %4461 = vtanh.f32 %v2014_v20  ;;  %v2015_v40 = vmul.f32 0.7978846, %v1955_v1 }
 0x284   :  { %v6407_v34 = vadd.f32 %v6133_v43, %v1568_v23  ;;  %v4458_v24 = vpop.eup %4457  ;;  %v1957_v25 = vadd.f32 %v1897_v21, %v6355_v19  ;;  %v1900_v59 = vmul.f32 %v1840_v37, %v6365_v46  ;;  %v1842_v63 = vmul.f32 %v1782_v16, %v6380_v32 }
 0x285   :  { %4215 = vmatmul.mubr.msk.f32.gmra.mrb[22].mxu1 %vm215_vm0, %v2190_v35  ;;  %v2191_v51 = vmul.f32 %v2131_v50, %v1711_v12  ;;  %v1712_v26 = vmul.f32 0.5, %v6309_v28  ;;  %v1784_v41 = vmul.f32 0.044715, %v6397_v52  ;;  %v2132_v1 = vadd.f32 1.0, %v4458_v24 }
 0x286   :  { %v4142_v5 = vpop.f32.mrb[38].mxu0  ;;  %v1899_v21 = vmul.f32 %v1839_v11, %v6373_v14  ;;  %v1841_v37 = vmul.f32 %v1781_v47, %v6388_v33  ;;  %4463 = vtanh.f32 %v2015_v40  ;;  %v2016_v16 = vmul.f32 0.7978846, %v1956_v4 }
 0x287   :  { %v1578_v49 = vpop.f32.mrb[39].mxu0  ;;  %v6415_v31 = vadd.f32 %v4142_v5, %v6133_v43  ;;  %4217 = vmatprep.mubr.msk.f32.mxu1 %vm215_vm0, %v2191_v51  ;;  %v1958_v35 = vadd.f32 %v1898_v38, %v6360_v56  ;;  %v1783_v28 = vmul.f32 0.044715, %v6407_v34  ;;  %v2192_v20 = vmul.f32 %v2132_v1, %v1712_v26  ;;  %v4460_v5 = vpop.eup %4459 }
 0x288   :  { %v6418_v23 = vadd.f32 %v6133_v43, %v1578_v49  ;;  %v1713_v50 = vmul.f32 0.5, %v6330_v62  ;;  %v1960_v49 = vadd.f32 %v1900_v59, %v6365_v46  ;;  %v1902_v51 = vmul.f32 %v1842_v63, %v6380_v32 }
 0x289   :  { %v1714_v11 = vmul.f32 0.5, %v6325_v0  ;;  %4465 = vtanh.f32 %v2016_v16  ;;  %v1844_v47 = vmul.f32 %v1784_v41, %v6397_v52  ;;  %v1786_v4 = vmul.f32 0.044715, %v6415_v31  ;;  %4218 = vmatmul.mubr.msk.f32.gmra.mrb[24].mxu1 %vm215_vm0, %v2192_v20 }
 0x28a   :  { %v4145_v12 = vpop.f32.mrb[40].mxu0  ;;  %v1785_v38 = vmul.f32 0.044715, %v6418_v23  ;;  %v2133_v40 = vadd.f32 1.0, %v4460_v5  ;;  %v1959_v62 = vadd.f32 %v1899_v21, %v6373_v14  ;;  %v1901_v26 = vmul.f32 %v1841_v37, %v6388_v33 }
 0x28b   :  { %v1588_v24 = vpop.f32.mrb[41].mxu0  ;;  %v6436_v59 = vadd.f32 %v4145_v12, %v6133_v43  ;;  %v2017_v63 = vmul.f32 0.7978846, %v1957_v25  ;;  %v1843_v0 = vmul.f32 %v1783_v28, %v6407_v34  ;;  %v2018_v60 = vmul.f32 0.7978846, %v1958_v35 }
 0x28c   :  { %v6440_v1 = vadd.f32 %v6133_v43, %v1588_v24  ;;  %v2193_v41 = vmul.f32 %v2133_v40, %v1713_v50  ;;  %v6443_v20 = vadd.f32 %v1902_v51, %v6380_v32  ;;  %v1715_v12 = vmul.f32 0.5, %v6345_v45 }
 0x28d   :  { %v4462_v53 = vpop.eup %4461  ;;  %4467 = vtanh.f32 %v2017_v63  ;;  %v1904_v25 = vmul.f32 %v1844_v47, %v6397_v52  ;;  %v1846_v28 = vmul.f32 %v1786_v4, %v6415_v31  ;;  %v1845_v5 = vmul.f32 %v1785_v38, %v6418_v23 }
 0x28e   :  { %v4148_v16 = vpop.f32.mrb[42].mxu0  ;;  %4220 = vmatprep.mubr.msk.f32.mxu1 %vm215_vm0, %v2193_v41  ;;  %v2134_v35 = vadd.f32 1.0, %v4462_v53  ;;  %v1961_v50 = vadd.f32 %v1901_v26, %v6388_v33  ;;  %v1788_v51 = vmul.f32 0.044715, %v6436_v59  ;;  %v1716_v24 = vmul.f32 0.5, %v6339_v15 }
 0x28f   :  { %v6446_v21 = vadd.f32 %v4148_v16, %v6133_v43  ;;  %v1598_v37 = vpop.f32.mrb[43].mxu0  ;;  %4469 = vtanh.f32 %v2018_v60  ;;  %v1903_v40 = vmul.f32 %v1843_v0, %v6407_v34  ;;  %v1787_v45 = vmul.f32 0.044715, %v6440_v1 }
 0x290   :  { %v2194_v63 = vmul.f32 %v2134_v35, %v1714_v11  ;;  %v2019_v16 = vmul.f32 0.7978846, %v1959_v62  ;;  %v4464_v4 = vpop.eup %4463  ;;  %v6460_v41 = vadd.f32 %v6133_v43, %v1598_v37  ;;  %v1717_v15 = vmul.f32 0.5, %v6355_v19 }
 0x291   :  { %v1790_v38 = vmul.f32 0.044715, %v6446_v21  ;;  %v6467_v60 = vadd.f32 %v1904_v25, %v6397_v52  ;;  %v1906_v0 = vmul.f32 %v1846_v28, %v6415_v31  ;;  %v1905_v11 = vmul.f32 %v1845_v5, %v6418_v23 }
 0x292   :  { %v4151_v47 = vpop.f32.mrb[44].mxu0  ;;  %4221 = vmatmul.mubr.msk.f32.gmra.mrb[26].mxu1 %vm215_vm0, %v2194_v63  ;;  %v2135_v62 = vadd.f32 1.0, %v4464_v4  ;;  %v1848_v37 = vmul.f32 %v1788_v51, %v6436_v59  ;;  %4471 = vtanh.f32 %v2019_v16  ;;  %v1963_v19 = vadd.f32 %v1903_v40, %v6407_v34 }
 0x293   :  { %v6463_v53 = vadd.f32 %v4151_v47, %v6133_v43  ;;  %v1608_v26 = vpop.f32.mrb[45].mxu0  ;;  %v4466_v35 = vpop.eup %4465  ;;  %v2020_v47 = vmul.f32 0.7978846, %v1960_v49  ;;  %v1847_v25 = vmul.f32 %v1787_v45, %v6440_v1  ;;  %v1850_v5 = vmul.f32 %v1790_v38, %v6446_v21 }
 0x294   :  { %v6474_v27 = vadd.f32 %v6133_v43, %v1608_v26  ;;  %v2195_v18 = vmul.f32 %v2135_v62, %v1715_v12  ;;  %v2136_v9 = vadd.f32 1.0, %v4466_v35  ;;  %v1789_v63 = vmul.f32 0.044715, %v6460_v41 }
 0x295   :  { %v1792_v4 = vmul.f32 0.044715, %v6463_v53  ;;  %4473 = vtanh.f32 %v2020_v47  ;;  %v6482_v51 = vadd.f32 %v1906_v0, %v6415_v31  ;;  %v1718_v40 = vmul.f32 0.5, %v6360_v56 }
 0x296   :  { %v4154_v28 = vpop.f32.mrb[46].mxu0  ;;  %4223 = vmatprep.mubr.msk.f32.mxu1 %vm215_vm0, %v2195_v18  ;;  %v2196_v49 = vmul.f32 %v2136_v9, %v1716_v24  ;;  %v6490_v16 = vadd.f32 %v1905_v11, %v6418_v23  ;;  %v1908_v38 = vmul.f32 %v1848_v37, %v6436_v59  ;;  %v1791_v26 = vmul.f32 0.044715, %v6474_v27 }
 0x297   :  { %v1618_v17 = vpop.f32.mrb[47].mxu0  ;;  %v6487_v12 = vadd.f32 %v4154_v28, %v6133_v43  ;;  %v4468_v45 = vpop.eup %4467  ;;  %v2021_v62 = vmul.f32 0.7978846, %v1961_v50  ;;  %v1907_v0 = vmul.f32 %v1847_v25, %v6440_v1  ;;  %v1719_v56 = vmul.f32 0.5, %v6373_v14 }
 0x298   :  { %4224 = vmatmul.mubr.msk.f32.gmra.mrb[28].mxu1 %vm215_vm0, %v2196_v49  ;;  %v2137_v18 = vadd.f32 1.0, %v4468_v45  ;;  %v6497_v9 = vadd.f32 %v6133_v43, %v1618_v17  ;;  %v1910_v11 = vmul.f32 %v1850_v5, %v6446_v21  ;;  %v1849_v47 = vmul.f32 %v1789_v63, %v6460_v41 }
 0x299   :  { %v4470_v35 = vpop.eup %4469  ;;  %v1852_v37 = vmul.f32 %v1792_v4, %v6463_v53  ;;  %4475 = vtanh.f32 %v2021_v62  ;;  %v1794_v49 = vmul.f32 0.044715, %v6487_v12  ;;  %v6508_v17 = vadd.f32 %v1908_v38, %v6436_v59 }
 0x29a   :  { %v4157_v24 = vpop.f32.mrb[48].mxu0  ;;  %v2197_v50 = vmul.f32 %v2137_v18, %v1717_v15  ;;  %v2138_v25 = vadd.f32 1.0, %v4470_v35  ;;  %v1851_v14 = vmul.f32 %v1791_v26, %v6474_v27  ;;  %v1720_v5 = vmul.f32 0.5, %v6365_v46  ;;  %v6525_v46 = vld [vmem:[%s7862_s5] ss:$0 sm:$0xff] }
 0x29b   :  { %v1628_v28 = vpop.f32.mrb[49].mxu0  ;;  %v6505_v45 = vadd.f32 %v4157_v24, %v6133_v43  ;;  %v2022_v63 = vmul.f32 0.7978846, %v6443_v20  ;;  %v6514_v4 = vadd.f32 %v1907_v0, %v6440_v1  ;;  %v1793_v62 = vmul.f32 0.044715, %v6497_v9 }
 0x29c   :  { %4226 = vmatprep.mubr.msk.f32.mxu1 %vm215_vm0, %v2197_v50  ;;  %v2198_v15 = vmul.f32 %v2138_v25, %v1718_v40  ;;  %v2023_v43 = vmul.f32 0.7978846, %v1963_v19  ;;  %v4472_v24 = vpop.eup %4471  ;;  %v6519_v38 = vadd.f32 %v1910_v11, %v6446_v21  ;;  %v1909_v26 = vmul.f32 %v1849_v47, %v6460_v41 }
 0x29d   :  { %v6528_v20 = vadd.f32 %v6525_v46, %v1628_v28  ;;  %4477 = vtanh.f32 %v2022_v63  ;;  %v1912_v0 = vmul.f32 %v1852_v37, %v6463_v53  ;;  %v1854_v19 = vmul.f32 %v1794_v49, %v6487_v12 }
 0x29e   :  { %v4160_v18 = vpop.f32.mrb[50].mxu0  ;;  %4227 = vmatmul.mubr.msk.f32.gmra.mrb[30].mxu1 %vm215_vm0, %v2198_v15  ;;  %v2139_v35 = vadd.f32 1.0, %v4472_v24  ;;  %v1796_v11 = vmul.f32 0.044715, %v6505_v45  ;;  %v1911_v50 = vmul.f32 %v1851_v14, %v6474_v27  ;;  %v1721_v25 = vmul.f32 0.5, %v6388_v33 }
 0x29f   :  { %v1638_v40 = vpop.f32.mrb[51].mxu0  ;;  %v4474_v47 = vpop.eup %4473  ;;  %v6537_v48 = vadd.f32 %v6525_v46, %v4160_v18  ;;  %4479 = vtanh.f32 %v2023_v43  ;;  %v1853_v28 = vmul.f32 %v1793_v62, %v6497_v9  ;;  %v6544_v24 = vadd.f32 %v1909_v26, %v6460_v41 }
 0x2a0   :  { %v2199_v63 = vmul.f32 %v2139_v35, %v1719_v56  ;;  %v2140_v37 = vadd.f32 1.0, %v4474_v47  ;;  %v6541_v15 = vadd.f32 %v6525_v46, %v1638_v40  ;;  %v1795_v3 = vmul.f32 0.044715, %v6528_v20 }
 0x2a1   :  { %v1722_v14 = vmul.f32 0.5, %v6380_v32  ;;  %v2024_v33 = vmul.f32 0.7978846, %v6467_v60  ;;  %v1914_v43 = vmul.f32 %v1854_v19, %v6487_v12  ;;  %v1856_v62 = vmul.f32 %v1796_v11, %v6505_v45 }
 0x2a2   :  { %v4163_v49 = vpop.f32.mrb[52].mxu0  ;;  %4229 = vmatprep.mubr.msk.f32.mxu1 %vm215_vm0, %v2199_v63  ;;  %v2200_v56 = vmul.f32 %v2140_v37, %v1720_v5  ;;  %v6556_v26 = vadd.f32 %v1912_v0, %v6463_v53  ;;  %v1798_v47 = vmul.f32 0.044715, %v6537_v48  ;;  %v6563_v60 = vadd.f32 %v1911_v50, %v6474_v27 }
 0x2a3   :  { %v1648_v18 = vpop.f32.mrb[53].mxu0  ;;  %v6553_v40 = vadd.f32 %v6525_v46, %v4163_v49  ;;  %v4476_v35 = vpop.eup %4475  ;;  %4481 = vtanh.f32 %v2024_v33  ;;  %v1913_v5 = vmul.f32 %v1853_v28, %v6497_v9  ;;  %v1797_v11 = vmul.f32 0.044715, %v6541_v15 }
 0x2a4   :  { %v6560_v32 = vadd.f32 %v6525_v46, %v1648_v18  ;;  %4230 = vmatmul.mubr.msk.f32.gmra.mrb[32].mxu1 %vm215_vm0, %v2200_v56  ;;  %v2141_v19 = vadd.f32 1.0, %v4476_v35  ;;  %v1855_v0 = vmul.f32 %v1795_v3, %v6528_v20  ;;  %v1723_v37 = vmul.f32 0.5, %v6407_v34 }
 0x2a5   :  { %v2025_v49 = vmul.f32 0.7978846, %v6490_v16  ;;  %v2026_v33 = vmul.f32 0.7978846, %v6482_v51  ;;  %v6573_v50 = vadd.f32 %v1914_v43, %v6487_v12  ;;  %v1916_v28 = vmul.f32 %v1856_v62, %v6505_v45 }
 0x2a6   :  { %v2201_v58 = vmul.f32 %v2141_v19, %v1721_v25  ;;  %v1800_v56 = vmul.f32 0.044715, %v6553_v40  ;;  %v1858_v61 = vmul.f32 %v1798_v47, %v6537_v48  ;;  %v1799_v3 = vmul.f32 0.044715, %v6560_v32 }
 0x2a7   :  { %v4166_v63 = vpop.f32.mrb[54].mxu0  ;;  %v4478_v35 = vpop.eup %4477  ;;  %4483 = vtanh.f32 %v2025_v49  ;;  %v1857_v16 = vmul.f32 %v1797_v11, %v6541_v15  ;;  %v6588_v19 = vadd.f32 %v1913_v5, %v6497_v9  ;;  %v1915_v47 = vmul.f32 %v1855_v0, %v6528_v20 }
 0x2a8   :  { %v1658_v18 = vpop.f32.mrb[55].mxu0  ;;  %v6580_v34 = vadd.f32 %v6525_v46, %v4166_v63  ;;  %4232 = vmatprep.mubr.msk.f32.mxu1 %vm215_vm0, %v2201_v58  ;;  %v2142_v51 = vadd.f32 1.0, %v4478_v35  ;;  %4485 = vtanh.f32 %v2026_v33  ;;  %v1724_v49 = vmul.f32 0.5, %v6397_v52 }
 0x2a9   :  { %v6585_v43 = vadd.f32 %v6525_v46, %v1658_v18  ;;  %v4480_v62 = vpop.eup %4479  ;;  %v2027_v63 = vmul.f32 0.7978846, %v6514_v4  ;;  %v6594_v58 = vadd.f32 %v1916_v28, %v6505_v45  ;;  %v1860_v33 = vmul.f32 %v1800_v56, %v6553_v40 }
 0x2aa   :  { %v2202_v35 = vmul.f32 %v2142_v51, %v1722_v14  ;;  %v2143_v11 = vadd.f32 1.0, %v4480_v62  ;;  %v1859_v7 = vmul.f32 %v1799_v3, %v6560_v32  ;;  %v1802_v2 = vmul.f32 0.044715, %v6580_v34 }
 0x2ab   :  { %v4169_v25 = vpop.f32.mrb[56].mxu0  ;;  %4487 = vtanh.f32 %v2027_v63  ;;  %v2028_v5 = vmul.f32 0.7978846, %v6508_v17  ;;  %v1918_v52 = vmul.f32 %v1858_v61, %v6537_v48  ;;  %v1917_v4 = vmul.f32 %v1857_v16, %v6541_v15 }
 0x2ac   :  { %v1668_v18 = vpop.f32.mrb[57].mxu0  ;;  %4233 = vmatmul.mubr.msk.f32.gmra.mrb[34].mxu1 %vm215_vm0, %v2202_v35  ;;  %v2203_v0 = vmul.f32 %v2143_v11, %v1723_v37  ;;  %v1801_v14 = vmul.f32 0.044715, %v6585_v43  ;;  %v1975_v56 = vadd.f32 %v1915_v47, %v6528_v20  ;;  %v2029_v62 = vmul.f32 0.7978846, %v6544_v24 }
 0x2ad   :  { %v4482_v51 = vpop.eup %4481  ;;  %4489 = vtanh.f32 %v2028_v5  ;;  %v6606_v3 = vadd.f32 %v6525_v46, %v1668_v18  ;;  %v1920_v61 = vmul.f32 %v1860_v33, %v6553_v40  ;;  %v1725_v37 = vmul.f32 0.5, %v6418_v23 }
 0x2ae   :  { %4235 = vmatprep.mubr.msk.f32.mxu1 %vm215_vm0, %v2203_v0  ;;  %v2144_v63 = vadd.f32 1.0, %v4482_v51  ;;  %v1726_v16 = vmul.f32 0.5, %v6415_v31  ;;  %v1919_v35 = vmul.f32 %v1859_v7, %v6560_v32  ;;  %v1862_v47 = vmul.f32 %v1802_v2, %v6580_v34 }
 0x2af   :  { %v4172_v28 = vpop.f32.mrb[58].mxu0  ;;  %4491 = vtanh.f32 %v2029_v62  ;;  %v2030_v11 = vmul.f32 0.7978846, %v6519_v38  ;;  %v1978_v18 = vadd.f32 %v1918_v52, %v6537_v48  ;;  %v1977_v24 = vadd.f32 %v1917_v4, %v6541_v15 }
 0x2b0   :  { %v1678_v17 = vpop.f32.mrb[59].mxu0  ;;  %v2204_v5 = vmul.f32 %v2144_v63, %v1724_v49  ;;  %v1861_v0 = vmul.f32 %v1801_v14, %v6585_v43  ;;  %v6620_v33 = vadd.f32 %v6525_v46, %v4169_v25  ;;  %v1803_v31 = vmul.f32 0.044715, %v6606_v3 }
 0x2b1   :  { %v4484_v51 = vpop.eup %4483  ;;  %4493 = vtanh.f32 %v2030_v11  ;;  %v2031_v7 = vmul.f32 0.7978846, %v6563_v60  ;;  %v6626_v23 = vadd.f32 %v1920_v61, %v6553_v40  ;;  %v1727_v49 = vmul.f32 0.5, %v6440_v1 }
 0x2b2   :  { %v4486_v2 = vpop.eup %4485  ;;  %4236 = vmatmul.mubr.msk.f32.gmra.mrb[36].mxu1 %vm215_vm0, %v2204_v5  ;;  %v2145_v38 = vadd.f32 1.0, %v4484_v51  ;;  %v6630_v52 = vadd.f32 %v6525_v46, %v1678_v17  ;;  %v1979_v25 = vadd.f32 %v1919_v35, %v6560_v32  ;;  %v1922_v14 = vmul.f32 %v1862_v47, %v6580_v34 }
 0x2b3   :  { %v2146_v4 = vadd.f32 1.0, %v4486_v2  ;;  %4495 = vtanh.f32 %v2031_v7  ;;  %v1921_v60 = vmul.f32 %v1861_v0, %v6585_v43  ;;  %v1728_v63 = vmul.f32 0.5, %v6436_v59 }
 0x2b4   :  { %v2205_v62 = vmul.f32 %v2145_v38, %v1725_v37  ;;  %v1729_v61 = vmul.f32 0.5, %v6460_v41  ;;  %v1804_v1 = vmul.f32 0.044715, %v6620_v33  ;;  %v1863_v17 = vmul.f32 %v1803_v31, %v6606_v3 }
 0x2b5   :  { %v4488_v11 = vpop.eup %4487  ;;  %v2206_v5 = vmul.f32 %v2146_v4, %v1726_v16  ;;  %v2032_v51 = vmul.f32 0.7978846, %v6556_v26  ;;  %v1730_v47 = vmul.f32 0.5, %v6446_v21  ;;  %v1805_v37 = vmul.f32 0.044715, %v6630_v52 }
 0x2b6   :  { %4238 = vmatprep.mubr.msk.f32.mxu1 %vm215_vm0, %v2205_v62  ;;  %v2147_v35 = vadd.f32 1.0, %v4488_v11  ;;  %v2033_v0 = vmul.f32 0.7978846, %v6588_v19  ;;  %v1982_v41 = vadd.f32 %v1922_v14, %v6580_v34  ;;  %v6647_v16 = vadd.f32 %v6525_v46, %v4172_v28 }
 0x2b7   :  { %v4490_v59 = vpop.eup %4489  ;;  %4239 = vmatmul.mubr.msk.f32.gmra.mrb[38].mxu1 %vm215_vm0, %v2206_v5  ;;  %4497 = vtanh.f32 %v2032_v51  ;;  %v2034_v26 = vmul.f32 0.7978846, %v6573_v50  ;;  %v1981_v31 = vadd.f32 %v1921_v60, %v6585_v43  ;;  %v1864_v38 = vmul.f32 %v1804_v1, %v6620_v33 }
 0x2b8   :  { %v2207_v7 = vmul.f32 %v2147_v35, %v1727_v49  ;;  %v2148_v2 = vadd.f32 1.0, %v4490_v59  ;;  %4499 = vtanh.f32 %v2033_v0  ;;  %v1923_v19 = vmul.f32 %v1863_v17, %v6606_v3 }
 0x2b9   :  { %v4492_v21 = vpop.eup %4491  ;;  %4501 = vtanh.f32 %v2034_v26  ;;  %v2035_v4 = vmul.f32 0.7978846, %v1975_v56  ;;  %v1865_v28 = vmul.f32 %v1805_v37, %v6630_v52  ;;  %v2036_v50 = vmul.f32 0.7978846, %v6594_v58 }
 0x2ba   :  { %4241 = vmatprep.mubr.msk.f32.mxu1 %vm215_vm0, %v2207_v7  ;;  %v2208_v14 = vmul.f32 %v2148_v2, %v1728_v63  ;;  %v2149_v46 = vadd.f32 1.0, %v4492_v21  ;;  %v1806_v49 = vmul.f32 0.044715, %v6647_v16  ;;  %v2037_v60 = vmul.f32 0.7978846, %v1977_v24 }
 0x2bb   :  { %v4494_v62 = vpop.eup %4493  ;;  %4503 = vtanh.f32 %v2035_v4  ;;  %v2038_v11 = vmul.f32 0.7978846, %v1978_v18  ;;  %v1731_v56 = vmul.f32 0.5, %v6474_v27  ;;  %v1924_v63 = vmul.f32 %v1864_v38, %v6620_v33 }
 0x2bc   :  { %4242 = vmatmul.mubr.msk.f32.gmra.mrb[40].mxu1 %vm215_vm0, %v2208_v14  ;;  %v2209_v5 = vmul.f32 %v2149_v46, %v1729_v61  ;;  %v2150_v1 = vadd.f32 1.0, %v4494_v62  ;;  %4505 = vtanh.f32 %v2036_v50  ;;  %v1983_v51 = vadd.f32 %v1923_v19, %v6606_v3 }
 0x2bd   :  { %v4496_v17 = vpop.eup %4495  ;;  %4507 = vtanh.f32 %v2037_v60  ;;  %v2039_v58 = vmul.f32 0.7978846, %v1979_v25  ;;  %v1925_v24 = vmul.f32 %v1865_v28, %v6630_v52  ;;  %v1866_v61 = vmul.f32 %v1806_v49, %v6647_v16 }
 0x2be   :  { %4244 = vmatprep.mubr.msk.f32.mxu1 %vm215_vm0, %v2209_v5  ;;  %v2210_v35 = vmul.f32 %v2150_v1, %v1730_v47  ;;  %v2151_v18 = vadd.f32 1.0, %v4496_v17  ;;  %4509 = vtanh.f32 %v2038_v11  ;;  %v2040_v27 = vmul.f32 0.7978846, %v6626_v23 }
 0x2bf   :  { %4511 = vtanh.f32 %v2039_v58  ;;  %v2041_v37 = vmul.f32 0.7978846, %v1981_v31  ;;  %v1984_v26 = vadd.f32 %v1924_v63, %v6620_v33  ;;  %v1732_v25 = vmul.f32 0.5, %v6463_v53 }
 0x2c0   :  { %4245 = vmatmul.mubr.msk.f32.gmra.mrb[42].mxu1 %vm215_vm0, %v2210_v35  ;;  %v2211_v0 = vmul.f32 %v2151_v18, %v1731_v56  ;;  %v1733_v47 = vmul.f32 0.5, %v6497_v9  ;;  %v1985_v2 = vadd.f32 %v1925_v24, %v6630_v52  ;;  %v2043_v38 = vmul.f32 0.7978846, %v1983_v51 }
 0x2c1   :  { %v4498_v59 = vpop.eup %4497  ;;  %4513 = vtanh.f32 %v2041_v37  ;;  %v1926_v31 = vmul.f32 %v1866_v61, %v6647_v16  ;;  %v2042_v4 = vmul.f32 0.7978846, %v1982_v41  ;;  %v1734_v9 = vmul.f32 0.5, %v6487_v12 }
 0x2c2   :  { %v4500_v7 = vpop.eup %4499  ;;  %4247 = vmatprep.mubr.msk.f32.mxu1 %vm215_vm0, %v2211_v0  ;;  %v2152_v21 = vadd.f32 1.0, %v4498_v59  ;;  %4515 = vtanh.f32 %v2040_v27  ;;  %v1735_v62 = vmul.f32 0.5, %v6528_v20  ;;  %v2045_v60 = vmul.f32 0.7978846, %v1985_v2 }
 0x2c3   :  { %v4502_v23 = vpop.eup %4501  ;;  %v2153_v19 = vadd.f32 1.0, %v4500_v7  ;;  %4517 = vtanh.f32 %v2043_v38  ;;  %v1986_v5 = vadd.f32 %v1926_v31, %v6647_v16  ;;  %v2044_v41 = vmul.f32 0.7978846, %v1984_v26 }
 0x2c4   :  { %v2212_v14 = vmul.f32 %v2152_v21, %v1732_v25  ;;  %v2154_v46 = vadd.f32 1.0, %v4502_v23  ;;  %4519 = vtanh.f32 %v2042_v4  ;;  %v1737_v58 = vmul.f32 0.5, %v6541_v15 }
 0x2c5   :  { %v4504_v28 = vpop.eup %4503  ;;  %v2213_v53 = vmul.f32 %v2153_v19, %v1733_v47  ;;  %v1736_v20 = vmul.f32 0.5, %v6505_v45  ;;  %4521 = vtanh.f32 %v2045_v60  ;;  %v2046_v18 = vmul.f32 0.7978846, %v1986_v5 }
 0x2c6   :  { %v4506_v50 = vpop.eup %4505  ;;  %4248 = vmatmul.mubr.msk.f32.gmra.mrb[44].mxu1 %vm215_vm0, %v2212_v14  ;;  %v2155_v49 = vadd.f32 1.0, %v4504_v28  ;;  %v2214_v56 = vmul.f32 %v2154_v46, %v1734_v9  ;;  %4523 = vtanh.f32 %v2044_v41  ;;  %v1739_v59 = vmul.f32 0.5, %v6560_v32 }
 0x2c7   :  { %v4508_v11 = vpop.eup %4507  ;;  %4250 = vmatprep.mubr.msk.f32.mxu1 %vm215_vm0, %v2213_v53  ;;  %v2156_v63 = vadd.f32 1.0, %v4506_v50  ;;  %v1738_v15 = vmul.f32 0.5, %v6537_v48  ;;  %4525 = vtanh.f32 %v2046_v18  ;;  %v1741_v21 = vmul.f32 0.5, %v6585_v43  ;;  %v8053_v18 = vld [vmem:[#allocation7_spill] sm:$0xff] }
 0x2c8   :  { %v4510_v1 = vpop.eup %4509  ;;  %v2215_v17 = vmul.f32 %v2155_v49, %v1735_v62  ;;  %v2157_v12 = vadd.f32 1.0, %v4508_v11  ;;  %v1740_v38 = vmul.f32 0.5, %v6553_v40  ;;  %v1743_v14 = vmul.f32 0.5, %v6606_v3 }
 0x2c9   :  { %v4512_v51 = vpop.eup %4511  ;;  %v2216_v27 = vmul.f32 %v2156_v63, %v1736_v20  ;;  %v2158_v37 = vadd.f32 1.0, %v4510_v1  ;;  %v1742_v46 = vmul.f32 0.5, %v6580_v34  ;;  %v1745_v50 = vmul.f32 0.5, %v6630_v52  ;;  %v6704_v52 = vld [vmem:[%s7863_s7] ss:$0 sm:$0xff] }
 0x2ca   :  { %4251 = vmatmul.mubr.msk.f32.gmra.mrb[46].mxu1 %vm215_vm0, %v2214_v56  ;;  %v2217_v35 = vmul.f32 %v2157_v12, %v1737_v58  ;;  %v2159_v24 = vadd.f32 1.0, %v4512_v51  ;;  %v1744_v62 = vmul.f32 0.5, %v6620_v33  ;;  %v1746_v34 = vmul.f32 0.5, %v6647_v16  ;;  %v8051_v56 = vld [vmem:[#allocation11_spill] sm:$0xff]  ;;  %v8052_v16 = vld [vmem:[#allocation10_spill] sm:$0xff] }
 0x2cb   :  { %4253 = vmatprep.mubr.msk.f32.mxu1 %vm215_vm0, %v2215_v17  ;;  %v4514_v61 = vpop.eup %4513  ;;  %v2218_v47 = vmul.f32 %v2158_v37, %v1738_v15 }
 0x2cc   :  { %v4516_v0 = vpop.eup %4515  ;;  %v2219_v45 = vmul.f32 %v2159_v24, %v1739_v59  ;;  %v2161_v26 = vadd.f32 1.0, %v4514_v61 }
 0x2cd   :  { %v4518_v25 = vpop.eup %4517  ;;  %v2160_v7 = vadd.f32 1.0, %v4516_v0 }
 0x2ce   :  { %4254 = vmatmul.mubr.msk.f32.gmra.mrb[48].mxu1 %vm215_vm0, %v2216_v27  ;;  %v4520_v2 = vpop.eup %4519  ;;  %v2221_v32 = vmul.f32 %v2161_v26, %v1741_v21  ;;  %v2163_v23 = vadd.f32 1.0, %v4518_v25  ;;  %v8054_v27 = vld [vmem:[#allocation4_spill] sm:$0xff] }
 0x2cf   :  { %4256 = vmatprep.mubr.msk.f32.mxu1 %vm215_vm0, %v2217_v35  ;;  %v4522_v48 = vpop.eup %4521  ;;  %v2220_v31 = vmul.f32 %v2160_v7, %v1740_v38  ;;  %v2162_v19 = vadd.f32 1.0, %v4520_v2  ;;  %v8056_v2 = vld [vmem:[#allocation6_spill] sm:$0xff] }
 0x2d0   :  { %v4524_v4 = vpop.eup %4523  ;;  %v2223_v43 = vmul.f32 %v2163_v23, %v1743_v14  ;;  %v2165_v28 = vadd.f32 1.0, %v4522_v48 }
 0x2d1   :  { %v2222_v53 = vmul.f32 %v2162_v19, %v1742_v46  ;;  %v2164_v40 = vadd.f32 1.0, %v4524_v4  ;;  %v4526_v9 = vpop.eup %4525  ;;  %v8057_v4 = vld [vmem:[#allocation13_spill] sm:$0xff]  ;;  %v8058_v46 = vld [vmem:[#allocation12_spill] sm:$0xff] }
 0x2d2   :  { %4257 = vmatmul.mubr.msk.f32.gmra.mrb[50].mxu1 %vm215_vm0, %v2218_v47  ;;  %v2225_v3 = vmul.f32 %v2165_v28, %v1745_v50  ;;  %v2166_v60 = vadd.f32 1.0, %v4526_v9  ;;  %v8055_v47 = vld [vmem:[#allocation8_spill] sm:$0xff] }
 0x2d3   :  { %4259 = vmatprep.mubr.msk.f32.mxu1 %vm215_vm0, %v2219_v45  ;;  %v2224_v49 = vmul.f32 %v2164_v40, %v1744_v62 }
 0x2d4   :  { %v2226_v11 = vmul.f32 %v2166_v60, %v1746_v34  ;;  %v8060_v60 = vld [vmem:[#allocation14_spill] sm:$0xff] }
 0x2d6   :  { %4260 = vmatmul.mubr.msk.f32.gmra.mrb[52].mxu1 %vm215_vm0, %v2220_v31 }
 0x2d7   :  { %4262 = vmatprep.mubr.msk.f32.mxu1 %vm215_vm0, %v2221_v32 }
 0x2da   :  { %4263 = vmatmul.mubr.msk.f32.gmra.mrb[54].mxu1 %vm215_vm0, %v2222_v53 }
 0x2db   :  { %4265 = vmatprep.mubr.msk.f32.mxu1 %vm215_vm0, %v2223_v43 }
 0x2de   :  { %4266 = vmatmul.mubr.msk.f32.gmra.mrb[56].mxu1 %vm215_vm0, %v2224_v49 }
 0x2df   :  { %4268 = vmatprep.mubr.msk.f32.mxu1 %vm215_vm0, %v2225_v3  ;;  %v8059_v3 = vld [vmem:[#allocation15_spill] sm:$0xff] }
 0x2e2   :  { %4269 = vmatmul.mubr.msk.f32.gmra.mrb[58].mxu1 %vm215_vm0, %v2226_v11 }
 0x306   :  { %v4183_v33 = vpop.f32.mrb[0].mxu1 }
 0x307   :  { %v2490_v5 = vadd.f32 %v4183_v33, %v6704_v52  ;;  %v2484_v41 = vpop.f32.mrb[1].mxu1 }
 0x308   :  { %v2485_v1 = vadd.f32 %v6704_v52, %v2484_v41 }
 0x309   :  { %v6709_v17 = vadd.f32 %v2490_v5, %v8051_v56 }
 0x30a   :  { %v6712_v63 = vadd.f32 %v2485_v1, %v8052_v16  ;;  %v8061_v16 = vld [vmem:[#allocation17_spill] sm:$0xff] }
 0x30b   :  { %v2846_v12 = vsel %vm215_vm0, %v6709_v17, 0.0 }
 0x30c   :  { %2847 = vadd.xlane.f32.xlu1 %v2846_v12  ;;  %v2843_v51 = vsel %vm215_vm0, %v6712_v63, 0.0 }
 0x30d   :  { %2844 = vadd.xlane.f32.xlu0 %v2843_v51  ;;  %v8062_v51 = vld [vmem:[#allocation16_spill] sm:$0xff] }
 0x30e   :  { %v4186_v58 = vpop.f32.mrb[2].mxu1 }
 0x30f   :  { %v2500_v20 = vadd.f32 %v4186_v58, %v6704_v52  ;;  %v2494_v35 = vpop.f32.mrb[3].mxu1 }
 0x310   :  { %v2495_v24 = vadd.f32 %v6704_v52, %v2494_v35 }
 0x311   :  { %v6721_v61 = vadd.f32 %v2500_v20, %v8053_v18 }
 0x312   :  { %v6724_v37 = vadd.f32 %v2495_v24, %v8054_v27 }
 0x313   :  { %v2852_v0 = vsel %vm215_vm0, %v6721_v61, 0.0 }
 0x314   :  { %2853 = vadd.xlane.f32.xlu1 %v2852_v0  ;;  %v2849_v59 = vsel %vm215_vm0, %v6724_v37, 0.0 }
 0x315   :  { %2850 = vadd.xlane.f32.xlu0 %v2849_v59 }
 0x316   :  { %v4189_v15 = vpop.f32.mrb[4].mxu1 }
 0x317   :  { %v2510_v45 = vadd.f32 %v4189_v15, %v6704_v52  ;;  %v2504_v26 = vpop.f32.mrb[5].mxu1  ;;  %v8063_v15 = vld [vmem:[#allocation18_spill] sm:$0xff] }
 0x318   :  { %v2505_v25 = vadd.f32 %v6704_v52, %v2504_v26 }
 0x319   :  { %v6733_v7 = vadd.f32 %v2510_v45, %v8055_v47 }
 0x31a   :  { %v6736_v21 = vadd.f32 %v2505_v25, %v8056_v2 }
 0x31b   :  { %v2858_v38 = vsel %vm215_vm0, %v6733_v7, 0.0 }
 0x31c   :  { %2859 = vadd.xlane.f32.xlu1 %v2858_v38  ;;  %v2855_v32 = vsel %vm215_vm0, %v6736_v21, 0.0 }
 0x31d   :  { %2856 = vadd.xlane.f32.xlu0 %v2855_v32 }
 0x31e   :  { %v4192_v23 = vpop.f32.mrb[6].mxu1 }
 0x31f   :  { %v2520_v48 = vadd.f32 %v4192_v23, %v6704_v52  ;;  %v2514_v31 = vpop.f32.mrb[7].mxu1 }
 0x320   :  { %v2515_v19 = vadd.f32 %v6704_v52, %v2514_v31 }
 0x321   :  { %v6745_v14 = vadd.f32 %v2520_v48, %v8057_v4 }
 0x322   :  { %v6748_v43 = vadd.f32 %v2515_v19, %v8058_v46 }
 0x323   :  { %v2864_v28 = vsel %vm215_vm0, %v6745_v14, 0.0 }
 0x324   :  { %2865 = vadd.xlane.f32.xlu1 %v2864_v28  ;;  %v2861_v53 = vsel %vm215_vm0, %v6748_v43, 0.0 }
 0x325   :  { %2862 = vadd.xlane.f32.xlu0 %v2861_v53  ;;  %v8064_v53 = vld [vmem:[#allocation19_spill] sm:$0xff] }
 0x326   :  { %v4195_v40 = vpop.f32.mrb[8].mxu1 }
 0x327   :  { %v2530_v9 = vadd.f32 %v4195_v40, %v6704_v52  ;;  %v2524_v50 = vpop.f32.mrb[9].mxu1 }
 0x328   :  { %v2525_v62 = vadd.f32 %v6704_v52, %v2524_v50 }
 0x329   :  { %v6757_v49 = vadd.f32 %v2530_v9, %v8059_v3 }
 0x32a   :  { %v6760_v34 = vadd.f32 %v2525_v62, %v8060_v60 }
 0x32b   :  { %v2870_v11 = vsel %vm215_vm0, %v6757_v49, 0.0 }
 0x32c   :  { %2871 = vadd.xlane.f32.xlu1 %v2870_v11  ;;  %v2867_v33 = vsel %vm215_vm0, %v6760_v34, 0.0 }
 0x32d   :  { %2868 = vadd.xlane.f32.xlu0 %v2867_v33 }
 0x32e   :  { %v4198_v5 = vpop.f32.mrb[10].mxu1 }
 0x32f   :  { %v2540_v41 = vadd.f32 %v4198_v5, %v6704_v52  ;;  %v2534_v1 = vpop.f32.mrb[11].mxu1 }
 0x330   :  { %v2535_v56 = vadd.f32 %v6704_v52, %v2534_v1 }
 0x331   :  { %v6769_v12 = vadd.f32 %v2540_v41, %v8061_v16 }
 0x332   :  { %v6772_v58 = vadd.f32 %v2535_v56, %v8062_v51 }
 0x333   :  { %v2876_v20 = vsel %vm215_vm0, %v6769_v12, 0.0 }
 0x334   :  { %2877 = vadd.xlane.f32.xlu1 %v2876_v20  ;;  %v2873_v35 = vsel %vm215_vm0, %v6772_v58, 0.0 }
 0x335   :  { %2874 = vadd.xlane.f32.xlu0 %v2873_v35 }
 0x336   :  { %v4201_v24 = vpop.f32.mrb[12].mxu1 }
 0x337   :  { %v2550_v18 = vadd.f32 %v4201_v24, %v6704_v52  ;;  %v2544_v27 = vpop.f32.mrb[13].mxu1 }
 0x338   :  { %v2545_v0 = vadd.f32 %v6704_v52, %v2544_v27 }
 0x339   :  { %v6781_v59 = vadd.f32 %v2550_v18, %v5796_v10 }
 0x33a   :  { %v6784_v45 = vadd.f32 %v2545_v0, %v8063_v15 }
 0x33b   :  { %v2882_v26 = vsel %vm215_vm0, %v6781_v59, 0.0 }
 0x33c   :  { %2883 = vadd.xlane.f32.xlu1 %v2882_v26  ;;  %v2879_v25 = vsel %vm215_vm0, %v6784_v45, 0.0 }
 0x33d   :  { %2880 = vadd.xlane.f32.xlu0 %v2879_v25 }
 0x33e   :  { %v4204_v47 = vpop.f32.mrb[14].mxu1 }
 0x33f   :  { %v2560_v2 = vadd.f32 %v4204_v47, %v6704_v52  ;;  %v2554_v38 = vpop.f32.mrb[15].mxu1 }
 0x340   :  { %v2555_v32 = vadd.f32 %v6704_v52, %v2554_v38 }
 0x341   :  { %v6793_v10 = vadd.f32 %v2560_v2, %v5810_v39 }
 0x342   :  { %v6796_v23 = vadd.f32 %v2555_v32, %v5803_v6 }
 0x343   :  { %v2888_v48 = vsel %vm215_vm0, %v6793_v10, 0.0 }
 0x344   :  { %2889 = vadd.xlane.f32.xlu1 %v2888_v48  ;;  %v2885_v31 = vsel %vm215_vm0, %v6796_v23, 0.0 }
 0x345   :  { %2886 = vadd.xlane.f32.xlu0 %v2885_v31 }
 0x346   :  { %v4207_v19 = vpop.f32.mrb[16].mxu1 }
 0x347   :  { %v2570_v4 = vadd.f32 %v4207_v19, %v6704_v52  ;;  %v2564_v46 = vpop.f32.mrb[17].mxu1 }
 0x348   :  { %v2565_v28 = vadd.f32 %v6704_v52, %v2564_v46 }
 0x349   :  { %v6805_v39 = vadd.f32 %v2570_v4, %v5824_v8 }
 0x34a   :  { %v6808_v6 = vadd.f32 %v2565_v28, %v8064_v53 }
 0x34b   :  { %v2894_v40 = vsel %vm215_vm0, %v6805_v39, 0.0 }
 0x34c   :  { %2895 = vadd.xlane.f32.xlu1 %v2894_v40  ;;  %v2891_v9 = vsel %vm215_vm0, %v6808_v6, 0.0 }
 0x34d   :  { %2892 = vadd.xlane.f32.xlu0 %v2891_v9 }
 0x34e   :  { %v4210_v50 = vpop.f32.mrb[18].mxu1 }
 0x34f   :  { %v2580_v62 = vadd.f32 %v4210_v50, %v6704_v52  ;;  %v2574_v3 = vpop.f32.mrb[19].mxu1 }
 0x350   :  { %v2575_v60 = vadd.f32 %v6704_v52, %v2574_v3  ;;  %v8066_v3 = vld [vmem:[#allocation20_spill] sm:$0xff] }
 0x351   :  { %v6817_v8 = vadd.f32 %v2580_v62, %v5839_v54  ;;  %v8065_v62 = vld [vmem:[#allocation21_spill] sm:$0xff] }
 0x352   :  { %v6820_v11 = vadd.f32 %v2575_v60, %v5831_v36 }
 0x353   :  { %v2900_v33 = vsel %vm215_vm0, %v6817_v8, 0.0 }
 0x354   :  { %v4213_v5 = vpop.f32.mrb[20].mxu1  ;;  %2901 = vadd.xlane.f32.xlu1 %v2900_v33  ;;  %v2897_v41 = vsel %vm215_vm0, %v6820_v11, 0.0 }
 0x355   :  { %v2590_v1 = vadd.f32 %v4213_v5, %v6704_v52  ;;  %v2584_v56 = vpop.f32.mrb[21].mxu1  ;;  %2898 = vadd.xlane.f32.xlu0 %v2897_v41 }
 0x356   :  { %v2585_v16 = vadd.f32 %v6704_v52, %v2584_v56 }
 0x357   :  { %v6829_v54 = vadd.f32 %v2590_v1, %v5853_v55 }
 0x358   :  { %v6832_v36 = vadd.f32 %v2585_v16, %v5849_v44  ;;  %v4216_v51 = vpop.f32.mrb[22].mxu1  ;;  %v8067_v16 = vld [vmem:[#allocation22_spill] sm:$0xff] }
 0x359   :  { %v2600_v20 = vadd.f32 %v4216_v51, %v6704_v52  ;;  %v2594_v35 = vpop.f32.mrb[23].mxu1  ;;  %v2906_v24 = vsel %vm215_vm0, %v6829_v54, 0.0 }
 0x35a   :  { %v2595_v18 = vadd.f32 %v6704_v52, %v2594_v35  ;;  %2907 = vadd.xlane.f32.xlu1 %v2906_v24  ;;  %v2903_v27 = vsel %vm215_vm0, %v6832_v36, 0.0 }
 0x35b   :  { %v6841_v0 = vadd.f32 %v2600_v20, %v5867_v29  ;;  %2904 = vadd.xlane.f32.xlu0 %v2903_v27  ;;  %v8068_v20 = vld [vmem:[#allocation23_spill] sm:$0xff] }
 0x35c   :  { %v6844_v44 = vadd.f32 %v2595_v18, %v5863_v57  ;;  %v4219_v26 = vpop.f32.mrb[24].mxu1 }
 0x35d   :  { %v2912_v55 = vsel %vm215_vm0, %v6841_v0, 0.0  ;;  %v2610_v25 = vadd.f32 %v4219_v26, %v6704_v52  ;;  %v2604_v47 = vpop.f32.mrb[25].mxu1 }
 0x35e   :  { %2913 = vadd.xlane.f32.xlu1 %v2912_v55  ;;  %v2909_v15 = vsel %vm215_vm0, %v6844_v44, 0.0  ;;  %v2605_v2 = vadd.f32 %v6704_v52, %v2604_v47 }
 0x35f   :  { %2910 = vadd.xlane.f32.xlu0 %v2909_v15  ;;  %v6853_v29 = vadd.f32 %v2610_v25, %v5879_v13  ;;  %v8069_v25 = vld [vmem:[#allocation24_spill] sm:$0xff] }
 0x360   :  { %v6856_v57 = vadd.f32 %v2605_v2, %v5876_v30  ;;  %v8070_v2 = vld [vmem:[#allocation3_spill] sm:$0xff] }
 0x361   :  { %v2918_v38 = vsel %vm215_vm0, %v6853_v29, 0.0 }
 0x362   :  { %2919 = vadd.xlane.f32.xlu1 %v2918_v38  ;;  %v2915_v32 = vsel %vm215_vm0, %v6856_v57, 0.0 }
 0x363   :  { %2916 = vadd.xlane.f32.xlu0 %v2915_v32 }
 0x365   :  { %v4222_v48 = vpop.f32.mrb[26].mxu1 }
 0x366   :  { %v2620_v31 = vadd.f32 %v4222_v48, %v6704_v52  ;;  %v2614_v19 = vpop.f32.mrb[27].mxu1 }
 0x367   :  { %v2615_v4 = vadd.f32 %v6704_v52, %v2614_v19 }
 0x368   :  { %v6865_v13 = vadd.f32 %v2620_v31, %v5895_v22 }
 0x369   :  { %v6868_v30 = vadd.f32 %v2615_v4, %v5891_v42 }
 0x36a   :  { %v2924_v46 = vsel %vm215_vm0, %v6865_v13, 0.0 }
 0x36b   :  { %v4225_v28 = vpop.f32.mrb[28].mxu1  ;;  %2925 = vadd.xlane.f32.xlu1 %v2924_v46  ;;  %v2921_v53 = vsel %vm215_vm0, %v6868_v30, 0.0 }
 0x36c   :  { %v2630_v40 = vadd.f32 %v4225_v28, %v6704_v52  ;;  %v2624_v9 = vpop.f32.mrb[29].mxu1  ;;  %2922 = vadd.xlane.f32.xlu0 %v2921_v53  ;;  %v8071_v28 = vld [vmem:[#allocation25_spill] sm:$0xff] }
 0x36d   :  { %v2625_v50 = vadd.f32 %v6704_v52, %v2624_v9 }
 0x36e   :  { %v6877_v22 = vadd.f32 %v2630_v40, %v8065_v62  ;;  %v8072_v40 = vld [vmem:[#allocation2_spill] sm:$0xff] }
 0x36f   :  { %v6880_v42 = vadd.f32 %v2625_v50, %v8066_v3 }
 0x370   :  { %v2930_v60 = vsel %vm215_vm0, %v6877_v22, 0.0 }
 0x371   :  { %v4228_v33 = vpop.f32.mrb[30].mxu1  ;;  %2931 = vadd.xlane.f32.xlu1 %v2930_v60  ;;  %v2927_v5 = vsel %vm215_vm0, %v6880_v42, 0.0 }
 0x372   :  { %v2640_v41 = vadd.f32 %v4228_v33, %v6704_v52  ;;  %v2634_v1 = vpop.f32.mrb[31].mxu1  ;;  %2928 = vadd.xlane.f32.xlu0 %v2927_v5 }
 0x373   :  { %v2635_v56 = vadd.f32 %v6704_v52, %v2634_v1 }
 0x374   :  { %v6889_v51 = vadd.f32 %v2640_v41, %v8067_v16  ;;  %v8073_v41 = vld [vmem:[#allocation26_spill] sm:$0xff] }
 0x375   :  { %v6892_v35 = vadd.f32 %v2635_v56, %v8068_v20  ;;  %v8074_v56 = vld [vmem:[#allocation27_spill] sm:$0xff] }
 0x376   :  { %v2936_v24 = vsel %vm215_vm0, %v6889_v51, 0.0 }
 0x377   :  { %v4231_v18 = vpop.f32.mrb[32].mxu1  ;;  %2937 = vadd.xlane.f32.xlu1 %v2936_v24  ;;  %v2933_v27 = vsel %vm215_vm0, %v6892_v35, 0.0 }
 0x378   :  { %v2650_v55 = vadd.f32 %v4231_v18, %v6704_v52  ;;  %v2644_v15 = vpop.f32.mrb[33].mxu1  ;;  %2934 = vadd.xlane.f32.xlu0 %v2933_v27 }
 0x379   :  { %v2645_v26 = vadd.f32 %v6704_v52, %v2644_v15 }
 0x37a   :  { %v6901_v47 = vadd.f32 %v2650_v55, %v8069_v25 }
 0x37b   :  { %v6904_v38 = vadd.f32 %v2645_v26, %v8070_v2  ;;  %v8075_v26 = vld [vmem:[#allocation28_spill] sm:$0xff]  ;;  %v8076_v2 = vld [vmem:[#allocation5_spill] sm:$0xff] }
 0x37c   :  { %v2942_v32 = vsel %vm215_vm0, %v6901_v47, 0.0 }
 0x37d   :  { %2943 = vadd.xlane.f32.xlu1 %v2942_v32  ;;  %v2939_v48 = vsel %vm215_vm0, %v6904_v38, 0.0 }
 0x37e   :  { %2940 = vadd.xlane.f32.xlu0 %v2939_v48 }
 0x37f   :  { %v4234_v31 = vpop.f32.mrb[34].mxu1 }
 0x380   :  { %v2660_v19 = vadd.f32 %v4234_v31, %v6704_v52  ;;  %v2654_v4 = vpop.f32.mrb[35].mxu1 }
 0x381   :  { %v2655_v46 = vadd.f32 %v6704_v52, %v2654_v4 }
 0x382   :  { %v6913_v53 = vadd.f32 %v2660_v19, %v8071_v28 }
 0x383   :  { %v6916_v9 = vadd.f32 %v2655_v46, %v8072_v40  ;;  %v8077_v40 = vld [vmem:[#allocation30_spill] sm:$0xff] }
 0x384   :  { %v2948_v50 = vsel %vm215_vm0, %v6913_v53, 0.0 }
 0x385   :  { %v4237_v62 = vpop.f32.mrb[36].mxu1  ;;  %2949 = vadd.xlane.f32.xlu1 %v2948_v50  ;;  %v2945_v3 = vsel %vm215_vm0, %v6916_v9, 0.0 }
 0x386   :  { %v2670_v60 = vadd.f32 %v4237_v62, %v6704_v52  ;;  %v2664_v33 = vpop.f32.mrb[37].mxu1  ;;  %2946 = vadd.xlane.f32.xlu0 %v2945_v3  ;;  %v8078_v62 = vld [vmem:[#allocation29_spill] sm:$0xff] }
 0x387   :  { %v2665_v5 = vadd.f32 %v6704_v52, %v2664_v33 }
 0x388   :  { %v6925_v1 = vadd.f32 %v2670_v60, %v8073_v41 }
 0x389   :  { %v6928_v16 = vadd.f32 %v2665_v5, %v8074_v56 }
 0x38a   :  { %v4240_v20 = vpop.f32.mrb[38].mxu1  ;;  %v2954_v24 = vsel %vm215_vm0, %v6925_v1, 0.0 }
 0x38b   :  { %v2680_v18 = vadd.f32 %v4240_v20, %v6704_v52  ;;  %v2674_v27 = vpop.f32.mrb[39].mxu1  ;;  %2955 = vadd.xlane.f32.xlu1 %v2954_v24  ;;  %v2951_v55 = vsel %vm215_vm0, %v6928_v16, 0.0  ;;  %v8079_v24 = vld [vmem:[#allocation31_spill] sm:$0xff] }
 0x38c   :  { %v2675_v15 = vadd.f32 %v6704_v52, %v2674_v27  ;;  %2952 = vadd.xlane.f32.xlu0 %v2951_v55  ;;  %v8080_v27 = vld [vmem:[#allocation32_spill] sm:$0xff] }
 0x38d   :  { %v6937_v25 = vadd.f32 %v2680_v18, %v8075_v26 }
 0x38e   :  { %v6940_v32 = vadd.f32 %v2675_v15, %v8076_v2 }
 0x38f   :  { %v4243_v48 = vpop.f32.mrb[40].mxu1  ;;  %v2960_v31 = vsel %vm215_vm0, %v6937_v25, 0.0 }
 0x390   :  { %v2690_v19 = vadd.f32 %v4243_v48, %v6704_v52  ;;  %v2684_v4 = vpop.f32.mrb[41].mxu1  ;;  %2961 = vadd.xlane.f32.xlu1 %v2960_v31  ;;  %v2957_v46 = vsel %vm215_vm0, %v6940_v32, 0.0 }
 0x391   :  { %v2685_v28 = vadd.f32 %v6704_v52, %v2684_v4  ;;  %2958 = vadd.xlane.f32.xlu0 %v2957_v46  ;;  %v8082_v4 = vld [vmem:[#allocation34_spill] sm:$0xff] }
 0x392   :  { %v6949_v50 = vadd.f32 %v2690_v19, %v8077_v40 }
 0x393   :  { %v6952_v3 = vadd.f32 %v2685_v28, %v8078_v62  ;;  %v4246_v60 = vpop.f32.mrb[42].mxu1  ;;  %v8084_v28 = vld [vmem:[#allocation33_spill] sm:$0xff] }
 0x394   :  { %v2700_v33 = vadd.f32 %v4246_v60, %v6704_v52  ;;  %v2694_v5 = vpop.f32.mrb[43].mxu1  ;;  %v2966_v41 = vsel %vm215_vm0, %v6949_v50, 0.0 }
 0x395   :  { %v2695_v56 = vadd.f32 %v6704_v52, %v2694_v5  ;;  %2967 = vadd.xlane.f32.xlu1 %v2966_v41  ;;  %v2963_v20 = vsel %vm215_vm0, %v6952_v3, 0.0 }
 0x396   :  { %v6961_v18 = vadd.f32 %v2700_v33, %v8079_v24  ;;  %2964 = vadd.xlane.f32.xlu0 %v2963_v20  ;;  %v8086_v20 = vld [vmem:[#allocation36_spill] sm:$0xff] }
 0x397   :  { %v6964_v55 = vadd.f32 %v2695_v56, %v8080_v27  ;;  %v8088_v27 = vld [vmem:[#allocation35_spill] sm:$0xff] }
 0x398   :  { %v2972_v15 = vsel %vm215_vm0, %v6961_v18, 0.0 }
 0x399   :  { %8081 = vst [vmem:[#allocation11_spill] sm:$0xff] %v6964_v55  ;;  %v4249_v26 = vpop.f32.mrb[44].mxu1  ;;  %2973 = vadd.xlane.f32.xlu1 %v2972_v15  ;;  %v2969_v2 = vsel %vm215_vm0, %v6964_v55, 0.0 }
 0x39a   :  { %v2710_v48 = vadd.f32 %v4249_v26, %v6704_v52  ;;  %v2704_v31 = vpop.f32.mrb[45].mxu1  ;;  %2970 = vadd.xlane.f32.xlu0 %v2969_v2 }
 0x39b   :  { %v2705_v19 = vadd.f32 %v6704_v52, %v2704_v31 }
 0x39c   :  { %v6973_v46 = vadd.f32 %v2710_v48, %v8082_v4 }
 0x39d   :  { %v6976_v40 = vadd.f32 %v2705_v19, %v8084_v28  ;;  %v4252_v62 = vpop.f32.mrb[46].mxu1  ;;  %v8090_v28 = vld [vmem:[#allocation38_spill] sm:$0xff] }
 0x39e   :  { %8083 = vst [vmem:[#allocation10_spill] sm:$0xff] %v6973_v46  ;;  %v2720_v60 = vadd.f32 %v4252_v62, %v6704_v52  ;;  %v2714_v33 = vpop.f32.mrb[47].mxu1  ;;  %v2978_v5 = vsel %vm215_vm0, %v6973_v46, 0.0 }
 0x39f   :  { %8085 = vst [vmem:[#allocation7_spill] sm:$0xff] %v6976_v40  ;;  %v2715_v41 = vadd.f32 %v6704_v52, %v2714_v33  ;;  %2979 = vadd.xlane.f32.xlu1 %v2978_v5  ;;  %v2975_v56 = vsel %vm215_vm0, %v6976_v40, 0.0 }
 0x3a0   :  { %v6985_v24 = vadd.f32 %v2720_v60, %v8086_v20  ;;  %2976 = vadd.xlane.f32.xlu0 %v2975_v56  ;;  %v8092_v60 = vld [vmem:[#allocation37_spill] sm:$0xff] }
 0x3a1   :  { %v6988_v15 = vadd.f32 %v2715_v41, %v8088_v27  ;;  %v4255_v26 = vpop.f32.mrb[48].mxu1 }
 0x3a2   :  { %8087 = vst [vmem:[#allocation4_spill] sm:$0xff] %v6985_v24  ;;  %v2730_v2 = vadd.f32 %v4255_v26, %v6704_v52  ;;  %v2724_v48 = vpop.f32.mrb[49].mxu1  ;;  %v2984_v31 = vsel %vm215_vm0, %v6985_v24, 0.0 }
 0x3a3   :  { %8089 = vst [vmem:[#allocation8_spill] sm:$0xff] %v6988_v15  ;;  %v2725_v19 = vadd.f32 %v6704_v52, %v2724_v48  ;;  %2985 = vadd.xlane.f32.xlu1 %v2984_v31  ;;  %v2981_v4 = vsel %vm215_vm0, %v6988_v15, 0.0  ;;  %v8094_v48 = vld [vmem:[#allocation40_spill] sm:$0xff]  ;;  %v8096_v31 = vld [vmem:[#allocation39_spill] sm:$0xff] }
 0x3a4   :  { %v6997_v62 = vadd.f32 %v2730_v2, %v8090_v28  ;;  %2982 = vadd.xlane.f32.xlu0 %v2981_v4 }
 0x3a5   :  { %v7000_v33 = vadd.f32 %v2725_v19, %v8092_v60  ;;  %v4258_v5 = vpop.f32.mrb[50].mxu1 }
 0x3a6   :  { %8091 = vst [vmem:[#allocation6_spill] sm:$0xff] %v6997_v62  ;;  %v2740_v41 = vadd.f32 %v4258_v5, %v6704_v52  ;;  %v2734_v56 = vpop.f32.mrb[51].mxu1  ;;  %v2990_v20 = vsel %vm215_vm0, %v6997_v62, 0.0 }
 0x3a7   :  { %8093 = vst [vmem:[#allocation13_spill] sm:$0xff] %v7000_v33  ;;  %v2735_v27 = vadd.f32 %v6704_v52, %v2734_v56  ;;  %2991 = vadd.xlane.f32.xlu1 %v2990_v20  ;;  %v2987_v26 = vsel %vm215_vm0, %v7000_v33, 0.0  ;;  %v8098_v33 = vld [vmem:[#allocation42_spill] sm:$0xff] }
 0x3a8   :  { %v7009_v2 = vadd.f32 %v2740_v41, %v8094_v48  ;;  %2988 = vadd.xlane.f32.xlu0 %v2987_v26  ;;  %v8100_v26 = vld [vmem:[#allocation41_spill] sm:$0xff] }
 0x3a9   :  { %v7012_v19 = vadd.f32 %v2735_v27, %v8096_v31  ;;  %v4261_v4 = vpop.f32.mrb[52].mxu1  ;;  %v2848_v31 = vpop.xlane.xlu1 %2847 }
 0x3aa   :  { %8095 = vst [vmem:[#allocation12_spill] sm:$0xff] %v7009_v2  ;;  %v2750_v28 = vadd.f32 %v4261_v4, %v6704_v52  ;;  %v2744_v60 = vpop.f32.mrb[53].mxu1  ;;  %v2996_v5 = vsel %vm215_vm0, %v7009_v2, 0.0  ;;  %v3024_v15 = vmul.f32 0.03125, %v2848_v31 }
 0x3ab   :  { %8097 = vst [vmem:[#allocation15_spill] sm:$0xff] %v7012_v19  ;;  %v2745_v56 = vadd.f32 %v6704_v52, %v2744_v60  ;;  %2997 = vadd.xlane.f32.xlu1 %v2996_v5  ;;  %v2993_v20 = vsel %vm215_vm0, %v7012_v19, 0.0  ;;  %v2845_v60 = vpop.xlane.xlu0 %2844 }
 0x3ac   :  { %v7021_v41 = vadd.f32 %v2750_v28, %v8098_v33  ;;  %2994 = vadd.xlane.f32.xlu0 %v2993_v20  ;;  %v8102_v28 = vld [vmem:[#allocation44_spill] sm:$0xff]  ;;  %v3023_v40 = vmul.f32 0.03125, %v2845_v60  ;;  %v7051_v46 = vsub.f32 %v6709_v17, %v3024_v15  ;;  %v8109_v17 = vld [vmem:[#allocation46_spill] sm:$0xff] }
 0x3ad   :  { %v7024_v27 = vadd.f32 %v2745_v56, %v8100_v26  ;;  %v4264_v48 = vpop.f32.mrb[54].mxu1  ;;  %v8104_v56 = vld [vmem:[#allocation43_spill] sm:$0xff] }
 0x3ae   :  { %8099 = vst [vmem:[#allocation14_spill] sm:$0xff] %v7021_v41  ;;  %v2760_v4 = vadd.f32 %v4264_v48, %v6704_v52  ;;  %v2754_v62 = vpop.f32.mrb[55].mxu1  ;;  %v3002_v2 = vsel %vm215_vm0, %v7021_v41, 0.0  ;;  %v2854_v48 = vpop.xlane.xlu1 %2853 }
 0x3af   :  { %8101 = vst [vmem:[#allocation17_spill] sm:$0xff] %v7024_v27  ;;  %v2755_v5 = vadd.f32 %v6704_v52, %v2754_v62  ;;  %3003 = vadd.xlane.f32.xlu1 %v3002_v2  ;;  %v2999_v33 = vsel %vm215_vm0, %v7024_v27, 0.0  ;;  %v2851_v2 = vpop.xlane.xlu0 %2850 }
 0x3b0   :  { %v7033_v20 = vadd.f32 %v2760_v4, %v8102_v28  ;;  %3000 = vadd.xlane.f32.xlu0 %v2999_v33  ;;  %v8106_v33 = vld [vmem:[#allocation9_spill] sm:$0xff] }
 0x3b1   :  { %v7036_v26 = vadd.f32 %v2755_v5, %v8104_v56  ;;  %v4267_v19 = vpop.f32.mrb[56].mxu1  ;;  %v8108_v28 = vld [vmem:[#allocation45_spill] sm:$0xff] }
 0x3b2   :  { %8103 = vst [vmem:[#allocation16_spill] sm:$0xff] %v7033_v20  ;;  %v2770_v24 = vadd.f32 %v4267_v19, %v6704_v52  ;;  %v2764_v41 = vpop.f32.mrb[57].mxu1  ;;  %v3008_v62 = vsel %vm215_vm0, %v7033_v20, 0.0  ;;  %v2860_v56 = vpop.xlane.xlu1 %2859 }
 0x3b3   :  { %8105 = vst [vmem:[#allocation18_spill] sm:$0xff] %v7036_v26  ;;  %v2765_v27 = vadd.f32 %v6704_v52, %v2764_v41  ;;  %3009 = vadd.xlane.f32.xlu1 %v3008_v62  ;;  %v3005_v4 = vsel %vm215_vm0, %v7036_v26, 0.0  ;;  %v3026_v41 = vmul.f32 0.03125, %v2854_v48  ;;  %v2857_v26 = vpop.xlane.xlu0 %2856  ;;  %v8110_v48 = vld [vmem:[#allocation47_spill] sm:$0xff] }
 0x3b4   :  { %v7045_v5 = vadd.f32 %v2770_v24, %v8106_v33  ;;  %3006 = vadd.xlane.f32.xlu0 %v3005_v4  ;;  %v7057_v24 = vsub.f32 %v6712_v63, %v3023_v40  ;;  %v3025_v33 = vmul.f32 0.03125, %v2851_v2  ;;  %v3144_v40 = vmul.f32 %v7051_v46, %v7051_v46 }
 0x3b5   :  { %v7048_v31 = vadd.f32 %v2765_v27, %v8108_v28  ;;  %v4270_v19 = vpop.f32.mrb[58].mxu1  ;;  %v3028_v28 = vmul.f32 0.03125, %v2860_v56  ;;  %v7069_v63 = vsub.f32 %v6721_v61, %v3026_v41 }
 0x3b6   :  { %8107 = vst [vmem:[#allocation19_spill] sm:$0xff] %v7045_v5  ;;  %v2780_v60 = vadd.f32 %v4270_v19, %v6704_v52  ;;  %v2774_v20 = vpop.f32.mrb[59].mxu1  ;;  %v3014_v62 = vsel %vm215_vm0, %v7045_v5, 0.0  ;;  %v3027_v5 = vmul.f32 0.03125, %v2857_v26  ;;  %v2866_v55 = vpop.xlane.xlu1 %2865  ;;  %v7076_v2 = vsub.f32 %v6724_v37, %v3025_v33 }
 0x3b7   :  { %v2775_v4 = vadd.f32 %v6704_v52, %v2774_v20  ;;  %3015 = vadd.xlane.f32.xlu1 %v3014_v62  ;;  %v3011_v27 = vsel %vm215_vm0, %v7048_v31, 0.0  ;;  %v2863_v20 = vpop.xlane.xlu0 %2862  ;;  %v3143_v26 = vmul.f32 %v7057_v24, %v7057_v24  ;;  %v7083_v61 = vsub.f32 %v6733_v7, %v3028_v28 }
 0x3b8   :  { %v7063_v15 = vadd.f32 %v2780_v60, %v8109_v17  ;;  %3012 = vadd.xlane.f32.xlu0 %v3011_v27  ;;  %v3030_v60 = vmul.f32 0.03125, %v2866_v55  ;;  %v7086_v41 = vsub.f32 %v6736_v21, %v3027_v5  ;;  %v3029_v62 = vmul.f32 0.03125, %v2863_v20 }
 0x3b9   :  { %v7066_v19 = vadd.f32 %v2775_v4, %v8110_v48  ;;  %v3206_v37 = vsel %vm215_vm0, %v3144_v40, 0.0  ;;  %v3146_v27 = vmul.f32 %v7069_v63, %v7069_v63  ;;  %v3203_v17 = vsel %vm215_vm0, %v3143_v26, 0.0 }
 0x3ba   :  { %v3020_v52 = vsel %vm215_vm0, %v7063_v15, 0.0  ;;  %v2872_v4 = vpop.xlane.xlu1 %2871  ;;  %v3145_v48 = vmul.f32 %v7076_v2, %v7076_v2  ;;  %v7095_v7 = vsub.f32 %v6745_v14, %v3030_v60  ;;  %v3148_v21 = vmul.f32 %v7083_v61, %v7083_v61 }
 0x3bb   :  { %3021 = vadd.xlane.f32.xlu1 %v3020_v52  ;;  %v3017_v56 = vsel %vm215_vm0, %v7066_v19, 0.0  ;;  %v2869_v33 = vpop.xlane.xlu0 %2868  ;;  %v3032_v55 = vmul.f32 0.03125, %v2872_v4  ;;  %v3147_v5 = vmul.f32 %v7086_v41, %v7086_v41  ;;  %v7102_v28 = vsub.f32 %v6748_v43, %v3029_v62 }
 0x3bc   :  { %3018 = vadd.xlane.f32.xlu0 %v3017_v56  ;;  %v3031_v52 = vmul.f32 0.03125, %v2869_v33  ;;  %v3212_v20 = vsel %vm215_vm0, %v3146_v27, 0.0  ;;  %v3209_v26 = vsel %vm215_vm0, %v3145_v48, 0.0  ;;  %v3218_v14 = vsel %vm215_vm0, %v3148_v21, 0.0 }
 0x3bd   :  { %v7108_v60 = vsub.f32 %v6757_v49, %v3032_v55  ;;  %v3150_v4 = vmul.f32 %v7095_v7, %v7095_v7  ;;  %v3215_v43 = vsel %vm215_vm0, %v3147_v5, 0.0  ;;  %v3149_v62 = vmul.f32 %v7102_v28, %v7102_v28 }
 0x3be   :  { %v7116_v27 = vsub.f32 %v6760_v34, %v3031_v52 }
 0x3bf   :  { %3207 = vadd.xlane.f32.xlu1 %v3206_v37  ;;  %v3224_v48 = vsel %vm215_vm0, %v3150_v4, 0.0  ;;  %v3152_v21 = vmul.f32 %v7108_v60, %v7108_v60 }
 0x3c0   :  { %3204 = vadd.xlane.f32.xlu0 %v3203_v17  ;;  %v3151_v34 = vmul.f32 %v7116_v27, %v7116_v27 }
 0x3c1   :  { %v2878_v40 = vpop.xlane.xlu1 %2877 }
 0x3c2   :  { %v2875_v56 = vpop.xlane.xlu0 %2874  ;;  %v3034_v37 = vmul.f32 0.03125, %v2878_v40  ;;  %v3221_v40 = vsel %vm215_vm0, %v3149_v62, 0.0 }
 0x3c3   :  { %3213 = vadd.xlane.f32.xlu1 %v3212_v20  ;;  %v3033_v33 = vmul.f32 0.03125, %v2875_v56  ;;  %v3230_v56 = vsel %vm215_vm0, %v3152_v21, 0.0 }
 0x3c4   :  { %3210 = vadd.xlane.f32.xlu0 %v3209_v26  ;;  %v7120_v49 = vsub.f32 %v6769_v12, %v3034_v37 }
 0x3c5   :  { %v7128_v52 = vsub.f32 %v6772_v58, %v3033_v33 }
 0x3c6   :  { %v3154_v26 = vmul.f32 %v7120_v49, %v7120_v49 }
 0x3c7   :  { %3219 = vadd.xlane.f32.xlu1 %v3218_v14  ;;  %v3227_v14 = vsel %vm215_vm0, %v3151_v34, 0.0  ;;  %v3153_v4 = vmul.f32 %v7128_v52, %v7128_v52 }
 0x3c8   :  { %3216 = vadd.xlane.f32.xlu0 %v3215_v43  ;;  %v3236_v43 = vsel %vm215_vm0, %v3154_v26, 0.0 }
 0x3c9   :  { %v2884_v17 = vpop.xlane.xlu1 %2883 }
 0x3ca   :  { %v3036_v55 = vmul.f32 0.03125, %v2884_v17  ;;  %v2881_v5 = vpop.xlane.xlu0 %2880  ;;  %v3233_v17 = vsel %vm215_vm0, %v3153_v4, 0.0 }
 0x3cb   :  { %v3035_v20 = vmul.f32 0.03125, %v2881_v5  ;;  %3225 = vadd.xlane.f32.xlu1 %v3224_v48 }
 0x3cc   :  { %3222 = vadd.xlane.f32.xlu0 %v3221_v40  ;;  %v7132_v12 = vsub.f32 %v6781_v59, %v3036_v55 }
 0x3cd   :  { %v7140_v37 = vsub.f32 %v6784_v45, %v3035_v20 }
 0x3ce   :  { %v3156_v59 = vmul.f32 %v7132_v12, %v7132_v12 }
 0x3cf   :  { %3231 = vadd.xlane.f32.xlu1 %v3230_v56  ;;  %v3155_v48 = vmul.f32 %v7140_v37, %v7140_v37 }
 0x3d0   :  { %3228 = vadd.xlane.f32.xlu0 %v3227_v14  ;;  %v3242_v5 = vsel %vm215_vm0, %v3156_v59, 0.0 }
 0x3d1   :  { %v2890_v58 = vpop.xlane.xlu1 %2889  ;;  %v3239_v34 = vsel %vm215_vm0, %v3155_v48, 0.0 }
 0x3d2   :  { %v3038_v62 = vmul.f32 0.03125, %v2890_v58  ;;  %v2887_v33 = vpop.xlane.xlu0 %2886 }
 0x3d3   :  { %v3037_v21 = vmul.f32 0.03125, %v2887_v33  ;;  %3237 = vadd.xlane.f32.xlu1 %v3236_v43 }
 0x3d4   :  { %v7149_v55 = vsub.f32 %v6793_v10, %v3038_v62  ;;  %3234 = vadd.xlane.f32.xlu0 %v3233_v17 }
 0x3d5   :  { %v7152_v45 = vsub.f32 %v6796_v23, %v3037_v21 }
 0x3d6   :  { %v3158_v40 = vmul.f32 %v7149_v55, %v7149_v55 }
 0x3d7   :  { %v3157_v20 = vmul.f32 %v7152_v45, %v7152_v45  ;;  %3243 = vadd.xlane.f32.xlu1 %v3242_v5 }
 0x3d8   :  { %3240 = vadd.xlane.f32.xlu0 %v3239_v34  ;;  %v3248_v26 = vsel %vm215_vm0, %v3158_v40, 0.0 }
 0x3d9   :  { %v2896_v56 = vpop.xlane.xlu1 %2895  ;;  %v3245_v23 = vsel %vm215_vm0, %v3157_v20, 0.0 }
 0x3da   :  { %v3040_v10 = vmul.f32 0.03125, %v2896_v56  ;;  %v2893_v14 = vpop.xlane.xlu0 %2892 }
 0x3db   :  { %v3039_v4 = vmul.f32 0.03125, %v2893_v14  ;;  %3249 = vadd.xlane.f32.xlu1 %v3248_v26 }
 0x3dc   :  { %v7163_v58 = vsub.f32 %v6805_v39, %v3040_v10  ;;  %3246 = vadd.xlane.f32.xlu0 %v3245_v23 }
 0x3dd   :  { %v7166_v43 = vsub.f32 %v6808_v6, %v3039_v4 }
 0x3de   :  { %v3160_v62 = vmul.f32 %v7163_v58, %v7163_v58 }
 0x3df   :  { %v3159_v59 = vmul.f32 %v7166_v43, %v7166_v43 }
 0x3e0   :  { %v3254_v33 = vsel %vm215_vm0, %v3160_v62, 0.0 }
 0x3e1   :  { %v2902_v17 = vpop.xlane.xlu1 %2901  ;;  %3255 = vadd.xlane.f32.xlu1 %v3254_v33  ;;  %v3251_v48 = vsel %vm215_vm0, %v3159_v59, 0.0 }
 0x3e2   :  { %v3042_v21 = vmul.f32 0.03125, %v2902_v17  ;;  %3252 = vadd.xlane.f32.xlu0 %v3251_v48  ;;  %v2899_v39 = vpop.xlane.xlu0 %2898 }
 0x3e3   :  { %v3041_v5 = vmul.f32 0.03125, %v2899_v39 }
 0x3e4   :  { %v7175_v6 = vsub.f32 %v6817_v8, %v3042_v21 }
 0x3e5   :  { %v7178_v40 = vsub.f32 %v6820_v11, %v3041_v5 }
 0x3e6   :  { %v3162_v34 = vmul.f32 %v7175_v6, %v7175_v6 }
 0x3e7   :  { %v2908_v20 = vpop.xlane.xlu1 %2907  ;;  %v3161_v56 = vmul.f32 %v7178_v40, %v7178_v40 }
 0x3e8   :  { %v3044_v10 = vmul.f32 0.03125, %v2908_v20  ;;  %v2905_v26 = vpop.xlane.xlu0 %2904  ;;  %v3260_v14 = vsel %vm215_vm0, %v3162_v34, 0.0 }
 0x3e9   :  { %v3043_v23 = vmul.f32 0.03125, %v2905_v26  ;;  %3261 = vadd.xlane.f32.xlu1 %v3260_v14  ;;  %v3257_v4 = vsel %vm215_vm0, %v3161_v56, 0.0 }
 0x3ea   :  { %v7187_v8 = vsub.f32 %v6829_v54, %v3044_v10  ;;  %3258 = vadd.xlane.f32.xlu0 %v3257_v4 }
 0x3eb   :  { %v7190_v11 = vsub.f32 %v6832_v36, %v3043_v23  ;;  %v2914_v62 = vpop.xlane.xlu1 %2913 }
 0x3ec   :  { %v3046_v59 = vmul.f32 0.03125, %v2914_v62  ;;  %v2911_v33 = vpop.xlane.xlu0 %2910  ;;  %v3164_v17 = vmul.f32 %v7187_v8, %v7187_v8 }
 0x3ed   :  { %v3045_v48 = vmul.f32 0.03125, %v2911_v33  ;;  %v3163_v21 = vmul.f32 %v7190_v11, %v7190_v11 }
 0x3ee   :  { %v7197_v39 = vsub.f32 %v6841_v0, %v3046_v59  ;;  %v3266_v54 = vsel %vm215_vm0, %v3164_v17, 0.0 }
 0x3ef   :  { %v7201_v5 = vsub.f32 %v6844_v44, %v3045_v48  ;;  %3267 = vadd.xlane.f32.xlu1 %v3266_v54  ;;  %v3263_v36 = vsel %vm215_vm0, %v3163_v21, 0.0  ;;  %v2920_v56 = vpop.xlane.xlu1 %2919 }
 0x3f0   :  { %3264 = vadd.xlane.f32.xlu0 %v3263_v36  ;;  %v3166_v34 = vmul.f32 %v7197_v39, %v7197_v39  ;;  %v3048_v0 = vmul.f32 0.03125, %v2920_v56  ;;  %v2917_v26 = vpop.xlane.xlu0 %2916 }
 0x3f1   :  { %v3165_v20 = vmul.f32 %v7201_v5, %v7201_v5  ;;  %v3047_v44 = vmul.f32 0.03125, %v2917_v26 }
 0x3f2   :  { %v3272_v10 = vsel %vm215_vm0, %v3166_v34, 0.0  ;;  %v7211_v23 = vsub.f32 %v6853_v29, %v3048_v0 }
 0x3f3   :  { %3273 = vadd.xlane.f32.xlu1 %v3272_v10  ;;  %v3269_v14 = vsel %vm215_vm0, %v3165_v20, 0.0  ;;  %v7214_v4 = vsub.f32 %v6856_v57, %v3047_v44 }
 0x3f4   :  { %3270 = vadd.xlane.f32.xlu0 %v3269_v14  ;;  %v3168_v62 = vmul.f32 %v7211_v23, %v7211_v23 }
 0x3f5   :  { %v3167_v59 = vmul.f32 %v7214_v4, %v7214_v4 }
 0x3f6   :  { %v3278_v33 = vsel %vm215_vm0, %v3168_v62, 0.0 }
 0x3f7   :  { %3279 = vadd.xlane.f32.xlu1 %v3278_v33  ;;  %v3275_v48 = vsel %vm215_vm0, %v3167_v59, 0.0 }
 0x3f8   :  { %v2926_v17 = vpop.xlane.xlu1 %2925  ;;  %3276 = vadd.xlane.f32.xlu0 %v3275_v48 }
 0x3f9   :  { %v3050_v21 = vmul.f32 0.03125, %v2926_v17  ;;  %v2923_v54 = vpop.xlane.xlu0 %2922 }
 0x3fa   :  { %v3049_v29 = vmul.f32 0.03125, %v2923_v54 }
 0x3fb   :  { %v7223_v36 = vsub.f32 %v6865_v13, %v3050_v21 }
 0x3fc   :  { %v7226_v57 = vsub.f32 %v6868_v30, %v3049_v29 }
 0x3fd   :  { %v3170_v34 = vmul.f32 %v7223_v36, %v7223_v36 }
 0x3fe   :  { %v2932_v20 = vpop.xlane.xlu1 %2931  ;;  %v3169_v56 = vmul.f32 %v7226_v57, %v7226_v57 }
 0x3ff   :  { %v3052_v10 = vmul.f32 0.03125, %v2932_v20  ;;  %v2929_v0 = vpop.xlane.xlu0 %2928  ;;  %v3284_v26 = vsel %vm215_vm0, %v3170_v34, 0.0 }
 0x400   :  { %v3051_v14 = vmul.f32 0.03125, %v2929_v0  ;;  %3285 = vadd.xlane.f32.xlu1 %v3284_v26  ;;  %v3281_v44 = vsel %vm215_vm0, %v3169_v56, 0.0 }
 0x401   :  { %v7235_v13 = vsub.f32 %v6877_v22, %v3052_v10  ;;  %3282 = vadd.xlane.f32.xlu0 %v3281_v44 }
 0x402   :  { %v7238_v30 = vsub.f32 %v6880_v42, %v3051_v14 }
 0x403   :  { %v3172_v62 = vmul.f32 %v7235_v13, %v7235_v13 }
 0x404   :  { %v2938_v59 = vpop.xlane.xlu1 %2937  ;;  %v3171_v33 = vmul.f32 %v7238_v30, %v7238_v30 }
 0x405   :  { %v3054_v17 = vmul.f32 0.03125, %v2938_v59  ;;  %v2935_v48 = vpop.xlane.xlu0 %2934  ;;  %v3290_v21 = vsel %vm215_vm0, %v3172_v62, 0.0 }
 0x406   :  { %v3053_v54 = vmul.f32 0.03125, %v2935_v48  ;;  %3291 = vadd.xlane.f32.xlu1 %v3290_v21  ;;  %v3287_v22 = vsel %vm215_vm0, %v3171_v33, 0.0 }
 0x407   :  { %v7247_v29 = vsub.f32 %v6889_v51, %v3054_v17  ;;  %3288 = vadd.xlane.f32.xlu0 %v3287_v22 }
 0x408   :  { %v7250_v42 = vsub.f32 %v6892_v35, %v3053_v54 }
 0x409   :  { %v3174_v34 = vmul.f32 %v7247_v29, %v7247_v29 }
 0x40a   :  { %v2944_v20 = vpop.xlane.xlu1 %2943  ;;  %v3173_v56 = vmul.f32 %v7250_v42, %v7250_v42 }
 0x40b   :  { %v3056_v10 = vmul.f32 0.03125, %v2944_v20  ;;  %v2941_v0 = vpop.xlane.xlu0 %2940  ;;  %v3296_v26 = vsel %vm215_vm0, %v3174_v34, 0.0 }
 0x40c   :  { %v3055_v14 = vmul.f32 0.03125, %v2941_v0  ;;  %3297 = vadd.xlane.f32.xlu1 %v3296_v26  ;;  %v3293_v51 = vsel %vm215_vm0, %v3173_v56, 0.0 }
 0x40d   :  { %v7259_v44 = vsub.f32 %v6901_v47, %v3056_v10  ;;  %3294 = vadd.xlane.f32.xlu0 %v3293_v51 }
 0x40e   :  { %v7262_v35 = vsub.f32 %v6904_v38, %v3055_v14 }
 0x40f   :  { %v3176_v62 = vmul.f32 %v7259_v44, %v7259_v44 }
 0x410   :  { %v3175_v59 = vmul.f32 %v7262_v35, %v7262_v35 }
 0x411   :  { %v3302_v33 = vsel %vm215_vm0, %v3176_v62, 0.0 }
 0x412   :  { %v2950_v17 = vpop.xlane.xlu1 %2949  ;;  %3303 = vadd.xlane.f32.xlu1 %v3302_v33  ;;  %v3299_v48 = vsel %vm215_vm0, %v3175_v59, 0.0 }
 0x413   :  { %v3058_v21 = vmul.f32 0.03125, %v2950_v17  ;;  %v2947_v54 = vpop.xlane.xlu0 %2946  ;;  %3300 = vadd.xlane.f32.xlu0 %v3299_v48 }
 0x414   :  { %v3057_v47 = vmul.f32 0.03125, %v2947_v54 }
 0x415   :  { %v7271_v22 = vsub.f32 %v6913_v53, %v3058_v21 }
 0x416   :  { %v7274_v38 = vsub.f32 %v6916_v9, %v3057_v47 }
 0x417   :  { %v3178_v34 = vmul.f32 %v7271_v22, %v7271_v22 }
 0x418   :  { %v2956_v20 = vpop.xlane.xlu1 %2955  ;;  %v3177_v56 = vmul.f32 %v7274_v38, %v7274_v38 }
 0x419   :  { %v3060_v10 = vmul.f32 0.03125, %v2956_v20  ;;  %v2953_v0 = vpop.xlane.xlu0 %2952  ;;  %v3308_v26 = vsel %vm215_vm0, %v3178_v34, 0.0 }
 0x41a   :  { %v3059_v14 = vmul.f32 0.03125, %v2953_v0  ;;  %3309 = vadd.xlane.f32.xlu1 %v3308_v26  ;;  %v3305_v51 = vsel %vm215_vm0, %v3177_v56, 0.0 }
 0x41b   :  { %v7283_v53 = vsub.f32 %v6925_v1, %v3060_v10  ;;  %3306 = vadd.xlane.f32.xlu0 %v3305_v51 }
 0x41c   :  { %v7286_v9 = vsub.f32 %v6928_v16, %v3059_v14 }
 0x41d   :  { %v2962_v62 = vpop.xlane.xlu1 %2961  ;;  %v3180_v59 = vmul.f32 %v7283_v53, %v7283_v53 }
 0x41e   :  { %v3062_v33 = vmul.f32 0.03125, %v2962_v62  ;;  %v2959_v17 = vpop.xlane.xlu0 %2958  ;;  %v3179_v48 = vmul.f32 %v7286_v9, %v7286_v9 }
 0x41f   :  { %v3061_v21 = vmul.f32 0.03125, %v2959_v17  ;;  %v3314_v54 = vsel %vm215_vm0, %v3180_v59, 0.0 }
 0x420   :  { %v7294_v47 = vsub.f32 %v6937_v25, %v3062_v33  ;;  %3315 = vadd.xlane.f32.xlu1 %v3314_v54  ;;  %v3311_v1 = vsel %vm215_vm0, %v3179_v48, 0.0 }
 0x421   :  { %v7298_v16 = vsub.f32 %v6940_v32, %v3061_v21  ;;  %3312 = vadd.xlane.f32.xlu0 %v3311_v1  ;;  %v8111_v1 = vld [vmem:[#allocation11_spill] sm:$0xff] }
 0x422   :  { %v2968_v34 = vpop.xlane.xlu1 %2967  ;;  %v3182_v20 = vmul.f32 %v7294_v47, %v7294_v47 }
 0x423   :  { %v3064_v56 = vmul.f32 0.03125, %v2968_v34  ;;  %v2965_v10 = vpop.xlane.xlu0 %2964  ;;  %v3181_v0 = vmul.f32 %v7298_v16, %v7298_v16 }
 0x424   :  { %v3063_v26 = vmul.f32 0.03125, %v2965_v10  ;;  %v3320_v25 = vsel %vm215_vm0, %v3182_v20, 0.0 }
 0x425   :  { %v7306_v14 = vsub.f32 %v6949_v50, %v3064_v56  ;;  %3321 = vadd.xlane.f32.xlu1 %v3320_v25  ;;  %v3317_v32 = vsel %vm215_vm0, %v3181_v0, 0.0 }
 0x426   :  { %v7310_v51 = vsub.f32 %v6952_v3, %v3063_v26  ;;  %v2974_v62 = vpop.xlane.xlu1 %2973  ;;  %3318 = vadd.xlane.f32.xlu0 %v3317_v32 }
 0x427   :  { %v3066_v59 = vmul.f32 0.03125, %v2974_v62  ;;  %v2971_v33 = vpop.xlane.xlu0 %2970  ;;  %v3184_v17 = vmul.f32 %v7306_v14, %v7306_v14  ;;  %v8112_v62 = vld [vmem:[#allocation10_spill] sm:$0xff] }
 0x428   :  { %v3065_v48 = vmul.f32 0.03125, %v2971_v33  ;;  %v3183_v21 = vmul.f32 %v7310_v51, %v7310_v51  ;;  %v8113_v33 = vld [vmem:[#allocation7_spill] sm:$0xff] }
 0x429   :  { %v7317_v50 = vsub.f32 %v6961_v18, %v3066_v59  ;;  %v3326_v54 = vsel %vm215_vm0, %v3184_v17, 0.0 }
 0x42a   :  { %v7321_v34 = vsub.f32 %v8111_v1, %v3065_v48  ;;  %3327 = vadd.xlane.f32.xlu1 %v3326_v54  ;;  %v3323_v3 = vsel %vm215_vm0, %v3183_v21, 0.0 }
 0x42b   :  { %3324 = vadd.xlane.f32.xlu0 %v3323_v3  ;;  %v3186_v20 = vmul.f32 %v7317_v50, %v7317_v50 }
 0x42c   :  { %v2980_v56 = vpop.xlane.xlu1 %2979  ;;  %v3185_v10 = vmul.f32 %v7321_v34, %v7321_v34 }
 0x42d   :  { %v3068_v0 = vmul.f32 0.03125, %v2980_v56  ;;  %v2977_v26 = vpop.xlane.xlu0 %2976  ;;  %v3332_v18 = vsel %vm215_vm0, %v3186_v20, 0.0  ;;  %v8115_v56 = vld [vmem:[#allocation4_spill] sm:$0xff] }
 0x42e   :  { %v3067_v25 = vmul.f32 0.03125, %v2977_v26  ;;  %3333 = vadd.xlane.f32.xlu1 %v3332_v18  ;;  %v3329_v32 = vsel %vm215_vm0, %v3185_v10, 0.0 }
 0x42f   :  { %v7331_v59 = vsub.f32 %v8112_v62, %v3068_v0  ;;  %3330 = vadd.xlane.f32.xlu0 %v3329_v32  ;;  %v8117_v0 = vld [vmem:[#allocation8_spill] sm:$0xff] }
 0x430   :  { %v7334_v17 = vsub.f32 %v8113_v33, %v3067_v25  ;;  %v2986_v48 = vpop.xlane.xlu1 %2985 }
 0x431   :  { %v3070_v21 = vmul.f32 0.03125, %v2986_v48  ;;  %v2983_v54 = vpop.xlane.xlu0 %2982  ;;  %v3188_v1 = vmul.f32 %v7331_v59, %v7331_v59 }
 0x432   :  { %8114 = vst [vmem:[#allocation21_spill] sm:$0xff] %v7334_v17  ;;  %v3069_v3 = vmul.f32 0.03125, %v2983_v54  ;;  %v3187_v20 = vmul.f32 %v7334_v17, %v7334_v17 }
 0x433   :  { %v7341_v26 = vsub.f32 %v8115_v56, %v3070_v21  ;;  %v3338_v10 = vsel %vm215_vm0, %v3188_v1, 0.0  ;;  %v8119_v56 = vld [vmem:[#allocation6_spill] sm:$0xff] }
 0x434   :  { %v7345_v18 = vsub.f32 %v8117_v0, %v3069_v3  ;;  %v2992_v25 = vpop.xlane.xlu1 %2991  ;;  %3339 = vadd.xlane.f32.xlu1 %v3338_v10  ;;  %v3335_v32 = vsel %vm215_vm0, %v3187_v20, 0.0  ;;  %v8121_v3 = vld [vmem:[#allocation13_spill] sm:$0xff] }
 0x435   :  { %8116 = vst [vmem:[#allocation20_spill] sm:$0xff] %v7341_v26  ;;  %v3072_v62 = vmul.f32 0.03125, %v2992_v25  ;;  %3336 = vadd.xlane.f32.xlu0 %v3335_v32  ;;  %v2989_v33 = vpop.xlane.xlu0 %2988  ;;  %v3190_v48 = vmul.f32 %v7341_v26, %v7341_v26 }
 0x436   :  { %8118 = vst [vmem:[#allocation22_spill] sm:$0xff] %v7345_v18  ;;  %v3071_v54 = vmul.f32 0.03125, %v2989_v33  ;;  %v3189_v21 = vmul.f32 %v7345_v18, %v7345_v18 }
 0x437   :  { %v7353_v17 = vsub.f32 %v8119_v56, %v3072_v62  ;;  %v3344_v1 = vsel %vm215_vm0, %v3190_v48, 0.0  ;;  %v8123_v56 = vld [vmem:[#allocation12_spill] sm:$0xff] }
 0x438   :  { %v7357_v0 = vsub.f32 %v8121_v3, %v3071_v54  ;;  %v2998_v10 = vpop.xlane.xlu1 %2997  ;;  %3345 = vadd.xlane.f32.xlu1 %v3344_v1  ;;  %v3341_v20 = vsel %vm215_vm0, %v3189_v21, 0.0  ;;  %v8125_v54 = vld [vmem:[#allocation15_spill] sm:$0xff] }
 0x439   :  { %8120 = vst [vmem:[#allocation23_spill] sm:$0xff] %v7353_v17  ;;  %v3074_v25 = vmul.f32 0.03125, %v2998_v10  ;;  %3342 = vadd.xlane.f32.xlu0 %v3341_v20  ;;  %v2995_v32 = vpop.xlane.xlu0 %2994  ;;  %v3192_v33 = vmul.f32 %v7353_v17, %v7353_v17 }
 0x43a   :  { %8122 = vst [vmem:[#allocation24_spill] sm:$0xff] %v7357_v0  ;;  %v3073_v26 = vmul.f32 0.03125, %v2995_v32  ;;  %v3191_v62 = vmul.f32 %v7357_v0, %v7357_v0 }
 0x43b   :  { %v7365_v18 = vsub.f32 %v8123_v56, %v3074_v25  ;;  %v3350_v48 = vsel %vm215_vm0, %v3192_v33, 0.0  ;;  %v8127_v56 = vld [vmem:[#allocation14_spill] sm:$0xff]  ;;  %v8129_v33 = vld [vmem:[#allocation17_spill] sm:$0xff] }
 0x43c   :  { %v7369_v3 = vsub.f32 %v8125_v54, %v3073_v26  ;;  %v3004_v1 = vpop.xlane.xlu1 %3003  ;;  %3351 = vadd.xlane.f32.xlu1 %v3350_v48  ;;  %v3347_v21 = vsel %vm215_vm0, %v3191_v62, 0.0 }
 0x43d   :  { %8124 = vst [vmem:[#allocation3_spill] sm:$0xff] %v7365_v18  ;;  %v3076_v10 = vmul.f32 0.03125, %v3004_v1  ;;  %3348 = vadd.xlane.f32.xlu0 %v3347_v21  ;;  %v3001_v20 = vpop.xlane.xlu0 %3000  ;;  %v3194_v32 = vmul.f32 %v7365_v18, %v7365_v18 }
 0x43e   :  { %8126 = vst [vmem:[#allocation25_spill] sm:$0xff] %v7369_v3  ;;  %v3075_v17 = vmul.f32 0.03125, %v3001_v20  ;;  %v3193_v25 = vmul.f32 %v7369_v3, %v7369_v3 }
 0x43f   :  { %v7377_v0 = vsub.f32 %v8127_v56, %v3076_v10  ;;  %v3356_v26 = vsel %vm215_vm0, %v3194_v32, 0.0  ;;  %v8131_v56 = vld [vmem:[#allocation16_spill] sm:$0xff]  ;;  %v8133_v32 = vld [vmem:[#allocation18_spill] sm:$0xff] }
 0x440   :  { %v7381_v54 = vsub.f32 %v8129_v33, %v3075_v17  ;;  %v3010_v48 = vpop.xlane.xlu1 %3009  ;;  %3357 = vadd.xlane.f32.xlu1 %v3356_v26  ;;  %v3353_v62 = vsel %vm215_vm0, %v3193_v25, 0.0 }
 0x441   :  { %8128 = vst [vmem:[#allocation2_spill] sm:$0xff] %v7377_v0  ;;  %v3078_v1 = vmul.f32 0.03125, %v3010_v48  ;;  %3354 = vadd.xlane.f32.xlu0 %v3353_v62  ;;  %v3007_v21 = vpop.xlane.xlu0 %3006  ;;  %v3196_v20 = vmul.f32 %v7377_v0, %v7377_v0 }
 0x442   :  { %8130 = vst [vmem:[#allocation26_spill] sm:$0xff] %v7381_v54  ;;  %v3077_v18 = vmul.f32 0.03125, %v3007_v21  ;;  %v3195_v10 = vmul.f32 %v7381_v54, %v7381_v54 }
 0x443   :  { %v7389_v3 = vsub.f32 %v8131_v56, %v3078_v1  ;;  %v3362_v17 = vsel %vm215_vm0, %v3196_v20, 0.0  ;;  %v8135_v56 = vld [vmem:[#allocation19_spill] sm:$0xff] }
 0x444   :  { %v7393_v33 = vsub.f32 %v8133_v32, %v3077_v18  ;;  %v3016_v26 = vpop.xlane.xlu1 %3015  ;;  %3363 = vadd.xlane.f32.xlu1 %v3362_v17  ;;  %v3359_v25 = vsel %vm215_vm0, %v3195_v10, 0.0 }
 0x445   :  { %8132 = vst [vmem:[#allocation27_spill] sm:$0xff] %v7389_v3  ;;  %v3080_v48 = vmul.f32 0.03125, %v3016_v26  ;;  %3360 = vadd.xlane.f32.xlu0 %v3359_v25  ;;  %v3013_v62 = vpop.xlane.xlu0 %3012  ;;  %v3198_v21 = vmul.f32 %v7389_v3, %v7389_v3 }
 0x446   :  { %8134 = vst [vmem:[#allocation28_spill] sm:$0xff] %v7393_v33  ;;  %v3079_v0 = vmul.f32 0.03125, %v3013_v62  ;;  %v3197_v1 = vmul.f32 %v7393_v33, %v7393_v33 }
 0x447   :  { %v7401_v54 = vsub.f32 %v8135_v56, %v3080_v48  ;;  %v3368_v18 = vsel %vm215_vm0, %v3198_v21, 0.0 }
 0x448   :  { %v7405_v20 = vsub.f32 %v7048_v31, %v3079_v0  ;;  %3369 = vadd.xlane.f32.xlu1 %v3368_v18  ;;  %v3022_v10 = vpop.xlane.xlu1 %3021  ;;  %v3365_v17 = vsel %vm215_vm0, %v3197_v1, 0.0 }
 0x449   :  { %8136 = vst [vmem:[#allocation5_spill] sm:$0xff] %v7401_v54  ;;  %v3082_v32 = vmul.f32 0.03125, %v3022_v10  ;;  %3366 = vadd.xlane.f32.xlu0 %v3365_v17  ;;  %v3019_v26 = vpop.xlane.xlu0 %3018  ;;  %v3200_v25 = vmul.f32 %v7401_v54, %v7401_v54 }
 0x44a   :  { %8137 = vst [vmem:[#allocation30_spill] sm:$0xff] %v7405_v20  ;;  %v3081_v62 = vmul.f32 0.03125, %v3019_v26  ;;  %v3199_v48 = vmul.f32 %v7405_v20, %v7405_v20 }
 0x44b   :  { %v7413_v56 = vsub.f32 %v7063_v15, %v3082_v32  ;;  %v3374_v31 = vsel %vm215_vm0, %v3200_v25, 0.0 }
 0x44c   :  { %v7417_v0 = vsub.f32 %v7066_v19, %v3081_v62  ;;  %3375 = vadd.xlane.f32.xlu1 %v3374_v31  ;;  %v3208_v21 = vpop.xlane.xlu1 %3207  ;;  %v3371_v1 = vsel %vm215_vm0, %v3199_v48, 0.0 }
 0x44d   :  { %8138 = vst [vmem:[#allocation29_spill] sm:$0xff] %v7413_v56  ;;  %v3384_v18 = vmul.f32 0.03125, %v3208_v21  ;;  %3372 = vadd.xlane.f32.xlu0 %v3371_v1  ;;  %v3205_v10 = vpop.xlane.xlu0 %3204  ;;  %v3202_v17 = vmul.f32 %v7413_v56, %v7413_v56 }
 0x44e   :  { %8139 = vst [vmem:[#allocation31_spill] sm:$0xff] %v7417_v0  ;;  %v3383_v26 = vmul.f32 0.03125, %v3205_v10  ;;  %v3201_v15 = vmul.f32 %v7417_v0, %v7417_v0 }
 0x44f   :  { %v3444_v32 = vadd.f32 1e-05, %v3384_v18  ;;  %v3380_v25 = vsel %vm215_vm0, %v3202_v17, 0.0 }
 0x450   :  { %v3443_v20 = vadd.f32 1e-05, %v3383_v26  ;;  %3381 = vadd.xlane.f32.xlu1 %v3380_v25  ;;  %v3214_v19 = vpop.xlane.xlu1 %3213  ;;  %v3377_v62 = vsel %vm215_vm0, %v3201_v15, 0.0 }
 0x451   :  { %4527 = vrsqrt.f32 %v3444_v32  ;;  %v3386_v48 = vmul.f32 0.03125, %v3214_v19  ;;  %3378 = vadd.xlane.f32.xlu0 %v3377_v62  ;;  %v3211_v31 = vpop.xlane.xlu0 %3210 }
 0x452   :  { %4529 = vrsqrt.f32 %v3443_v20  ;;  %v3385_v21 = vmul.f32 0.03125, %v3211_v31  ;;  %v7429_v20 = vld [vmem:[%s7864_s8] ss:$0 sm:$0xff] }
 0x453   :  { %v3446_v1 = vadd.f32 1e-05, %v3386_v48 }
 0x454   :  { %v3445_v56 = vadd.f32 1e-05, %v3385_v21  ;;  %v3220_v10 = vpop.xlane.xlu1 %3219 }
 0x455   :  { %4531 = vrsqrt.f32 %v3446_v1  ;;  %v3388_v54 = vmul.f32 0.03125, %v3220_v10  ;;  %v3217_v0 = vpop.xlane.xlu0 %3216 }
 0x456   :  { %4533 = vrsqrt.f32 %v3445_v56  ;;  %v3387_v18 = vmul.f32 0.03125, %v3217_v0 }
 0x457   :  { %v3448_v17 = vadd.f32 1e-05, %v3388_v54  ;;  %v7435_v54 = vld [vmem:[%s7865_s9] ss:$0 sm:$0xff] }
 0x458   :  { %v3447_v26 = vadd.f32 1e-05, %v3387_v18  ;;  %v3226_v25 = vpop.xlane.xlu1 %3225 }
 0x459   :  { %4535 = vrsqrt.f32 %v3448_v17  ;;  %v3390_v33 = vmul.f32 0.03125, %v3226_v25  ;;  %v3223_v15 = vpop.xlane.xlu0 %3222 }
 0x45a   :  { %4537 = vrsqrt.f32 %v3447_v26  ;;  %v3389_v32 = vmul.f32 0.03125, %v3223_v15 }
 0x45b   :  { %v4528_v19 = vpop.eup %4527  ;;  %v3450_v62 = vadd.f32 1e-05, %v3390_v33 }
 0x45c   :  { %v4530_v48 = vpop.eup %4529  ;;  %v3564_v31 = vmul.f32 %v4528_v19, %v7051_v46  ;;  %v3449_v56 = vadd.f32 1e-05, %v3389_v32  ;;  %v3232_v0 = vpop.xlane.xlu1 %3231 }
 0x45d   :  { %v3563_v21 = vmul.f32 %v4530_v48, %v7057_v24  ;;  %4539 = vrsqrt.f32 %v3450_v62  ;;  %v3392_v1 = vmul.f32 0.03125, %v3232_v0  ;;  %v3229_v10 = vpop.xlane.xlu0 %3228 }
 0x45e   :  { %v3631_v18 = vmul.f32 %v7429_v20, %v3564_v31  ;;  %4541 = vrsqrt.f32 %v3449_v56  ;;  %v3391_v17 = vmul.f32 0.03125, %v3229_v10 }
 0x45f   :  { %v4532_v33 = vpop.eup %4531  ;;  %v3630_v26 = vmul.f32 %v7429_v20, %v3563_v21  ;;  %v3452_v46 = vadd.f32 1e-05, %v3392_v1 }
 0x460   :  { %v4534_v25 = vpop.eup %4533  ;;  %v3698_v15 = vadd.f32 %v7435_v54, %v3631_v18  ;;  %v3566_v32 = vmul.f32 %v4532_v33, %v7069_v63  ;;  %v3451_v19 = vadd.f32 1e-05, %v3391_v17  ;;  %v3238_v3 = vpop.xlane.xlu1 %3237 }
 0x461   :  { %v3697_v24 = vadd.f32 %v7435_v54, %v3630_v26  ;;  %v3565_v62 = vmul.f32 %v4534_v25, %v7076_v2  ;;  %4543 = vrsqrt.f32 %v3452_v46  ;;  %v3394_v48 = vmul.f32 0.03125, %v3238_v3  ;;  %v3235_v31 = vpop.xlane.xlu0 %3234 }
 0x462   :  { %3758 = vst.msk [vmem:[%s7866_s10 + $0x8] sm:$0xff] %vm215_vm0, %v3698_v15  ;;  %v3633_v56 = vmul.f32 %v7429_v20, %v3566_v32  ;;  %4545 = vrsqrt.f32 %v3451_v19  ;;  %v3393_v0 = vmul.f32 0.03125, %v3235_v31 }
 0x463   :  { %v4536_v21 = vpop.eup %4535  ;;  %3757 = vst.msk [vmem:[%s7866_s10] sm:$0xff] %vm215_vm0, %v3697_v24  ;;  %v3632_v63 = vmul.f32 %v7429_v20, %v3565_v62  ;;  %v3454_v2 = vadd.f32 1e-05, %v3394_v48 }
 0x464   :  { %v4538_v3 = vpop.eup %4537  ;;  %v3700_v1 = vadd.f32 %v7435_v54, %v3633_v56  ;;  %v3568_v10 = vmul.f32 %v4536_v21, %v7083_v61  ;;  %v3453_v18 = vadd.f32 1e-05, %v3393_v0  ;;  %v3244_v17 = vpop.xlane.xlu1 %3243 }
 0x465   :  { %v3699_v33 = vadd.f32 %v7435_v54, %v3632_v63  ;;  %v3567_v26 = vmul.f32 %v4538_v3, %v7086_v41  ;;  %4547 = vrsqrt.f32 %v3454_v2  ;;  %v3396_v46 = vmul.f32 0.03125, %v3244_v17  ;;  %v3241_v25 = vpop.xlane.xlu0 %3240 }
 0x466   :  { %3760 = vst.msk [vmem:[%s7866_s10 + $0x18] sm:$0xff] %vm215_vm0, %v3700_v1  ;;  %v3635_v15 = vmul.f32 %v7429_v20, %v3568_v10  ;;  %4549 = vrsqrt.f32 %v3453_v18  ;;  %v3395_v32 = vmul.f32 0.03125, %v3241_v25 }
 0x467   :  { %v4540_v19 = vpop.eup %4539  ;;  %3759 = vst.msk [vmem:[%s7866_s10 + $0x10] sm:$0xff] %vm215_vm0, %v3699_v33  ;;  %v3634_v61 = vmul.f32 %v7429_v20, %v3567_v26  ;;  %v3456_v41 = vadd.f32 1e-05, %v3396_v46 }
 0x468   :  { %v4542_v24 = vpop.eup %4541  ;;  %v3702_v62 = vadd.f32 %v7435_v54, %v3635_v15  ;;  %v3570_v48 = vmul.f32 %v4540_v19, %v7095_v7  ;;  %v3455_v31 = vadd.f32 1e-05, %v3395_v32  ;;  %v3250_v56 = vpop.xlane.xlu1 %3249 }
 0x469   :  { %v3701_v0 = vadd.f32 %v7435_v54, %v3634_v61  ;;  %v3569_v21 = vmul.f32 %v4542_v24, %v7102_v28  ;;  %4551 = vrsqrt.f32 %v3456_v41  ;;  %v3398_v63 = vmul.f32 0.03125, %v3250_v56  ;;  %v3247_v2 = vpop.xlane.xlu0 %3246 }
 0x46a   :  { %3762 = vst.msk [vmem:[%s7866_s10 + $0x28] sm:$0xff] %vm215_vm0, %v3702_v62  ;;  %v3637_v3 = vmul.f32 %v7429_v20, %v3570_v48  ;;  %4553 = vrsqrt.f32 %v3455_v31  ;;  %v3397_v1 = vmul.f32 0.03125, %v3247_v2 }
 0x46b   :  { %v4544_v10 = vpop.eup %4543  ;;  %3761 = vst.msk [vmem:[%s7866_s10 + $0x20] sm:$0xff] %vm215_vm0, %v3701_v0  ;;  %v3636_v7 = vmul.f32 %v7429_v20, %v3569_v21  ;;  %v3458_v28 = vadd.f32 1e-05, %v3398_v63 }
 0x46c   :  { %v4546_v18 = vpop.eup %4545  ;;  %v3704_v17 = vadd.f32 %v7435_v54, %v3637_v3  ;;  %v3572_v33 = vmul.f32 %v4544_v10, %v7108_v60  ;;  %v3457_v26 = vadd.f32 1e-05, %v3397_v1 }
 0x46d   :  { %v3703_v25 = vadd.f32 %v7435_v54, %v3636_v7  ;;  %v3571_v15 = vmul.f32 %v4546_v18, %v7116_v27  ;;  %4555 = vrsqrt.f32 %v3458_v28 }
 0x46e   :  { %v3256_v46 = vpop.xlane.xlu1 %3255  ;;  %3764 = vst.msk [vmem:[%s7866_s10 + $0x38] sm:$0xff] %vm215_vm0, %v3704_v17  ;;  %v3639_v61 = vmul.f32 %v7429_v20, %v3572_v33  ;;  %4557 = vrsqrt.f32 %v3457_v26 }
 0x46f   :  { %v3400_v32 = vmul.f32 0.03125, %v3256_v46  ;;  %v3253_v19 = vpop.xlane.xlu0 %3252  ;;  %v4548_v24 = vpop.eup %4547  ;;  %3763 = vst.msk [vmem:[%s7866_s10 + $0x30] sm:$0xff] %vm215_vm0, %v3703_v25  ;;  %v3638_v60 = vmul.f32 %v7429_v20, %v3571_v15 }
 0x470   :  { %v3399_v41 = vmul.f32 0.03125, %v3253_v19  ;;  %v4550_v62 = vpop.eup %4549  ;;  %v3706_v48 = vadd.f32 %v7435_v54, %v3639_v61  ;;  %v3574_v31 = vmul.f32 %v4548_v24, %v7120_v49 }
 0x471   :  { %v3460_v27 = vadd.f32 1e-05, %v3400_v32  ;;  %v3705_v0 = vadd.f32 %v7435_v54, %v3638_v60  ;;  %v3573_v21 = vmul.f32 %v4550_v62, %v7128_v52 }
 0x472   :  { %v3459_v56 = vadd.f32 1e-05, %v3399_v41  ;;  %3766 = vst.msk [vmem:[%s7866_s10 + $0x48] sm:$0xff] %vm215_vm0, %v3706_v48  ;;  %v3641_v63 = vmul.f32 %v7429_v20, %v3574_v31 }
 0x473   :  { %4559 = vrsqrt.f32 %v3460_v27  ;;  %v4552_v2 = vpop.eup %4551  ;;  %3765 = vst.msk [vmem:[%s7866_s10 + $0x40] sm:$0xff] %vm215_vm0, %v3705_v0  ;;  %v3640_v49 = vmul.f32 %v7429_v20, %v3573_v21 }
 0x474   :  { %4561 = vrsqrt.f32 %v3459_v56  ;;  %v4554_v3 = vpop.eup %4553  ;;  %v3708_v52 = vadd.f32 %v7435_v54, %v3641_v63  ;;  %v3576_v1 = vmul.f32 %v4552_v2, %v7132_v12 }
 0x475   :  { %v3707_v7 = vadd.f32 %v7435_v54, %v3640_v49  ;;  %v3575_v28 = vmul.f32 %v4554_v3, %v7140_v37 }
 0x476   :  { %v3262_v10 = vpop.xlane.xlu1 %3261  ;;  %3768 = vst.msk [vmem:[%s7866_s10 + $0x58] sm:$0xff] %vm215_vm0, %v3708_v52  ;;  %v3643_v33 = vmul.f32 %v7429_v20, %v3576_v1 }
 0x477   :  { %v3402_v18 = vmul.f32 0.03125, %v3262_v10  ;;  %v3259_v17 = vpop.xlane.xlu0 %3258  ;;  %v4556_v46 = vpop.eup %4555  ;;  %3767 = vst.msk [vmem:[%s7866_s10 + $0x50] sm:$0xff] %vm215_vm0, %v3707_v7  ;;  %v3642_v12 = vmul.f32 %v7429_v20, %v3575_v28 }
 0x478   :  { %v3401_v26 = vmul.f32 0.03125, %v3259_v17  ;;  %v4558_v37 = vpop.eup %4557  ;;  %v3710_v15 = vadd.f32 %v7435_v54, %v3643_v33  ;;  %v3578_v32 = vmul.f32 %v4556_v46, %v7149_v55 }
 0x479   :  { %v3462_v25 = vadd.f32 1e-05, %v3402_v18  ;;  %v3709_v61 = vadd.f32 %v7435_v54, %v3642_v12  ;;  %v3577_v41 = vmul.f32 %v4558_v37, %v7152_v45 }
 0x47a   :  { %v3461_v19 = vadd.f32 1e-05, %v3401_v26  ;;  %3770 = vst.msk [vmem:[%s7866_s10 + $0x68] sm:$0xff] %vm215_vm0, %v3710_v15  ;;  %v3645_v24 = vmul.f32 %v7429_v20, %v3578_v32 }
 0x47b   :  { %4563 = vrsqrt.f32 %v3462_v25  ;;  %3769 = vst.msk [vmem:[%s7866_s10 + $0x60] sm:$0xff] %vm215_vm0, %v3709_v61  ;;  %v3644_v55 = vmul.f32 %v7429_v20, %v3577_v41 }
 0x47c   :  { %4565 = vrsqrt.f32 %v3461_v19  ;;  %v3268_v60 = vpop.xlane.xlu1 %3267  ;;  %v3712_v31 = vadd.f32 %v7435_v54, %v3645_v24 }
 0x47d   :  { %v4560_v27 = vpop.eup %4559  ;;  %v3404_v62 = vmul.f32 0.03125, %v3268_v60  ;;  %v3265_v45 = vpop.xlane.xlu0 %3264  ;;  %v3711_v21 = vadd.f32 %v7435_v54, %v3644_v55 }
 0x47e   :  { %v4562_v48 = vpop.eup %4561  ;;  %v3580_v56 = vmul.f32 %v4560_v27, %v7163_v58  ;;  %v3403_v0 = vmul.f32 0.03125, %v3265_v45  ;;  %3772 = vst.msk [vmem:[%s7866_s10 + $0x78] sm:$0xff] %vm215_vm0, %v3712_v31 }
 0x47f   :  { %v3579_v63 = vmul.f32 %v4562_v48, %v7166_v43  ;;  %v3464_v2 = vadd.f32 1e-05, %v3404_v62  ;;  %3771 = vst.msk [vmem:[%s7866_s10 + $0x70] sm:$0xff] %vm215_vm0, %v3711_v21 }
 0x480   :  { %v3647_v49 = vmul.f32 %v7429_v20, %v3580_v56  ;;  %v3463_v3 = vadd.f32 1e-05, %v3403_v0  ;;  %v3274_v52 = vpop.xlane.xlu1 %3273 }
 0x481   :  { %v3646_v58 = vmul.f32 %v7429_v20, %v3579_v63  ;;  %4567 = vrsqrt.f32 %v3464_v2  ;;  %v3406_v1 = vmul.f32 0.03125, %v3274_v52  ;;  %v3271_v43 = vpop.xlane.xlu0 %3270 }
 0x482   :  { %v3714_v10 = vadd.f32 %v7435_v54, %v3647_v49  ;;  %4569 = vrsqrt.f32 %v3463_v3  ;;  %v3405_v7 = vmul.f32 0.03125, %v3271_v43 }
 0x483   :  { %v3713_v28 = vadd.f32 %v7435_v54, %v3646_v58  ;;  %v3466_v18 = vadd.f32 1e-05, %v3406_v1 }
 0x484   :  { %3774 = vst.msk [vmem:[%s7866_s10 + $0x88] sm:$0xff] %vm215_vm0, %v3714_v10  ;;  %v3465_v17 = vadd.f32 1e-05, %v3405_v7  ;;  %v3280_v25 = vpop.xlane.xlu1 %3279 }
 0x485   :  { %v4564_v33 = vpop.eup %4563  ;;  %3773 = vst.msk [vmem:[%s7866_s10 + $0x80] sm:$0xff] %vm215_vm0, %v3713_v28  ;;  %4571 = vrsqrt.f32 %v3466_v18  ;;  %v3408_v15 = vmul.f32 0.03125, %v3280_v25  ;;  %v3277_v32 = vpop.xlane.xlu0 %3276 }
 0x486   :  { %v4566_v26 = vpop.eup %4565  ;;  %v3582_v46 = vmul.f32 %v4564_v33, %v7175_v6  ;;  %4573 = vrsqrt.f32 %v3465_v17  ;;  %v3407_v61 = vmul.f32 0.03125, %v3277_v32 }
 0x487   :  { %v3581_v12 = vmul.f32 %v4566_v26, %v7178_v40  ;;  %v3468_v24 = vadd.f32 1e-05, %v3408_v15 }
 0x488   :  { %v3649_v37 = vmul.f32 %v7429_v20, %v3582_v46  ;;  %v3467_v55 = vadd.f32 1e-05, %v3407_v61 }
 0x489   :  { %v3648_v19 = vmul.f32 %v7429_v20, %v3581_v12  ;;  %4575 = vrsqrt.f32 %v3468_v24 }
 0x48a   :  { %v3716_v41 = vadd.f32 %v7435_v54, %v3649_v37  ;;  %4577 = vrsqrt.f32 %v3467_v55 }
 0x48b   :  { %v4568_v60 = vpop.eup %4567  ;;  %v3715_v27 = vadd.f32 %v7435_v54, %v3648_v19 }
 0x48c   :  { %v4570_v62 = vpop.eup %4569  ;;  %3776 = vst.msk [vmem:[%s7866_s10 + $0x98] sm:$0xff] %vm215_vm0, %v3716_v41  ;;  %v3584_v6 = vmul.f32 %v4568_v60, %v7187_v8 }
 0x48d   :  { %3775 = vst.msk [vmem:[%s7866_s10 + $0x90] sm:$0xff] %vm215_vm0, %v3715_v27  ;;  %v3583_v40 = vmul.f32 %v4570_v62, %v7190_v11  ;;  %v3286_v56 = vpop.xlane.xlu1 %3285 }
 0x48e   :  { %v3651_v45 = vmul.f32 %v7429_v20, %v3584_v6  ;;  %v3410_v63 = vmul.f32 0.03125, %v3286_v56  ;;  %v3283_v2 = vpop.xlane.xlu0 %3282 }
 0x48f   :  { %v4572_v48 = vpop.eup %4571  ;;  %v3650_v31 = vmul.f32 %v7429_v20, %v3583_v40  ;;  %v3409_v52 = vmul.f32 0.03125, %v3283_v2 }
 0x490   :  { %v4574_v0 = vpop.eup %4573  ;;  %v3718_v21 = vadd.f32 %v7435_v54, %v3651_v45  ;;  %v3586_v8 = vmul.f32 %v4572_v48, %v7197_v39  ;;  %v3470_v58 = vadd.f32 1e-05, %v3410_v63 }
 0x491   :  { %v3717_v49 = vadd.f32 %v7435_v54, %v3650_v31  ;;  %v3585_v3 = vmul.f32 %v4574_v0, %v7201_v5  ;;  %v3469_v1 = vadd.f32 1e-05, %v3409_v52 }
 0x492   :  { %3778 = vst.msk [vmem:[%s7866_s10 + $0xa8] sm:$0xff] %vm215_vm0, %v3718_v21  ;;  %v3653_v11 = vmul.f32 %v7429_v20, %v3586_v8  ;;  %4579 = vrsqrt.f32 %v3470_v58 }
 0x493   :  { %3777 = vst.msk [vmem:[%s7866_s10 + $0xa0] sm:$0xff] %vm215_vm0, %v3717_v49  ;;  %v3652_v39 = vmul.f32 %v7429_v20, %v3585_v3  ;;  %4581 = vrsqrt.f32 %v3469_v1  ;;  %v3292_v10 = vpop.xlane.xlu1 %3291  ;;  %v4576_v7 = vpop.eup %4575 }
 0x494   :  { %v3720_v43 = vadd.f32 %v7435_v54, %v3653_v11  ;;  %v3412_v28 = vmul.f32 0.03125, %v3292_v10  ;;  %v3289_v18 = vpop.xlane.xlu0 %3288  ;;  %v4578_v17 = vpop.eup %4577  ;;  %v3588_v33 = vmul.f32 %v4576_v7, %v7211_v23 }
 0x495   :  { %v3719_v5 = vadd.f32 %v7435_v54, %v3652_v39  ;;  %v3411_v26 = vmul.f32 0.03125, %v3289_v18  ;;  %v3587_v46 = vmul.f32 %v4578_v17, %v7214_v4 }
 0x496   :  { %3780 = vst.msk [vmem:[%s7866_s10 + $0xb8] sm:$0xff] %vm215_vm0, %v3720_v43  ;;  %v3472_v12 = vadd.f32 1e-05, %v3412_v28  ;;  %v3655_v25 = vmul.f32 %v7429_v20, %v3588_v33 }
 0x497   :  { %3779 = vst.msk [vmem:[%s7866_s10 + $0xb0] sm:$0xff] %vm215_vm0, %v3719_v5  ;;  %v3471_v37 = vadd.f32 1e-05, %v3411_v26  ;;  %v3654_v15 = vmul.f32 %v7429_v20, %v3587_v46 }
 0x498   :  { %4583 = vrsqrt.f32 %v3472_v12  ;;  %v3722_v32 = vadd.f32 %v7435_v54, %v3655_v25 }
 0x499   :  { %4585 = vrsqrt.f32 %v3471_v37  ;;  %v3298_v19 = vpop.xlane.xlu1 %3297  ;;  %v3721_v61 = vadd.f32 %v7435_v54, %v3654_v15 }
 0x49a   :  { %v3414_v41 = vmul.f32 0.03125, %v3298_v19  ;;  %v3295_v24 = vpop.xlane.xlu0 %3294  ;;  %3782 = vst.msk [vmem:[%s7866_s10 + $0xc8] sm:$0xff] %vm215_vm0, %v3722_v32 }
 0x49b   :  { %v3413_v23 = vmul.f32 0.03125, %v3295_v24  ;;  %3781 = vst.msk [vmem:[%s7866_s10 + $0xc0] sm:$0xff] %vm215_vm0, %v3721_v61 }
 0x49c   :  { %v4580_v4 = vpop.eup %4579  ;;  %v3474_v60 = vadd.f32 1e-05, %v3414_v41 }
 0x49d   :  { %v4582_v27 = vpop.eup %4581  ;;  %v3590_v55 = vmul.f32 %v4580_v4, %v7223_v36  ;;  %v3473_v62 = vadd.f32 1e-05, %v3413_v23 }
 0x49e   :  { %v3589_v6 = vmul.f32 %v4582_v27, %v7226_v57  ;;  %4587 = vrsqrt.f32 %v3474_v60 }
 0x49f   :  { %v3657_v40 = vmul.f32 %v7429_v20, %v3590_v55  ;;  %4589 = vrsqrt.f32 %v3473_v62  ;;  %v3304_v45 = vpop.xlane.xlu1 %3303 }
 0x4a0   :  { %v3656_v48 = vmul.f32 %v7429_v20, %v3589_v6  ;;  %v3416_v31 = vmul.f32 0.03125, %v3304_v45  ;;  %v3301_v56 = vpop.xlane.xlu0 %3300 }
 0x4a1   :  { %v3724_v0 = vadd.f32 %v7435_v54, %v3657_v40  ;;  %v3415_v21 = vmul.f32 0.03125, %v3301_v56 }
 0x4a2   :  { %v4584_v8 = vpop.eup %4583  ;;  %v3723_v63 = vadd.f32 %v7435_v54, %v3656_v48  ;;  %v3476_v2 = vadd.f32 1e-05, %v3416_v31 }
 0x4a3   :  { %v4586_v36 = vpop.eup %4585  ;;  %3784 = vst.msk [vmem:[%s7866_s10 + $0xd8] sm:$0xff] %vm215_vm0, %v3724_v0  ;;  %v3592_v57 = vmul.f32 %v4584_v8, %v7235_v13  ;;  %v3475_v49 = vadd.f32 1e-05, %v3415_v21 }
 0x4a4   :  { %3783 = vst.msk [vmem:[%s7866_s10 + $0xd0] sm:$0xff] %vm215_vm0, %v3723_v63  ;;  %v3591_v3 = vmul.f32 %v4586_v36, %v7238_v30  ;;  %4591 = vrsqrt.f32 %v3476_v2 }
 0x4a5   :  { %v3659_v52 = vmul.f32 %v7429_v20, %v3592_v57  ;;  %4593 = vrsqrt.f32 %v3475_v49 }
 0x4a6   :  { %v3658_v11 = vmul.f32 %v7429_v20, %v3591_v3 }
 0x4a7   :  { %v3726_v58 = vadd.f32 %v7435_v54, %v3659_v52  ;;  %v3310_v39 = vpop.xlane.xlu1 %3309 }
 0x4a8   :  { %v4588_v1 = vpop.eup %4587  ;;  %v3725_v13 = vadd.f32 %v7435_v54, %v3658_v11  ;;  %v3418_v43 = vmul.f32 0.03125, %v3310_v39  ;;  %v3307_v5 = vpop.xlane.xlu0 %3306 }
 0x4a9   :  { %v4590_v10 = vpop.eup %4589  ;;  %3786 = vst.msk [vmem:[%s7866_s10 + $0xe8] sm:$0xff] %vm215_vm0, %v3726_v58  ;;  %v3594_v30 = vmul.f32 %v4588_v1, %v7247_v29  ;;  %v3417_v7 = vmul.f32 0.03125, %v3307_v5 }
 0x4aa   :  { %3785 = vst.msk [vmem:[%s7866_s10 + $0xe0] sm:$0xff] %vm215_vm0, %v3725_v13  ;;  %v3593_v28 = vmul.f32 %v4590_v10, %v7250_v42  ;;  %v3478_v18 = vadd.f32 1e-05, %v3418_v43 }
 0x4ab   :  { %v3661_v17 = vmul.f32 %v7429_v20, %v3594_v30  ;;  %v3477_v33 = vadd.f32 1e-05, %v3417_v7 }
 0x4ac   :  { %v3660_v26 = vmul.f32 %v7429_v20, %v3593_v28  ;;  %4595 = vrsqrt.f32 %v3478_v18 }
 0x4ad   :  { %v3728_v46 = vadd.f32 %v7435_v54, %v3661_v17  ;;  %4597 = vrsqrt.f32 %v3477_v33  ;;  %v3316_v12 = vpop.xlane.xlu1 %3315 }
 0x4ae   :  { %v4592_v29 = vpop.eup %4591  ;;  %v3727_v25 = vadd.f32 %v7435_v54, %v3660_v26  ;;  %v3420_v37 = vmul.f32 0.03125, %v3316_v12  ;;  %v3313_v15 = vpop.xlane.xlu0 %3312 }
 0x4af   :  { %v4594_v32 = vpop.eup %4593  ;;  %3788 = vst.msk [vmem:[%s7866_s10 + $0xf8] sm:$0xff] %vm215_vm0, %v3728_v46  ;;  %v3596_v42 = vmul.f32 %v4592_v29, %v7259_v44  ;;  %v3419_v19 = vmul.f32 0.03125, %v3313_v15 }
 0x4b0   :  { %3787 = vst.msk [vmem:[%s7866_s10 + $0xf0] sm:$0xff] %vm215_vm0, %v3727_v25  ;;  %v3595_v61 = vmul.f32 %v4594_v32, %v7262_v35  ;;  %v3480_v41 = vadd.f32 1e-05, %v3420_v37 }
 0x4b1   :  { %v3663_v24 = vmul.f32 %v7429_v20, %v3596_v42  ;;  %v3479_v23 = vadd.f32 1e-05, %v3419_v19 }
 0x4b2   :  { %v3662_v4 = vmul.f32 %v7429_v20, %v3595_v61  ;;  %4599 = vrsqrt.f32 %v3480_v41  ;;  %v3322_v60 = vpop.xlane.xlu1 %3321 }
 0x4b3   :  { %v3730_v27 = vadd.f32 %v7435_v54, %v3663_v24  ;;  %4601 = vrsqrt.f32 %v3479_v23  ;;  %v3422_v44 = vmul.f32 0.03125, %v3322_v60  ;;  %v3319_v55 = vpop.xlane.xlu0 %3318 }
 0x4b4   :  { %v3729_v62 = vadd.f32 %v7435_v54, %v3662_v4  ;;  %v3421_v6 = vmul.f32 0.03125, %v3319_v55 }
 0x4b5   :  { %3790 = vst.msk [vmem:[%s7866_s10 + $0x108] sm:$0xff] %vm215_vm0, %v3730_v27  ;;  %v3482_v35 = vadd.f32 1e-05, %v3422_v44 }
 0x4b6   :  { %v4596_v40 = vpop.eup %4595  ;;  %3789 = vst.msk [vmem:[%s7866_s10 + $0x100] sm:$0xff] %vm215_vm0, %v3729_v62  ;;  %v3481_v45 = vadd.f32 1e-05, %v3421_v6 }
 0x4b7   :  { %v4598_v48 = vpop.eup %4597  ;;  %v3598_v31 = vmul.f32 %v4596_v40, %v7271_v22  ;;  %4603 = vrsqrt.f32 %v3482_v35  ;;  %v3328_v56 = vpop.xlane.xlu1 %3327 }
 0x4b8   :  { %v3597_v0 = vmul.f32 %v4598_v48, %v7274_v38  ;;  %4605 = vrsqrt.f32 %v3481_v45  ;;  %v3424_v21 = vmul.f32 0.03125, %v3328_v56  ;;  %v3325_v8 = vpop.xlane.xlu0 %3324 }
 0x4b9   :  { %v3665_v63 = vmul.f32 %v7429_v20, %v3598_v31  ;;  %v3423_v2 = vmul.f32 0.03125, %v3325_v8 }
 0x4ba   :  { %v3664_v36 = vmul.f32 %v7429_v20, %v3597_v0  ;;  %v3484_v57 = vadd.f32 1e-05, %v3424_v21 }
 0x4bb   :  { %v3732_v49 = vadd.f32 %v7435_v54, %v3665_v63  ;;  %v3483_v3 = vadd.f32 1e-05, %v3423_v2  ;;  %v3334_v52 = vpop.xlane.xlu1 %3333 }
 0x4bc   :  { %v4600_v11 = vpop.eup %4599  ;;  %v3731_v22 = vadd.f32 %v7435_v54, %v3664_v36  ;;  %4607 = vrsqrt.f32 %v3484_v57  ;;  %v3426_v58 = vmul.f32 0.03125, %v3334_v52  ;;  %v3331_v39 = vpop.xlane.xlu0 %3330 }
 0x4bd   :  { %v4602_v38 = vpop.eup %4601  ;;  %3792 = vst.msk [vmem:[%s7866_s10 + $0x118] sm:$0xff] %vm215_vm0, %v3732_v49  ;;  %v3600_v1 = vmul.f32 %v4600_v11, %v7283_v53  ;;  %4609 = vrsqrt.f32 %v3483_v3  ;;  %v3425_v13 = vmul.f32 0.03125, %v3331_v39 }
 0x4be   :  { %3791 = vst.msk [vmem:[%s7866_s10 + $0x110] sm:$0xff] %vm215_vm0, %v3731_v22  ;;  %v3599_v43 = vmul.f32 %v4602_v38, %v7286_v9  ;;  %v3486_v5 = vadd.f32 1e-05, %v3426_v58 }
 0x4bf   :  { %v3667_v10 = vmul.f32 %v7429_v20, %v3600_v1  ;;  %v3485_v30 = vadd.f32 1e-05, %v3425_v13  ;;  %v8140_v1 = vld [vmem:[#allocation21_spill] sm:$0xff] }
 0x4c0   :  { %v3666_v7 = vmul.f32 %v7429_v20, %v3599_v43  ;;  %4611 = vrsqrt.f32 %v3486_v5 }
 0x4c1   :  { %v4604_v28 = vpop.eup %4603  ;;  %v3734_v18 = vadd.f32 %v7435_v54, %v3667_v10  ;;  %4613 = vrsqrt.f32 %v3485_v30  ;;  %v3340_v53 = vpop.xlane.xlu1 %3339 }
 0x4c2   :  { %v4606_v17 = vpop.eup %4605  ;;  %v3733_v33 = vadd.f32 %v7435_v54, %v3666_v7  ;;  %v3602_v26 = vmul.f32 %v4604_v28, %v7294_v47  ;;  %v3428_v46 = vmul.f32 0.03125, %v3340_v53  ;;  %v3337_v12 = vpop.xlane.xlu0 %3336 }
 0x4c3   :  { %3794 = vst.msk [vmem:[%s7866_s10 + $0x128] sm:$0xff] %vm215_vm0, %v3734_v18  ;;  %v3601_v9 = vmul.f32 %v4606_v17, %v7298_v16  ;;  %v3427_v29 = vmul.f32 0.03125, %v3337_v12  ;;  %v8141_v17 = vld [vmem:[#allocation20_spill] sm:$0xff] }
 0x4c4   :  { %3793 = vst.msk [vmem:[%s7866_s10 + $0x120] sm:$0xff] %vm215_vm0, %v3733_v33  ;;  %v3669_v25 = vmul.f32 %v7429_v20, %v3602_v26  ;;  %v3488_v37 = vadd.f32 1e-05, %v3428_v46 }
 0x4c5   :  { %v3668_v47 = vmul.f32 %v7429_v20, %v3601_v9  ;;  %v3487_v15 = vadd.f32 1e-05, %v3427_v29  ;;  %v3346_v32 = vpop.xlane.xlu1 %3345  ;;  %v8142_v9 = vld [vmem:[#allocation22_spill] sm:$0xff] }
 0x4c6   :  { %v4608_v42 = vpop.eup %4607  ;;  %v3736_v19 = vadd.f32 %v7435_v54, %v3669_v25  ;;  %4615 = vrsqrt.f32 %v3488_v37  ;;  %v3430_v61 = vmul.f32 0.03125, %v3346_v32  ;;  %v3343_v41 = vpop.xlane.xlu0 %3342 }
 0x4c7   :  { %v4610_v16 = vpop.eup %4609  ;;  %v3735_v24 = vadd.f32 %v7435_v54, %v3668_v47  ;;  %v3604_v23 = vmul.f32 %v4608_v42, %v7306_v14  ;;  %4617 = vrsqrt.f32 %v3487_v15  ;;  %v3429_v4 = vmul.f32 0.03125, %v3343_v41 }
 0x4c8   :  { %3796 = vst.msk [vmem:[%s7866_s10 + $0x138] sm:$0xff] %vm215_vm0, %v3736_v19  ;;  %v3603_v60 = vmul.f32 %v4610_v16, %v7310_v51  ;;  %v3490_v27 = vadd.f32 1e-05, %v3430_v61  ;;  %v8143_v16 = vld [vmem:[#allocation23_spill] sm:$0xff] }
 0x4c9   :  { %3795 = vst.msk [vmem:[%s7866_s10 + $0x130] sm:$0xff] %vm215_vm0, %v3735_v24  ;;  %v3671_v44 = vmul.f32 %v7429_v20, %v3604_v23  ;;  %v3489_v55 = vadd.f32 1e-05, %v3429_v4  ;;  %v3352_v62 = vpop.xlane.xlu1 %3351 }
 0x4ca   :  { %v4612_v14 = vpop.eup %4611  ;;  %v3670_v6 = vmul.f32 %v7429_v20, %v3603_v60  ;;  %4619 = vrsqrt.f32 %v3490_v27  ;;  %v3432_v35 = vmul.f32 0.03125, %v3352_v62  ;;  %v3349_v40 = vpop.xlane.xlu0 %3348  ;;  %v8144_v27 = vld [vmem:[#allocation24_spill] sm:$0xff] }
 0x4cb   :  { %v4614_v45 = vpop.eup %4613  ;;  %v3738_v48 = vadd.f32 %v7435_v54, %v3671_v44  ;;  %v3606_v51 = vmul.f32 %v4612_v14, %v7317_v50  ;;  %4621 = vrsqrt.f32 %v3489_v55  ;;  %v3431_v31 = vmul.f32 0.03125, %v3349_v40 }
 0x4cc   :  { %v3737_v56 = vadd.f32 %v7435_v54, %v3670_v6  ;;  %v3605_v0 = vmul.f32 %v4614_v45, %v7321_v34  ;;  %v3492_v21 = vadd.f32 1e-05, %v3432_v35 }
 0x4cd   :  { %3798 = vst.msk [vmem:[%s7866_s10 + $0x148] sm:$0xff] %vm215_vm0, %v3738_v48  ;;  %v3673_v8 = vmul.f32 %v7429_v20, %v3606_v51  ;;  %v3491_v63 = vadd.f32 1e-05, %v3431_v31  ;;  %v3358_v2 = vpop.xlane.xlu1 %3357  ;;  %v8145_v31 = vld [vmem:[#allocation3_spill] sm:$0xff] }
 0x4ce   :  { %3797 = vst.msk [vmem:[%s7866_s10 + $0x140] sm:$0xff] %vm215_vm0, %v3737_v56  ;;  %v3672_v50 = vmul.f32 %v7429_v20, %v3605_v0  ;;  %4623 = vrsqrt.f32 %v3492_v21  ;;  %v3434_v36 = vmul.f32 0.03125, %v3358_v2  ;;  %v3355_v34 = vpop.xlane.xlu0 %3354 }
 0x4cf   :  { %v3740_v57 = vadd.f32 %v7435_v54, %v3673_v8  ;;  %4625 = vrsqrt.f32 %v3491_v63  ;;  %v3433_v49 = vmul.f32 0.03125, %v3355_v34  ;;  %v8146_v63 = vld [vmem:[#allocation25_spill] sm:$0xff] }
 0x4d0   :  { %v4616_v3 = vpop.eup %4615  ;;  %v3739_v52 = vadd.f32 %v7435_v54, %v3672_v50  ;;  %v3494_v11 = vadd.f32 1e-05, %v3434_v36 }
 0x4d1   :  { %v4618_v22 = vpop.eup %4617  ;;  %3800 = vst.msk [vmem:[%s7866_s10 + $0x158] sm:$0xff] %vm215_vm0, %v3740_v57  ;;  %v3608_v58 = vmul.f32 %v4616_v3, %v7331_v59  ;;  %v3493_v39 = vadd.f32 1e-05, %v3433_v49  ;;  %v3364_v38 = vpop.xlane.xlu1 %3363 }
 0x4d2   :  { %3799 = vst.msk [vmem:[%s7866_s10 + $0x150] sm:$0xff] %vm215_vm0, %v3739_v52  ;;  %v3607_v13 = vmul.f32 %v4618_v22, %v8140_v1  ;;  %4627 = vrsqrt.f32 %v3494_v11  ;;  %v3436_v43 = vmul.f32 0.03125, %v3364_v38  ;;  %v3361_v5 = vpop.xlane.xlu0 %3360 }
 0x4d3   :  { %v3675_v10 = vmul.f32 %v7429_v20, %v3608_v58  ;;  %4629 = vrsqrt.f32 %v3493_v39  ;;  %v3435_v30 = vmul.f32 0.03125, %v3361_v5  ;;  %v8147_v58 = vld [vmem:[#allocation2_spill] sm:$0xff] }
 0x4d4   :  { %v4620_v7 = vpop.eup %4619  ;;  %v3674_v28 = vmul.f32 %v7429_v20, %v3607_v13  ;;  %v3496_v59 = vadd.f32 1e-05, %v3436_v43  ;;  %v8148_v13 = vld [vmem:[#allocation26_spill] sm:$0xff] }
 0x4d5   :  { %v4622_v18 = vpop.eup %4621  ;;  %v3742_v53 = vadd.f32 %v7435_v54, %v3675_v10  ;;  %v3610_v33 = vmul.f32 %v4620_v7, %v8141_v17  ;;  %v3495_v26 = vadd.f32 1e-05, %v3435_v30  ;;  %v3370_v46 = vpop.xlane.xlu1 %3369  ;;  %v8150_v17 = vld [vmem:[#allocation28_spill] sm:$0xff] }
 0x4d6   :  { %v3741_v12 = vadd.f32 %v7435_v54, %v3674_v28  ;;  %v3609_v29 = vmul.f32 %v4622_v18, %v8142_v9  ;;  %4631 = vrsqrt.f32 %v3496_v59  ;;  %v3438_v25 = vmul.f32 0.03125, %v3370_v46  ;;  %v3367_v37 = vpop.xlane.xlu0 %3366  ;;  %v8149_v59 = vld [vmem:[#allocation27_spill] sm:$0xff] }
 0x4d7   :  { %3802 = vst.msk [vmem:[%s7866_s10 + $0x168] sm:$0xff] %vm215_vm0, %v3742_v53  ;;  %v3677_v47 = vmul.f32 %v7429_v20, %v3610_v33  ;;  %4633 = vrsqrt.f32 %v3495_v26  ;;  %v3437_v15 = vmul.f32 0.03125, %v3367_v37 }
 0x4d8   :  { %v4624_v32 = vpop.eup %4623  ;;  %3801 = vst.msk [vmem:[%s7866_s10 + $0x160] sm:$0xff] %vm215_vm0, %v3741_v12  ;;  %v3676_v42 = vmul.f32 %v7429_v20, %v3609_v29  ;;  %v3498_v19 = vadd.f32 1e-05, %v3438_v25  ;;  %v8151_v25 = vld [vmem:[#allocation5_spill] sm:$0xff] }
 0x4d9   :  { %v4626_v61 = vpop.eup %4625  ;;  %v3744_v41 = vadd.f32 %v7435_v54, %v3677_v47  ;;  %v3612_v24 = vmul.f32 %v4624_v32, %v8143_v16  ;;  %v3497_v23 = vadd.f32 1e-05, %v3437_v15  ;;  %v3376_v4 = vpop.xlane.xlu1 %3375  ;;  %v8152_v15 = vld [vmem:[#allocation30_spill] sm:$0xff] }
 0x4da   :  { %v3743_v60 = vadd.f32 %v7435_v54, %v3676_v42  ;;  %v3611_v44 = vmul.f32 %v4626_v61, %v8144_v27  ;;  %4635 = vrsqrt.f32 %v3498_v19  ;;  %v3440_v55 = vmul.f32 0.03125, %v3376_v4  ;;  %v3373_v62 = vpop.xlane.xlu0 %3372 }
 0x4db   :  { %3804 = vst.msk [vmem:[%s7866_s10 + $0x178] sm:$0xff] %vm215_vm0, %v3744_v41  ;;  %v3679_v14 = vmul.f32 %v7429_v20, %v3612_v24  ;;  %4637 = vrsqrt.f32 %v3497_v23  ;;  %v3439_v6 = vmul.f32 0.03125, %v3373_v62  ;;  %v8153_v24 = vld [vmem:[#allocation29_spill] sm:$0xff] }
 0x4dc   :  { %v4628_v35 = vpop.eup %4627  ;;  %3803 = vst.msk [vmem:[%s7866_s10 + $0x170] sm:$0xff] %vm215_vm0, %v3743_v60  ;;  %v3678_v40 = vmul.f32 %v7429_v20, %v3611_v44  ;;  %v3500_v45 = vadd.f32 1e-05, %v3440_v55  ;;  %v8154_v60 = vld [vmem:[#allocation31_spill] sm:$0xff] }
 0x4dd   :  { %v4630_v48 = vpop.eup %4629  ;;  %v3746_v51 = vadd.f32 %v7435_v54, %v3679_v14  ;;  %v3614_v56 = vmul.f32 %v4628_v35, %v8145_v31  ;;  %v3499_v0 = vadd.f32 1e-05, %v3439_v6  ;;  %v3382_v21 = vpop.xlane.xlu1 %3381 }
 0x4de   :  { %v3745_v8 = vadd.f32 %v7435_v54, %v3678_v40  ;;  %v3613_v2 = vmul.f32 %v4630_v48, %v8146_v63  ;;  %4639 = vrsqrt.f32 %v3500_v45  ;;  %v3442_v50 = vmul.f32 0.03125, %v3382_v21  ;;  %v3379_v36 = vpop.xlane.xlu0 %3378 }
 0x4df   :  { %3806 = vst.msk [vmem:[%s7866_s10 + $0x188] sm:$0xff] %vm215_vm0, %v3746_v51  ;;  %v3681_v34 = vmul.f32 %v7429_v20, %v3614_v56  ;;  %4641 = vrsqrt.f32 %v3499_v0  ;;  %v3441_v57 = vmul.f32 0.03125, %v3379_v36 }
 0x4e0   :  { %v4632_v49 = vpop.eup %4631  ;;  %3805 = vst.msk [vmem:[%s7866_s10 + $0x180] sm:$0xff] %vm215_vm0, %v3745_v8  ;;  %v3680_v3 = vmul.f32 %v7429_v20, %v3613_v2  ;;  %v3502_v52 = vadd.f32 1e-05, %v3442_v50 }
 0x4e1   :  { %v4634_v11 = vpop.eup %4633  ;;  %v3748_v22 = vadd.f32 %v7435_v54, %v3681_v34  ;;  %v3616_v39 = vmul.f32 %v4632_v49, %v8147_v58  ;;  %v3501_v38 = vadd.f32 1e-05, %v3441_v57 }
 0x4e2   :  { %v3747_v1 = vadd.f32 %v7435_v54, %v3680_v3  ;;  %v3615_v43 = vmul.f32 %v4634_v11, %v8148_v13  ;;  %4643 = vrsqrt.f32 %v3502_v52 }
 0x4e3   :  { %3808 = vst.msk [vmem:[%s7866_s10 + $0x198] sm:$0xff] %vm215_vm0, %v3748_v22  ;;  %v3683_v5 = vmul.f32 %v7429_v20, %v3616_v39  ;;  %4645 = vrsqrt.f32 %v3501_v38 }
 0x4e4   :  { %v4636_v10 = vpop.eup %4635  ;;  %3807 = vst.msk [vmem:[%s7866_s10 + $0x190] sm:$0xff] %vm215_vm0, %v3747_v1  ;;  %v3682_v30 = vmul.f32 %v7429_v20, %v3615_v43 }
 0x4e5   :  { %v4638_v7 = vpop.eup %4637  ;;  %v3750_v28 = vadd.f32 %v7435_v54, %v3683_v5  ;;  %v3618_v18 = vmul.f32 %v4636_v10, %v8149_v59 }
 0x4e6   :  { %v3749_v53 = vadd.f32 %v7435_v54, %v3682_v30  ;;  %v3617_v33 = vmul.f32 %v4638_v7, %v8150_v17 }
 0x4e7   :  { %3810 = vst.msk [vmem:[%s7866_s10 + $0x1a8] sm:$0xff] %vm215_vm0, %v3750_v28  ;;  %v3685_v26 = vmul.f32 %v7429_v20, %v3618_v18 }
 0x4e8   :  { %v4640_v46 = vpop.eup %4639  ;;  %3809 = vst.msk [vmem:[%s7866_s10 + $0x1a0] sm:$0xff] %vm215_vm0, %v3749_v53  ;;  %v3684_v12 = vmul.f32 %v7429_v20, %v3617_v33 }
 0x4e9   :  { %v4642_v9 = vpop.eup %4641  ;;  %v3752_v29 = vadd.f32 %v7435_v54, %v3685_v26  ;;  %v3620_v37 = vmul.f32 %v4640_v46, %v8151_v25 }
 0x4ea   :  { %v3751_v47 = vadd.f32 %v7435_v54, %v3684_v12  ;;  %v3619_v32 = vmul.f32 %v4642_v9, %v8152_v15 }
 0x4eb   :  { %3812 = vst.msk [vmem:[%s7866_s10 + $0x1b8] sm:$0xff] %vm215_vm0, %v3752_v29  ;;  %v3687_v42 = vmul.f32 %v7429_v20, %v3620_v37 }
 0x4ec   :  { %v4644_v19 = vpop.eup %4643  ;;  %3811 = vst.msk [vmem:[%s7866_s10 + $0x1b0] sm:$0xff] %vm215_vm0, %v3751_v47  ;;  %v3686_v61 = vmul.f32 %v7429_v20, %v3619_v32 }
 0x4ed   :  { %v4646_v41 = vpop.eup %4645  ;;  %v3754_v16 = vadd.f32 %v7435_v54, %v3687_v42  ;;  %v3622_v23 = vmul.f32 %v4644_v19, %v8153_v24 }
 0x4ee   :  { %v3753_v4 = vadd.f32 %v7435_v54, %v3686_v61  ;;  %v3621_v27 = vmul.f32 %v4646_v41, %v8154_v60 }
 0x4ef   :  { %3814 = vst.msk [vmem:[%s7866_s10 + $0x1c8] sm:$0xff] %vm215_vm0, %v3754_v16  ;;  %v3689_v44 = vmul.f32 %v7429_v20, %v3622_v23 }
 0x4f0   :  { %3813 = vst.msk [vmem:[%s7866_s10 + $0x1c0] sm:$0xff] %vm215_vm0, %v3753_v4  ;;  %v3688_v55 = vmul.f32 %v7429_v20, %v3621_v27 }
 0x4f1   :  { %v3756_v62 = vadd.f32 %v7435_v54, %v3689_v44 }
 0x4f2   :  { %v3755_v14 = vadd.f32 %v7435_v54, %v3688_v55 }
 0x4f3   :  { %3816 = vst.msk [vmem:[%s7866_s10 + $0x1d8] sm:$0xff] %vm215_vm0, %v3756_v62 }
 0x4f4   :  { %3815 = vst.msk [vmem:[%s7866_s10 + $0x1d0] sm:$0xff] %vm215_vm0, %v3755_v14 }

</bundles_post_ra>
